<compile_context>
chip_gen: v7x
topology: tpu7x:2x2x1
jax: 0.10.0
libtpu: 0.0.40
codegen_flags: <defaults>
</compile_context>

<pallas_src>
import functools
import math

import jax
import jax.numpy as jnp
from jax.experimental import pallas as pl
from jax.experimental.pallas import tpu as pltpu

# ----------------------------------------------------------------------------
# Config (small shapes consistent with the module's forward)
# ----------------------------------------------------------------------------
D_MODEL = 32
DIM_FF = 64
NHEAD = 4
NUM_LAYERS = 3
SRC_VOCAB = 64
TGT_VOCAB = 64
PAD_ID = 0
SEQ_SRC = 8
SEQ_TGT = 8
BATCH = 2
MAX_LEN = 128
NEG = -1e9          # additive mask value (avoids NaN rows torch's -inf can produce)
VOCAB_PAD = 128     # classifier output padded to a full 128-lane vreg (lane-dense store)

VMEM = pl.BlockSpec(memory_space=pltpu.MemorySpace.VMEM)


# ----------------------------------------------------------------------------
# In-kernel helpers (operate on values already resident in VMEM / vregs)
# ----------------------------------------------------------------------------
def _layer_norm(x, g, b):
    # post-norm LayerNorm, eps = 1e-5 (f32 elementwise everywhere — v5e-safe)
    mu = jnp.mean(x, axis=-1, keepdims=True)
    xc = x - mu
    var = jnp.mean(xc * xc, axis=-1, keepdims=True)
    return xc * jax.lax.rsqrt(var + 1e-5) * g + b


def _mha(q3, k3, v3, bias, nhead, scale):
    """Multi-head scaled-dot-product attention, heads split via static lane slices.

    q3: (B, Sq, D)   k3, v3: (B, Sk, D)   bias: (B, 1 or Sq, Sk) additive.
    Returns (B, Sq, D).
    """
    dh = q3.shape[-1] // nhead
    outs = []
    for h in range(nhead):
        sl = slice(h * dh, (h + 1) * dh)
        s = jnp.einsum("bqd,bkd->bqk", q3[:, :, sl], k3[:, :, sl],
                       preferred_element_type=jnp.float32)
        s = s * scale + bias                         # broadcast in-kernel (free vreg op)
        mx = jnp.max(s, axis=-1, keepdims=True)
        p = jnp.exp(s - mx)
        p = p * pl.reciprocal(jnp.sum(p, axis=-1, keepdims=True), approx=True)
        outs.append(jnp.einsum("bqk,bkd->bqd", p, v3[:, :, sl],
                               preferred_element_type=jnp.float32))
    return jnp.concatenate(outs, axis=-1)


# ----------------------------------------------------------------------------
# The single fused kernel: encoders + decoders + classifier
# ----------------------------------------------------------------------------
def _uformer_kernel(*refs, B, Ss, St, d_model, nhead, num_layers):
    (enc_x_ref, dec_x_ref, src_bias_ref, tgt_bias_ref,
     e_wqkv, e_bqkv, e_wo, e_bo, e_w1, e_b1, e_w2, e_b2,
     e_ln1g, e_ln1b, e_ln2g, e_ln2b,
     d_swqkv, d_sbqkv, d_swo, d_sbo,
     d_cwq, d_cbq, d_cwkv, d_cbkv, d_cwo, d_cbo,
     d_w1, d_b1, d_w2, d_b2,
     d_ln1g, d_ln1b, d_ln2g, d_ln2b, d_ln3g, d_ln3b,
     cls_w, cls_b, out_ref) = refs

    D = d_model
    scale = 1.0 / math.sqrt(D // nhead)

    def dot(a, b):
        return jnp.dot(a, b, preferred_element_type=jnp.float32)

    src_bias = src_bias_ref[...]          # (B, 1, Ss)  key-padding bias (src / memory)
    tgt_bias = tgt_bias_ref[...]          # (B, St, St) causal + tgt key-padding bias

    # ----------------------------- encoder stack -----------------------------
    x = enc_x_ref[...]                    # (B*Ss, D)
    enc_outs = []
    for l in range(num_layers):
        # fused QKV projection (one MXU pass), head split done in-register
        qkv = (dot(x, e_wqkv[l]) + e_bqkv[l]).reshape(B, Ss, 3 * D)
        a = _mha(qkv[:, :, :D], qkv[:, :, D:2 * D], qkv[:, :, 2 * D:],
                 src_bias, nhead, scale).reshape(B * Ss, D)
        a = dot(a, e_wo[l]) + e_bo[l]
        x = _layer_norm(x + a, e_ln1g[l], e_ln1b[l])
        h = jnp.maximum(dot(x, e_w1[l]) + e_b1[l], 0.0)
        h = dot(h, e_w2[l]) + e_b2[l]
        x = _layer_norm(x + h, e_ln2g[l], e_ln2b[l])
        enc_outs.append(x)

    # ----------------------------- decoder stack -----------------------------
    # NOTE: reproduces the original module's memory wiring:
    # decoder0 -> enc_outs[0], decoder1 -> enc_outs[0], decoder2 -> enc_outs[1]
    y = dec_x_ref[...]                    # (B*St, D)
    for l in range(num_layers):
        mem = enc_outs[0] if l == 0 else enc_outs[l - 1]

        # self-attention (causal + tgt key-padding)
        qkv = (dot(y, d_swqkv[l]) + d_sbqkv[l]).reshape(B, St, 3 * D)
        a = _mha(qkv[:, :, :D], qkv[:, :, D:2 * D], qkv[:, :, 2 * D:],
                 tgt_bias, nhead, scale).reshape(B * St, D)
        a = dot(a, d_swo[l]) + d_sbo[l]
        y = _layer_norm(y + a, d_ln1g[l], d_ln1b[l])

        # cross-attention (memory key-padding); K/V projections fused
        q = (dot(y, d_cwq[l]) + d_cbq[l]).reshape(B, St, D)
        kv = (dot(mem, d_cwkv[l]) + d_cbkv[l]).reshape(B, Ss, 2 * D)
        c = _mha(q, kv[:, :, :D], kv[:, :, D:], src_bias,
                 nhead, scale).reshape(B * St, D)
        c = dot(c, d_cwo[l]) + d_cbo[l]
        y = _layer_norm(y + c, d_ln2g[l], d_ln2b[l])

        # feed-forward
        h = jnp.maximum(dot(y, d_w1[l]) + d_b1[l], 0.0)
        h = dot(h, d_w2[l]) + d_b2[l]
        y = _layer_norm(y + h, d_ln3g[l], d_ln3b[l])

    # -------------------- classifier (lane-padded to 128) --------------------
    out_ref[...] = dot(y, cls_w[...]) + cls_b[...]


# ----------------------------------------------------------------------------
# Host-side glue: embeddings, bias construction, the single pallas_call
# ----------------------------------------------------------------------------
def triple_embed(p, ids):
    # TODO(synk): TripleEmbeddingBlock definition not provided in the source;
    # implemented as word + learned positional + token-type embedding, summed
    # (the gathers are plain-JAX glue, not a Pallas hot path).
    S = ids.shape[1]
    word = jnp.take(p["word"], ids, axis=0)              # (B, S, D)
    pos = p["pos"][:S][None, :, :]                       # (1, S, D)
    typ = p["type"][0][None, None, :]                    # (1, 1, D)
    return (word + pos + typ).astype(jnp.float32)


def uformer_forward(packed, src, tgt):
    B, Ss = src.shape
    St = tgt.shape[1]
    D = D_MODEL

    enc_x = triple_embed(packed["enc_embed"], src).reshape(B * Ss, D)
    dec_x = triple_embed(packed["dec_embed"], tgt).reshape(B * St, D)

    # compact additive attention biases (broadcast over heads inside the kernel)
    src_bias = jnp.where(src == PAD_ID, NEG, 0.0).astype(jnp.float32)[:, None, :]   # (B,1,Ss)
    tgt_pad = jnp.where(tgt == PAD_ID, NEG, 0.0).astype(jnp.float32)[:, None, :]    # (B,1,St)
    causal = jnp.where(jnp.triu(jnp.ones((St, St), jnp.bool_), k=1), NEG, 0.0)
    tgt_bias = tgt_pad + causal.astype(jnp.float32)[None, :, :]                     # (B,St,St)

    args = ((enc_x, dec_x, src_bias, tgt_bias)
            + packed["enc"] + packed["dec"]
            + (packed["cls_w"], packed["cls_b"]))

    kernel = functools.partial(_uformer_kernel, B=B, Ss=Ss, St=St,
                               d_model=D, nhead=NHEAD, num_layers=NUM_LAYERS)

    logits_pad = pl.pallas_call(
        kernel,
        out_shape=jax.ShapeDtypeStruct((B * St, VOCAB_PAD), jnp.float32),
        in_specs=[VMEM] * len(args),
        out_specs=VMEM,
    )(*args)

    return logits_pad[:, :TGT_VOCAB].reshape(B, St, TGT_VOCAB)


# ----------------------------------------------------------------------------
# One-time parameter packing: pre-transpose to (K,N), fuse QKV, stack per layer
# ----------------------------------------------------------------------------
def pack_params(params):
    f32 = jnp.float32
    d = D_MODEL

    def t(w):                       # (out, in) -> (in, out)
        return w.T.astype(f32)

    def row(b):                     # (N,) -> (1, N)
        return b.reshape(1, -1).astype(f32)

    def enc_fields(p):
        sa = p["self_attn"]
        return [t(sa["in_proj_w"]), row(sa["in_proj_b"]),
                t(sa["out_proj_w"]), row(sa["out_proj_b"]),
                t(p["w1"]), row(p["b1"]), t(p["w2"]), row(p["b2"]),
                row(p["ln1_g"]), row(p["ln1_b"]), row(p["ln2_g"]), row(p["ln2_b"])]

    def dec_fields(p):
        sa, ca = p["self_attn"], p["cross_attn"]
        return [t(sa["in_proj_w"]), row(sa["in_proj_b"]),
                t(sa["out_proj_w"]), row(sa["out_proj_b"]),
                t(ca["in_proj_w"][:d]), row(ca["in_proj_b"][:d]),    # cross Q
                t(ca["in_proj_w"][d:]), row(ca["in_proj_b"][d:]),    # cross fused KV
                t(ca["out_proj_w"]), row(ca["out_proj_b"]),
                t(p["w1"]), row(p["b1"]), t(p["w2"]), row(p["b2"]),
                row(p["ln1_g"]), row(p["ln1_b"]), row(p["ln2_g"]), row(p["ln2_b"]),
                row(p["ln3_g"]), row(p["ln3_b"])]

    enc = tuple(jnp.stack(cols) for cols in
                zip(*[enc_fields(p) for p in params["encoders"]]))
    dec = tuple(jnp.stack(cols) for cols in
                zip(*[dec_fields(p) for p in params["decoders"]]))

    cls_w = jnp.zeros((d, VOCAB_PAD), f32).at[:, :TGT_VOCAB].set(params["cls_w"].T.astype(f32))
    cls_b = jnp.zeros((1, VOCAB_PAD), f32).at[0, :TGT_VOCAB].set(params["cls_b"].astype(f32))

    return dict(enc_embed=params["enc_embed"], dec_embed=params["dec_embed"],
                enc=enc, dec=dec, cls_w=cls_w, cls_b=cls_b)


# ----------------------------------------------------------------------------
# Deterministic parameter init (xavier_uniform for dim>1, zeros/ones otherwise)
# ----------------------------------------------------------------------------
def xavier(key, shape):
    fan_out, fan_in = shape[0], shape[1]
    limit = math.sqrt(6.0 / (fan_in + fan_out))
    return jax.random.uniform(key, shape, jnp.float32, -limit, limit)


def init_mha(key, d):
    k1, k2 = jax.random.split(key)
    return dict(
        in_proj_w=xavier(k1, (3 * d, d)),
        in_proj_b=jnp.zeros((3 * d,), jnp.float32),
        out_proj_w=xavier(k2, (d, d)),
        out_proj_b=jnp.zeros((d,), jnp.float32),
    )


def init_encoder_layer(key, d, ff):
    ks = jax.random.split(key, 3)
    return dict(
        self_attn=init_mha(ks[0], d),
        w1=xavier(ks[1], (ff, d)), b1=jnp.zeros((ff,), jnp.float32),
        w2=xavier(ks[2], (d, ff)), b2=jnp.zeros((d,), jnp.float32),
        ln1_g=jnp.ones((d,), jnp.float32), ln1_b=jnp.zeros((d,), jnp.float32),
        ln2_g=jnp.ones((d,), jnp.float32), ln2_b=jnp.zeros((d,), jnp.float32),
    )


def init_decoder_layer(key, d, ff):
    ks = jax.random.split(key, 4)
    return dict(
        self_attn=init_mha(ks[0], d),
        cross_attn=init_mha(ks[1], d),
        w1=xavier(ks[2], (ff, d)), b1=jnp.zeros((ff,), jnp.float32),
        w2=xavier(ks[3], (d, ff)), b2=jnp.zeros((d,), jnp.float32),
        ln1_g=jnp.ones((d,), jnp.float32), ln1_b=jnp.zeros((d,), jnp.float32),
        ln2_g=jnp.ones((d,), jnp.float32), ln2_b=jnp.zeros((d,), jnp.float32),
        ln3_g=jnp.ones((d,), jnp.float32), ln3_b=jnp.zeros((d,), jnp.float32),
    )


def init_embed(key, vocab, d, max_len):
    k1, k2, k3 = jax.random.split(key, 3)
    return dict(word=xavier(k1, (vocab, d)),
                pos=xavier(k2, (max_len, d)),
                type=xavier(k3, (1, d)))


def init_params(key):
    keys = jax.random.split(key, 5 + 2 * NUM_LAYERS)
    return dict(
        enc_embed=init_embed(keys[0], SRC_VOCAB, D_MODEL, MAX_LEN),
        dec_embed=init_embed(keys[1], TGT_VOCAB, D_MODEL, MAX_LEN),
        encoders=[init_encoder_layer(keys[2 + i], D_MODEL, DIM_FF)
                  for i in range(NUM_LAYERS)],
        decoders=[init_decoder_layer(keys[2 + NUM_LAYERS + i], D_MODEL, DIM_FF)
                  for i in range(NUM_LAYERS)],
        cls_w=xavier(keys[-2], (TGT_VOCAB, D_MODEL)),
        cls_b=jnp.zeros((TGT_VOCAB,), jnp.float32),
    )


# ----------------------------------------------------------------------------
if __name__ == "__main__":
    root = jax.random.PRNGKey(0)
    k_par, k_src, k_tgt = jax.random.split(root, 3)

    params = init_params(k_par)
    packed = pack_params(params)   # one-time pre-transpose / QKV fuse / layer stack

    src = jax.random.randint(k_src, (BATCH, SEQ_SRC), 1, SRC_VOCAB, dtype=jnp.int32)
    tgt = jax.random.randint(k_tgt, (BATCH, SEQ_TGT), 1, TGT_VOCAB, dtype=jnp.int32)
    # add a couple of padding tokens so the key-padding masks are exercised
    src = src.at[:, -2:].set(PAD_ID)
    tgt = tgt.at[:, -1:].set(PAD_ID)

    fwd = jax.jit(uformer_forward)
    logits = jax.block_until_ready(fwd(packed, src, tgt))

    assert logits.shape == (BATCH, SEQ_TGT, TGT_VOCAB)
    assert bool(jnp.all(jnp.isfinite(logits)))
    print("KERNEL_OK")
</pallas_src>

<mosaic_0001>
module attributes {stable_mosaic.version = 11 : i64} {
  func.func @_uformer_kernel(%arg0: memref<16x32xf32, #tpu.memory_space<vmem>>, %arg1: memref<16x32xf32, #tpu.memory_space<vmem>>, %arg2: memref<2x1x8xf32, #tpu.memory_space<vmem>>, %arg3: memref<2x8x8xf32, #tpu.memory_space<vmem>>, %arg4: memref<3x32x96xf32, #tpu.memory_space<vmem>>, %arg5: memref<3x1x96xf32, #tpu.memory_space<vmem>>, %arg6: memref<3x32x32xf32, #tpu.memory_space<vmem>>, %arg7: memref<3x1x32xf32, #tpu.memory_space<vmem>>, %arg8: memref<3x32x64xf32, #tpu.memory_space<vmem>>, %arg9: memref<3x1x64xf32, #tpu.memory_space<vmem>>, %arg10: memref<3x64x32xf32, #tpu.memory_space<vmem>>, %arg11: memref<3x1x32xf32, #tpu.memory_space<vmem>>, %arg12: memref<3x1x32xf32, #tpu.memory_space<vmem>>, %arg13: memref<3x1x32xf32, #tpu.memory_space<vmem>>, %arg14: memref<3x1x32xf32, #tpu.memory_space<vmem>>, %arg15: memref<3x1x32xf32, #tpu.memory_space<vmem>>, %arg16: memref<3x32x96xf32, #tpu.memory_space<vmem>>, %arg17: memref<3x1x96xf32, #tpu.memory_space<vmem>>, %arg18: memref<3x32x32xf32, #tpu.memory_space<vmem>>, %arg19: memref<3x1x32xf32, #tpu.memory_space<vmem>>, %arg20: memref<3x32x32xf32, #tpu.memory_space<vmem>>, %arg21: memref<3x1x32xf32, #tpu.memory_space<vmem>>, %arg22: memref<3x32x64xf32, #tpu.memory_space<vmem>>, %arg23: memref<3x1x64xf32, #tpu.memory_space<vmem>>, %arg24: memref<3x32x32xf32, #tpu.memory_space<vmem>>, %arg25: memref<3x1x32xf32, #tpu.memory_space<vmem>>, %arg26: memref<3x32x64xf32, #tpu.memory_space<vmem>>, %arg27: memref<3x1x64xf32, #tpu.memory_space<vmem>>, %arg28: memref<3x64x32xf32, #tpu.memory_space<vmem>>, %arg29: memref<3x1x32xf32, #tpu.memory_space<vmem>>, %arg30: memref<3x1x32xf32, #tpu.memory_space<vmem>>, %arg31: memref<3x1x32xf32, #tpu.memory_space<vmem>>, %arg32: memref<3x1x32xf32, #tpu.memory_space<vmem>>, %arg33: memref<3x1x32xf32, #tpu.memory_space<vmem>>, %arg34: memref<3x1x32xf32, #tpu.memory_space<vmem>>, %arg35: memref<3x1x32xf32, #tpu.memory_space<vmem>>, %arg36: memref<32x128xf32, #tpu.memory_space<vmem>>, %arg37: memref<1x128xf32, #tpu.memory_space<vmem>>, %arg38: memref<16x128xf32, #tpu.memory_space<vmem>>) attributes {dimension_semantics = [], scalar_prefetch = 0 : i64, scratch_operands = 0 : i64, tpu.core_type = #tpu.core_type<tc>} {
    %c0 = arith.constant 0 : index
    %c0_0 = arith.constant 0 : index
    %c0_1 = arith.constant 0 : index
    %0 = vector.load %arg2[%c0, %c0_0, %c0_1] : memref<2x1x8xf32, #tpu.memory_space<vmem>>, vector<2x1x8xf32>
    %c0_2 = arith.constant 0 : index
    %c0_3 = arith.constant 0 : index
    %c0_4 = arith.constant 0 : index
    %1 = vector.load %arg3[%c0_2, %c0_3, %c0_4] : memref<2x8x8xf32, #tpu.memory_space<vmem>>, vector<2x8x8xf32>
    %c0_5 = arith.constant 0 : index
    %c0_6 = arith.constant 0 : index
    %2 = vector.load %arg0[%c0_5, %c0_6] : memref<16x32xf32, #tpu.memory_space<vmem>>, vector<16x32xf32>
    %c0_7 = arith.constant 0 : index
    %c0_8 = arith.constant 0 : index
    %c0_9 = arith.constant 0 : index
    %3 = vector.load %arg4[%c0_7, %c0_8, %c0_9] : memref<3x32x96xf32, #tpu.memory_space<vmem>>, vector<1x32x96xf32>
    %4 = vector.shape_cast %3 : vector<1x32x96xf32> to vector<32x96xf32>
    %cst = arith.constant dense<0.000000e+00> : vector<16x96xf32>
    %5 = tpu.matmul %2, %4, %cst {dimension_numbers = #tpu.dot_dimension_numbers<[1], [0], [0], [1], [0, 0, 1, 1], [], []>} : vector<16x32xf32>, vector<32x96xf32>, vector<16x96xf32> -> vector<16x96xf32>
    %c0_10 = arith.constant 0 : index
    %c0_11 = arith.constant 0 : index
    %c0_12 = arith.constant 0 : index
    %6 = vector.load %arg5[%c0_10, %c0_11, %c0_12] : memref<3x1x96xf32, #tpu.memory_space<vmem>>, vector<1x1x96xf32>
    %7 = vector.shape_cast %6 : vector<1x1x96xf32> to vector<1x96xf32>
    %8 = vector.broadcast %7 : vector<1x96xf32> to vector<16x96xf32>
    %9 = arith.addf %5, %8 : vector<16x96xf32>
    %10 = vector.shape_cast %9 : vector<16x96xf32> to vector<2x8x96xf32>
    %11 = vector.extract_strided_slice %10 {offsets = [0, 0, 0], sizes = [2, 8, 32], strides = [1, 1, 1]} : vector<2x8x96xf32> to vector<2x8x32xf32>
    %12 = vector.extract_strided_slice %10 {offsets = [0, 0, 32], sizes = [2, 8, 32], strides = [1, 1, 1]} : vector<2x8x96xf32> to vector<2x8x32xf32>
    %13 = vector.extract_strided_slice %10 {offsets = [0, 0, 64], sizes = [2, 8, 32], strides = [1, 1, 1]} : vector<2x8x96xf32> to vector<2x8x32xf32>
    %14 = vector.extract_strided_slice %11 {offsets = [0, 0, 0], sizes = [2, 8, 8], strides = [1, 1, 1]} : vector<2x8x32xf32> to vector<2x8x8xf32>
    %15 = vector.extract_strided_slice %12 {offsets = [0, 0, 0], sizes = [2, 8, 8], strides = [1, 1, 1]} : vector<2x8x32xf32> to vector<2x8x8xf32>
    "tpu.trace_start"() <{level = 10 : i32, message = "bqd,bkd->bqk"}> : () -> ()
    %cst_13 = arith.constant dense<0.000000e+00> : vector<2x8x8xf32>
    %16 = tpu.matmul %14, %15, %cst_13 {dimension_numbers = #tpu.dot_dimension_numbers<[2], [2], [1], [1], [0, 0, 0, 1, 1, 1], [0], [0]>} : vector<2x8x8xf32>, vector<2x8x8xf32>, vector<2x8x8xf32> -> vector<2x8x8xf32>
    "tpu.trace_stop"() : () -> ()
    %cst_14 = arith.constant 0.353553385 : f32
    %17 = vector.broadcast %cst_14 : f32 to vector<2x8x8xf32>
    %18 = arith.mulf %16, %17 : vector<2x8x8xf32>
    %19 = vector.broadcast %0 : vector<2x1x8xf32> to vector<2x8x8xf32>
    %20 = arith.addf %18, %19 : vector<2x8x8xf32>
    %cst_15 = arith.constant dense<0xFF800000> : vector<2x8xf32>
    %21 = vector.multi_reduction <maximumf>, %20, %cst_15 [2] : vector<2x8x8xf32> to vector<2x8xf32>
    %22 = vector.shape_cast %21 : vector<2x8xf32> to vector<2x8x1xf32>
    %23 = vector.broadcast %22 : vector<2x8x1xf32> to vector<2x8x8xf32>
    %24 = arith.subf %20, %23 : vector<2x8x8xf32>
    %25 = math.exp %24 : vector<2x8x8xf32>
    %cst_16 = arith.constant dense<0.000000e+00> : vector<2x8xf32>
    %26 = vector.multi_reduction <add>, %25, %cst_16 [2] : vector<2x8x8xf32> to vector<2x8xf32>
    %27 = vector.shape_cast %26 : vector<2x8xf32> to vector<2x8x1xf32>
    %28 = tpu.reciprocal %27 {approx = true} : vector<2x8x1xf32> -> vector<2x8x1xf32>
    %29 = vector.broadcast %28 : vector<2x8x1xf32> to vector<2x8x8xf32>
    %30 = arith.mulf %25, %29 : vector<2x8x8xf32>
    %31 = vector.extract_strided_slice %13 {offsets = [0, 0, 0], sizes = [2, 8, 8], strides = [1, 1, 1]} : vector<2x8x32xf32> to vector<2x8x8xf32>
    "tpu.trace_start"() <{level = 10 : i32, message = "bqk,bkd->bqd"}> : () -> ()
    %cst_17 = arith.constant dense<0.000000e+00> : vector<2x8x8xf32>
    %32 = tpu.matmul %30, %31, %cst_17 {dimension_numbers = #tpu.dot_dimension_numbers<[2], [1], [1], [2], [0, 0, 0, 1, 1, 2], [0], [0]>} : vector<2x8x8xf32>, vector<2x8x8xf32>, vector<2x8x8xf32> -> vector<2x8x8xf32>
    "tpu.trace_stop"() : () -> ()
    %33 = vector.extract_strided_slice %11 {offsets = [0, 0, 8], sizes = [2, 8, 8], strides = [1, 1, 1]} : vector<2x8x32xf32> to vector<2x8x8xf32>
    %34 = vector.extract_strided_slice %12 {offsets = [0, 0, 8], sizes = [2, 8, 8], strides = [1, 1, 1]} : vector<2x8x32xf32> to vector<2x8x8xf32>
    "tpu.trace_start"() <{level = 10 : i32, message = "bqd,bkd->bqk"}> : () -> ()
    %cst_18 = arith.constant dense<0.000000e+00> : vector<2x8x8xf32>
    %35 = tpu.matmul %33, %34, %cst_18 {dimension_numbers = #tpu.dot_dimension_numbers<[2], [2], [1], [1], [0, 0, 0, 1, 1, 1], [0], [0]>} : vector<2x8x8xf32>, vector<2x8x8xf32>, vector<2x8x8xf32> -> vector<2x8x8xf32>
    "tpu.trace_stop"() : () -> ()
    %cst_19 = arith.constant 0.353553385 : f32
    %36 = vector.broadcast %cst_19 : f32 to vector<2x8x8xf32>
    %37 = arith.mulf %35, %36 : vector<2x8x8xf32>
    %38 = vector.broadcast %0 : vector<2x1x8xf32> to vector<2x8x8xf32>
    %39 = arith.addf %37, %38 : vector<2x8x8xf32>
    %cst_20 = arith.constant dense<0xFF800000> : vector<2x8xf32>
    %40 = vector.multi_reduction <maximumf>, %39, %cst_20 [2] : vector<2x8x8xf32> to vector<2x8xf32>
    %41 = vector.shape_cast %40 : vector<2x8xf32> to vector<2x8x1xf32>
    %42 = vector.broadcast %41 : vector<2x8x1xf32> to vector<2x8x8xf32>
    %43 = arith.subf %39, %42 : vector<2x8x8xf32>
    %44 = math.exp %43 : vector<2x8x8xf32>
    %cst_21 = arith.constant dense<0.000000e+00> : vector<2x8xf32>
    %45 = vector.multi_reduction <add>, %44, %cst_21 [2] : vector<2x8x8xf32> to vector<2x8xf32>
    %46 = vector.shape_cast %45 : vector<2x8xf32> to vector<2x8x1xf32>
    %47 = tpu.reciprocal %46 {approx = true} : vector<2x8x1xf32> -> vector<2x8x1xf32>
    %48 = vector.broadcast %47 : vector<2x8x1xf32> to vector<2x8x8xf32>
    %49 = arith.mulf %44, %48 : vector<2x8x8xf32>
    %50 = vector.extract_strided_slice %13 {offsets = [0, 0, 8], sizes = [2, 8, 8], strides = [1, 1, 1]} : vector<2x8x32xf32> to vector<2x8x8xf32>
    "tpu.trace_start"() <{level = 10 : i32, message = "bqk,bkd->bqd"}> : () -> ()
    %cst_22 = arith.constant dense<0.000000e+00> : vector<2x8x8xf32>
    %51 = tpu.matmul %49, %50, %cst_22 {dimension_numbers = #tpu.dot_dimension_numbers<[2], [1], [1], [2], [0, 0, 0, 1, 1, 2], [0], [0]>} : vector<2x8x8xf32>, vector<2x8x8xf32>, vector<2x8x8xf32> -> vector<2x8x8xf32>
    "tpu.trace_stop"() : () -> ()
    %52 = vector.extract_strided_slice %11 {offsets = [0, 0, 16], sizes = [2, 8, 8], strides = [1, 1, 1]} : vector<2x8x32xf32> to vector<2x8x8xf32>
    %53 = vector.extract_strided_slice %12 {offsets = [0, 0, 16], sizes = [2, 8, 8], strides = [1, 1, 1]} : vector<2x8x32xf32> to vector<2x8x8xf32>
    "tpu.trace_start"() <{level = 10 : i32, message = "bqd,bkd->bqk"}> : () -> ()
    %cst_23 = arith.constant dense<0.000000e+00> : vector<2x8x8xf32>
    %54 = tpu.matmul %52, %53, %cst_23 {dimension_numbers = #tpu.dot_dimension_numbers<[2], [2], [1], [1], [0, 0, 0, 1, 1, 1], [0], [0]>} : vector<2x8x8xf32>, vector<2x8x8xf32>, vector<2x8x8xf32> -> vector<2x8x8xf32>
    "tpu.trace_stop"() : () -> ()
    %cst_24 = arith.constant 0.353553385 : f32
    %55 = vector.broadcast %cst_24 : f32 to vector<2x8x8xf32>
    %56 = arith.mulf %54, %55 : vector<2x8x8xf32>
    %57 = vector.broadcast %0 : vector<2x1x8xf32> to vector<2x8x8xf32>
    %58 = arith.addf %56, %57 : vector<2x8x8xf32>
    %cst_25 = arith.constant dense<0xFF800000> : vector<2x8xf32>
    %59 = vector.multi_reduction <maximumf>, %58, %cst_25 [2] : vector<2x8x8xf32> to vector<2x8xf32>
    %60 = vector.shape_cast %59 : vector<2x8xf32> to vector<2x8x1xf32>
    %61 = vector.broadcast %60 : vector<2x8x1xf32> to vector<2x8x8xf32>
    %62 = arith.subf %58, %61 : vector<2x8x8xf32>
    %63 = math.exp %62 : vector<2x8x8xf32>
    %cst_26 = arith.constant dense<0.000000e+00> : vector<2x8xf32>
    %64 = vector.multi_reduction <add>, %63, %cst_26 [2] : vector<2x8x8xf32> to vector<2x8xf32>
    %65 = vector.shape_cast %64 : vector<2x8xf32> to vector<2x8x1xf32>
    %66 = tpu.reciprocal %65 {approx = true} : vector<2x8x1xf32> -> vector<2x8x1xf32>
    %67 = vector.broadcast %66 : vector<2x8x1xf32> to vector<2x8x8xf32>
    %68 = arith.mulf %63, %67 : vector<2x8x8xf32>
    %69 = vector.extract_strided_slice %13 {offsets = [0, 0, 16], sizes = [2, 8, 8], strides = [1, 1, 1]} : vector<2x8x32xf32> to vector<2x8x8xf32>
    "tpu.trace_start"() <{level = 10 : i32, message = "bqk,bkd->bqd"}> : () -> ()
    %cst_27 = arith.constant dense<0.000000e+00> : vector<2x8x8xf32>
    %70 = tpu.matmul %68, %69, %cst_27 {dimension_numbers = #tpu.dot_dimension_numbers<[2], [1], [1], [2], [0, 0, 0, 1, 1, 2], [0], [0]>} : vector<2x8x8xf32>, vector<2x8x8xf32>, vector<2x8x8xf32> -> vector<2x8x8xf32>
    "tpu.trace_stop"() : () -> ()
    %71 = vector.extract_strided_slice %11 {offsets = [0, 0, 24], sizes = [2, 8, 8], strides = [1, 1, 1]} : vector<2x8x32xf32> to vector<2x8x8xf32>
    %72 = vector.extract_strided_slice %12 {offsets = [0, 0, 24], sizes = [2, 8, 8], strides = [1, 1, 1]} : vector<2x8x32xf32> to vector<2x8x8xf32>
    "tpu.trace_start"() <{level = 10 : i32, message = "bqd,bkd->bqk"}> : () -> ()
    %cst_28 = arith.constant dense<0.000000e+00> : vector<2x8x8xf32>
    %73 = tpu.matmul %71, %72, %cst_28 {dimension_numbers = #tpu.dot_dimension_numbers<[2], [2], [1], [1], [0, 0, 0, 1, 1, 1], [0], [0]>} : vector<2x8x8xf32>, vector<2x8x8xf32>, vector<2x8x8xf32> -> vector<2x8x8xf32>
    "tpu.trace_stop"() : () -> ()
    %cst_29 = arith.constant 0.353553385 : f32
    %74 = vector.broadcast %cst_29 : f32 to vector<2x8x8xf32>
    %75 = arith.mulf %73, %74 : vector<2x8x8xf32>
    %76 = vector.broadcast %0 : vector<2x1x8xf32> to vector<2x8x8xf32>
    %77 = arith.addf %75, %76 : vector<2x8x8xf32>
    %cst_30 = arith.constant dense<0xFF800000> : vector<2x8xf32>
    %78 = vector.multi_reduction <maximumf>, %77, %cst_30 [2] : vector<2x8x8xf32> to vector<2x8xf32>
    %79 = vector.shape_cast %78 : vector<2x8xf32> to vector<2x8x1xf32>
    %80 = vector.broadcast %79 : vector<2x8x1xf32> to vector<2x8x8xf32>
    %81 = arith.subf %77, %80 : vector<2x8x8xf32>
    %82 = math.exp %81 : vector<2x8x8xf32>
    %cst_31 = arith.constant dense<0.000000e+00> : vector<2x8xf32>
    %83 = vector.multi_reduction <add>, %82, %cst_31 [2] : vector<2x8x8xf32> to vector<2x8xf32>
    %84 = vector.shape_cast %83 : vector<2x8xf32> to vector<2x8x1xf32>
    %85 = tpu.reciprocal %84 {approx = true} : vector<2x8x1xf32> -> vector<2x8x1xf32>
    %86 = vector.broadcast %85 : vector<2x8x1xf32> to vector<2x8x8xf32>
    %87 = arith.mulf %82, %86 : vector<2x8x8xf32>
    %88 = vector.extract_strided_slice %13 {offsets = [0, 0, 24], sizes = [2, 8, 8], strides = [1, 1, 1]} : vector<2x8x32xf32> to vector<2x8x8xf32>
    "tpu.trace_start"() <{level = 10 : i32, message = "bqk,bkd->bqd"}> : () -> ()
    %cst_32 = arith.constant dense<0.000000e+00> : vector<2x8x8xf32>
    %89 = tpu.matmul %87, %88, %cst_32 {dimension_numbers = #tpu.dot_dimension_numbers<[2], [1], [1], [2], [0, 0, 0, 1, 1, 2], [0], [0]>} : vector<2x8x8xf32>, vector<2x8x8xf32>, vector<2x8x8xf32> -> vector<2x8x8xf32>
    "tpu.trace_stop"() : () -> ()
    %90 = tpu.concatenate %32, %51, %70, %89 in 2 : vector<2x8x8xf32>, vector<2x8x8xf32>, vector<2x8x8xf32>, vector<2x8x8xf32> -> vector<2x8x32xf32>
    %91 = vector.shape_cast %90 : vector<2x8x32xf32> to vector<16x32xf32>
    %c0_33 = arith.constant 0 : index
    %c0_34 = arith.constant 0 : index
    %c0_35 = arith.constant 0 : index
    %92 = vector.load %arg6[%c0_33, %c0_34, %c0_35] : memref<3x32x32xf32, #tpu.memory_space<vmem>>, vector<1x32x32xf32>
    %93 = vector.shape_cast %92 : vector<1x32x32xf32> to vector<32x32xf32>
    %cst_36 = arith.constant dense<0.000000e+00> : vector<16x32xf32>
    %94 = tpu.matmul %91, %93, %cst_36 {dimension_numbers = #tpu.dot_dimension_numbers<[1], [0], [0], [1], [0, 0, 1, 1], [], []>} : vector<16x32xf32>, vector<32x32xf32>, vector<16x32xf32> -> vector<16x32xf32>
    %c0_37 = arith.constant 0 : index
    %c0_38 = arith.constant 0 : index
    %c0_39 = arith.constant 0 : index
    %95 = vector.load %arg7[%c0_37, %c0_38, %c0_39] : memref<3x1x32xf32, #tpu.memory_space<vmem>>, vector<1x1x32xf32>
    %96 = vector.shape_cast %95 : vector<1x1x32xf32> to vector<1x32xf32>
    %97 = vector.broadcast %96 : vector<1x32xf32> to vector<16x32xf32>
    %98 = arith.addf %94, %97 : vector<16x32xf32>
    %99 = arith.addf %2, %98 : vector<16x32xf32>
    %c0_40 = arith.constant 0 : index
    %c0_41 = arith.constant 0 : index
    %c0_42 = arith.constant 0 : index
    %100 = vector.load %arg12[%c0_40, %c0_41, %c0_42] : memref<3x1x32xf32, #tpu.memory_space<vmem>>, vector<1x1x32xf32>
    %101 = vector.shape_cast %100 : vector<1x1x32xf32> to vector<1x32xf32>
    %c0_43 = arith.constant 0 : index
    %c0_44 = arith.constant 0 : index
    %c0_45 = arith.constant 0 : index
    %102 = vector.load %arg13[%c0_43, %c0_44, %c0_45] : memref<3x1x32xf32, #tpu.memory_space<vmem>>, vector<1x1x32xf32>
    %103 = vector.shape_cast %102 : vector<1x1x32xf32> to vector<1x32xf32>
    %cst_46 = arith.constant dense<0.000000e+00> : vector<16xf32>
    %104 = vector.multi_reduction <add>, %99, %cst_46 [1] : vector<16x32xf32> to vector<16xf32>
    %105 = vector.shape_cast %104 : vector<16xf32> to vector<16x1xf32>
    %cst_47 = arith.constant 3.200000e+01 : f32
    %106 = vector.broadcast %cst_47 : f32 to vector<16x1xf32>
    %107 = arith.divf %105, %106 : vector<16x1xf32>
    %108 = vector.broadcast %107 : vector<16x1xf32> to vector<16x32xf32>
    %109 = arith.subf %99, %108 : vector<16x32xf32>
    %110 = arith.mulf %109, %109 : vector<16x32xf32>
    %cst_48 = arith.constant dense<0.000000e+00> : vector<16xf32>
    %111 = vector.multi_reduction <add>, %110, %cst_48 [1] : vector<16x32xf32> to vector<16xf32>
    %112 = vector.shape_cast %111 : vector<16xf32> to vector<16x1xf32>
    %cst_49 = arith.constant 3.200000e+01 : f32
    %113 = vector.broadcast %cst_49 : f32 to vector<16x1xf32>
    %114 = arith.divf %112, %113 : vector<16x1xf32>
    %cst_50 = arith.constant 9.99999974E-6 : f32
    %115 = vector.broadcast %cst_50 : f32 to vector<16x1xf32>
    %116 = arith.addf %114, %115 : vector<16x1xf32>
    %117 = math.rsqrt %116 : vector<16x1xf32>
    %118 = vector.broadcast %117 : vector<16x1xf32> to vector<16x32xf32>
    %119 = arith.mulf %109, %118 : vector<16x32xf32>
    %120 = vector.broadcast %101 : vector<1x32xf32> to vector<16x32xf32>
    %121 = arith.mulf %119, %120 : vector<16x32xf32>
    %122 = vector.broadcast %103 : vector<1x32xf32> to vector<16x32xf32>
    %123 = arith.addf %121, %122 : vector<16x32xf32>
    %c0_51 = arith.constant 0 : index
    %c0_52 = arith.constant 0 : index
    %c0_53 = arith.constant 0 : index
    %124 = vector.load %arg8[%c0_51, %c0_52, %c0_53] : memref<3x32x64xf32, #tpu.memory_space<vmem>>, vector<1x32x64xf32>
    %125 = vector.shape_cast %124 : vector<1x32x64xf32> to vector<32x64xf32>
    %cst_54 = arith.constant dense<0.000000e+00> : vector<16x64xf32>
    %126 = tpu.matmul %123, %125, %cst_54 {dimension_numbers = #tpu.dot_dimension_numbers<[1], [0], [0], [1], [0, 0, 1, 1], [], []>} : vector<16x32xf32>, vector<32x64xf32>, vector<16x64xf32> -> vector<16x64xf32>
    %c0_55 = arith.constant 0 : index
    %c0_56 = arith.constant 0 : index
    %c0_57 = arith.constant 0 : index
    %127 = vector.load %arg9[%c0_55, %c0_56, %c0_57] : memref<3x1x64xf32, #tpu.memory_space<vmem>>, vector<1x1x64xf32>
    %128 = vector.shape_cast %127 : vector<1x1x64xf32> to vector<1x64xf32>
    %129 = vector.broadcast %128 : vector<1x64xf32> to vector<16x64xf32>
    %130 = arith.addf %126, %129 : vector<16x64xf32>
    %cst_58 = arith.constant 0.000000e+00 : f32
    %131 = vector.broadcast %cst_58 : f32 to vector<16x64xf32>
    %132 = arith.maximumf %130, %131 : vector<16x64xf32>
    %c0_59 = arith.constant 0 : index
    %c0_60 = arith.constant 0 : index
    %c0_61 = arith.constant 0 : index
    %133 = vector.load %arg10[%c0_59, %c0_60, %c0_61] : memref<3x64x32xf32, #tpu.memory_space<vmem>>, vector<1x64x32xf32>
    %134 = vector.shape_cast %133 : vector<1x64x32xf32> to vector<64x32xf32>
    %cst_62 = arith.constant dense<0.000000e+00> : vector<16x32xf32>
    %135 = tpu.matmul %132, %134, %cst_62 {dimension_numbers = #tpu.dot_dimension_numbers<[1], [0], [0], [1], [0, 0, 1, 1], [], []>} : vector<16x64xf32>, vector<64x32xf32>, vector<16x32xf32> -> vector<16x32xf32>
    %c0_63 = arith.constant 0 : index
    %c0_64 = arith.constant 0 : index
    %c0_65 = arith.constant 0 : index
    %136 = vector.load %arg11[%c0_63, %c0_64, %c0_65] : memref<3x1x32xf32, #tpu.memory_space<vmem>>, vector<1x1x32xf32>
    %137 = vector.shape_cast %136 : vector<1x1x32xf32> to vector<1x32xf32>
    %138 = vector.broadcast %137 : vector<1x32xf32> to vector<16x32xf32>
    %139 = arith.addf %135, %138 : vector<16x32xf32>
    %140 = arith.addf %123, %139 : vector<16x32xf32>
    %c0_66 = arith.constant 0 : index
    %c0_67 = arith.constant 0 : index
    %c0_68 = arith.constant 0 : index
    %141 = vector.load %arg14[%c0_66, %c0_67, %c0_68] : memref<3x1x32xf32, #tpu.memory_space<vmem>>, vector<1x1x32xf32>
    %142 = vector.shape_cast %141 : vector<1x1x32xf32> to vector<1x32xf32>
    %c0_69 = arith.constant 0 : index
    %c0_70 = arith.constant 0 : index
    %c0_71 = arith.constant 0 : index
    %143 = vector.load %arg15[%c0_69, %c0_70, %c0_71] : memref<3x1x32xf32, #tpu.memory_space<vmem>>, vector<1x1x32xf32>
    %144 = vector.shape_cast %143 : vector<1x1x32xf32> to vector<1x32xf32>
    %cst_72 = arith.constant dense<0.000000e+00> : vector<16xf32>
    %145 = vector.multi_reduction <add>, %140, %cst_72 [1] : vector<16x32xf32> to vector<16xf32>
    %146 = vector.shape_cast %145 : vector<16xf32> to vector<16x1xf32>
    %cst_73 = arith.constant 3.200000e+01 : f32
    %147 = vector.broadcast %cst_73 : f32 to vector<16x1xf32>
    %148 = arith.divf %146, %147 : vector<16x1xf32>
    %149 = vector.broadcast %148 : vector<16x1xf32> to vector<16x32xf32>
    %150 = arith.subf %140, %149 : vector<16x32xf32>
    %151 = arith.mulf %150, %150 : vector<16x32xf32>
    %cst_74 = arith.constant dense<0.000000e+00> : vector<16xf32>
    %152 = vector.multi_reduction <add>, %151, %cst_74 [1] : vector<16x32xf32> to vector<16xf32>
    %153 = vector.shape_cast %152 : vector<16xf32> to vector<16x1xf32>
    %cst_75 = arith.constant 3.200000e+01 : f32
    %154 = vector.broadcast %cst_75 : f32 to vector<16x1xf32>
    %155 = arith.divf %153, %154 : vector<16x1xf32>
    %cst_76 = arith.constant 9.99999974E-6 : f32
    %156 = vector.broadcast %cst_76 : f32 to vector<16x1xf32>
    %157 = arith.addf %155, %156 : vector<16x1xf32>
    %158 = math.rsqrt %157 : vector<16x1xf32>
    %159 = vector.broadcast %158 : vector<16x1xf32> to vector<16x32xf32>
    %160 = arith.mulf %150, %159 : vector<16x32xf32>
    %161 = vector.broadcast %142 : vector<1x32xf32> to vector<16x32xf32>
    %162 = arith.mulf %160, %161 : vector<16x32xf32>
    %163 = vector.broadcast %144 : vector<1x32xf32> to vector<16x32xf32>
    %164 = arith.addf %162, %163 : vector<16x32xf32>
    %c1 = arith.constant 1 : index
    %c0_77 = arith.constant 0 : index
    %c0_78 = arith.constant 0 : index
    %165 = vector.load %arg4[%c1, %c0_77, %c0_78] : memref<3x32x96xf32, #tpu.memory_space<vmem>>, vector<1x32x96xf32>
    %166 = vector.shape_cast %165 : vector<1x32x96xf32> to vector<32x96xf32>
    %cst_79 = arith.constant dense<0.000000e+00> : vector<16x96xf32>
    %167 = tpu.matmul %164, %166, %cst_79 {dimension_numbers = #tpu.dot_dimension_numbers<[1], [0], [0], [1], [0, 0, 1, 1], [], []>} : vector<16x32xf32>, vector<32x96xf32>, vector<16x96xf32> -> vector<16x96xf32>
    %c1_80 = arith.constant 1 : index
    %c0_81 = arith.constant 0 : index
    %c0_82 = arith.constant 0 : index
    %168 = vector.load %arg5[%c1_80, %c0_81, %c0_82] : memref<3x1x96xf32, #tpu.memory_space<vmem>>, vector<1x1x96xf32>
    %169 = vector.shape_cast %168 : vector<1x1x96xf32> to vector<1x96xf32>
    %170 = vector.broadcast %169 : vector<1x96xf32> to vector<16x96xf32>
    %171 = arith.addf %167, %170 : vector<16x96xf32>
    %172 = vector.shape_cast %171 : vector<16x96xf32> to vector<2x8x96xf32>
    %173 = vector.extract_strided_slice %172 {offsets = [0, 0, 0], sizes = [2, 8, 32], strides = [1, 1, 1]} : vector<2x8x96xf32> to vector<2x8x32xf32>
    %174 = vector.extract_strided_slice %172 {offsets = [0, 0, 32], sizes = [2, 8, 32], strides = [1, 1, 1]} : vector<2x8x96xf32> to vector<2x8x32xf32>
    %175 = vector.extract_strided_slice %172 {offsets = [0, 0, 64], sizes = [2, 8, 32], strides = [1, 1, 1]} : vector<2x8x96xf32> to vector<2x8x32xf32>
    %176 = vector.extract_strided_slice %173 {offsets = [0, 0, 0], sizes = [2, 8, 8], strides = [1, 1, 1]} : vector<2x8x32xf32> to vector<2x8x8xf32>
    %177 = vector.extract_strided_slice %174 {offsets = [0, 0, 0], sizes = [2, 8, 8], strides = [1, 1, 1]} : vector<2x8x32xf32> to vector<2x8x8xf32>
    "tpu.trace_start"() <{level = 10 : i32, message = "bqd,bkd->bqk"}> : () -> ()
    %cst_83 = arith.constant dense<0.000000e+00> : vector<2x8x8xf32>
    %178 = tpu.matmul %176, %177, %cst_83 {dimension_numbers = #tpu.dot_dimension_numbers<[2], [2], [1], [1], [0, 0, 0, 1, 1, 1], [0], [0]>} : vector<2x8x8xf32>, vector<2x8x8xf32>, vector<2x8x8xf32> -> vector<2x8x8xf32>
    "tpu.trace_stop"() : () -> ()
    %cst_84 = arith.constant 0.353553385 : f32
    %179 = vector.broadcast %cst_84 : f32 to vector<2x8x8xf32>
    %180 = arith.mulf %178, %179 : vector<2x8x8xf32>
    %181 = vector.broadcast %0 : vector<2x1x8xf32> to vector<2x8x8xf32>
    %182 = arith.addf %180, %181 : vector<2x8x8xf32>
    %cst_85 = arith.constant dense<0xFF800000> : vector<2x8xf32>
    %183 = vector.multi_reduction <maximumf>, %182, %cst_85 [2] : vector<2x8x8xf32> to vector<2x8xf32>
    %184 = vector.shape_cast %183 : vector<2x8xf32> to vector<2x8x1xf32>
    %185 = vector.broadcast %184 : vector<2x8x1xf32> to vector<2x8x8xf32>
    %186 = arith.subf %182, %185 : vector<2x8x8xf32>
    %187 = math.exp %186 : vector<2x8x8xf32>
    %cst_86 = arith.constant dense<0.000000e+00> : vector<2x8xf32>
    %188 = vector.multi_reduction <add>, %187, %cst_86 [2] : vector<2x8x8xf32> to vector<2x8xf32>
    %189 = vector.shape_cast %188 : vector<2x8xf32> to vector<2x8x1xf32>
    %190 = tpu.reciprocal %189 {approx = true} : vector<2x8x1xf32> -> vector<2x8x1xf32>
    %191 = vector.broadcast %190 : vector<2x8x1xf32> to vector<2x8x8xf32>
    %192 = arith.mulf %187, %191 : vector<2x8x8xf32>
    %193 = vector.extract_strided_slice %175 {offsets = [0, 0, 0], sizes = [2, 8, 8], strides = [1, 1, 1]} : vector<2x8x32xf32> to vector<2x8x8xf32>
    "tpu.trace_start"() <{level = 10 : i32, message = "bqk,bkd->bqd"}> : () -> ()
    %cst_87 = arith.constant dense<0.000000e+00> : vector<2x8x8xf32>
    %194 = tpu.matmul %192, %193, %cst_87 {dimension_numbers = #tpu.dot_dimension_numbers<[2], [1], [1], [2], [0, 0, 0, 1, 1, 2], [0], [0]>} : vector<2x8x8xf32>, vector<2x8x8xf32>, vector<2x8x8xf32> -> vector<2x8x8xf32>
    "tpu.trace_stop"() : () -> ()
    %195 = vector.extract_strided_slice %173 {offsets = [0, 0, 8], sizes = [2, 8, 8], strides = [1, 1, 1]} : vector<2x8x32xf32> to vector<2x8x8xf32>
    %196 = vector.extract_strided_slice %174 {offsets = [0, 0, 8], sizes = [2, 8, 8], strides = [1, 1, 1]} : vector<2x8x32xf32> to vector<2x8x8xf32>
    "tpu.trace_start"() <{level = 10 : i32, message = "bqd,bkd->bqk"}> : () -> ()
    %cst_88 = arith.constant dense<0.000000e+00> : vector<2x8x8xf32>
    %197 = tpu.matmul %195, %196, %cst_88 {dimension_numbers = #tpu.dot_dimension_numbers<[2], [2], [1], [1], [0, 0, 0, 1, 1, 1], [0], [0]>} : vector<2x8x8xf32>, vector<2x8x8xf32>, vector<2x8x8xf32> -> vector<2x8x8xf32>
    "tpu.trace_stop"() : () -> ()
    %cst_89 = arith.constant 0.353553385 : f32
    %198 = vector.broadcast %cst_89 : f32 to vector<2x8x8xf32>
    %199 = arith.mulf %197, %198 : vector<2x8x8xf32>
    %200 = vector.broadcast %0 : vector<2x1x8xf32> to vector<2x8x8xf32>
    %201 = arith.addf %199, %200 : vector<2x8x8xf32>
    %cst_90 = arith.constant dense<0xFF800000> : vector<2x8xf32>
    %202 = vector.multi_reduction <maximumf>, %201, %cst_90 [2] : vector<2x8x8xf32> to vector<2x8xf32>
    %203 = vector.shape_cast %202 : vector<2x8xf32> to vector<2x8x1xf32>
    %204 = vector.broadcast %203 : vector<2x8x1xf32> to vector<2x8x8xf32>
    %205 = arith.subf %201, %204 : vector<2x8x8xf32>
    %206 = math.exp %205 : vector<2x8x8xf32>
    %cst_91 = arith.constant dense<0.000000e+00> : vector<2x8xf32>
    %207 = vector.multi_reduction <add>, %206, %cst_91 [2] : vector<2x8x8xf32> to vector<2x8xf32>
    %208 = vector.shape_cast %207 : vector<2x8xf32> to vector<2x8x1xf32>
    %209 = tpu.reciprocal %208 {approx = true} : vector<2x8x1xf32> -> vector<2x8x1xf32>
    %210 = vector.broadcast %209 : vector<2x8x1xf32> to vector<2x8x8xf32>
    %211 = arith.mulf %206, %210 : vector<2x8x8xf32>
    %212 = vector.extract_strided_slice %175 {offsets = [0, 0, 8], sizes = [2, 8, 8], strides = [1, 1, 1]} : vector<2x8x32xf32> to vector<2x8x8xf32>
    "tpu.trace_start"() <{level = 10 : i32, message = "bqk,bkd->bqd"}> : () -> ()
    %cst_92 = arith.constant dense<0.000000e+00> : vector<2x8x8xf32>
    %213 = tpu.matmul %211, %212, %cst_92 {dimension_numbers = #tpu.dot_dimension_numbers<[2], [1], [1], [2], [0, 0, 0, 1, 1, 2], [0], [0]>} : vector<2x8x8xf32>, vector<2x8x8xf32>, vector<2x8x8xf32> -> vector<2x8x8xf32>
    "tpu.trace_stop"() : () -> ()
    %214 = vector.extract_strided_slice %173 {offsets = [0, 0, 16], sizes = [2, 8, 8], strides = [1, 1, 1]} : vector<2x8x32xf32> to vector<2x8x8xf32>
    %215 = vector.extract_strided_slice %174 {offsets = [0, 0, 16], sizes = [2, 8, 8], strides = [1, 1, 1]} : vector<2x8x32xf32> to vector<2x8x8xf32>
    "tpu.trace_start"() <{level = 10 : i32, message = "bqd,bkd->bqk"}> : () -> ()
    %cst_93 = arith.constant dense<0.000000e+00> : vector<2x8x8xf32>
    %216 = tpu.matmul %214, %215, %cst_93 {dimension_numbers = #tpu.dot_dimension_numbers<[2], [2], [1], [1], [0, 0, 0, 1, 1, 1], [0], [0]>} : vector<2x8x8xf32>, vector<2x8x8xf32>, vector<2x8x8xf32> -> vector<2x8x8xf32>
    "tpu.trace_stop"() : () -> ()
    %cst_94 = arith.constant 0.353553385 : f32
    %217 = vector.broadcast %cst_94 : f32 to vector<2x8x8xf32>
    %218 = arith.mulf %216, %217 : vector<2x8x8xf32>
    %219 = vector.broadcast %0 : vector<2x1x8xf32> to vector<2x8x8xf32>
    %220 = arith.addf %218, %219 : vector<2x8x8xf32>
    %cst_95 = arith.constant dense<0xFF800000> : vector<2x8xf32>
    %221 = vector.multi_reduction <maximumf>, %220, %cst_95 [2] : vector<2x8x8xf32> to vector<2x8xf32>
    %222 = vector.shape_cast %221 : vector<2x8xf32> to vector<2x8x1xf32>
    %223 = vector.broadcast %222 : vector<2x8x1xf32> to vector<2x8x8xf32>
    %224 = arith.subf %220, %223 : vector<2x8x8xf32>
    %225 = math.exp %224 : vector<2x8x8xf32>
    %cst_96 = arith.constant dense<0.000000e+00> : vector<2x8xf32>
    %226 = vector.multi_reduction <add>, %225, %cst_96 [2] : vector<2x8x8xf32> to vector<2x8xf32>
    %227 = vector.shape_cast %226 : vector<2x8xf32> to vector<2x8x1xf32>
    %228 = tpu.reciprocal %227 {approx = true} : vector<2x8x1xf32> -> vector<2x8x1xf32>
    %229 = vector.broadcast %228 : vector<2x8x1xf32> to vector<2x8x8xf32>
    %230 = arith.mulf %225, %229 : vector<2x8x8xf32>
    %231 = vector.extract_strided_slice %175 {offsets = [0, 0, 16], sizes = [2, 8, 8], strides = [1, 1, 1]} : vector<2x8x32xf32> to vector<2x8x8xf32>
    "tpu.trace_start"() <{level = 10 : i32, message = "bqk,bkd->bqd"}> : () -> ()
    %cst_97 = arith.constant dense<0.000000e+00> : vector<2x8x8xf32>
    %232 = tpu.matmul %230, %231, %cst_97 {dimension_numbers = #tpu.dot_dimension_numbers<[2], [1], [1], [2], [0, 0, 0, 1, 1, 2], [0], [0]>} : vector<2x8x8xf32>, vector<2x8x8xf32>, vector<2x8x8xf32> -> vector<2x8x8xf32>
    "tpu.trace_stop"() : () -> ()
    %233 = vector.extract_strided_slice %173 {offsets = [0, 0, 24], sizes = [2, 8, 8], strides = [1, 1, 1]} : vector<2x8x32xf32> to vector<2x8x8xf32>
    %234 = vector.extract_strided_slice %174 {offsets = [0, 0, 24], sizes = [2, 8, 8], strides = [1, 1, 1]} : vector<2x8x32xf32> to vector<2x8x8xf32>
    "tpu.trace_start"() <{level = 10 : i32, message = "bqd,bkd->bqk"}> : () -> ()
    %cst_98 = arith.constant dense<0.000000e+00> : vector<2x8x8xf32>
    %235 = tpu.matmul %233, %234, %cst_98 {dimension_numbers = #tpu.dot_dimension_numbers<[2], [2], [1], [1], [0, 0, 0, 1, 1, 1], [0], [0]>} : vector<2x8x8xf32>, vector<2x8x8xf32>, vector<2x8x8xf32> -> vector<2x8x8xf32>
    "tpu.trace_stop"() : () -> ()
    %cst_99 = arith.constant 0.353553385 : f32
    %236 = vector.broadcast %cst_99 : f32 to vector<2x8x8xf32>
    %237 = arith.mulf %235, %236 : vector<2x8x8xf32>
    %238 = vector.broadcast %0 : vector<2x1x8xf32> to vector<2x8x8xf32>
    %239 = arith.addf %237, %238 : vector<2x8x8xf32>
    %cst_100 = arith.constant dense<0xFF800000> : vector<2x8xf32>
    %240 = vector.multi_reduction <maximumf>, %239, %cst_100 [2] : vector<2x8x8xf32> to vector<2x8xf32>
    %241 = vector.shape_cast %240 : vector<2x8xf32> to vector<2x8x1xf32>
    %242 = vector.broadcast %241 : vector<2x8x1xf32> to vector<2x8x8xf32>
    %243 = arith.subf %239, %242 : vector<2x8x8xf32>
    %244 = math.exp %243 : vector<2x8x8xf32>
    %cst_101 = arith.constant dense<0.000000e+00> : vector<2x8xf32>
    %245 = vector.multi_reduction <add>, %244, %cst_101 [2] : vector<2x8x8xf32> to vector<2x8xf32>
    %246 = vector.shape_cast %245 : vector<2x8xf32> to vector<2x8x1xf32>
    %247 = tpu.reciprocal %246 {approx = true} : vector<2x8x1xf32> -> vector<2x8x1xf32>
    %248 = vector.broadcast %247 : vector<2x8x1xf32> to vector<2x8x8xf32>
    %249 = arith.mulf %244, %248 : vector<2x8x8xf32>
    %250 = vector.extract_strided_slice %175 {offsets = [0, 0, 24], sizes = [2, 8, 8], strides = [1, 1, 1]} : vector<2x8x32xf32> to vector<2x8x8xf32>
    "tpu.trace_start"() <{level = 10 : i32, message = "bqk,bkd->bqd"}> : () -> ()
    %cst_102 = arith.constant dense<0.000000e+00> : vector<2x8x8xf32>
    %251 = tpu.matmul %249, %250, %cst_102 {dimension_numbers = #tpu.dot_dimension_numbers<[2], [1], [1], [2], [0, 0, 0, 1, 1, 2], [0], [0]>} : vector<2x8x8xf32>, vector<2x8x8xf32>, vector<2x8x8xf32> -> vector<2x8x8xf32>
    "tpu.trace_stop"() : () -> ()
    %252 = tpu.concatenate %194, %213, %232, %251 in 2 : vector<2x8x8xf32>, vector<2x8x8xf32>, vector<2x8x8xf32>, vector<2x8x8xf32> -> vector<2x8x32xf32>
    %253 = vector.shape_cast %252 : vector<2x8x32xf32> to vector<16x32xf32>
    %c1_103 = arith.constant 1 : index
    %c0_104 = arith.constant 0 : index
    %c0_105 = arith.constant 0 : index
    %254 = vector.load %arg6[%c1_103, %c0_104, %c0_105] : memref<3x32x32xf32, #tpu.memory_space<vmem>>, vector<1x32x32xf32>
    %255 = vector.shape_cast %254 : vector<1x32x32xf32> to vector<32x32xf32>
    %cst_106 = arith.constant dense<0.000000e+00> : vector<16x32xf32>
    %256 = tpu.matmul %253, %255, %cst_106 {dimension_numbers = #tpu.dot_dimension_numbers<[1], [0], [0], [1], [0, 0, 1, 1], [], []>} : vector<16x32xf32>, vector<32x32xf32>, vector<16x32xf32> -> vector<16x32xf32>
    %c1_107 = arith.constant 1 : index
    %c0_108 = arith.constant 0 : index
    %c0_109 = arith.constant 0 : index
    %257 = vector.load %arg7[%c1_107, %c0_108, %c0_109] : memref<3x1x32xf32, #tpu.memory_space<vmem>>, vector<1x1x32xf32>
    %258 = vector.shape_cast %257 : vector<1x1x32xf32> to vector<1x32xf32>
    %259 = vector.broadcast %258 : vector<1x32xf32> to vector<16x32xf32>
    %260 = arith.addf %256, %259 : vector<16x32xf32>
    %261 = arith.addf %164, %260 : vector<16x32xf32>
    %c1_110 = arith.constant 1 : index
    %c0_111 = arith.constant 0 : index
    %c0_112 = arith.constant 0 : index
    %262 = vector.load %arg12[%c1_110, %c0_111, %c0_112] : memref<3x1x32xf32, #tpu.memory_space<vmem>>, vector<1x1x32xf32>
    %263 = vector.shape_cast %262 : vector<1x1x32xf32> to vector<1x32xf32>
    %c1_113 = arith.constant 1 : index
    %c0_114 = arith.constant 0 : index
    %c0_115 = arith.constant 0 : index
    %264 = vector.load %arg13[%c1_113, %c0_114, %c0_115] : memref<3x1x32xf32, #tpu.memory_space<vmem>>, vector<1x1x32xf32>
    %265 = vector.shape_cast %264 : vector<1x1x32xf32> to vector<1x32xf32>
    %cst_116 = arith.constant dense<0.000000e+00> : vector<16xf32>
    %266 = vector.multi_reduction <add>, %261, %cst_116 [1] : vector<16x32xf32> to vector<16xf32>
    %267 = vector.shape_cast %266 : vector<16xf32> to vector<16x1xf32>
    %cst_117 = arith.constant 3.200000e+01 : f32
    %268 = vector.broadcast %cst_117 : f32 to vector<16x1xf32>
    %269 = arith.divf %267, %268 : vector<16x1xf32>
    %270 = vector.broadcast %269 : vector<16x1xf32> to vector<16x32xf32>
    %271 = arith.subf %261, %270 : vector<16x32xf32>
    %272 = arith.mulf %271, %271 : vector<16x32xf32>
    %cst_118 = arith.constant dense<0.000000e+00> : vector<16xf32>
    %273 = vector.multi_reduction <add>, %272, %cst_118 [1] : vector<16x32xf32> to vector<16xf32>
    %274 = vector.shape_cast %273 : vector<16xf32> to vector<16x1xf32>
    %cst_119 = arith.constant 3.200000e+01 : f32
    %275 = vector.broadcast %cst_119 : f32 to vector<16x1xf32>
    %276 = arith.divf %274, %275 : vector<16x1xf32>
    %cst_120 = arith.constant 9.99999974E-6 : f32
    %277 = vector.broadcast %cst_120 : f32 to vector<16x1xf32>
    %278 = arith.addf %276, %277 : vector<16x1xf32>
    %279 = math.rsqrt %278 : vector<16x1xf32>
    %280 = vector.broadcast %279 : vector<16x1xf32> to vector<16x32xf32>
    %281 = arith.mulf %271, %280 : vector<16x32xf32>
    %282 = vector.broadcast %263 : vector<1x32xf32> to vector<16x32xf32>
    %283 = arith.mulf %281, %282 : vector<16x32xf32>
    %284 = vector.broadcast %265 : vector<1x32xf32> to vector<16x32xf32>
    %285 = arith.addf %283, %284 : vector<16x32xf32>
    %c1_121 = arith.constant 1 : index
    %c0_122 = arith.constant 0 : index
    %c0_123 = arith.constant 0 : index
    %286 = vector.load %arg8[%c1_121, %c0_122, %c0_123] : memref<3x32x64xf32, #tpu.memory_space<vmem>>, vector<1x32x64xf32>
    %287 = vector.shape_cast %286 : vector<1x32x64xf32> to vector<32x64xf32>
    %cst_124 = arith.constant dense<0.000000e+00> : vector<16x64xf32>
    %288 = tpu.matmul %285, %287, %cst_124 {dimension_numbers = #tpu.dot_dimension_numbers<[1], [0], [0], [1], [0, 0, 1, 1], [], []>} : vector<16x32xf32>, vector<32x64xf32>, vector<16x64xf32> -> vector<16x64xf32>
    %c1_125 = arith.constant 1 : index
    %c0_126 = arith.constant 0 : index
    %c0_127 = arith.constant 0 : index
    %289 = vector.load %arg9[%c1_125, %c0_126, %c0_127] : memref<3x1x64xf32, #tpu.memory_space<vmem>>, vector<1x1x64xf32>
    %290 = vector.shape_cast %289 : vector<1x1x64xf32> to vector<1x64xf32>
    %291 = vector.broadcast %290 : vector<1x64xf32> to vector<16x64xf32>
    %292 = arith.addf %288, %291 : vector<16x64xf32>
    %cst_128 = arith.constant 0.000000e+00 : f32
    %293 = vector.broadcast %cst_128 : f32 to vector<16x64xf32>
    %294 = arith.maximumf %292, %293 : vector<16x64xf32>
    %c1_129 = arith.constant 1 : index
    %c0_130 = arith.constant 0 : index
    %c0_131 = arith.constant 0 : index
    %295 = vector.load %arg10[%c1_129, %c0_130, %c0_131] : memref<3x64x32xf32, #tpu.memory_space<vmem>>, vector<1x64x32xf32>
    %296 = vector.shape_cast %295 : vector<1x64x32xf32> to vector<64x32xf32>
    %cst_132 = arith.constant dense<0.000000e+00> : vector<16x32xf32>
    %297 = tpu.matmul %294, %296, %cst_132 {dimension_numbers = #tpu.dot_dimension_numbers<[1], [0], [0], [1], [0, 0, 1, 1], [], []>} : vector<16x64xf32>, vector<64x32xf32>, vector<16x32xf32> -> vector<16x32xf32>
    %c1_133 = arith.constant 1 : index
    %c0_134 = arith.constant 0 : index
    %c0_135 = arith.constant 0 : index
    %298 = vector.load %arg11[%c1_133, %c0_134, %c0_135] : memref<3x1x32xf32, #tpu.memory_space<vmem>>, vector<1x1x32xf32>
    %299 = vector.shape_cast %298 : vector<1x1x32xf32> to vector<1x32xf32>
    %300 = vector.broadcast %299 : vector<1x32xf32> to vector<16x32xf32>
    %301 = arith.addf %297, %300 : vector<16x32xf32>
    %302 = arith.addf %285, %301 : vector<16x32xf32>
    %c1_136 = arith.constant 1 : index
    %c0_137 = arith.constant 0 : index
    %c0_138 = arith.constant 0 : index
    %303 = vector.load %arg14[%c1_136, %c0_137, %c0_138] : memref<3x1x32xf32, #tpu.memory_space<vmem>>, vector<1x1x32xf32>
    %304 = vector.shape_cast %303 : vector<1x1x32xf32> to vector<1x32xf32>
    %c1_139 = arith.constant 1 : index
    %c0_140 = arith.constant 0 : index
    %c0_141 = arith.constant 0 : index
    %305 = vector.load %arg15[%c1_139, %c0_140, %c0_141] : memref<3x1x32xf32, #tpu.memory_space<vmem>>, vector<1x1x32xf32>
    %306 = vector.shape_cast %305 : vector<1x1x32xf32> to vector<1x32xf32>
    %cst_142 = arith.constant dense<0.000000e+00> : vector<16xf32>
    %307 = vector.multi_reduction <add>, %302, %cst_142 [1] : vector<16x32xf32> to vector<16xf32>
    %308 = vector.shape_cast %307 : vector<16xf32> to vector<16x1xf32>
    %cst_143 = arith.constant 3.200000e+01 : f32
    %309 = vector.broadcast %cst_143 : f32 to vector<16x1xf32>
    %310 = arith.divf %308, %309 : vector<16x1xf32>
    %311 = vector.broadcast %310 : vector<16x1xf32> to vector<16x32xf32>
    %312 = arith.subf %302, %311 : vector<16x32xf32>
    %313 = arith.mulf %312, %312 : vector<16x32xf32>
    %cst_144 = arith.constant dense<0.000000e+00> : vector<16xf32>
    %314 = vector.multi_reduction <add>, %313, %cst_144 [1] : vector<16x32xf32> to vector<16xf32>
    %315 = vector.shape_cast %314 : vector<16xf32> to vector<16x1xf32>
    %cst_145 = arith.constant 3.200000e+01 : f32
    %316 = vector.broadcast %cst_145 : f32 to vector<16x1xf32>
    %317 = arith.divf %315, %316 : vector<16x1xf32>
    %cst_146 = arith.constant 9.99999974E-6 : f32
    %318 = vector.broadcast %cst_146 : f32 to vector<16x1xf32>
    %319 = arith.addf %317, %318 : vector<16x1xf32>
    %320 = math.rsqrt %319 : vector<16x1xf32>
    %321 = vector.broadcast %320 : vector<16x1xf32> to vector<16x32xf32>
    %322 = arith.mulf %312, %321 : vector<16x32xf32>
    %323 = vector.broadcast %304 : vector<1x32xf32> to vector<16x32xf32>
    %324 = arith.mulf %322, %323 : vector<16x32xf32>
    %325 = vector.broadcast %306 : vector<1x32xf32> to vector<16x32xf32>
    %326 = arith.addf %324, %325 : vector<16x32xf32>
    %c0_147 = arith.constant 0 : index
    %c0_148 = arith.constant 0 : index
    %327 = vector.load %arg1[%c0_147, %c0_148] : memref<16x32xf32, #tpu.memory_space<vmem>>, vector<16x32xf32>
    %c0_149 = arith.constant 0 : index
    %c0_150 = arith.constant 0 : index
    %c0_151 = arith.constant 0 : index
    %328 = vector.load %arg16[%c0_149, %c0_150, %c0_151] : memref<3x32x96xf32, #tpu.memory_space<vmem>>, vector<1x32x96xf32>
    %329 = vector.shape_cast %328 : vector<1x32x96xf32> to vector<32x96xf32>
    %cst_152 = arith.constant dense<0.000000e+00> : vector<16x96xf32>
    %330 = tpu.matmul %327, %329, %cst_152 {dimension_numbers = #tpu.dot_dimension_numbers<[1], [0], [0], [1], [0, 0, 1, 1], [], []>} : vector<16x32xf32>, vector<32x96xf32>, vector<16x96xf32> -> vector<16x96xf32>
    %c0_153 = arith.constant 0 : index
    %c0_154 = arith.constant 0 : index
    %c0_155 = arith.constant 0 : index
    %331 = vector.load %arg17[%c0_153, %c0_154, %c0_155] : memref<3x1x96xf32, #tpu.memory_space<vmem>>, vector<1x1x96xf32>
    %332 = vector.shape_cast %331 : vector<1x1x96xf32> to vector<1x96xf32>
    %333 = vector.broadcast %332 : vector<1x96xf32> to vector<16x96xf32>
    %334 = arith.addf %330, %333 : vector<16x96xf32>
    %335 = vector.shape_cast %334 : vector<16x96xf32> to vector<2x8x96xf32>
    %336 = vector.extract_strided_slice %335 {offsets = [0, 0, 0], sizes = [2, 8, 32], strides = [1, 1, 1]} : vector<2x8x96xf32> to vector<2x8x32xf32>
    %337 = vector.extract_strided_slice %335 {offsets = [0, 0, 32], sizes = [2, 8, 32], strides = [1, 1, 1]} : vector<2x8x96xf32> to vector<2x8x32xf32>
    %338 = vector.extract_strided_slice %335 {offsets = [0, 0, 64], sizes = [2, 8, 32], strides = [1, 1, 1]} : vector<2x8x96xf32> to vector<2x8x32xf32>
    %339 = vector.extract_strided_slice %336 {offsets = [0, 0, 0], sizes = [2, 8, 8], strides = [1, 1, 1]} : vector<2x8x32xf32> to vector<2x8x8xf32>
    %340 = vector.extract_strided_slice %337 {offsets = [0, 0, 0], sizes = [2, 8, 8], strides = [1, 1, 1]} : vector<2x8x32xf32> to vector<2x8x8xf32>
    "tpu.trace_start"() <{level = 10 : i32, message = "bqd,bkd->bqk"}> : () -> ()
    %cst_156 = arith.constant dense<0.000000e+00> : vector<2x8x8xf32>
    %341 = tpu.matmul %339, %340, %cst_156 {dimension_numbers = #tpu.dot_dimension_numbers<[2], [2], [1], [1], [0, 0, 0, 1, 1, 1], [0], [0]>} : vector<2x8x8xf32>, vector<2x8x8xf32>, vector<2x8x8xf32> -> vector<2x8x8xf32>
    "tpu.trace_stop"() : () -> ()
    %cst_157 = arith.constant 0.353553385 : f32
    %342 = vector.broadcast %cst_157 : f32 to vector<2x8x8xf32>
    %343 = arith.mulf %341, %342 : vector<2x8x8xf32>
    %344 = arith.addf %343, %1 : vector<2x8x8xf32>
    %cst_158 = arith.constant dense<0xFF800000> : vector<2x8xf32>
    %345 = vector.multi_reduction <maximumf>, %344, %cst_158 [2] : vector<2x8x8xf32> to vector<2x8xf32>
    %346 = vector.shape_cast %345 : vector<2x8xf32> to vector<2x8x1xf32>
    %347 = vector.broadcast %346 : vector<2x8x1xf32> to vector<2x8x8xf32>
    %348 = arith.subf %344, %347 : vector<2x8x8xf32>
    %349 = math.exp %348 : vector<2x8x8xf32>
    %cst_159 = arith.constant dense<0.000000e+00> : vector<2x8xf32>
    %350 = vector.multi_reduction <add>, %349, %cst_159 [2] : vector<2x8x8xf32> to vector<2x8xf32>
    %351 = vector.shape_cast %350 : vector<2x8xf32> to vector<2x8x1xf32>
    %352 = tpu.reciprocal %351 {approx = true} : vector<2x8x1xf32> -> vector<2x8x1xf32>
    %353 = vector.broadcast %352 : vector<2x8x1xf32> to vector<2x8x8xf32>
    %354 = arith.mulf %349, %353 : vector<2x8x8xf32>
    %355 = vector.extract_strided_slice %338 {offsets = [0, 0, 0], sizes = [2, 8, 8], strides = [1, 1, 1]} : vector<2x8x32xf32> to vector<2x8x8xf32>
    "tpu.trace_start"() <{level = 10 : i32, message = "bqk,bkd->bqd"}> : () -> ()
    %cst_160 = arith.constant dense<0.000000e+00> : vector<2x8x8xf32>
    %356 = tpu.matmul %354, %355, %cst_160 {dimension_numbers = #tpu.dot_dimension_numbers<[2], [1], [1], [2], [0, 0, 0, 1, 1, 2], [0], [0]>} : vector<2x8x8xf32>, vector<2x8x8xf32>, vector<2x8x8xf32> -> vector<2x8x8xf32>
    "tpu.trace_stop"() : () -> ()
    %357 = vector.extract_strided_slice %336 {offsets = [0, 0, 8], sizes = [2, 8, 8], strides = [1, 1, 1]} : vector<2x8x32xf32> to vector<2x8x8xf32>
    %358 = vector.extract_strided_slice %337 {offsets = [0, 0, 8], sizes = [2, 8, 8], strides = [1, 1, 1]} : vector<2x8x32xf32> to vector<2x8x8xf32>
    "tpu.trace_start"() <{level = 10 : i32, message = "bqd,bkd->bqk"}> : () -> ()
    %cst_161 = arith.constant dense<0.000000e+00> : vector<2x8x8xf32>
    %359 = tpu.matmul %357, %358, %cst_161 {dimension_numbers = #tpu.dot_dimension_numbers<[2], [2], [1], [1], [0, 0, 0, 1, 1, 1], [0], [0]>} : vector<2x8x8xf32>, vector<2x8x8xf32>, vector<2x8x8xf32> -> vector<2x8x8xf32>
    "tpu.trace_stop"() : () -> ()
    %cst_162 = arith.constant 0.353553385 : f32
    %360 = vector.broadcast %cst_162 : f32 to vector<2x8x8xf32>
    %361 = arith.mulf %359, %360 : vector<2x8x8xf32>
    %362 = arith.addf %361, %1 : vector<2x8x8xf32>
    %cst_163 = arith.constant dense<0xFF800000> : vector<2x8xf32>
    %363 = vector.multi_reduction <maximumf>, %362, %cst_163 [2] : vector<2x8x8xf32> to vector<2x8xf32>
    %364 = vector.shape_cast %363 : vector<2x8xf32> to vector<2x8x1xf32>
    %365 = vector.broadcast %364 : vector<2x8x1xf32> to vector<2x8x8xf32>
    %366 = arith.subf %362, %365 : vector<2x8x8xf32>
    %367 = math.exp %366 : vector<2x8x8xf32>
    %cst_164 = arith.constant dense<0.000000e+00> : vector<2x8xf32>
    %368 = vector.multi_reduction <add>, %367, %cst_164 [2] : vector<2x8x8xf32> to vector<2x8xf32>
    %369 = vector.shape_cast %368 : vector<2x8xf32> to vector<2x8x1xf32>
    %370 = tpu.reciprocal %369 {approx = true} : vector<2x8x1xf32> -> vector<2x8x1xf32>
    %371 = vector.broadcast %370 : vector<2x8x1xf32> to vector<2x8x8xf32>
    %372 = arith.mulf %367, %371 : vector<2x8x8xf32>
    %373 = vector.extract_strided_slice %338 {offsets = [0, 0, 8], sizes = [2, 8, 8], strides = [1, 1, 1]} : vector<2x8x32xf32> to vector<2x8x8xf32>
    "tpu.trace_start"() <{level = 10 : i32, message = "bqk,bkd->bqd"}> : () -> ()
    %cst_165 = arith.constant dense<0.000000e+00> : vector<2x8x8xf32>
    %374 = tpu.matmul %372, %373, %cst_165 {dimension_numbers = #tpu.dot_dimension_numbers<[2], [1], [1], [2], [0, 0, 0, 1, 1, 2], [0], [0]>} : vector<2x8x8xf32>, vector<2x8x8xf32>, vector<2x8x8xf32> -> vector<2x8x8xf32>
    "tpu.trace_stop"() : () -> ()
    %375 = vector.extract_strided_slice %336 {offsets = [0, 0, 16], sizes = [2, 8, 8], strides = [1, 1, 1]} : vector<2x8x32xf32> to vector<2x8x8xf32>
    %376 = vector.extract_strided_slice %337 {offsets = [0, 0, 16], sizes = [2, 8, 8], strides = [1, 1, 1]} : vector<2x8x32xf32> to vector<2x8x8xf32>
    "tpu.trace_start"() <{level = 10 : i32, message = "bqd,bkd->bqk"}> : () -> ()
    %cst_166 = arith.constant dense<0.000000e+00> : vector<2x8x8xf32>
    %377 = tpu.matmul %375, %376, %cst_166 {dimension_numbers = #tpu.dot_dimension_numbers<[2], [2], [1], [1], [0, 0, 0, 1, 1, 1], [0], [0]>} : vector<2x8x8xf32>, vector<2x8x8xf32>, vector<2x8x8xf32> -> vector<2x8x8xf32>
    "tpu.trace_stop"() : () -> ()
    %cst_167 = arith.constant 0.353553385 : f32
    %378 = vector.broadcast %cst_167 : f32 to vector<2x8x8xf32>
    %379 = arith.mulf %377, %378 : vector<2x8x8xf32>
    %380 = arith.addf %379, %1 : vector<2x8x8xf32>
    %cst_168 = arith.constant dense<0xFF800000> : vector<2x8xf32>
    %381 = vector.multi_reduction <maximumf>, %380, %cst_168 [2] : vector<2x8x8xf32> to vector<2x8xf32>
    %382 = vector.shape_cast %381 : vector<2x8xf32> to vector<2x8x1xf32>
    %383 = vector.broadcast %382 : vector<2x8x1xf32> to vector<2x8x8xf32>
    %384 = arith.subf %380, %383 : vector<2x8x8xf32>
    %385 = math.exp %384 : vector<2x8x8xf32>
    %cst_169 = arith.constant dense<0.000000e+00> : vector<2x8xf32>
    %386 = vector.multi_reduction <add>, %385, %cst_169 [2] : vector<2x8x8xf32> to vector<2x8xf32>
    %387 = vector.shape_cast %386 : vector<2x8xf32> to vector<2x8x1xf32>
    %388 = tpu.reciprocal %387 {approx = true} : vector<2x8x1xf32> -> vector<2x8x1xf32>
    %389 = vector.broadcast %388 : vector<2x8x1xf32> to vector<2x8x8xf32>
    %390 = arith.mulf %385, %389 : vector<2x8x8xf32>
    %391 = vector.extract_strided_slice %338 {offsets = [0, 0, 16], sizes = [2, 8, 8], strides = [1, 1, 1]} : vector<2x8x32xf32> to vector<2x8x8xf32>
    "tpu.trace_start"() <{level = 10 : i32, message = "bqk,bkd->bqd"}> : () -> ()
    %cst_170 = arith.constant dense<0.000000e+00> : vector<2x8x8xf32>
    %392 = tpu.matmul %390, %391, %cst_170 {dimension_numbers = #tpu.dot_dimension_numbers<[2], [1], [1], [2], [0, 0, 0, 1, 1, 2], [0], [0]>} : vector<2x8x8xf32>, vector<2x8x8xf32>, vector<2x8x8xf32> -> vector<2x8x8xf32>
    "tpu.trace_stop"() : () -> ()
    %393 = vector.extract_strided_slice %336 {offsets = [0, 0, 24], sizes = [2, 8, 8], strides = [1, 1, 1]} : vector<2x8x32xf32> to vector<2x8x8xf32>
    %394 = vector.extract_strided_slice %337 {offsets = [0, 0, 24], sizes = [2, 8, 8], strides = [1, 1, 1]} : vector<2x8x32xf32> to vector<2x8x8xf32>
    "tpu.trace_start"() <{level = 10 : i32, message = "bqd,bkd->bqk"}> : () -> ()
    %cst_171 = arith.constant dense<0.000000e+00> : vector<2x8x8xf32>
    %395 = tpu.matmul %393, %394, %cst_171 {dimension_numbers = #tpu.dot_dimension_numbers<[2], [2], [1], [1], [0, 0, 0, 1, 1, 1], [0], [0]>} : vector<2x8x8xf32>, vector<2x8x8xf32>, vector<2x8x8xf32> -> vector<2x8x8xf32>
    "tpu.trace_stop"() : () -> ()
    %cst_172 = arith.constant 0.353553385 : f32
    %396 = vector.broadcast %cst_172 : f32 to vector<2x8x8xf32>
    %397 = arith.mulf %395, %396 : vector<2x8x8xf32>
    %398 = arith.addf %397, %1 : vector<2x8x8xf32>
    %cst_173 = arith.constant dense<0xFF800000> : vector<2x8xf32>
    %399 = vector.multi_reduction <maximumf>, %398, %cst_173 [2] : vector<2x8x8xf32> to vector<2x8xf32>
    %400 = vector.shape_cast %399 : vector<2x8xf32> to vector<2x8x1xf32>
    %401 = vector.broadcast %400 : vector<2x8x1xf32> to vector<2x8x8xf32>
    %402 = arith.subf %398, %401 : vector<2x8x8xf32>
    %403 = math.exp %402 : vector<2x8x8xf32>
    %cst_174 = arith.constant dense<0.000000e+00> : vector<2x8xf32>
    %404 = vector.multi_reduction <add>, %403, %cst_174 [2] : vector<2x8x8xf32> to vector<2x8xf32>
    %405 = vector.shape_cast %404 : vector<2x8xf32> to vector<2x8x1xf32>
    %406 = tpu.reciprocal %405 {approx = true} : vector<2x8x1xf32> -> vector<2x8x1xf32>
    %407 = vector.broadcast %406 : vector<2x8x1xf32> to vector<2x8x8xf32>
    %408 = arith.mulf %403, %407 : vector<2x8x8xf32>
    %409 = vector.extract_strided_slice %338 {offsets = [0, 0, 24], sizes = [2, 8, 8], strides = [1, 1, 1]} : vector<2x8x32xf32> to vector<2x8x8xf32>
    "tpu.trace_start"() <{level = 10 : i32, message = "bqk,bkd->bqd"}> : () -> ()
    %cst_175 = arith.constant dense<0.000000e+00> : vector<2x8x8xf32>
    %410 = tpu.matmul %408, %409, %cst_175 {dimension_numbers = #tpu.dot_dimension_numbers<[2], [1], [1], [2], [0, 0, 0, 1, 1, 2], [0], [0]>} : vector<2x8x8xf32>, vector<2x8x8xf32>, vector<2x8x8xf32> -> vector<2x8x8xf32>
    "tpu.trace_stop"() : () -> ()
    %411 = tpu.concatenate %356, %374, %392, %410 in 2 : vector<2x8x8xf32>, vector<2x8x8xf32>, vector<2x8x8xf32>, vector<2x8x8xf32> -> vector<2x8x32xf32>
    %412 = vector.shape_cast %411 : vector<2x8x32xf32> to vector<16x32xf32>
    %c0_176 = arith.constant 0 : index
    %c0_177 = arith.constant 0 : index
    %c0_178 = arith.constant 0 : index
    %413 = vector.load %arg18[%c0_176, %c0_177, %c0_178] : memref<3x32x32xf32, #tpu.memory_space<vmem>>, vector<1x32x32xf32>
    %414 = vector.shape_cast %413 : vector<1x32x32xf32> to vector<32x32xf32>
    %cst_179 = arith.constant dense<0.000000e+00> : vector<16x32xf32>
    %415 = tpu.matmul %412, %414, %cst_179 {dimension_numbers = #tpu.dot_dimension_numbers<[1], [0], [0], [1], [0, 0, 1, 1], [], []>} : vector<16x32xf32>, vector<32x32xf32>, vector<16x32xf32> -> vector<16x32xf32>
    %c0_180 = arith.constant 0 : index
    %c0_181 = arith.constant 0 : index
    %c0_182 = arith.constant 0 : index
    %416 = vector.load %arg19[%c0_180, %c0_181, %c0_182] : memref<3x1x32xf32, #tpu.memory_space<vmem>>, vector<1x1x32xf32>
    %417 = vector.shape_cast %416 : vector<1x1x32xf32> to vector<1x32xf32>
    %418 = vector.broadcast %417 : vector<1x32xf32> to vector<16x32xf32>
    %419 = arith.addf %415, %418 : vector<16x32xf32>
    %420 = arith.addf %327, %419 : vector<16x32xf32>
    %c0_183 = arith.constant 0 : index
    %c0_184 = arith.constant 0 : index
    %c0_185 = arith.constant 0 : index
    %421 = vector.load %arg30[%c0_183, %c0_184, %c0_185] : memref<3x1x32xf32, #tpu.memory_space<vmem>>, vector<1x1x32xf32>
    %422 = vector.shape_cast %421 : vector<1x1x32xf32> to vector<1x32xf32>
    %c0_186 = arith.constant 0 : index
    %c0_187 = arith.constant 0 : index
    %c0_188 = arith.constant 0 : index
    %423 = vector.load %arg31[%c0_186, %c0_187, %c0_188] : memref<3x1x32xf32, #tpu.memory_space<vmem>>, vector<1x1x32xf32>
    %424 = vector.shape_cast %423 : vector<1x1x32xf32> to vector<1x32xf32>
    %cst_189 = arith.constant dense<0.000000e+00> : vector<16xf32>
    %425 = vector.multi_reduction <add>, %420, %cst_189 [1] : vector<16x32xf32> to vector<16xf32>
    %426 = vector.shape_cast %425 : vector<16xf32> to vector<16x1xf32>
    %cst_190 = arith.constant 3.200000e+01 : f32
    %427 = vector.broadcast %cst_190 : f32 to vector<16x1xf32>
    %428 = arith.divf %426, %427 : vector<16x1xf32>
    %429 = vector.broadcast %428 : vector<16x1xf32> to vector<16x32xf32>
    %430 = arith.subf %420, %429 : vector<16x32xf32>
    %431 = arith.mulf %430, %430 : vector<16x32xf32>
    %cst_191 = arith.constant dense<0.000000e+00> : vector<16xf32>
    %432 = vector.multi_reduction <add>, %431, %cst_191 [1] : vector<16x32xf32> to vector<16xf32>
    %433 = vector.shape_cast %432 : vector<16xf32> to vector<16x1xf32>
    %cst_192 = arith.constant 3.200000e+01 : f32
    %434 = vector.broadcast %cst_192 : f32 to vector<16x1xf32>
    %435 = arith.divf %433, %434 : vector<16x1xf32>
    %cst_193 = arith.constant 9.99999974E-6 : f32
    %436 = vector.broadcast %cst_193 : f32 to vector<16x1xf32>
    %437 = arith.addf %435, %436 : vector<16x1xf32>
    %438 = math.rsqrt %437 : vector<16x1xf32>
    %439 = vector.broadcast %438 : vector<16x1xf32> to vector<16x32xf32>
    %440 = arith.mulf %430, %439 : vector<16x32xf32>
    %441 = vector.broadcast %422 : vector<1x32xf32> to vector<16x32xf32>
    %442 = arith.mulf %440, %441 : vector<16x32xf32>
    %443 = vector.broadcast %424 : vector<1x32xf32> to vector<16x32xf32>
    %444 = arith.addf %442, %443 : vector<16x32xf32>
    %c0_194 = arith.constant 0 : index
    %c0_195 = arith.constant 0 : index
    %c0_196 = arith.constant 0 : index
    %445 = vector.load %arg20[%c0_194, %c0_195, %c0_196] : memref<3x32x32xf32, #tpu.memory_space<vmem>>, vector<1x32x32xf32>
    %446 = vector.shape_cast %445 : vector<1x32x32xf32> to vector<32x32xf32>
    %cst_197 = arith.constant dense<0.000000e+00> : vector<16x32xf32>
    %447 = tpu.matmul %444, %446, %cst_197 {dimension_numbers = #tpu.dot_dimension_numbers<[1], [0], [0], [1], [0, 0, 1, 1], [], []>} : vector<16x32xf32>, vector<32x32xf32>, vector<16x32xf32> -> vector<16x32xf32>
    %c0_198 = arith.constant 0 : index
    %c0_199 = arith.constant 0 : index
    %c0_200 = arith.constant 0 : index
    %448 = vector.load %arg21[%c0_198, %c0_199, %c0_200] : memref<3x1x32xf32, #tpu.memory_space<vmem>>, vector<1x1x32xf32>
    %449 = vector.shape_cast %448 : vector<1x1x32xf32> to vector<1x32xf32>
    %450 = vector.broadcast %449 : vector<1x32xf32> to vector<16x32xf32>
    %451 = arith.addf %447, %450 : vector<16x32xf32>
    %452 = vector.shape_cast %451 : vector<16x32xf32> to vector<2x8x32xf32>
    %c0_201 = arith.constant 0 : index
    %c0_202 = arith.constant 0 : index
    %c0_203 = arith.constant 0 : index
    %453 = vector.load %arg22[%c0_201, %c0_202, %c0_203] : memref<3x32x64xf32, #tpu.memory_space<vmem>>, vector<1x32x64xf32>
    %454 = vector.shape_cast %453 : vector<1x32x64xf32> to vector<32x64xf32>
    %cst_204 = arith.constant dense<0.000000e+00> : vector<16x64xf32>
    %455 = tpu.matmul %164, %454, %cst_204 {dimension_numbers = #tpu.dot_dimension_numbers<[1], [0], [0], [1], [0, 0, 1, 1], [], []>} : vector<16x32xf32>, vector<32x64xf32>, vector<16x64xf32> -> vector<16x64xf32>
    %c0_205 = arith.constant 0 : index
    %c0_206 = arith.constant 0 : index
    %c0_207 = arith.constant 0 : index
    %456 = vector.load %arg23[%c0_205, %c0_206, %c0_207] : memref<3x1x64xf32, #tpu.memory_space<vmem>>, vector<1x1x64xf32>
    %457 = vector.shape_cast %456 : vector<1x1x64xf32> to vector<1x64xf32>
    %458 = vector.broadcast %457 : vector<1x64xf32> to vector<16x64xf32>
    %459 = arith.addf %455, %458 : vector<16x64xf32>
    %460 = vector.shape_cast %459 : vector<16x64xf32> to vector<2x8x64xf32>
    %461 = vector.extract_strided_slice %460 {offsets = [0, 0, 0], sizes = [2, 8, 32], strides = [1, 1, 1]} : vector<2x8x64xf32> to vector<2x8x32xf32>
    %462 = vector.extract_strided_slice %460 {offsets = [0, 0, 32], sizes = [2, 8, 32], strides = [1, 1, 1]} : vector<2x8x64xf32> to vector<2x8x32xf32>
    %463 = vector.extract_strided_slice %452 {offsets = [0, 0, 0], sizes = [2, 8, 8], strides = [1, 1, 1]} : vector<2x8x32xf32> to vector<2x8x8xf32>
    %464 = vector.extract_strided_slice %461 {offsets = [0, 0, 0], sizes = [2, 8, 8], strides = [1, 1, 1]} : vector<2x8x32xf32> to vector<2x8x8xf32>
    "tpu.trace_start"() <{level = 10 : i32, message = "bqd,bkd->bqk"}> : () -> ()
    %cst_208 = arith.constant dense<0.000000e+00> : vector<2x8x8xf32>
    %465 = tpu.matmul %463, %464, %cst_208 {dimension_numbers = #tpu.dot_dimension_numbers<[2], [2], [1], [1], [0, 0, 0, 1, 1, 1], [0], [0]>} : vector<2x8x8xf32>, vector<2x8x8xf32>, vector<2x8x8xf32> -> vector<2x8x8xf32>
    "tpu.trace_stop"() : () -> ()
    %cst_209 = arith.constant 0.353553385 : f32
    %466 = vector.broadcast %cst_209 : f32 to vector<2x8x8xf32>
    %467 = arith.mulf %465, %466 : vector<2x8x8xf32>
    %468 = vector.broadcast %0 : vector<2x1x8xf32> to vector<2x8x8xf32>
    %469 = arith.addf %467, %468 : vector<2x8x8xf32>
    %cst_210 = arith.constant dense<0xFF800000> : vector<2x8xf32>
    %470 = vector.multi_reduction <maximumf>, %469, %cst_210 [2] : vector<2x8x8xf32> to vector<2x8xf32>
    %471 = vector.shape_cast %470 : vector<2x8xf32> to vector<2x8x1xf32>
    %472 = vector.broadcast %471 : vector<2x8x1xf32> to vector<2x8x8xf32>
    %473 = arith.subf %469, %472 : vector<2x8x8xf32>
    %474 = math.exp %473 : vector<2x8x8xf32>
    %cst_211 = arith.constant dense<0.000000e+00> : vector<2x8xf32>
    %475 = vector.multi_reduction <add>, %474, %cst_211 [2] : vector<2x8x8xf32> to vector<2x8xf32>
    %476 = vector.shape_cast %475 : vector<2x8xf32> to vector<2x8x1xf32>
    %477 = tpu.reciprocal %476 {approx = true} : vector<2x8x1xf32> -> vector<2x8x1xf32>
    %478 = vector.broadcast %477 : vector<2x8x1xf32> to vector<2x8x8xf32>
    %479 = arith.mulf %474, %478 : vector<2x8x8xf32>
    %480 = vector.extract_strided_slice %462 {offsets = [0, 0, 0], sizes = [2, 8, 8], strides = [1, 1, 1]} : vector<2x8x32xf32> to vector<2x8x8xf32>
    "tpu.trace_start"() <{level = 10 : i32, message = "bqk,bkd->bqd"}> : () -> ()
    %cst_212 = arith.constant dense<0.000000e+00> : vector<2x8x8xf32>
    %481 = tpu.matmul %479, %480, %cst_212 {dimension_numbers = #tpu.dot_dimension_numbers<[2], [1], [1], [2], [0, 0, 0, 1, 1, 2], [0], [0]>} : vector<2x8x8xf32>, vector<2x8x8xf32>, vector<2x8x8xf32> -> vector<2x8x8xf32>
    "tpu.trace_stop"() : () -> ()
    %482 = vector.extract_strided_slice %452 {offsets = [0, 0, 8], sizes = [2, 8, 8], strides = [1, 1, 1]} : vector<2x8x32xf32> to vector<2x8x8xf32>
    %483 = vector.extract_strided_slice %461 {offsets = [0, 0, 8], sizes = [2, 8, 8], strides = [1, 1, 1]} : vector<2x8x32xf32> to vector<2x8x8xf32>
    "tpu.trace_start"() <{level = 10 : i32, message = "bqd,bkd->bqk"}> : () -> ()
    %cst_213 = arith.constant dense<0.000000e+00> : vector<2x8x8xf32>
    %484 = tpu.matmul %482, %483, %cst_213 {dimension_numbers = #tpu.dot_dimension_numbers<[2], [2], [1], [1], [0, 0, 0, 1, 1, 1], [0], [0]>} : vector<2x8x8xf32>, vector<2x8x8xf32>, vector<2x8x8xf32> -> vector<2x8x8xf32>
    "tpu.trace_stop"() : () -> ()
    %cst_214 = arith.constant 0.353553385 : f32
    %485 = vector.broadcast %cst_214 : f32 to vector<2x8x8xf32>
    %486 = arith.mulf %484, %485 : vector<2x8x8xf32>
    %487 = vector.broadcast %0 : vector<2x1x8xf32> to vector<2x8x8xf32>
    %488 = arith.addf %486, %487 : vector<2x8x8xf32>
    %cst_215 = arith.constant dense<0xFF800000> : vector<2x8xf32>
    %489 = vector.multi_reduction <maximumf>, %488, %cst_215 [2] : vector<2x8x8xf32> to vector<2x8xf32>
    %490 = vector.shape_cast %489 : vector<2x8xf32> to vector<2x8x1xf32>
    %491 = vector.broadcast %490 : vector<2x8x1xf32> to vector<2x8x8xf32>
    %492 = arith.subf %488, %491 : vector<2x8x8xf32>
    %493 = math.exp %492 : vector<2x8x8xf32>
    %cst_216 = arith.constant dense<0.000000e+00> : vector<2x8xf32>
    %494 = vector.multi_reduction <add>, %493, %cst_216 [2] : vector<2x8x8xf32> to vector<2x8xf32>
    %495 = vector.shape_cast %494 : vector<2x8xf32> to vector<2x8x1xf32>
    %496 = tpu.reciprocal %495 {approx = true} : vector<2x8x1xf32> -> vector<2x8x1xf32>
    %497 = vector.broadcast %496 : vector<2x8x1xf32> to vector<2x8x8xf32>
    %498 = arith.mulf %493, %497 : vector<2x8x8xf32>
    %499 = vector.extract_strided_slice %462 {offsets = [0, 0, 8], sizes = [2, 8, 8], strides = [1, 1, 1]} : vector<2x8x32xf32> to vector<2x8x8xf32>
    "tpu.trace_start"() <{level = 10 : i32, message = "bqk,bkd->bqd"}> : () -> ()
    %cst_217 = arith.constant dense<0.000000e+00> : vector<2x8x8xf32>
    %500 = tpu.matmul %498, %499, %cst_217 {dimension_numbers = #tpu.dot_dimension_numbers<[2], [1], [1], [2], [0, 0, 0, 1, 1, 2], [0], [0]>} : vector<2x8x8xf32>, vector<2x8x8xf32>, vector<2x8x8xf32> -> vector<2x8x8xf32>
    "tpu.trace_stop"() : () -> ()
    %501 = vector.extract_strided_slice %452 {offsets = [0, 0, 16], sizes = [2, 8, 8], strides = [1, 1, 1]} : vector<2x8x32xf32> to vector<2x8x8xf32>
    %502 = vector.extract_strided_slice %461 {offsets = [0, 0, 16], sizes = [2, 8, 8], strides = [1, 1, 1]} : vector<2x8x32xf32> to vector<2x8x8xf32>
    "tpu.trace_start"() <{level = 10 : i32, message = "bqd,bkd->bqk"}> : () -> ()
    %cst_218 = arith.constant dense<0.000000e+00> : vector<2x8x8xf32>
    %503 = tpu.matmul %501, %502, %cst_218 {dimension_numbers = #tpu.dot_dimension_numbers<[2], [2], [1], [1], [0, 0, 0, 1, 1, 1], [0], [0]>} : vector<2x8x8xf32>, vector<2x8x8xf32>, vector<2x8x8xf32> -> vector<2x8x8xf32>
    "tpu.trace_stop"() : () -> ()
    %cst_219 = arith.constant 0.353553385 : f32
    %504 = vector.broadcast %cst_219 : f32 to vector<2x8x8xf32>
    %505 = arith.mulf %503, %504 : vector<2x8x8xf32>
    %506 = vector.broadcast %0 : vector<2x1x8xf32> to vector<2x8x8xf32>
    %507 = arith.addf %505, %506 : vector<2x8x8xf32>
    %cst_220 = arith.constant dense<0xFF800000> : vector<2x8xf32>
    %508 = vector.multi_reduction <maximumf>, %507, %cst_220 [2] : vector<2x8x8xf32> to vector<2x8xf32>
    %509 = vector.shape_cast %508 : vector<2x8xf32> to vector<2x8x1xf32>
    %510 = vector.broadcast %509 : vector<2x8x1xf32> to vector<2x8x8xf32>
    %511 = arith.subf %507, %510 : vector<2x8x8xf32>
    %512 = math.exp %511 : vector<2x8x8xf32>
    %cst_221 = arith.constant dense<0.000000e+00> : vector<2x8xf32>
    %513 = vector.multi_reduction <add>, %512, %cst_221 [2] : vector<2x8x8xf32> to vector<2x8xf32>
    %514 = vector.shape_cast %513 : vector<2x8xf32> to vector<2x8x1xf32>
    %515 = tpu.reciprocal %514 {approx = true} : vector<2x8x1xf32> -> vector<2x8x1xf32>
    %516 = vector.broadcast %515 : vector<2x8x1xf32> to vector<2x8x8xf32>
    %517 = arith.mulf %512, %516 : vector<2x8x8xf32>
    %518 = vector.extract_strided_slice %462 {offsets = [0, 0, 16], sizes = [2, 8, 8], strides = [1, 1, 1]} : vector<2x8x32xf32> to vector<2x8x8xf32>
    "tpu.trace_start"() <{level = 10 : i32, message = "bqk,bkd->bqd"}> : () -> ()
    %cst_222 = arith.constant dense<0.000000e+00> : vector<2x8x8xf32>
    %519 = tpu.matmul %517, %518, %cst_222 {dimension_numbers = #tpu.dot_dimension_numbers<[2], [1], [1], [2], [0, 0, 0, 1, 1, 2], [0], [0]>} : vector<2x8x8xf32>, vector<2x8x8xf32>, vector<2x8x8xf32> -> vector<2x8x8xf32>
    "tpu.trace_stop"() : () -> ()
    %520 = vector.extract_strided_slice %452 {offsets = [0, 0, 24], sizes = [2, 8, 8], strides = [1, 1, 1]} : vector<2x8x32xf32> to vector<2x8x8xf32>
    %521 = vector.extract_strided_slice %461 {offsets = [0, 0, 24], sizes = [2, 8, 8], strides = [1, 1, 1]} : vector<2x8x32xf32> to vector<2x8x8xf32>
    "tpu.trace_start"() <{level = 10 : i32, message = "bqd,bkd->bqk"}> : () -> ()
    %cst_223 = arith.constant dense<0.000000e+00> : vector<2x8x8xf32>
    %522 = tpu.matmul %520, %521, %cst_223 {dimension_numbers = #tpu.dot_dimension_numbers<[2], [2], [1], [1], [0, 0, 0, 1, 1, 1], [0], [0]>} : vector<2x8x8xf32>, vector<2x8x8xf32>, vector<2x8x8xf32> -> vector<2x8x8xf32>
    "tpu.trace_stop"() : () -> ()
    %cst_224 = arith.constant 0.353553385 : f32
    %523 = vector.broadcast %cst_224 : f32 to vector<2x8x8xf32>
    %524 = arith.mulf %522, %523 : vector<2x8x8xf32>
    %525 = vector.broadcast %0 : vector<2x1x8xf32> to vector<2x8x8xf32>
    %526 = arith.addf %524, %525 : vector<2x8x8xf32>
    %cst_225 = arith.constant dense<0xFF800000> : vector<2x8xf32>
    %527 = vector.multi_reduction <maximumf>, %526, %cst_225 [2] : vector<2x8x8xf32> to vector<2x8xf32>
    %528 = vector.shape_cast %527 : vector<2x8xf32> to vector<2x8x1xf32>
    %529 = vector.broadcast %528 : vector<2x8x1xf32> to vector<2x8x8xf32>
    %530 = arith.subf %526, %529 : vector<2x8x8xf32>
    %531 = math.exp %530 : vector<2x8x8xf32>
    %cst_226 = arith.constant dense<0.000000e+00> : vector<2x8xf32>
    %532 = vector.multi_reduction <add>, %531, %cst_226 [2] : vector<2x8x8xf32> to vector<2x8xf32>
    %533 = vector.shape_cast %532 : vector<2x8xf32> to vector<2x8x1xf32>
    %534 = tpu.reciprocal %533 {approx = true} : vector<2x8x1xf32> -> vector<2x8x1xf32>
    %535 = vector.broadcast %534 : vector<2x8x1xf32> to vector<2x8x8xf32>
    %536 = arith.mulf %531, %535 : vector<2x8x8xf32>
    %537 = vector.extract_strided_slice %462 {offsets = [0, 0, 24], sizes = [2, 8, 8], strides = [1, 1, 1]} : vector<2x8x32xf32> to vector<2x8x8xf32>
    "tpu.trace_start"() <{level = 10 : i32, message = "bqk,bkd->bqd"}> : () -> ()
    %cst_227 = arith.constant dense<0.000000e+00> : vector<2x8x8xf32>
    %538 = tpu.matmul %536, %537, %cst_227 {dimension_numbers = #tpu.dot_dimension_numbers<[2], [1], [1], [2], [0, 0, 0, 1, 1, 2], [0], [0]>} : vector<2x8x8xf32>, vector<2x8x8xf32>, vector<2x8x8xf32> -> vector<2x8x8xf32>
    "tpu.trace_stop"() : () -> ()
    %539 = tpu.concatenate %481, %500, %519, %538 in 2 : vector<2x8x8xf32>, vector<2x8x8xf32>, vector<2x8x8xf32>, vector<2x8x8xf32> -> vector<2x8x32xf32>
    %540 = vector.shape_cast %539 : vector<2x8x32xf32> to vector<16x32xf32>
    %c0_228 = arith.constant 0 : index
    %c0_229 = arith.constant 0 : index
    %c0_230 = arith.constant 0 : index
    %541 = vector.load %arg24[%c0_228, %c0_229, %c0_230] : memref<3x32x32xf32, #tpu.memory_space<vmem>>, vector<1x32x32xf32>
    %542 = vector.shape_cast %541 : vector<1x32x32xf32> to vector<32x32xf32>
    %cst_231 = arith.constant dense<0.000000e+00> : vector<16x32xf32>
    %543 = tpu.matmul %540, %542, %cst_231 {dimension_numbers = #tpu.dot_dimension_numbers<[1], [0], [0], [1], [0, 0, 1, 1], [], []>} : vector<16x32xf32>, vector<32x32xf32>, vector<16x32xf32> -> vector<16x32xf32>
    %c0_232 = arith.constant 0 : index
    %c0_233 = arith.constant 0 : index
    %c0_234 = arith.constant 0 : index
    %544 = vector.load %arg25[%c0_232, %c0_233, %c0_234] : memref<3x1x32xf32, #tpu.memory_space<vmem>>, vector<1x1x32xf32>
    %545 = vector.shape_cast %544 : vector<1x1x32xf32> to vector<1x32xf32>
    %546 = vector.broadcast %545 : vector<1x32xf32> to vector<16x32xf32>
    %547 = arith.addf %543, %546 : vector<16x32xf32>
    %548 = arith.addf %444, %547 : vector<16x32xf32>
    %c0_235 = arith.constant 0 : index
    %c0_236 = arith.constant 0 : index
    %c0_237 = arith.constant 0 : index
    %549 = vector.load %arg32[%c0_235, %c0_236, %c0_237] : memref<3x1x32xf32, #tpu.memory_space<vmem>>, vector<1x1x32xf32>
    %550 = vector.shape_cast %549 : vector<1x1x32xf32> to vector<1x32xf32>
    %c0_238 = arith.constant 0 : index
    %c0_239 = arith.constant 0 : index
    %c0_240 = arith.constant 0 : index
    %551 = vector.load %arg33[%c0_238, %c0_239, %c0_240] : memref<3x1x32xf32, #tpu.memory_space<vmem>>, vector<1x1x32xf32>
    %552 = vector.shape_cast %551 : vector<1x1x32xf32> to vector<1x32xf32>
    %cst_241 = arith.constant dense<0.000000e+00> : vector<16xf32>
    %553 = vector.multi_reduction <add>, %548, %cst_241 [1] : vector<16x32xf32> to vector<16xf32>
    %554 = vector.shape_cast %553 : vector<16xf32> to vector<16x1xf32>
    %cst_242 = arith.constant 3.200000e+01 : f32
    %555 = vector.broadcast %cst_242 : f32 to vector<16x1xf32>
    %556 = arith.divf %554, %555 : vector<16x1xf32>
    %557 = vector.broadcast %556 : vector<16x1xf32> to vector<16x32xf32>
    %558 = arith.subf %548, %557 : vector<16x32xf32>
    %559 = arith.mulf %558, %558 : vector<16x32xf32>
    %cst_243 = arith.constant dense<0.000000e+00> : vector<16xf32>
    %560 = vector.multi_reduction <add>, %559, %cst_243 [1] : vector<16x32xf32> to vector<16xf32>
    %561 = vector.shape_cast %560 : vector<16xf32> to vector<16x1xf32>
    %cst_244 = arith.constant 3.200000e+01 : f32
    %562 = vector.broadcast %cst_244 : f32 to vector<16x1xf32>
    %563 = arith.divf %561, %562 : vector<16x1xf32>
    %cst_245 = arith.constant 9.99999974E-6 : f32
    %564 = vector.broadcast %cst_245 : f32 to vector<16x1xf32>
    %565 = arith.addf %563, %564 : vector<16x1xf32>
    %566 = math.rsqrt %565 : vector<16x1xf32>
    %567 = vector.broadcast %566 : vector<16x1xf32> to vector<16x32xf32>
    %568 = arith.mulf %558, %567 : vector<16x32xf32>
    %569 = vector.broadcast %550 : vector<1x32xf32> to vector<16x32xf32>
    %570 = arith.mulf %568, %569 : vector<16x32xf32>
    %571 = vector.broadcast %552 : vector<1x32xf32> to vector<16x32xf32>
    %572 = arith.addf %570, %571 : vector<16x32xf32>
    %c0_246 = arith.constant 0 : index
    %c0_247 = arith.constant 0 : index
    %c0_248 = arith.constant 0 : index
    %573 = vector.load %arg26[%c0_246, %c0_247, %c0_248] : memref<3x32x64xf32, #tpu.memory_space<vmem>>, vector<1x32x64xf32>
    %574 = vector.shape_cast %573 : vector<1x32x64xf32> to vector<32x64xf32>
    %cst_249 = arith.constant dense<0.000000e+00> : vector<16x64xf32>
    %575 = tpu.matmul %572, %574, %cst_249 {dimension_numbers = #tpu.dot_dimension_numbers<[1], [0], [0], [1], [0, 0, 1, 1], [], []>} : vector<16x32xf32>, vector<32x64xf32>, vector<16x64xf32> -> vector<16x64xf32>
    %c0_250 = arith.constant 0 : index
    %c0_251 = arith.constant 0 : index
    %c0_252 = arith.constant 0 : index
    %576 = vector.load %arg27[%c0_250, %c0_251, %c0_252] : memref<3x1x64xf32, #tpu.memory_space<vmem>>, vector<1x1x64xf32>
    %577 = vector.shape_cast %576 : vector<1x1x64xf32> to vector<1x64xf32>
    %578 = vector.broadcast %577 : vector<1x64xf32> to vector<16x64xf32>
    %579 = arith.addf %575, %578 : vector<16x64xf32>
    %cst_253 = arith.constant 0.000000e+00 : f32
    %580 = vector.broadcast %cst_253 : f32 to vector<16x64xf32>
    %581 = arith.maximumf %579, %580 : vector<16x64xf32>
    %c0_254 = arith.constant 0 : index
    %c0_255 = arith.constant 0 : index
    %c0_256 = arith.constant 0 : index
    %582 = vector.load %arg28[%c0_254, %c0_255, %c0_256] : memref<3x64x32xf32, #tpu.memory_space<vmem>>, vector<1x64x32xf32>
    %583 = vector.shape_cast %582 : vector<1x64x32xf32> to vector<64x32xf32>
    %cst_257 = arith.constant dense<0.000000e+00> : vector<16x32xf32>
    %584 = tpu.matmul %581, %583, %cst_257 {dimension_numbers = #tpu.dot_dimension_numbers<[1], [0], [0], [1], [0, 0, 1, 1], [], []>} : vector<16x64xf32>, vector<64x32xf32>, vector<16x32xf32> -> vector<16x32xf32>
    %c0_258 = arith.constant 0 : index
    %c0_259 = arith.constant 0 : index
    %c0_260 = arith.constant 0 : index
    %585 = vector.load %arg29[%c0_258, %c0_259, %c0_260] : memref<3x1x32xf32, #tpu.memory_space<vmem>>, vector<1x1x32xf32>
    %586 = vector.shape_cast %585 : vector<1x1x32xf32> to vector<1x32xf32>
    %587 = vector.broadcast %586 : vector<1x32xf32> to vector<16x32xf32>
    %588 = arith.addf %584, %587 : vector<16x32xf32>
    %589 = arith.addf %572, %588 : vector<16x32xf32>
    %c0_261 = arith.constant 0 : index
    %c0_262 = arith.constant 0 : index
    %c0_263 = arith.constant 0 : index
    %590 = vector.load %arg34[%c0_261, %c0_262, %c0_263] : memref<3x1x32xf32, #tpu.memory_space<vmem>>, vector<1x1x32xf32>
    %591 = vector.shape_cast %590 : vector<1x1x32xf32> to vector<1x32xf32>
    %c0_264 = arith.constant 0 : index
    %c0_265 = arith.constant 0 : index
    %c0_266 = arith.constant 0 : index
    %592 = vector.load %arg35[%c0_264, %c0_265, %c0_266] : memref<3x1x32xf32, #tpu.memory_space<vmem>>, vector<1x1x32xf32>
    %593 = vector.shape_cast %592 : vector<1x1x32xf32> to vector<1x32xf32>
    %cst_267 = arith.constant dense<0.000000e+00> : vector<16xf32>
    %594 = vector.multi_reduction <add>, %589, %cst_267 [1] : vector<16x32xf32> to vector<16xf32>
    %595 = vector.shape_cast %594 : vector<16xf32> to vector<16x1xf32>
    %cst_268 = arith.constant 3.200000e+01 : f32
    %596 = vector.broadcast %cst_268 : f32 to vector<16x1xf32>
    %597 = arith.divf %595, %596 : vector<16x1xf32>
    %598 = vector.broadcast %597 : vector<16x1xf32> to vector<16x32xf32>
    %599 = arith.subf %589, %598 : vector<16x32xf32>
    %600 = arith.mulf %599, %599 : vector<16x32xf32>
    %cst_269 = arith.constant dense<0.000000e+00> : vector<16xf32>
    %601 = vector.multi_reduction <add>, %600, %cst_269 [1] : vector<16x32xf32> to vector<16xf32>
    %602 = vector.shape_cast %601 : vector<16xf32> to vector<16x1xf32>
    %cst_270 = arith.constant 3.200000e+01 : f32
    %603 = vector.broadcast %cst_270 : f32 to vector<16x1xf32>
    %604 = arith.divf %602, %603 : vector<16x1xf32>
    %cst_271 = arith.constant 9.99999974E-6 : f32
    %605 = vector.broadcast %cst_271 : f32 to vector<16x1xf32>
    %606 = arith.addf %604, %605 : vector<16x1xf32>
    %607 = math.rsqrt %606 : vector<16x1xf32>
    %608 = vector.broadcast %607 : vector<16x1xf32> to vector<16x32xf32>
    %609 = arith.mulf %599, %608 : vector<16x32xf32>
    %610 = vector.broadcast %591 : vector<1x32xf32> to vector<16x32xf32>
    %611 = arith.mulf %609, %610 : vector<16x32xf32>
    %612 = vector.broadcast %593 : vector<1x32xf32> to vector<16x32xf32>
    %613 = arith.addf %611, %612 : vector<16x32xf32>
    %c1_272 = arith.constant 1 : index
    %c0_273 = arith.constant 0 : index
    %c0_274 = arith.constant 0 : index
    %614 = vector.load %arg16[%c1_272, %c0_273, %c0_274] : memref<3x32x96xf32, #tpu.memory_space<vmem>>, vector<1x32x96xf32>
    %615 = vector.shape_cast %614 : vector<1x32x96xf32> to vector<32x96xf32>
    %cst_275 = arith.constant dense<0.000000e+00> : vector<16x96xf32>
    %616 = tpu.matmul %613, %615, %cst_275 {dimension_numbers = #tpu.dot_dimension_numbers<[1], [0], [0], [1], [0, 0, 1, 1], [], []>} : vector<16x32xf32>, vector<32x96xf32>, vector<16x96xf32> -> vector<16x96xf32>
    %c1_276 = arith.constant 1 : index
    %c0_277 = arith.constant 0 : index
    %c0_278 = arith.constant 0 : index
    %617 = vector.load %arg17[%c1_276, %c0_277, %c0_278] : memref<3x1x96xf32, #tpu.memory_space<vmem>>, vector<1x1x96xf32>
    %618 = vector.shape_cast %617 : vector<1x1x96xf32> to vector<1x96xf32>
    %619 = vector.broadcast %618 : vector<1x96xf32> to vector<16x96xf32>
    %620 = arith.addf %616, %619 : vector<16x96xf32>
    %621 = vector.shape_cast %620 : vector<16x96xf32> to vector<2x8x96xf32>
    %622 = vector.extract_strided_slice %621 {offsets = [0, 0, 0], sizes = [2, 8, 32], strides = [1, 1, 1]} : vector<2x8x96xf32> to vector<2x8x32xf32>
    %623 = vector.extract_strided_slice %621 {offsets = [0, 0, 32], sizes = [2, 8, 32], strides = [1, 1, 1]} : vector<2x8x96xf32> to vector<2x8x32xf32>
    %624 = vector.extract_strided_slice %621 {offsets = [0, 0, 64], sizes = [2, 8, 32], strides = [1, 1, 1]} : vector<2x8x96xf32> to vector<2x8x32xf32>
    %625 = vector.extract_strided_slice %622 {offsets = [0, 0, 0], sizes = [2, 8, 8], strides = [1, 1, 1]} : vector<2x8x32xf32> to vector<2x8x8xf32>
    %626 = vector.extract_strided_slice %623 {offsets = [0, 0, 0], sizes = [2, 8, 8], strides = [1, 1, 1]} : vector<2x8x32xf32> to vector<2x8x8xf32>
    "tpu.trace_start"() <{level = 10 : i32, message = "bqd,bkd->bqk"}> : () -> ()
    %cst_279 = arith.constant dense<0.000000e+00> : vector<2x8x8xf32>
    %627 = tpu.matmul %625, %626, %cst_279 {dimension_numbers = #tpu.dot_dimension_numbers<[2], [2], [1], [1], [0, 0, 0, 1, 1, 1], [0], [0]>} : vector<2x8x8xf32>, vector<2x8x8xf32>, vector<2x8x8xf32> -> vector<2x8x8xf32>
    "tpu.trace_stop"() : () -> ()
    %cst_280 = arith.constant 0.353553385 : f32
    %628 = vector.broadcast %cst_280 : f32 to vector<2x8x8xf32>
    %629 = arith.mulf %627, %628 : vector<2x8x8xf32>
    %630 = arith.addf %629, %1 : vector<2x8x8xf32>
    %cst_281 = arith.constant dense<0xFF800000> : vector<2x8xf32>
    %631 = vector.multi_reduction <maximumf>, %630, %cst_281 [2] : vector<2x8x8xf32> to vector<2x8xf32>
    %632 = vector.shape_cast %631 : vector<2x8xf32> to vector<2x8x1xf32>
    %633 = vector.broadcast %632 : vector<2x8x1xf32> to vector<2x8x8xf32>
    %634 = arith.subf %630, %633 : vector<2x8x8xf32>
    %635 = math.exp %634 : vector<2x8x8xf32>
    %cst_282 = arith.constant dense<0.000000e+00> : vector<2x8xf32>
    %636 = vector.multi_reduction <add>, %635, %cst_282 [2] : vector<2x8x8xf32> to vector<2x8xf32>
    %637 = vector.shape_cast %636 : vector<2x8xf32> to vector<2x8x1xf32>
    %638 = tpu.reciprocal %637 {approx = true} : vector<2x8x1xf32> -> vector<2x8x1xf32>
    %639 = vector.broadcast %638 : vector<2x8x1xf32> to vector<2x8x8xf32>
    %640 = arith.mulf %635, %639 : vector<2x8x8xf32>
    %641 = vector.extract_strided_slice %624 {offsets = [0, 0, 0], sizes = [2, 8, 8], strides = [1, 1, 1]} : vector<2x8x32xf32> to vector<2x8x8xf32>
    "tpu.trace_start"() <{level = 10 : i32, message = "bqk,bkd->bqd"}> : () -> ()
    %cst_283 = arith.constant dense<0.000000e+00> : vector<2x8x8xf32>
    %642 = tpu.matmul %640, %641, %cst_283 {dimension_numbers = #tpu.dot_dimension_numbers<[2], [1], [1], [2], [0, 0, 0, 1, 1, 2], [0], [0]>} : vector<2x8x8xf32>, vector<2x8x8xf32>, vector<2x8x8xf32> -> vector<2x8x8xf32>
    "tpu.trace_stop"() : () -> ()
    %643 = vector.extract_strided_slice %622 {offsets = [0, 0, 8], sizes = [2, 8, 8], strides = [1, 1, 1]} : vector<2x8x32xf32> to vector<2x8x8xf32>
    %644 = vector.extract_strided_slice %623 {offsets = [0, 0, 8], sizes = [2, 8, 8], strides = [1, 1, 1]} : vector<2x8x32xf32> to vector<2x8x8xf32>
    "tpu.trace_start"() <{level = 10 : i32, message = "bqd,bkd->bqk"}> : () -> ()
    %cst_284 = arith.constant dense<0.000000e+00> : vector<2x8x8xf32>
    %645 = tpu.matmul %643, %644, %cst_284 {dimension_numbers = #tpu.dot_dimension_numbers<[2], [2], [1], [1], [0, 0, 0, 1, 1, 1], [0], [0]>} : vector<2x8x8xf32>, vector<2x8x8xf32>, vector<2x8x8xf32> -> vector<2x8x8xf32>
    "tpu.trace_stop"() : () -> ()
    %cst_285 = arith.constant 0.353553385 : f32
    %646 = vector.broadcast %cst_285 : f32 to vector<2x8x8xf32>
    %647 = arith.mulf %645, %646 : vector<2x8x8xf32>
    %648 = arith.addf %647, %1 : vector<2x8x8xf32>
    %cst_286 = arith.constant dense<0xFF800000> : vector<2x8xf32>
    %649 = vector.multi_reduction <maximumf>, %648, %cst_286 [2] : vector<2x8x8xf32> to vector<2x8xf32>
    %650 = vector.shape_cast %649 : vector<2x8xf32> to vector<2x8x1xf32>
    %651 = vector.broadcast %650 : vector<2x8x1xf32> to vector<2x8x8xf32>
    %652 = arith.subf %648, %651 : vector<2x8x8xf32>
    %653 = math.exp %652 : vector<2x8x8xf32>
    %cst_287 = arith.constant dense<0.000000e+00> : vector<2x8xf32>
    %654 = vector.multi_reduction <add>, %653, %cst_287 [2] : vector<2x8x8xf32> to vector<2x8xf32>
    %655 = vector.shape_cast %654 : vector<2x8xf32> to vector<2x8x1xf32>
    %656 = tpu.reciprocal %655 {approx = true} : vector<2x8x1xf32> -> vector<2x8x1xf32>
    %657 = vector.broadcast %656 : vector<2x8x1xf32> to vector<2x8x8xf32>
    %658 = arith.mulf %653, %657 : vector<2x8x8xf32>
    %659 = vector.extract_strided_slice %624 {offsets = [0, 0, 8], sizes = [2, 8, 8], strides = [1, 1, 1]} : vector<2x8x32xf32> to vector<2x8x8xf32>
    "tpu.trace_start"() <{level = 10 : i32, message = "bqk,bkd->bqd"}> : () -> ()
    %cst_288 = arith.constant dense<0.000000e+00> : vector<2x8x8xf32>
    %660 = tpu.matmul %658, %659, %cst_288 {dimension_numbers = #tpu.dot_dimension_numbers<[2], [1], [1], [2], [0, 0, 0, 1, 1, 2], [0], [0]>} : vector<2x8x8xf32>, vector<2x8x8xf32>, vector<2x8x8xf32> -> vector<2x8x8xf32>
    "tpu.trace_stop"() : () -> ()
    %661 = vector.extract_strided_slice %622 {offsets = [0, 0, 16], sizes = [2, 8, 8], strides = [1, 1, 1]} : vector<2x8x32xf32> to vector<2x8x8xf32>
    %662 = vector.extract_strided_slice %623 {offsets = [0, 0, 16], sizes = [2, 8, 8], strides = [1, 1, 1]} : vector<2x8x32xf32> to vector<2x8x8xf32>
    "tpu.trace_start"() <{level = 10 : i32, message = "bqd,bkd->bqk"}> : () -> ()
    %cst_289 = arith.constant dense<0.000000e+00> : vector<2x8x8xf32>
    %663 = tpu.matmul %661, %662, %cst_289 {dimension_numbers = #tpu.dot_dimension_numbers<[2], [2], [1], [1], [0, 0, 0, 1, 1, 1], [0], [0]>} : vector<2x8x8xf32>, vector<2x8x8xf32>, vector<2x8x8xf32> -> vector<2x8x8xf32>
    "tpu.trace_stop"() : () -> ()
    %cst_290 = arith.constant 0.353553385 : f32
    %664 = vector.broadcast %cst_290 : f32 to vector<2x8x8xf32>
    %665 = arith.mulf %663, %664 : vector<2x8x8xf32>
    %666 = arith.addf %665, %1 : vector<2x8x8xf32>
    %cst_291 = arith.constant dense<0xFF800000> : vector<2x8xf32>
    %667 = vector.multi_reduction <maximumf>, %666, %cst_291 [2] : vector<2x8x8xf32> to vector<2x8xf32>
    %668 = vector.shape_cast %667 : vector<2x8xf32> to vector<2x8x1xf32>
    %669 = vector.broadcast %668 : vector<2x8x1xf32> to vector<2x8x8xf32>
    %670 = arith.subf %666, %669 : vector<2x8x8xf32>
    %671 = math.exp %670 : vector<2x8x8xf32>
    %cst_292 = arith.constant dense<0.000000e+00> : vector<2x8xf32>
    %672 = vector.multi_reduction <add>, %671, %cst_292 [2] : vector<2x8x8xf32> to vector<2x8xf32>
    %673 = vector.shape_cast %672 : vector<2x8xf32> to vector<2x8x1xf32>
    %674 = tpu.reciprocal %673 {approx = true} : vector<2x8x1xf32> -> vector<2x8x1xf32>
    %675 = vector.broadcast %674 : vector<2x8x1xf32> to vector<2x8x8xf32>
    %676 = arith.mulf %671, %675 : vector<2x8x8xf32>
    %677 = vector.extract_strided_slice %624 {offsets = [0, 0, 16], sizes = [2, 8, 8], strides = [1, 1, 1]} : vector<2x8x32xf32> to vector<2x8x8xf32>
    "tpu.trace_start"() <{level = 10 : i32, message = "bqk,bkd->bqd"}> : () -> ()
    %cst_293 = arith.constant dense<0.000000e+00> : vector<2x8x8xf32>
    %678 = tpu.matmul %676, %677, %cst_293 {dimension_numbers = #tpu.dot_dimension_numbers<[2], [1], [1], [2], [0, 0, 0, 1, 1, 2], [0], [0]>} : vector<2x8x8xf32>, vector<2x8x8xf32>, vector<2x8x8xf32> -> vector<2x8x8xf32>
    "tpu.trace_stop"() : () -> ()
    %679 = vector.extract_strided_slice %622 {offsets = [0, 0, 24], sizes = [2, 8, 8], strides = [1, 1, 1]} : vector<2x8x32xf32> to vector<2x8x8xf32>
    %680 = vector.extract_strided_slice %623 {offsets = [0, 0, 24], sizes = [2, 8, 8], strides = [1, 1, 1]} : vector<2x8x32xf32> to vector<2x8x8xf32>
    "tpu.trace_start"() <{level = 10 : i32, message = "bqd,bkd->bqk"}> : () -> ()
    %cst_294 = arith.constant dense<0.000000e+00> : vector<2x8x8xf32>
    %681 = tpu.matmul %679, %680, %cst_294 {dimension_numbers = #tpu.dot_dimension_numbers<[2], [2], [1], [1], [0, 0, 0, 1, 1, 1], [0], [0]>} : vector<2x8x8xf32>, vector<2x8x8xf32>, vector<2x8x8xf32> -> vector<2x8x8xf32>
    "tpu.trace_stop"() : () -> ()
    %cst_295 = arith.constant 0.353553385 : f32
    %682 = vector.broadcast %cst_295 : f32 to vector<2x8x8xf32>
    %683 = arith.mulf %681, %682 : vector<2x8x8xf32>
    %684 = arith.addf %683, %1 : vector<2x8x8xf32>
    %cst_296 = arith.constant dense<0xFF800000> : vector<2x8xf32>
    %685 = vector.multi_reduction <maximumf>, %684, %cst_296 [2] : vector<2x8x8xf32> to vector<2x8xf32>
    %686 = vector.shape_cast %685 : vector<2x8xf32> to vector<2x8x1xf32>
    %687 = vector.broadcast %686 : vector<2x8x1xf32> to vector<2x8x8xf32>
    %688 = arith.subf %684, %687 : vector<2x8x8xf32>
    %689 = math.exp %688 : vector<2x8x8xf32>
    %cst_297 = arith.constant dense<0.000000e+00> : vector<2x8xf32>
    %690 = vector.multi_reduction <add>, %689, %cst_297 [2] : vector<2x8x8xf32> to vector<2x8xf32>
    %691 = vector.shape_cast %690 : vector<2x8xf32> to vector<2x8x1xf32>
    %692 = tpu.reciprocal %691 {approx = true} : vector<2x8x1xf32> -> vector<2x8x1xf32>
    %693 = vector.broadcast %692 : vector<2x8x1xf32> to vector<2x8x8xf32>
    %694 = arith.mulf %689, %693 : vector<2x8x8xf32>
    %695 = vector.extract_strided_slice %624 {offsets = [0, 0, 24], sizes = [2, 8, 8], strides = [1, 1, 1]} : vector<2x8x32xf32> to vector<2x8x8xf32>
    "tpu.trace_start"() <{level = 10 : i32, message = "bqk,bkd->bqd"}> : () -> ()
    %cst_298 = arith.constant dense<0.000000e+00> : vector<2x8x8xf32>
    %696 = tpu.matmul %694, %695, %cst_298 {dimension_numbers = #tpu.dot_dimension_numbers<[2], [1], [1], [2], [0, 0, 0, 1, 1, 2], [0], [0]>} : vector<2x8x8xf32>, vector<2x8x8xf32>, vector<2x8x8xf32> -> vector<2x8x8xf32>
    "tpu.trace_stop"() : () -> ()
    %697 = tpu.concatenate %642, %660, %678, %696 in 2 : vector<2x8x8xf32>, vector<2x8x8xf32>, vector<2x8x8xf32>, vector<2x8x8xf32> -> vector<2x8x32xf32>
    %698 = vector.shape_cast %697 : vector<2x8x32xf32> to vector<16x32xf32>
    %c1_299 = arith.constant 1 : index
    %c0_300 = arith.constant 0 : index
    %c0_301 = arith.constant 0 : index
    %699 = vector.load %arg18[%c1_299, %c0_300, %c0_301] : memref<3x32x32xf32, #tpu.memory_space<vmem>>, vector<1x32x32xf32>
    %700 = vector.shape_cast %699 : vector<1x32x32xf32> to vector<32x32xf32>
    %cst_302 = arith.constant dense<0.000000e+00> : vector<16x32xf32>
    %701 = tpu.matmul %698, %700, %cst_302 {dimension_numbers = #tpu.dot_dimension_numbers<[1], [0], [0], [1], [0, 0, 1, 1], [], []>} : vector<16x32xf32>, vector<32x32xf32>, vector<16x32xf32> -> vector<16x32xf32>
    %c1_303 = arith.constant 1 : index
    %c0_304 = arith.constant 0 : index
    %c0_305 = arith.constant 0 : index
    %702 = vector.load %arg19[%c1_303, %c0_304, %c0_305] : memref<3x1x32xf32, #tpu.memory_space<vmem>>, vector<1x1x32xf32>
    %703 = vector.shape_cast %702 : vector<1x1x32xf32> to vector<1x32xf32>
    %704 = vector.broadcast %703 : vector<1x32xf32> to vector<16x32xf32>
    %705 = arith.addf %701, %704 : vector<16x32xf32>
    %706 = arith.addf %613, %705 : vector<16x32xf32>
    %c1_306 = arith.constant 1 : index
    %c0_307 = arith.constant 0 : index
    %c0_308 = arith.constant 0 : index
    %707 = vector.load %arg30[%c1_306, %c0_307, %c0_308] : memref<3x1x32xf32, #tpu.memory_space<vmem>>, vector<1x1x32xf32>
    %708 = vector.shape_cast %707 : vector<1x1x32xf32> to vector<1x32xf32>
    %c1_309 = arith.constant 1 : index
    %c0_310 = arith.constant 0 : index
    %c0_311 = arith.constant 0 : index
    %709 = vector.load %arg31[%c1_309, %c0_310, %c0_311] : memref<3x1x32xf32, #tpu.memory_space<vmem>>, vector<1x1x32xf32>
    %710 = vector.shape_cast %709 : vector<1x1x32xf32> to vector<1x32xf32>
    %cst_312 = arith.constant dense<0.000000e+00> : vector<16xf32>
    %711 = vector.multi_reduction <add>, %706, %cst_312 [1] : vector<16x32xf32> to vector<16xf32>
    %712 = vector.shape_cast %711 : vector<16xf32> to vector<16x1xf32>
    %cst_313 = arith.constant 3.200000e+01 : f32
    %713 = vector.broadcast %cst_313 : f32 to vector<16x1xf32>
    %714 = arith.divf %712, %713 : vector<16x1xf32>
    %715 = vector.broadcast %714 : vector<16x1xf32> to vector<16x32xf32>
    %716 = arith.subf %706, %715 : vector<16x32xf32>
    %717 = arith.mulf %716, %716 : vector<16x32xf32>
    %cst_314 = arith.constant dense<0.000000e+00> : vector<16xf32>
    %718 = vector.multi_reduction <add>, %717, %cst_314 [1] : vector<16x32xf32> to vector<16xf32>
    %719 = vector.shape_cast %718 : vector<16xf32> to vector<16x1xf32>
    %cst_315 = arith.constant 3.200000e+01 : f32
    %720 = vector.broadcast %cst_315 : f32 to vector<16x1xf32>
    %721 = arith.divf %719, %720 : vector<16x1xf32>
    %cst_316 = arith.constant 9.99999974E-6 : f32
    %722 = vector.broadcast %cst_316 : f32 to vector<16x1xf32>
    %723 = arith.addf %721, %722 : vector<16x1xf32>
    %724 = math.rsqrt %723 : vector<16x1xf32>
    %725 = vector.broadcast %724 : vector<16x1xf32> to vector<16x32xf32>
    %726 = arith.mulf %716, %725 : vector<16x32xf32>
    %727 = vector.broadcast %708 : vector<1x32xf32> to vector<16x32xf32>
    %728 = arith.mulf %726, %727 : vector<16x32xf32>
    %729 = vector.broadcast %710 : vector<1x32xf32> to vector<16x32xf32>
    %730 = arith.addf %728, %729 : vector<16x32xf32>
    %c1_317 = arith.constant 1 : index
    %c0_318 = arith.constant 0 : index
    %c0_319 = arith.constant 0 : index
    %731 = vector.load %arg20[%c1_317, %c0_318, %c0_319] : memref<3x32x32xf32, #tpu.memory_space<vmem>>, vector<1x32x32xf32>
    %732 = vector.shape_cast %731 : vector<1x32x32xf32> to vector<32x32xf32>
    %cst_320 = arith.constant dense<0.000000e+00> : vector<16x32xf32>
    %733 = tpu.matmul %730, %732, %cst_320 {dimension_numbers = #tpu.dot_dimension_numbers<[1], [0], [0], [1], [0, 0, 1, 1], [], []>} : vector<16x32xf32>, vector<32x32xf32>, vector<16x32xf32> -> vector<16x32xf32>
    %c1_321 = arith.constant 1 : index
    %c0_322 = arith.constant 0 : index
    %c0_323 = arith.constant 0 : index
    %734 = vector.load %arg21[%c1_321, %c0_322, %c0_323] : memref<3x1x32xf32, #tpu.memory_space<vmem>>, vector<1x1x32xf32>
    %735 = vector.shape_cast %734 : vector<1x1x32xf32> to vector<1x32xf32>
    %736 = vector.broadcast %735 : vector<1x32xf32> to vector<16x32xf32>
    %737 = arith.addf %733, %736 : vector<16x32xf32>
    %738 = vector.shape_cast %737 : vector<16x32xf32> to vector<2x8x32xf32>
    %c1_324 = arith.constant 1 : index
    %c0_325 = arith.constant 0 : index
    %c0_326 = arith.constant 0 : index
    %739 = vector.load %arg22[%c1_324, %c0_325, %c0_326] : memref<3x32x64xf32, #tpu.memory_space<vmem>>, vector<1x32x64xf32>
    %740 = vector.shape_cast %739 : vector<1x32x64xf32> to vector<32x64xf32>
    %cst_327 = arith.constant dense<0.000000e+00> : vector<16x64xf32>
    %741 = tpu.matmul %164, %740, %cst_327 {dimension_numbers = #tpu.dot_dimension_numbers<[1], [0], [0], [1], [0, 0, 1, 1], [], []>} : vector<16x32xf32>, vector<32x64xf32>, vector<16x64xf32> -> vector<16x64xf32>
    %c1_328 = arith.constant 1 : index
    %c0_329 = arith.constant 0 : index
    %c0_330 = arith.constant 0 : index
    %742 = vector.load %arg23[%c1_328, %c0_329, %c0_330] : memref<3x1x64xf32, #tpu.memory_space<vmem>>, vector<1x1x64xf32>
    %743 = vector.shape_cast %742 : vector<1x1x64xf32> to vector<1x64xf32>
    %744 = vector.broadcast %743 : vector<1x64xf32> to vector<16x64xf32>
    %745 = arith.addf %741, %744 : vector<16x64xf32>
    %746 = vector.shape_cast %745 : vector<16x64xf32> to vector<2x8x64xf32>
    %747 = vector.extract_strided_slice %746 {offsets = [0, 0, 0], sizes = [2, 8, 32], strides = [1, 1, 1]} : vector<2x8x64xf32> to vector<2x8x32xf32>
    %748 = vector.extract_strided_slice %746 {offsets = [0, 0, 32], sizes = [2, 8, 32], strides = [1, 1, 1]} : vector<2x8x64xf32> to vector<2x8x32xf32>
    %749 = vector.extract_strided_slice %738 {offsets = [0, 0, 0], sizes = [2, 8, 8], strides = [1, 1, 1]} : vector<2x8x32xf32> to vector<2x8x8xf32>
    %750 = vector.extract_strided_slice %747 {offsets = [0, 0, 0], sizes = [2, 8, 8], strides = [1, 1, 1]} : vector<2x8x32xf32> to vector<2x8x8xf32>
    "tpu.trace_start"() <{level = 10 : i32, message = "bqd,bkd->bqk"}> : () -> ()
    %cst_331 = arith.constant dense<0.000000e+00> : vector<2x8x8xf32>
    %751 = tpu.matmul %749, %750, %cst_331 {dimension_numbers = #tpu.dot_dimension_numbers<[2], [2], [1], [1], [0, 0, 0, 1, 1, 1], [0], [0]>} : vector<2x8x8xf32>, vector<2x8x8xf32>, vector<2x8x8xf32> -> vector<2x8x8xf32>
    "tpu.trace_stop"() : () -> ()
    %cst_332 = arith.constant 0.353553385 : f32
    %752 = vector.broadcast %cst_332 : f32 to vector<2x8x8xf32>
    %753 = arith.mulf %751, %752 : vector<2x8x8xf32>
    %754 = vector.broadcast %0 : vector<2x1x8xf32> to vector<2x8x8xf32>
    %755 = arith.addf %753, %754 : vector<2x8x8xf32>
    %cst_333 = arith.constant dense<0xFF800000> : vector<2x8xf32>
    %756 = vector.multi_reduction <maximumf>, %755, %cst_333 [2] : vector<2x8x8xf32> to vector<2x8xf32>
    %757 = vector.shape_cast %756 : vector<2x8xf32> to vector<2x8x1xf32>
    %758 = vector.broadcast %757 : vector<2x8x1xf32> to vector<2x8x8xf32>
    %759 = arith.subf %755, %758 : vector<2x8x8xf32>
    %760 = math.exp %759 : vector<2x8x8xf32>
    %cst_334 = arith.constant dense<0.000000e+00> : vector<2x8xf32>
    %761 = vector.multi_reduction <add>, %760, %cst_334 [2] : vector<2x8x8xf32> to vector<2x8xf32>
    %762 = vector.shape_cast %761 : vector<2x8xf32> to vector<2x8x1xf32>
    %763 = tpu.reciprocal %762 {approx = true} : vector<2x8x1xf32> -> vector<2x8x1xf32>
    %764 = vector.broadcast %763 : vector<2x8x1xf32> to vector<2x8x8xf32>
    %765 = arith.mulf %760, %764 : vector<2x8x8xf32>
    %766 = vector.extract_strided_slice %748 {offsets = [0, 0, 0], sizes = [2, 8, 8], strides = [1, 1, 1]} : vector<2x8x32xf32> to vector<2x8x8xf32>
    "tpu.trace_start"() <{level = 10 : i32, message = "bqk,bkd->bqd"}> : () -> ()
    %cst_335 = arith.constant dense<0.000000e+00> : vector<2x8x8xf32>
    %767 = tpu.matmul %765, %766, %cst_335 {dimension_numbers = #tpu.dot_dimension_numbers<[2], [1], [1], [2], [0, 0, 0, 1, 1, 2], [0], [0]>} : vector<2x8x8xf32>, vector<2x8x8xf32>, vector<2x8x8xf32> -> vector<2x8x8xf32>
    "tpu.trace_stop"() : () -> ()
    %768 = vector.extract_strided_slice %738 {offsets = [0, 0, 8], sizes = [2, 8, 8], strides = [1, 1, 1]} : vector<2x8x32xf32> to vector<2x8x8xf32>
    %769 = vector.extract_strided_slice %747 {offsets = [0, 0, 8], sizes = [2, 8, 8], strides = [1, 1, 1]} : vector<2x8x32xf32> to vector<2x8x8xf32>
    "tpu.trace_start"() <{level = 10 : i32, message = "bqd,bkd->bqk"}> : () -> ()
    %cst_336 = arith.constant dense<0.000000e+00> : vector<2x8x8xf32>
    %770 = tpu.matmul %768, %769, %cst_336 {dimension_numbers = #tpu.dot_dimension_numbers<[2], [2], [1], [1], [0, 0, 0, 1, 1, 1], [0], [0]>} : vector<2x8x8xf32>, vector<2x8x8xf32>, vector<2x8x8xf32> -> vector<2x8x8xf32>
    "tpu.trace_stop"() : () -> ()
    %cst_337 = arith.constant 0.353553385 : f32
    %771 = vector.broadcast %cst_337 : f32 to vector<2x8x8xf32>
    %772 = arith.mulf %770, %771 : vector<2x8x8xf32>
    %773 = vector.broadcast %0 : vector<2x1x8xf32> to vector<2x8x8xf32>
    %774 = arith.addf %772, %773 : vector<2x8x8xf32>
    %cst_338 = arith.constant dense<0xFF800000> : vector<2x8xf32>
    %775 = vector.multi_reduction <maximumf>, %774, %cst_338 [2] : vector<2x8x8xf32> to vector<2x8xf32>
    %776 = vector.shape_cast %775 : vector<2x8xf32> to vector<2x8x1xf32>
    %777 = vector.broadcast %776 : vector<2x8x1xf32> to vector<2x8x8xf32>
    %778 = arith.subf %774, %777 : vector<2x8x8xf32>
    %779 = math.exp %778 : vector<2x8x8xf32>
    %cst_339 = arith.constant dense<0.000000e+00> : vector<2x8xf32>
    %780 = vector.multi_reduction <add>, %779, %cst_339 [2] : vector<2x8x8xf32> to vector<2x8xf32>
    %781 = vector.shape_cast %780 : vector<2x8xf32> to vector<2x8x1xf32>
    %782 = tpu.reciprocal %781 {approx = true} : vector<2x8x1xf32> -> vector<2x8x1xf32>
    %783 = vector.broadcast %782 : vector<2x8x1xf32> to vector<2x8x8xf32>
    %784 = arith.mulf %779, %783 : vector<2x8x8xf32>
    %785 = vector.extract_strided_slice %748 {offsets = [0, 0, 8], sizes = [2, 8, 8], strides = [1, 1, 1]} : vector<2x8x32xf32> to vector<2x8x8xf32>
    "tpu.trace_start"() <{level = 10 : i32, message = "bqk,bkd->bqd"}> : () -> ()
    %cst_340 = arith.constant dense<0.000000e+00> : vector<2x8x8xf32>
    %786 = tpu.matmul %784, %785, %cst_340 {dimension_numbers = #tpu.dot_dimension_numbers<[2], [1], [1], [2], [0, 0, 0, 1, 1, 2], [0], [0]>} : vector<2x8x8xf32>, vector<2x8x8xf32>, vector<2x8x8xf32> -> vector<2x8x8xf32>
    "tpu.trace_stop"() : () -> ()
    %787 = vector.extract_strided_slice %738 {offsets = [0, 0, 16], sizes = [2, 8, 8], strides = [1, 1, 1]} : vector<2x8x32xf32> to vector<2x8x8xf32>
    %788 = vector.extract_strided_slice %747 {offsets = [0, 0, 16], sizes = [2, 8, 8], strides = [1, 1, 1]} : vector<2x8x32xf32> to vector<2x8x8xf32>
    "tpu.trace_start"() <{level = 10 : i32, message = "bqd,bkd->bqk"}> : () -> ()
    %cst_341 = arith.constant dense<0.000000e+00> : vector<2x8x8xf32>
    %789 = tpu.matmul %787, %788, %cst_341 {dimension_numbers = #tpu.dot_dimension_numbers<[2], [2], [1], [1], [0, 0, 0, 1, 1, 1], [0], [0]>} : vector<2x8x8xf32>, vector<2x8x8xf32>, vector<2x8x8xf32> -> vector<2x8x8xf32>
    "tpu.trace_stop"() : () -> ()
    %cst_342 = arith.constant 0.353553385 : f32
    %790 = vector.broadcast %cst_342 : f32 to vector<2x8x8xf32>
    %791 = arith.mulf %789, %790 : vector<2x8x8xf32>
    %792 = vector.broadcast %0 : vector<2x1x8xf32> to vector<2x8x8xf32>
    %793 = arith.addf %791, %792 : vector<2x8x8xf32>
    %cst_343 = arith.constant dense<0xFF800000> : vector<2x8xf32>
    %794 = vector.multi_reduction <maximumf>, %793, %cst_343 [2] : vector<2x8x8xf32> to vector<2x8xf32>
    %795 = vector.shape_cast %794 : vector<2x8xf32> to vector<2x8x1xf32>
    %796 = vector.broadcast %795 : vector<2x8x1xf32> to vector<2x8x8xf32>
    %797 = arith.subf %793, %796 : vector<2x8x8xf32>
    %798 = math.exp %797 : vector<2x8x8xf32>
    %cst_344 = arith.constant dense<0.000000e+00> : vector<2x8xf32>
    %799 = vector.multi_reduction <add>, %798, %cst_344 [2] : vector<2x8x8xf32> to vector<2x8xf32>
    %800 = vector.shape_cast %799 : vector<2x8xf32> to vector<2x8x1xf32>
    %801 = tpu.reciprocal %800 {approx = true} : vector<2x8x1xf32> -> vector<2x8x1xf32>
    %802 = vector.broadcast %801 : vector<2x8x1xf32> to vector<2x8x8xf32>
    %803 = arith.mulf %798, %802 : vector<2x8x8xf32>
    %804 = vector.extract_strided_slice %748 {offsets = [0, 0, 16], sizes = [2, 8, 8], strides = [1, 1, 1]} : vector<2x8x32xf32> to vector<2x8x8xf32>
    "tpu.trace_start"() <{level = 10 : i32, message = "bqk,bkd->bqd"}> : () -> ()
    %cst_345 = arith.constant dense<0.000000e+00> : vector<2x8x8xf32>
    %805 = tpu.matmul %803, %804, %cst_345 {dimension_numbers = #tpu.dot_dimension_numbers<[2], [1], [1], [2], [0, 0, 0, 1, 1, 2], [0], [0]>} : vector<2x8x8xf32>, vector<2x8x8xf32>, vector<2x8x8xf32> -> vector<2x8x8xf32>
    "tpu.trace_stop"() : () -> ()
    %806 = vector.extract_strided_slice %738 {offsets = [0, 0, 24], sizes = [2, 8, 8], strides = [1, 1, 1]} : vector<2x8x32xf32> to vector<2x8x8xf32>
    %807 = vector.extract_strided_slice %747 {offsets = [0, 0, 24], sizes = [2, 8, 8], strides = [1, 1, 1]} : vector<2x8x32xf32> to vector<2x8x8xf32>
    "tpu.trace_start"() <{level = 10 : i32, message = "bqd,bkd->bqk"}> : () -> ()
    %cst_346 = arith.constant dense<0.000000e+00> : vector<2x8x8xf32>
    %808 = tpu.matmul %806, %807, %cst_346 {dimension_numbers = #tpu.dot_dimension_numbers<[2], [2], [1], [1], [0, 0, 0, 1, 1, 1], [0], [0]>} : vector<2x8x8xf32>, vector<2x8x8xf32>, vector<2x8x8xf32> -> vector<2x8x8xf32>
    "tpu.trace_stop"() : () -> ()
    %cst_347 = arith.constant 0.353553385 : f32
    %809 = vector.broadcast %cst_347 : f32 to vector<2x8x8xf32>
    %810 = arith.mulf %808, %809 : vector<2x8x8xf32>
    %811 = vector.broadcast %0 : vector<2x1x8xf32> to vector<2x8x8xf32>
    %812 = arith.addf %810, %811 : vector<2x8x8xf32>
    %cst_348 = arith.constant dense<0xFF800000> : vector<2x8xf32>
    %813 = vector.multi_reduction <maximumf>, %812, %cst_348 [2] : vector<2x8x8xf32> to vector<2x8xf32>
    %814 = vector.shape_cast %813 : vector<2x8xf32> to vector<2x8x1xf32>
    %815 = vector.broadcast %814 : vector<2x8x1xf32> to vector<2x8x8xf32>
    %816 = arith.subf %812, %815 : vector<2x8x8xf32>
    %817 = math.exp %816 : vector<2x8x8xf32>
    %cst_349 = arith.constant dense<0.000000e+00> : vector<2x8xf32>
    %818 = vector.multi_reduction <add>, %817, %cst_349 [2] : vector<2x8x8xf32> to vector<2x8xf32>
    %819 = vector.shape_cast %818 : vector<2x8xf32> to vector<2x8x1xf32>
    %820 = tpu.reciprocal %819 {approx = true} : vector<2x8x1xf32> -> vector<2x8x1xf32>
    %821 = vector.broadcast %820 : vector<2x8x1xf32> to vector<2x8x8xf32>
    %822 = arith.mulf %817, %821 : vector<2x8x8xf32>
    %823 = vector.extract_strided_slice %748 {offsets = [0, 0, 24], sizes = [2, 8, 8], strides = [1, 1, 1]} : vector<2x8x32xf32> to vector<2x8x8xf32>
    "tpu.trace_start"() <{level = 10 : i32, message = "bqk,bkd->bqd"}> : () -> ()
    %cst_350 = arith.constant dense<0.000000e+00> : vector<2x8x8xf32>
    %824 = tpu.matmul %822, %823, %cst_350 {dimension_numbers = #tpu.dot_dimension_numbers<[2], [1], [1], [2], [0, 0, 0, 1, 1, 2], [0], [0]>} : vector<2x8x8xf32>, vector<2x8x8xf32>, vector<2x8x8xf32> -> vector<2x8x8xf32>
    "tpu.trace_stop"() : () -> ()
    %825 = tpu.concatenate %767, %786, %805, %824 in 2 : vector<2x8x8xf32>, vector<2x8x8xf32>, vector<2x8x8xf32>, vector<2x8x8xf32> -> vector<2x8x32xf32>
    %826 = vector.shape_cast %825 : vector<2x8x32xf32> to vector<16x32xf32>
    %c1_351 = arith.constant 1 : index
    %c0_352 = arith.constant 0 : index
    %c0_353 = arith.constant 0 : index
    %827 = vector.load %arg24[%c1_351, %c0_352, %c0_353] : memref<3x32x32xf32, #tpu.memory_space<vmem>>, vector<1x32x32xf32>
    %828 = vector.shape_cast %827 : vector<1x32x32xf32> to vector<32x32xf32>
    %cst_354 = arith.constant dense<0.000000e+00> : vector<16x32xf32>
    %829 = tpu.matmul %826, %828, %cst_354 {dimension_numbers = #tpu.dot_dimension_numbers<[1], [0], [0], [1], [0, 0, 1, 1], [], []>} : vector<16x32xf32>, vector<32x32xf32>, vector<16x32xf32> -> vector<16x32xf32>
    %c1_355 = arith.constant 1 : index
    %c0_356 = arith.constant 0 : index
    %c0_357 = arith.constant 0 : index
    %830 = vector.load %arg25[%c1_355, %c0_356, %c0_357] : memref<3x1x32xf32, #tpu.memory_space<vmem>>, vector<1x1x32xf32>
    %831 = vector.shape_cast %830 : vector<1x1x32xf32> to vector<1x32xf32>
    %832 = vector.broadcast %831 : vector<1x32xf32> to vector<16x32xf32>
    %833 = arith.addf %829, %832 : vector<16x32xf32>
    %834 = arith.addf %730, %833 : vector<16x32xf32>
    %c1_358 = arith.constant 1 : index
    %c0_359 = arith.constant 0 : index
    %c0_360 = arith.constant 0 : index
    %835 = vector.load %arg32[%c1_358, %c0_359, %c0_360] : memref<3x1x32xf32, #tpu.memory_space<vmem>>, vector<1x1x32xf32>
    %836 = vector.shape_cast %835 : vector<1x1x32xf32> to vector<1x32xf32>
    %c1_361 = arith.constant 1 : index
    %c0_362 = arith.constant 0 : index
    %c0_363 = arith.constant 0 : index
    %837 = vector.load %arg33[%c1_361, %c0_362, %c0_363] : memref<3x1x32xf32, #tpu.memory_space<vmem>>, vector<1x1x32xf32>
    %838 = vector.shape_cast %837 : vector<1x1x32xf32> to vector<1x32xf32>
    %cst_364 = arith.constant dense<0.000000e+00> : vector<16xf32>
    %839 = vector.multi_reduction <add>, %834, %cst_364 [1] : vector<16x32xf32> to vector<16xf32>
    %840 = vector.shape_cast %839 : vector<16xf32> to vector<16x1xf32>
    %cst_365 = arith.constant 3.200000e+01 : f32
    %841 = vector.broadcast %cst_365 : f32 to vector<16x1xf32>
    %842 = arith.divf %840, %841 : vector<16x1xf32>
    %843 = vector.broadcast %842 : vector<16x1xf32> to vector<16x32xf32>
    %844 = arith.subf %834, %843 : vector<16x32xf32>
    %845 = arith.mulf %844, %844 : vector<16x32xf32>
    %cst_366 = arith.constant dense<0.000000e+00> : vector<16xf32>
    %846 = vector.multi_reduction <add>, %845, %cst_366 [1] : vector<16x32xf32> to vector<16xf32>
    %847 = vector.shape_cast %846 : vector<16xf32> to vector<16x1xf32>
    %cst_367 = arith.constant 3.200000e+01 : f32
    %848 = vector.broadcast %cst_367 : f32 to vector<16x1xf32>
    %849 = arith.divf %847, %848 : vector<16x1xf32>
    %cst_368 = arith.constant 9.99999974E-6 : f32
    %850 = vector.broadcast %cst_368 : f32 to vector<16x1xf32>
    %851 = arith.addf %849, %850 : vector<16x1xf32>
    %852 = math.rsqrt %851 : vector<16x1xf32>
    %853 = vector.broadcast %852 : vector<16x1xf32> to vector<16x32xf32>
    %854 = arith.mulf %844, %853 : vector<16x32xf32>
    %855 = vector.broadcast %836 : vector<1x32xf32> to vector<16x32xf32>
    %856 = arith.mulf %854, %855 : vector<16x32xf32>
    %857 = vector.broadcast %838 : vector<1x32xf32> to vector<16x32xf32>
    %858 = arith.addf %856, %857 : vector<16x32xf32>
    %c1_369 = arith.constant 1 : index
    %c0_370 = arith.constant 0 : index
    %c0_371 = arith.constant 0 : index
    %859 = vector.load %arg26[%c1_369, %c0_370, %c0_371] : memref<3x32x64xf32, #tpu.memory_space<vmem>>, vector<1x32x64xf32>
    %860 = vector.shape_cast %859 : vector<1x32x64xf32> to vector<32x64xf32>
    %cst_372 = arith.constant dense<0.000000e+00> : vector<16x64xf32>
    %861 = tpu.matmul %858, %860, %cst_372 {dimension_numbers = #tpu.dot_dimension_numbers<[1], [0], [0], [1], [0, 0, 1, 1], [], []>} : vector<16x32xf32>, vector<32x64xf32>, vector<16x64xf32> -> vector<16x64xf32>
    %c1_373 = arith.constant 1 : index
    %c0_374 = arith.constant 0 : index
    %c0_375 = arith.constant 0 : index
    %862 = vector.load %arg27[%c1_373, %c0_374, %c0_375] : memref<3x1x64xf32, #tpu.memory_space<vmem>>, vector<1x1x64xf32>
    %863 = vector.shape_cast %862 : vector<1x1x64xf32> to vector<1x64xf32>
    %864 = vector.broadcast %863 : vector<1x64xf32> to vector<16x64xf32>
    %865 = arith.addf %861, %864 : vector<16x64xf32>
    %cst_376 = arith.constant 0.000000e+00 : f32
    %866 = vector.broadcast %cst_376 : f32 to vector<16x64xf32>
    %867 = arith.maximumf %865, %866 : vector<16x64xf32>
    %c1_377 = arith.constant 1 : index
    %c0_378 = arith.constant 0 : index
    %c0_379 = arith.constant 0 : index
    %868 = vector.load %arg28[%c1_377, %c0_378, %c0_379] : memref<3x64x32xf32, #tpu.memory_space<vmem>>, vector<1x64x32xf32>
    %869 = vector.shape_cast %868 : vector<1x64x32xf32> to vector<64x32xf32>
    %cst_380 = arith.constant dense<0.000000e+00> : vector<16x32xf32>
    %870 = tpu.matmul %867, %869, %cst_380 {dimension_numbers = #tpu.dot_dimension_numbers<[1], [0], [0], [1], [0, 0, 1, 1], [], []>} : vector<16x64xf32>, vector<64x32xf32>, vector<16x32xf32> -> vector<16x32xf32>
    %c1_381 = arith.constant 1 : index
    %c0_382 = arith.constant 0 : index
    %c0_383 = arith.constant 0 : index
    %871 = vector.load %arg29[%c1_381, %c0_382, %c0_383] : memref<3x1x32xf32, #tpu.memory_space<vmem>>, vector<1x1x32xf32>
    %872 = vector.shape_cast %871 : vector<1x1x32xf32> to vector<1x32xf32>
    %873 = vector.broadcast %872 : vector<1x32xf32> to vector<16x32xf32>
    %874 = arith.addf %870, %873 : vector<16x32xf32>
    %875 = arith.addf %858, %874 : vector<16x32xf32>
    %c1_384 = arith.constant 1 : index
    %c0_385 = arith.constant 0 : index
    %c0_386 = arith.constant 0 : index
    %876 = vector.load %arg34[%c1_384, %c0_385, %c0_386] : memref<3x1x32xf32, #tpu.memory_space<vmem>>, vector<1x1x32xf32>
    %877 = vector.shape_cast %876 : vector<1x1x32xf32> to vector<1x32xf32>
    %c1_387 = arith.constant 1 : index
    %c0_388 = arith.constant 0 : index
    %c0_389 = arith.constant 0 : index
    %878 = vector.load %arg35[%c1_387, %c0_388, %c0_389] : memref<3x1x32xf32, #tpu.memory_space<vmem>>, vector<1x1x32xf32>
    %879 = vector.shape_cast %878 : vector<1x1x32xf32> to vector<1x32xf32>
    %cst_390 = arith.constant dense<0.000000e+00> : vector<16xf32>
    %880 = vector.multi_reduction <add>, %875, %cst_390 [1] : vector<16x32xf32> to vector<16xf32>
    %881 = vector.shape_cast %880 : vector<16xf32> to vector<16x1xf32>
    %cst_391 = arith.constant 3.200000e+01 : f32
    %882 = vector.broadcast %cst_391 : f32 to vector<16x1xf32>
    %883 = arith.divf %881, %882 : vector<16x1xf32>
    %884 = vector.broadcast %883 : vector<16x1xf32> to vector<16x32xf32>
    %885 = arith.subf %875, %884 : vector<16x32xf32>
    %886 = arith.mulf %885, %885 : vector<16x32xf32>
    %cst_392 = arith.constant dense<0.000000e+00> : vector<16xf32>
    %887 = vector.multi_reduction <add>, %886, %cst_392 [1] : vector<16x32xf32> to vector<16xf32>
    %888 = vector.shape_cast %887 : vector<16xf32> to vector<16x1xf32>
    %cst_393 = arith.constant 3.200000e+01 : f32
    %889 = vector.broadcast %cst_393 : f32 to vector<16x1xf32>
    %890 = arith.divf %888, %889 : vector<16x1xf32>
    %cst_394 = arith.constant 9.99999974E-6 : f32
    %891 = vector.broadcast %cst_394 : f32 to vector<16x1xf32>
    %892 = arith.addf %890, %891 : vector<16x1xf32>
    %893 = math.rsqrt %892 : vector<16x1xf32>
    %894 = vector.broadcast %893 : vector<16x1xf32> to vector<16x32xf32>
    %895 = arith.mulf %885, %894 : vector<16x32xf32>
    %896 = vector.broadcast %877 : vector<1x32xf32> to vector<16x32xf32>
    %897 = arith.mulf %895, %896 : vector<16x32xf32>
    %898 = vector.broadcast %879 : vector<1x32xf32> to vector<16x32xf32>
    %899 = arith.addf %897, %898 : vector<16x32xf32>
    %c2 = arith.constant 2 : index
    %c0_395 = arith.constant 0 : index
    %c0_396 = arith.constant 0 : index
    %900 = vector.load %arg16[%c2, %c0_395, %c0_396] : memref<3x32x96xf32, #tpu.memory_space<vmem>>, vector<1x32x96xf32>
    %901 = vector.shape_cast %900 : vector<1x32x96xf32> to vector<32x96xf32>
    %cst_397 = arith.constant dense<0.000000e+00> : vector<16x96xf32>
    %902 = tpu.matmul %899, %901, %cst_397 {dimension_numbers = #tpu.dot_dimension_numbers<[1], [0], [0], [1], [0, 0, 1, 1], [], []>} : vector<16x32xf32>, vector<32x96xf32>, vector<16x96xf32> -> vector<16x96xf32>
    %c2_398 = arith.constant 2 : index
    %c0_399 = arith.constant 0 : index
    %c0_400 = arith.constant 0 : index
    %903 = vector.load %arg17[%c2_398, %c0_399, %c0_400] : memref<3x1x96xf32, #tpu.memory_space<vmem>>, vector<1x1x96xf32>
    %904 = vector.shape_cast %903 : vector<1x1x96xf32> to vector<1x96xf32>
    %905 = vector.broadcast %904 : vector<1x96xf32> to vector<16x96xf32>
    %906 = arith.addf %902, %905 : vector<16x96xf32>
    %907 = vector.shape_cast %906 : vector<16x96xf32> to vector<2x8x96xf32>
    %908 = vector.extract_strided_slice %907 {offsets = [0, 0, 0], sizes = [2, 8, 32], strides = [1, 1, 1]} : vector<2x8x96xf32> to vector<2x8x32xf32>
    %909 = vector.extract_strided_slice %907 {offsets = [0, 0, 32], sizes = [2, 8, 32], strides = [1, 1, 1]} : vector<2x8x96xf32> to vector<2x8x32xf32>
    %910 = vector.extract_strided_slice %907 {offsets = [0, 0, 64], sizes = [2, 8, 32], strides = [1, 1, 1]} : vector<2x8x96xf32> to vector<2x8x32xf32>
    %911 = vector.extract_strided_slice %908 {offsets = [0, 0, 0], sizes = [2, 8, 8], strides = [1, 1, 1]} : vector<2x8x32xf32> to vector<2x8x8xf32>
    %912 = vector.extract_strided_slice %909 {offsets = [0, 0, 0], sizes = [2, 8, 8], strides = [1, 1, 1]} : vector<2x8x32xf32> to vector<2x8x8xf32>
    "tpu.trace_start"() <{level = 10 : i32, message = "bqd,bkd->bqk"}> : () -> ()
    %cst_401 = arith.constant dense<0.000000e+00> : vector<2x8x8xf32>
    %913 = tpu.matmul %911, %912, %cst_401 {dimension_numbers = #tpu.dot_dimension_numbers<[2], [2], [1], [1], [0, 0, 0, 1, 1, 1], [0], [0]>} : vector<2x8x8xf32>, vector<2x8x8xf32>, vector<2x8x8xf32> -> vector<2x8x8xf32>
    "tpu.trace_stop"() : () -> ()
    %cst_402 = arith.constant 0.353553385 : f32
    %914 = vector.broadcast %cst_402 : f32 to vector<2x8x8xf32>
    %915 = arith.mulf %913, %914 : vector<2x8x8xf32>
    %916 = arith.addf %915, %1 : vector<2x8x8xf32>
    %cst_403 = arith.constant dense<0xFF800000> : vector<2x8xf32>
    %917 = vector.multi_reduction <maximumf>, %916, %cst_403 [2] : vector<2x8x8xf32> to vector<2x8xf32>
    %918 = vector.shape_cast %917 : vector<2x8xf32> to vector<2x8x1xf32>
    %919 = vector.broadcast %918 : vector<2x8x1xf32> to vector<2x8x8xf32>
    %920 = arith.subf %916, %919 : vector<2x8x8xf32>
    %921 = math.exp %920 : vector<2x8x8xf32>
    %cst_404 = arith.constant dense<0.000000e+00> : vector<2x8xf32>
    %922 = vector.multi_reduction <add>, %921, %cst_404 [2] : vector<2x8x8xf32> to vector<2x8xf32>
    %923 = vector.shape_cast %922 : vector<2x8xf32> to vector<2x8x1xf32>
    %924 = tpu.reciprocal %923 {approx = true} : vector<2x8x1xf32> -> vector<2x8x1xf32>
    %925 = vector.broadcast %924 : vector<2x8x1xf32> to vector<2x8x8xf32>
    %926 = arith.mulf %921, %925 : vector<2x8x8xf32>
    %927 = vector.extract_strided_slice %910 {offsets = [0, 0, 0], sizes = [2, 8, 8], strides = [1, 1, 1]} : vector<2x8x32xf32> to vector<2x8x8xf32>
    "tpu.trace_start"() <{level = 10 : i32, message = "bqk,bkd->bqd"}> : () -> ()
    %cst_405 = arith.constant dense<0.000000e+00> : vector<2x8x8xf32>
    %928 = tpu.matmul %926, %927, %cst_405 {dimension_numbers = #tpu.dot_dimension_numbers<[2], [1], [1], [2], [0, 0, 0, 1, 1, 2], [0], [0]>} : vector<2x8x8xf32>, vector<2x8x8xf32>, vector<2x8x8xf32> -> vector<2x8x8xf32>
    "tpu.trace_stop"() : () -> ()
    %929 = vector.extract_strided_slice %908 {offsets = [0, 0, 8], sizes = [2, 8, 8], strides = [1, 1, 1]} : vector<2x8x32xf32> to vector<2x8x8xf32>
    %930 = vector.extract_strided_slice %909 {offsets = [0, 0, 8], sizes = [2, 8, 8], strides = [1, 1, 1]} : vector<2x8x32xf32> to vector<2x8x8xf32>
    "tpu.trace_start"() <{level = 10 : i32, message = "bqd,bkd->bqk"}> : () -> ()
    %cst_406 = arith.constant dense<0.000000e+00> : vector<2x8x8xf32>
    %931 = tpu.matmul %929, %930, %cst_406 {dimension_numbers = #tpu.dot_dimension_numbers<[2], [2], [1], [1], [0, 0, 0, 1, 1, 1], [0], [0]>} : vector<2x8x8xf32>, vector<2x8x8xf32>, vector<2x8x8xf32> -> vector<2x8x8xf32>
    "tpu.trace_stop"() : () -> ()
    %cst_407 = arith.constant 0.353553385 : f32
    %932 = vector.broadcast %cst_407 : f32 to vector<2x8x8xf32>
    %933 = arith.mulf %931, %932 : vector<2x8x8xf32>
    %934 = arith.addf %933, %1 : vector<2x8x8xf32>
    %cst_408 = arith.constant dense<0xFF800000> : vector<2x8xf32>
    %935 = vector.multi_reduction <maximumf>, %934, %cst_408 [2] : vector<2x8x8xf32> to vector<2x8xf32>
    %936 = vector.shape_cast %935 : vector<2x8xf32> to vector<2x8x1xf32>
    %937 = vector.broadcast %936 : vector<2x8x1xf32> to vector<2x8x8xf32>
    %938 = arith.subf %934, %937 : vector<2x8x8xf32>
    %939 = math.exp %938 : vector<2x8x8xf32>
    %cst_409 = arith.constant dense<0.000000e+00> : vector<2x8xf32>
    %940 = vector.multi_reduction <add>, %939, %cst_409 [2] : vector<2x8x8xf32> to vector<2x8xf32>
    %941 = vector.shape_cast %940 : vector<2x8xf32> to vector<2x8x1xf32>
    %942 = tpu.reciprocal %941 {approx = true} : vector<2x8x1xf32> -> vector<2x8x1xf32>
    %943 = vector.broadcast %942 : vector<2x8x1xf32> to vector<2x8x8xf32>
    %944 = arith.mulf %939, %943 : vector<2x8x8xf32>
    %945 = vector.extract_strided_slice %910 {offsets = [0, 0, 8], sizes = [2, 8, 8], strides = [1, 1, 1]} : vector<2x8x32xf32> to vector<2x8x8xf32>
    "tpu.trace_start"() <{level = 10 : i32, message = "bqk,bkd->bqd"}> : () -> ()
    %cst_410 = arith.constant dense<0.000000e+00> : vector<2x8x8xf32>
    %946 = tpu.matmul %944, %945, %cst_410 {dimension_numbers = #tpu.dot_dimension_numbers<[2], [1], [1], [2], [0, 0, 0, 1, 1, 2], [0], [0]>} : vector<2x8x8xf32>, vector<2x8x8xf32>, vector<2x8x8xf32> -> vector<2x8x8xf32>
    "tpu.trace_stop"() : () -> ()
    %947 = vector.extract_strided_slice %908 {offsets = [0, 0, 16], sizes = [2, 8, 8], strides = [1, 1, 1]} : vector<2x8x32xf32> to vector<2x8x8xf32>
    %948 = vector.extract_strided_slice %909 {offsets = [0, 0, 16], sizes = [2, 8, 8], strides = [1, 1, 1]} : vector<2x8x32xf32> to vector<2x8x8xf32>
    "tpu.trace_start"() <{level = 10 : i32, message = "bqd,bkd->bqk"}> : () -> ()
    %cst_411 = arith.constant dense<0.000000e+00> : vector<2x8x8xf32>
    %949 = tpu.matmul %947, %948, %cst_411 {dimension_numbers = #tpu.dot_dimension_numbers<[2], [2], [1], [1], [0, 0, 0, 1, 1, 1], [0], [0]>} : vector<2x8x8xf32>, vector<2x8x8xf32>, vector<2x8x8xf32> -> vector<2x8x8xf32>
    "tpu.trace_stop"() : () -> ()
    %cst_412 = arith.constant 0.353553385 : f32
    %950 = vector.broadcast %cst_412 : f32 to vector<2x8x8xf32>
    %951 = arith.mulf %949, %950 : vector<2x8x8xf32>
    %952 = arith.addf %951, %1 : vector<2x8x8xf32>
    %cst_413 = arith.constant dense<0xFF800000> : vector<2x8xf32>
    %953 = vector.multi_reduction <maximumf>, %952, %cst_413 [2] : vector<2x8x8xf32> to vector<2x8xf32>
    %954 = vector.shape_cast %953 : vector<2x8xf32> to vector<2x8x1xf32>
    %955 = vector.broadcast %954 : vector<2x8x1xf32> to vector<2x8x8xf32>
    %956 = arith.subf %952, %955 : vector<2x8x8xf32>
    %957 = math.exp %956 : vector<2x8x8xf32>
    %cst_414 = arith.constant dense<0.000000e+00> : vector<2x8xf32>
    %958 = vector.multi_reduction <add>, %957, %cst_414 [2] : vector<2x8x8xf32> to vector<2x8xf32>
    %959 = vector.shape_cast %958 : vector<2x8xf32> to vector<2x8x1xf32>
    %960 = tpu.reciprocal %959 {approx = true} : vector<2x8x1xf32> -> vector<2x8x1xf32>
    %961 = vector.broadcast %960 : vector<2x8x1xf32> to vector<2x8x8xf32>
    %962 = arith.mulf %957, %961 : vector<2x8x8xf32>
    %963 = vector.extract_strided_slice %910 {offsets = [0, 0, 16], sizes = [2, 8, 8], strides = [1, 1, 1]} : vector<2x8x32xf32> to vector<2x8x8xf32>
    "tpu.trace_start"() <{level = 10 : i32, message = "bqk,bkd->bqd"}> : () -> ()
    %cst_415 = arith.constant dense<0.000000e+00> : vector<2x8x8xf32>
    %964 = tpu.matmul %962, %963, %cst_415 {dimension_numbers = #tpu.dot_dimension_numbers<[2], [1], [1], [2], [0, 0, 0, 1, 1, 2], [0], [0]>} : vector<2x8x8xf32>, vector<2x8x8xf32>, vector<2x8x8xf32> -> vector<2x8x8xf32>
    "tpu.trace_stop"() : () -> ()
    %965 = vector.extract_strided_slice %908 {offsets = [0, 0, 24], sizes = [2, 8, 8], strides = [1, 1, 1]} : vector<2x8x32xf32> to vector<2x8x8xf32>
    %966 = vector.extract_strided_slice %909 {offsets = [0, 0, 24], sizes = [2, 8, 8], strides = [1, 1, 1]} : vector<2x8x32xf32> to vector<2x8x8xf32>
    "tpu.trace_start"() <{level = 10 : i32, message = "bqd,bkd->bqk"}> : () -> ()
    %cst_416 = arith.constant dense<0.000000e+00> : vector<2x8x8xf32>
    %967 = tpu.matmul %965, %966, %cst_416 {dimension_numbers = #tpu.dot_dimension_numbers<[2], [2], [1], [1], [0, 0, 0, 1, 1, 1], [0], [0]>} : vector<2x8x8xf32>, vector<2x8x8xf32>, vector<2x8x8xf32> -> vector<2x8x8xf32>
    "tpu.trace_stop"() : () -> ()
    %cst_417 = arith.constant 0.353553385 : f32
    %968 = vector.broadcast %cst_417 : f32 to vector<2x8x8xf32>
    %969 = arith.mulf %967, %968 : vector<2x8x8xf32>
    %970 = arith.addf %969, %1 : vector<2x8x8xf32>
    %cst_418 = arith.constant dense<0xFF800000> : vector<2x8xf32>
    %971 = vector.multi_reduction <maximumf>, %970, %cst_418 [2] : vector<2x8x8xf32> to vector<2x8xf32>
    %972 = vector.shape_cast %971 : vector<2x8xf32> to vector<2x8x1xf32>
    %973 = vector.broadcast %972 : vector<2x8x1xf32> to vector<2x8x8xf32>
    %974 = arith.subf %970, %973 : vector<2x8x8xf32>
    %975 = math.exp %974 : vector<2x8x8xf32>
    %cst_419 = arith.constant dense<0.000000e+00> : vector<2x8xf32>
    %976 = vector.multi_reduction <add>, %975, %cst_419 [2] : vector<2x8x8xf32> to vector<2x8xf32>
    %977 = vector.shape_cast %976 : vector<2x8xf32> to vector<2x8x1xf32>
    %978 = tpu.reciprocal %977 {approx = true} : vector<2x8x1xf32> -> vector<2x8x1xf32>
    %979 = vector.broadcast %978 : vector<2x8x1xf32> to vector<2x8x8xf32>
    %980 = arith.mulf %975, %979 : vector<2x8x8xf32>
    %981 = vector.extract_strided_slice %910 {offsets = [0, 0, 24], sizes = [2, 8, 8], strides = [1, 1, 1]} : vector<2x8x32xf32> to vector<2x8x8xf32>
    "tpu.trace_start"() <{level = 10 : i32, message = "bqk,bkd->bqd"}> : () -> ()
    %cst_420 = arith.constant dense<0.000000e+00> : vector<2x8x8xf32>
    %982 = tpu.matmul %980, %981, %cst_420 {dimension_numbers = #tpu.dot_dimension_numbers<[2], [1], [1], [2], [0, 0, 0, 1, 1, 2], [0], [0]>} : vector<2x8x8xf32>, vector<2x8x8xf32>, vector<2x8x8xf32> -> vector<2x8x8xf32>
    "tpu.trace_stop"() : () -> ()
    %983 = tpu.concatenate %928, %946, %964, %982 in 2 : vector<2x8x8xf32>, vector<2x8x8xf32>, vector<2x8x8xf32>, vector<2x8x8xf32> -> vector<2x8x32xf32>
    %984 = vector.shape_cast %983 : vector<2x8x32xf32> to vector<16x32xf32>
    %c2_421 = arith.constant 2 : index
    %c0_422 = arith.constant 0 : index
    %c0_423 = arith.constant 0 : index
    %985 = vector.load %arg18[%c2_421, %c0_422, %c0_423] : memref<3x32x32xf32, #tpu.memory_space<vmem>>, vector<1x32x32xf32>
    %986 = vector.shape_cast %985 : vector<1x32x32xf32> to vector<32x32xf32>
    %cst_424 = arith.constant dense<0.000000e+00> : vector<16x32xf32>
    %987 = tpu.matmul %984, %986, %cst_424 {dimension_numbers = #tpu.dot_dimension_numbers<[1], [0], [0], [1], [0, 0, 1, 1], [], []>} : vector<16x32xf32>, vector<32x32xf32>, vector<16x32xf32> -> vector<16x32xf32>
    %c2_425 = arith.constant 2 : index
    %c0_426 = arith.constant 0 : index
    %c0_427 = arith.constant 0 : index
    %988 = vector.load %arg19[%c2_425, %c0_426, %c0_427] : memref<3x1x32xf32, #tpu.memory_space<vmem>>, vector<1x1x32xf32>
    %989 = vector.shape_cast %988 : vector<1x1x32xf32> to vector<1x32xf32>
    %990 = vector.broadcast %989 : vector<1x32xf32> to vector<16x32xf32>
    %991 = arith.addf %987, %990 : vector<16x32xf32>
    %992 = arith.addf %899, %991 : vector<16x32xf32>
    %c2_428 = arith.constant 2 : index
    %c0_429 = arith.constant 0 : index
    %c0_430 = arith.constant 0 : index
    %993 = vector.load %arg30[%c2_428, %c0_429, %c0_430] : memref<3x1x32xf32, #tpu.memory_space<vmem>>, vector<1x1x32xf32>
    %994 = vector.shape_cast %993 : vector<1x1x32xf32> to vector<1x32xf32>
    %c2_431 = arith.constant 2 : index
    %c0_432 = arith.constant 0 : index
    %c0_433 = arith.constant 0 : index
    %995 = vector.load %arg31[%c2_431, %c0_432, %c0_433] : memref<3x1x32xf32, #tpu.memory_space<vmem>>, vector<1x1x32xf32>
    %996 = vector.shape_cast %995 : vector<1x1x32xf32> to vector<1x32xf32>
    %cst_434 = arith.constant dense<0.000000e+00> : vector<16xf32>
    %997 = vector.multi_reduction <add>, %992, %cst_434 [1] : vector<16x32xf32> to vector<16xf32>
    %998 = vector.shape_cast %997 : vector<16xf32> to vector<16x1xf32>
    %cst_435 = arith.constant 3.200000e+01 : f32
    %999 = vector.broadcast %cst_435 : f32 to vector<16x1xf32>
    %1000 = arith.divf %998, %999 : vector<16x1xf32>
    %1001 = vector.broadcast %1000 : vector<16x1xf32> to vector<16x32xf32>
    %1002 = arith.subf %992, %1001 : vector<16x32xf32>
    %1003 = arith.mulf %1002, %1002 : vector<16x32xf32>
    %cst_436 = arith.constant dense<0.000000e+00> : vector<16xf32>
    %1004 = vector.multi_reduction <add>, %1003, %cst_436 [1] : vector<16x32xf32> to vector<16xf32>
    %1005 = vector.shape_cast %1004 : vector<16xf32> to vector<16x1xf32>
    %cst_437 = arith.constant 3.200000e+01 : f32
    %1006 = vector.broadcast %cst_437 : f32 to vector<16x1xf32>
    %1007 = arith.divf %1005, %1006 : vector<16x1xf32>
    %cst_438 = arith.constant 9.99999974E-6 : f32
    %1008 = vector.broadcast %cst_438 : f32 to vector<16x1xf32>
    %1009 = arith.addf %1007, %1008 : vector<16x1xf32>
    %1010 = math.rsqrt %1009 : vector<16x1xf32>
    %1011 = vector.broadcast %1010 : vector<16x1xf32> to vector<16x32xf32>
    %1012 = arith.mulf %1002, %1011 : vector<16x32xf32>
    %1013 = vector.broadcast %994 : vector<1x32xf32> to vector<16x32xf32>
    %1014 = arith.mulf %1012, %1013 : vector<16x32xf32>
    %1015 = vector.broadcast %996 : vector<1x32xf32> to vector<16x32xf32>
    %1016 = arith.addf %1014, %1015 : vector<16x32xf32>
    %c2_439 = arith.constant 2 : index
    %c0_440 = arith.constant 0 : index
    %c0_441 = arith.constant 0 : index
    %1017 = vector.load %arg20[%c2_439, %c0_440, %c0_441] : memref<3x32x32xf32, #tpu.memory_space<vmem>>, vector<1x32x32xf32>
    %1018 = vector.shape_cast %1017 : vector<1x32x32xf32> to vector<32x32xf32>
    %cst_442 = arith.constant dense<0.000000e+00> : vector<16x32xf32>
    %1019 = tpu.matmul %1016, %1018, %cst_442 {dimension_numbers = #tpu.dot_dimension_numbers<[1], [0], [0], [1], [0, 0, 1, 1], [], []>} : vector<16x32xf32>, vector<32x32xf32>, vector<16x32xf32> -> vector<16x32xf32>
    %c2_443 = arith.constant 2 : index
    %c0_444 = arith.constant 0 : index
    %c0_445 = arith.constant 0 : index
    %1020 = vector.load %arg21[%c2_443, %c0_444, %c0_445] : memref<3x1x32xf32, #tpu.memory_space<vmem>>, vector<1x1x32xf32>
    %1021 = vector.shape_cast %1020 : vector<1x1x32xf32> to vector<1x32xf32>
    %1022 = vector.broadcast %1021 : vector<1x32xf32> to vector<16x32xf32>
    %1023 = arith.addf %1019, %1022 : vector<16x32xf32>
    %1024 = vector.shape_cast %1023 : vector<16x32xf32> to vector<2x8x32xf32>
    %c2_446 = arith.constant 2 : index
    %c0_447 = arith.constant 0 : index
    %c0_448 = arith.constant 0 : index
    %1025 = vector.load %arg22[%c2_446, %c0_447, %c0_448] : memref<3x32x64xf32, #tpu.memory_space<vmem>>, vector<1x32x64xf32>
    %1026 = vector.shape_cast %1025 : vector<1x32x64xf32> to vector<32x64xf32>
    %cst_449 = arith.constant dense<0.000000e+00> : vector<16x64xf32>
    %1027 = tpu.matmul %326, %1026, %cst_449 {dimension_numbers = #tpu.dot_dimension_numbers<[1], [0], [0], [1], [0, 0, 1, 1], [], []>} : vector<16x32xf32>, vector<32x64xf32>, vector<16x64xf32> -> vector<16x64xf32>
    %c2_450 = arith.constant 2 : index
    %c0_451 = arith.constant 0 : index
    %c0_452 = arith.constant 0 : index
    %1028 = vector.load %arg23[%c2_450, %c0_451, %c0_452] : memref<3x1x64xf32, #tpu.memory_space<vmem>>, vector<1x1x64xf32>
    %1029 = vector.shape_cast %1028 : vector<1x1x64xf32> to vector<1x64xf32>
    %1030 = vector.broadcast %1029 : vector<1x64xf32> to vector<16x64xf32>
    %1031 = arith.addf %1027, %1030 : vector<16x64xf32>
    %1032 = vector.shape_cast %1031 : vector<16x64xf32> to vector<2x8x64xf32>
    %1033 = vector.extract_strided_slice %1032 {offsets = [0, 0, 0], sizes = [2, 8, 32], strides = [1, 1, 1]} : vector<2x8x64xf32> to vector<2x8x32xf32>
    %1034 = vector.extract_strided_slice %1032 {offsets = [0, 0, 32], sizes = [2, 8, 32], strides = [1, 1, 1]} : vector<2x8x64xf32> to vector<2x8x32xf32>
    %1035 = vector.extract_strided_slice %1024 {offsets = [0, 0, 0], sizes = [2, 8, 8], strides = [1, 1, 1]} : vector<2x8x32xf32> to vector<2x8x8xf32>
    %1036 = vector.extract_strided_slice %1033 {offsets = [0, 0, 0], sizes = [2, 8, 8], strides = [1, 1, 1]} : vector<2x8x32xf32> to vector<2x8x8xf32>
    "tpu.trace_start"() <{level = 10 : i32, message = "bqd,bkd->bqk"}> : () -> ()
    %cst_453 = arith.constant dense<0.000000e+00> : vector<2x8x8xf32>
    %1037 = tpu.matmul %1035, %1036, %cst_453 {dimension_numbers = #tpu.dot_dimension_numbers<[2], [2], [1], [1], [0, 0, 0, 1, 1, 1], [0], [0]>} : vector<2x8x8xf32>, vector<2x8x8xf32>, vector<2x8x8xf32> -> vector<2x8x8xf32>
    "tpu.trace_stop"() : () -> ()
    %cst_454 = arith.constant 0.353553385 : f32
    %1038 = vector.broadcast %cst_454 : f32 to vector<2x8x8xf32>
    %1039 = arith.mulf %1037, %1038 : vector<2x8x8xf32>
    %1040 = vector.broadcast %0 : vector<2x1x8xf32> to vector<2x8x8xf32>
    %1041 = arith.addf %1039, %1040 : vector<2x8x8xf32>
    %cst_455 = arith.constant dense<0xFF800000> : vector<2x8xf32>
    %1042 = vector.multi_reduction <maximumf>, %1041, %cst_455 [2] : vector<2x8x8xf32> to vector<2x8xf32>
    %1043 = vector.shape_cast %1042 : vector<2x8xf32> to vector<2x8x1xf32>
    %1044 = vector.broadcast %1043 : vector<2x8x1xf32> to vector<2x8x8xf32>
    %1045 = arith.subf %1041, %1044 : vector<2x8x8xf32>
    %1046 = math.exp %1045 : vector<2x8x8xf32>
    %cst_456 = arith.constant dense<0.000000e+00> : vector<2x8xf32>
    %1047 = vector.multi_reduction <add>, %1046, %cst_456 [2] : vector<2x8x8xf32> to vector<2x8xf32>
    %1048 = vector.shape_cast %1047 : vector<2x8xf32> to vector<2x8x1xf32>
    %1049 = tpu.reciprocal %1048 {approx = true} : vector<2x8x1xf32> -> vector<2x8x1xf32>
    %1050 = vector.broadcast %1049 : vector<2x8x1xf32> to vector<2x8x8xf32>
    %1051 = arith.mulf %1046, %1050 : vector<2x8x8xf32>
    %1052 = vector.extract_strided_slice %1034 {offsets = [0, 0, 0], sizes = [2, 8, 8], strides = [1, 1, 1]} : vector<2x8x32xf32> to vector<2x8x8xf32>
    "tpu.trace_start"() <{level = 10 : i32, message = "bqk,bkd->bqd"}> : () -> ()
    %cst_457 = arith.constant dense<0.000000e+00> : vector<2x8x8xf32>
    %1053 = tpu.matmul %1051, %1052, %cst_457 {dimension_numbers = #tpu.dot_dimension_numbers<[2], [1], [1], [2], [0, 0, 0, 1, 1, 2], [0], [0]>} : vector<2x8x8xf32>, vector<2x8x8xf32>, vector<2x8x8xf32> -> vector<2x8x8xf32>
    "tpu.trace_stop"() : () -> ()
    %1054 = vector.extract_strided_slice %1024 {offsets = [0, 0, 8], sizes = [2, 8, 8], strides = [1, 1, 1]} : vector<2x8x32xf32> to vector<2x8x8xf32>
    %1055 = vector.extract_strided_slice %1033 {offsets = [0, 0, 8], sizes = [2, 8, 8], strides = [1, 1, 1]} : vector<2x8x32xf32> to vector<2x8x8xf32>
    "tpu.trace_start"() <{level = 10 : i32, message = "bqd,bkd->bqk"}> : () -> ()
    %cst_458 = arith.constant dense<0.000000e+00> : vector<2x8x8xf32>
    %1056 = tpu.matmul %1054, %1055, %cst_458 {dimension_numbers = #tpu.dot_dimension_numbers<[2], [2], [1], [1], [0, 0, 0, 1, 1, 1], [0], [0]>} : vector<2x8x8xf32>, vector<2x8x8xf32>, vector<2x8x8xf32> -> vector<2x8x8xf32>
    "tpu.trace_stop"() : () -> ()
    %cst_459 = arith.constant 0.353553385 : f32
    %1057 = vector.broadcast %cst_459 : f32 to vector<2x8x8xf32>
    %1058 = arith.mulf %1056, %1057 : vector<2x8x8xf32>
    %1059 = vector.broadcast %0 : vector<2x1x8xf32> to vector<2x8x8xf32>
    %1060 = arith.addf %1058, %1059 : vector<2x8x8xf32>
    %cst_460 = arith.constant dense<0xFF800000> : vector<2x8xf32>
    %1061 = vector.multi_reduction <maximumf>, %1060, %cst_460 [2] : vector<2x8x8xf32> to vector<2x8xf32>
    %1062 = vector.shape_cast %1061 : vector<2x8xf32> to vector<2x8x1xf32>
    %1063 = vector.broadcast %1062 : vector<2x8x1xf32> to vector<2x8x8xf32>
    %1064 = arith.subf %1060, %1063 : vector<2x8x8xf32>
    %1065 = math.exp %1064 : vector<2x8x8xf32>
    %cst_461 = arith.constant dense<0.000000e+00> : vector<2x8xf32>
    %1066 = vector.multi_reduction <add>, %1065, %cst_461 [2] : vector<2x8x8xf32> to vector<2x8xf32>
    %1067 = vector.shape_cast %1066 : vector<2x8xf32> to vector<2x8x1xf32>
    %1068 = tpu.reciprocal %1067 {approx = true} : vector<2x8x1xf32> -> vector<2x8x1xf32>
    %1069 = vector.broadcast %1068 : vector<2x8x1xf32> to vector<2x8x8xf32>
    %1070 = arith.mulf %1065, %1069 : vector<2x8x8xf32>
    %1071 = vector.extract_strided_slice %1034 {offsets = [0, 0, 8], sizes = [2, 8, 8], strides = [1, 1, 1]} : vector<2x8x32xf32> to vector<2x8x8xf32>
    "tpu.trace_start"() <{level = 10 : i32, message = "bqk,bkd->bqd"}> : () -> ()
    %cst_462 = arith.constant dense<0.000000e+00> : vector<2x8x8xf32>
    %1072 = tpu.matmul %1070, %1071, %cst_462 {dimension_numbers = #tpu.dot_dimension_numbers<[2], [1], [1], [2], [0, 0, 0, 1, 1, 2], [0], [0]>} : vector<2x8x8xf32>, vector<2x8x8xf32>, vector<2x8x8xf32> -> vector<2x8x8xf32>
    "tpu.trace_stop"() : () -> ()
    %1073 = vector.extract_strided_slice %1024 {offsets = [0, 0, 16], sizes = [2, 8, 8], strides = [1, 1, 1]} : vector<2x8x32xf32> to vector<2x8x8xf32>
    %1074 = vector.extract_strided_slice %1033 {offsets = [0, 0, 16], sizes = [2, 8, 8], strides = [1, 1, 1]} : vector<2x8x32xf32> to vector<2x8x8xf32>
    "tpu.trace_start"() <{level = 10 : i32, message = "bqd,bkd->bqk"}> : () -> ()
    %cst_463 = arith.constant dense<0.000000e+00> : vector<2x8x8xf32>
    %1075 = tpu.matmul %1073, %1074, %cst_463 {dimension_numbers = #tpu.dot_dimension_numbers<[2], [2], [1], [1], [0, 0, 0, 1, 1, 1], [0], [0]>} : vector<2x8x8xf32>, vector<2x8x8xf32>, vector<2x8x8xf32> -> vector<2x8x8xf32>
    "tpu.trace_stop"() : () -> ()
    %cst_464 = arith.constant 0.353553385 : f32
    %1076 = vector.broadcast %cst_464 : f32 to vector<2x8x8xf32>
    %1077 = arith.mulf %1075, %1076 : vector<2x8x8xf32>
    %1078 = vector.broadcast %0 : vector<2x1x8xf32> to vector<2x8x8xf32>
    %1079 = arith.addf %1077, %1078 : vector<2x8x8xf32>
    %cst_465 = arith.constant dense<0xFF800000> : vector<2x8xf32>
    %1080 = vector.multi_reduction <maximumf>, %1079, %cst_465 [2] : vector<2x8x8xf32> to vector<2x8xf32>
    %1081 = vector.shape_cast %1080 : vector<2x8xf32> to vector<2x8x1xf32>
    %1082 = vector.broadcast %1081 : vector<2x8x1xf32> to vector<2x8x8xf32>
    %1083 = arith.subf %1079, %1082 : vector<2x8x8xf32>
    %1084 = math.exp %1083 : vector<2x8x8xf32>
    %cst_466 = arith.constant dense<0.000000e+00> : vector<2x8xf32>
    %1085 = vector.multi_reduction <add>, %1084, %cst_466 [2] : vector<2x8x8xf32> to vector<2x8xf32>
    %1086 = vector.shape_cast %1085 : vector<2x8xf32> to vector<2x8x1xf32>
    %1087 = tpu.reciprocal %1086 {approx = true} : vector<2x8x1xf32> -> vector<2x8x1xf32>
    %1088 = vector.broadcast %1087 : vector<2x8x1xf32> to vector<2x8x8xf32>
    %1089 = arith.mulf %1084, %1088 : vector<2x8x8xf32>
    %1090 = vector.extract_strided_slice %1034 {offsets = [0, 0, 16], sizes = [2, 8, 8], strides = [1, 1, 1]} : vector<2x8x32xf32> to vector<2x8x8xf32>
    "tpu.trace_start"() <{level = 10 : i32, message = "bqk,bkd->bqd"}> : () -> ()
    %cst_467 = arith.constant dense<0.000000e+00> : vector<2x8x8xf32>
    %1091 = tpu.matmul %1089, %1090, %cst_467 {dimension_numbers = #tpu.dot_dimension_numbers<[2], [1], [1], [2], [0, 0, 0, 1, 1, 2], [0], [0]>} : vector<2x8x8xf32>, vector<2x8x8xf32>, vector<2x8x8xf32> -> vector<2x8x8xf32>
    "tpu.trace_stop"() : () -> ()
    %1092 = vector.extract_strided_slice %1024 {offsets = [0, 0, 24], sizes = [2, 8, 8], strides = [1, 1, 1]} : vector<2x8x32xf32> to vector<2x8x8xf32>
    %1093 = vector.extract_strided_slice %1033 {offsets = [0, 0, 24], sizes = [2, 8, 8], strides = [1, 1, 1]} : vector<2x8x32xf32> to vector<2x8x8xf32>
    "tpu.trace_start"() <{level = 10 : i32, message = "bqd,bkd->bqk"}> : () -> ()
    %cst_468 = arith.constant dense<0.000000e+00> : vector<2x8x8xf32>
    %1094 = tpu.matmul %1092, %1093, %cst_468 {dimension_numbers = #tpu.dot_dimension_numbers<[2], [2], [1], [1], [0, 0, 0, 1, 1, 1], [0], [0]>} : vector<2x8x8xf32>, vector<2x8x8xf32>, vector<2x8x8xf32> -> vector<2x8x8xf32>
    "tpu.trace_stop"() : () -> ()
    %cst_469 = arith.constant 0.353553385 : f32
    %1095 = vector.broadcast %cst_469 : f32 to vector<2x8x8xf32>
    %1096 = arith.mulf %1094, %1095 : vector<2x8x8xf32>
    %1097 = vector.broadcast %0 : vector<2x1x8xf32> to vector<2x8x8xf32>
    %1098 = arith.addf %1096, %1097 : vector<2x8x8xf32>
    %cst_470 = arith.constant dense<0xFF800000> : vector<2x8xf32>
    %1099 = vector.multi_reduction <maximumf>, %1098, %cst_470 [2] : vector<2x8x8xf32> to vector<2x8xf32>
    %1100 = vector.shape_cast %1099 : vector<2x8xf32> to vector<2x8x1xf32>
    %1101 = vector.broadcast %1100 : vector<2x8x1xf32> to vector<2x8x8xf32>
    %1102 = arith.subf %1098, %1101 : vector<2x8x8xf32>
    %1103 = math.exp %1102 : vector<2x8x8xf32>
    %cst_471 = arith.constant dense<0.000000e+00> : vector<2x8xf32>
    %1104 = vector.multi_reduction <add>, %1103, %cst_471 [2] : vector<2x8x8xf32> to vector<2x8xf32>
    %1105 = vector.shape_cast %1104 : vector<2x8xf32> to vector<2x8x1xf32>
    %1106 = tpu.reciprocal %1105 {approx = true} : vector<2x8x1xf32> -> vector<2x8x1xf32>
    %1107 = vector.broadcast %1106 : vector<2x8x1xf32> to vector<2x8x8xf32>
    %1108 = arith.mulf %1103, %1107 : vector<2x8x8xf32>
    %1109 = vector.extract_strided_slice %1034 {offsets = [0, 0, 24], sizes = [2, 8, 8], strides = [1, 1, 1]} : vector<2x8x32xf32> to vector<2x8x8xf32>
    "tpu.trace_start"() <{level = 10 : i32, message = "bqk,bkd->bqd"}> : () -> ()
    %cst_472 = arith.constant dense<0.000000e+00> : vector<2x8x8xf32>
    %1110 = tpu.matmul %1108, %1109, %cst_472 {dimension_numbers = #tpu.dot_dimension_numbers<[2], [1], [1], [2], [0, 0, 0, 1, 1, 2], [0], [0]>} : vector<2x8x8xf32>, vector<2x8x8xf32>, vector<2x8x8xf32> -> vector<2x8x8xf32>
    "tpu.trace_stop"() : () -> ()
    %1111 = tpu.concatenate %1053, %1072, %1091, %1110 in 2 : vector<2x8x8xf32>, vector<2x8x8xf32>, vector<2x8x8xf32>, vector<2x8x8xf32> -> vector<2x8x32xf32>
    %1112 = vector.shape_cast %1111 : vector<2x8x32xf32> to vector<16x32xf32>
    %c2_473 = arith.constant 2 : index
    %c0_474 = arith.constant 0 : index
    %c0_475 = arith.constant 0 : index
    %1113 = vector.load %arg24[%c2_473, %c0_474, %c0_475] : memref<3x32x32xf32, #tpu.memory_space<vmem>>, vector<1x32x32xf32>
    %1114 = vector.shape_cast %1113 : vector<1x32x32xf32> to vector<32x32xf32>
    %cst_476 = arith.constant dense<0.000000e+00> : vector<16x32xf32>
    %1115 = tpu.matmul %1112, %1114, %cst_476 {dimension_numbers = #tpu.dot_dimension_numbers<[1], [0], [0], [1], [0, 0, 1, 1], [], []>} : vector<16x32xf32>, vector<32x32xf32>, vector<16x32xf32> -> vector<16x32xf32>
    %c2_477 = arith.constant 2 : index
    %c0_478 = arith.constant 0 : index
    %c0_479 = arith.constant 0 : index
    %1116 = vector.load %arg25[%c2_477, %c0_478, %c0_479] : memref<3x1x32xf32, #tpu.memory_space<vmem>>, vector<1x1x32xf32>
    %1117 = vector.shape_cast %1116 : vector<1x1x32xf32> to vector<1x32xf32>
    %1118 = vector.broadcast %1117 : vector<1x32xf32> to vector<16x32xf32>
    %1119 = arith.addf %1115, %1118 : vector<16x32xf32>
    %1120 = arith.addf %1016, %1119 : vector<16x32xf32>
    %c2_480 = arith.constant 2 : index
    %c0_481 = arith.constant 0 : index
    %c0_482 = arith.constant 0 : index
    %1121 = vector.load %arg32[%c2_480, %c0_481, %c0_482] : memref<3x1x32xf32, #tpu.memory_space<vmem>>, vector<1x1x32xf32>
    %1122 = vector.shape_cast %1121 : vector<1x1x32xf32> to vector<1x32xf32>
    %c2_483 = arith.constant 2 : index
    %c0_484 = arith.constant 0 : index
    %c0_485 = arith.constant 0 : index
    %1123 = vector.load %arg33[%c2_483, %c0_484, %c0_485] : memref<3x1x32xf32, #tpu.memory_space<vmem>>, vector<1x1x32xf32>
    %1124 = vector.shape_cast %1123 : vector<1x1x32xf32> to vector<1x32xf32>
    %cst_486 = arith.constant dense<0.000000e+00> : vector<16xf32>
    %1125 = vector.multi_reduction <add>, %1120, %cst_486 [1] : vector<16x32xf32> to vector<16xf32>
    %1126 = vector.shape_cast %1125 : vector<16xf32> to vector<16x1xf32>
    %cst_487 = arith.constant 3.200000e+01 : f32
    %1127 = vector.broadcast %cst_487 : f32 to vector<16x1xf32>
    %1128 = arith.divf %1126, %1127 : vector<16x1xf32>
    %1129 = vector.broadcast %1128 : vector<16x1xf32> to vector<16x32xf32>
    %1130 = arith.subf %1120, %1129 : vector<16x32xf32>
    %1131 = arith.mulf %1130, %1130 : vector<16x32xf32>
    %cst_488 = arith.constant dense<0.000000e+00> : vector<16xf32>
    %1132 = vector.multi_reduction <add>, %1131, %cst_488 [1] : vector<16x32xf32> to vector<16xf32>
    %1133 = vector.shape_cast %1132 : vector<16xf32> to vector<16x1xf32>
    %cst_489 = arith.constant 3.200000e+01 : f32
    %1134 = vector.broadcast %cst_489 : f32 to vector<16x1xf32>
    %1135 = arith.divf %1133, %1134 : vector<16x1xf32>
    %cst_490 = arith.constant 9.99999974E-6 : f32
    %1136 = vector.broadcast %cst_490 : f32 to vector<16x1xf32>
    %1137 = arith.addf %1135, %1136 : vector<16x1xf32>
    %1138 = math.rsqrt %1137 : vector<16x1xf32>
    %1139 = vector.broadcast %1138 : vector<16x1xf32> to vector<16x32xf32>
    %1140 = arith.mulf %1130, %1139 : vector<16x32xf32>
    %1141 = vector.broadcast %1122 : vector<1x32xf32> to vector<16x32xf32>
    %1142 = arith.mulf %1140, %1141 : vector<16x32xf32>
    %1143 = vector.broadcast %1124 : vector<1x32xf32> to vector<16x32xf32>
    %1144 = arith.addf %1142, %1143 : vector<16x32xf32>
    %c2_491 = arith.constant 2 : index
    %c0_492 = arith.constant 0 : index
    %c0_493 = arith.constant 0 : index
    %1145 = vector.load %arg26[%c2_491, %c0_492, %c0_493] : memref<3x32x64xf32, #tpu.memory_space<vmem>>, vector<1x32x64xf32>
    %1146 = vector.shape_cast %1145 : vector<1x32x64xf32> to vector<32x64xf32>
    %cst_494 = arith.constant dense<0.000000e+00> : vector<16x64xf32>
    %1147 = tpu.matmul %1144, %1146, %cst_494 {dimension_numbers = #tpu.dot_dimension_numbers<[1], [0], [0], [1], [0, 0, 1, 1], [], []>} : vector<16x32xf32>, vector<32x64xf32>, vector<16x64xf32> -> vector<16x64xf32>
    %c2_495 = arith.constant 2 : index
    %c0_496 = arith.constant 0 : index
    %c0_497 = arith.constant 0 : index
    %1148 = vector.load %arg27[%c2_495, %c0_496, %c0_497] : memref<3x1x64xf32, #tpu.memory_space<vmem>>, vector<1x1x64xf32>
    %1149 = vector.shape_cast %1148 : vector<1x1x64xf32> to vector<1x64xf32>
    %1150 = vector.broadcast %1149 : vector<1x64xf32> to vector<16x64xf32>
    %1151 = arith.addf %1147, %1150 : vector<16x64xf32>
    %cst_498 = arith.constant 0.000000e+00 : f32
    %1152 = vector.broadcast %cst_498 : f32 to vector<16x64xf32>
    %1153 = arith.maximumf %1151, %1152 : vector<16x64xf32>
    %c2_499 = arith.constant 2 : index
    %c0_500 = arith.constant 0 : index
    %c0_501 = arith.constant 0 : index
    %1154 = vector.load %arg28[%c2_499, %c0_500, %c0_501] : memref<3x64x32xf32, #tpu.memory_space<vmem>>, vector<1x64x32xf32>
    %1155 = vector.shape_cast %1154 : vector<1x64x32xf32> to vector<64x32xf32>
    %cst_502 = arith.constant dense<0.000000e+00> : vector<16x32xf32>
    %1156 = tpu.matmul %1153, %1155, %cst_502 {dimension_numbers = #tpu.dot_dimension_numbers<[1], [0], [0], [1], [0, 0, 1, 1], [], []>} : vector<16x64xf32>, vector<64x32xf32>, vector<16x32xf32> -> vector<16x32xf32>
    %c2_503 = arith.constant 2 : index
    %c0_504 = arith.constant 0 : index
    %c0_505 = arith.constant 0 : index
    %1157 = vector.load %arg29[%c2_503, %c0_504, %c0_505] : memref<3x1x32xf32, #tpu.memory_space<vmem>>, vector<1x1x32xf32>
    %1158 = vector.shape_cast %1157 : vector<1x1x32xf32> to vector<1x32xf32>
    %1159 = vector.broadcast %1158 : vector<1x32xf32> to vector<16x32xf32>
    %1160 = arith.addf %1156, %1159 : vector<16x32xf32>
    %1161 = arith.addf %1144, %1160 : vector<16x32xf32>
    %c2_506 = arith.constant 2 : index
    %c0_507 = arith.constant 0 : index
    %c0_508 = arith.constant 0 : index
    %1162 = vector.load %arg34[%c2_506, %c0_507, %c0_508] : memref<3x1x32xf32, #tpu.memory_space<vmem>>, vector<1x1x32xf32>
    %1163 = vector.shape_cast %1162 : vector<1x1x32xf32> to vector<1x32xf32>
    %c2_509 = arith.constant 2 : index
    %c0_510 = arith.constant 0 : index
    %c0_511 = arith.constant 0 : index
    %1164 = vector.load %arg35[%c2_509, %c0_510, %c0_511] : memref<3x1x32xf32, #tpu.memory_space<vmem>>, vector<1x1x32xf32>
    %1165 = vector.shape_cast %1164 : vector<1x1x32xf32> to vector<1x32xf32>
    %cst_512 = arith.constant dense<0.000000e+00> : vector<16xf32>
    %1166 = vector.multi_reduction <add>, %1161, %cst_512 [1] : vector<16x32xf32> to vector<16xf32>
    %1167 = vector.shape_cast %1166 : vector<16xf32> to vector<16x1xf32>
    %cst_513 = arith.constant 3.200000e+01 : f32
    %1168 = vector.broadcast %cst_513 : f32 to vector<16x1xf32>
    %1169 = arith.divf %1167, %1168 : vector<16x1xf32>
    %1170 = vector.broadcast %1169 : vector<16x1xf32> to vector<16x32xf32>
    %1171 = arith.subf %1161, %1170 : vector<16x32xf32>
    %1172 = arith.mulf %1171, %1171 : vector<16x32xf32>
    %cst_514 = arith.constant dense<0.000000e+00> : vector<16xf32>
    %1173 = vector.multi_reduction <add>, %1172, %cst_514 [1] : vector<16x32xf32> to vector<16xf32>
    %1174 = vector.shape_cast %1173 : vector<16xf32> to vector<16x1xf32>
    %cst_515 = arith.constant 3.200000e+01 : f32
    %1175 = vector.broadcast %cst_515 : f32 to vector<16x1xf32>
    %1176 = arith.divf %1174, %1175 : vector<16x1xf32>
    %cst_516 = arith.constant 9.99999974E-6 : f32
    %1177 = vector.broadcast %cst_516 : f32 to vector<16x1xf32>
    %1178 = arith.addf %1176, %1177 : vector<16x1xf32>
    %1179 = math.rsqrt %1178 : vector<16x1xf32>
    %1180 = vector.broadcast %1179 : vector<16x1xf32> to vector<16x32xf32>
    %1181 = arith.mulf %1171, %1180 : vector<16x32xf32>
    %1182 = vector.broadcast %1163 : vector<1x32xf32> to vector<16x32xf32>
    %1183 = arith.mulf %1181, %1182 : vector<16x32xf32>
    %1184 = vector.broadcast %1165 : vector<1x32xf32> to vector<16x32xf32>
    %1185 = arith.addf %1183, %1184 : vector<16x32xf32>
    %c0_517 = arith.constant 0 : index
    %c0_518 = arith.constant 0 : index
    %1186 = vector.load %arg36[%c0_517, %c0_518] : memref<32x128xf32, #tpu.memory_space<vmem>>, vector<32x128xf32>
    %cst_519 = arith.constant dense<0.000000e+00> : vector<16x128xf32>
    %1187 = tpu.matmul %1185, %1186, %cst_519 {dimension_numbers = #tpu.dot_dimension_numbers<[1], [0], [0], [1], [0, 0, 1, 1], [], []>} : vector<16x32xf32>, vector<32x128xf32>, vector<16x128xf32> -> vector<16x128xf32>
    %c0_520 = arith.constant 0 : index
    %c0_521 = arith.constant 0 : index
    %1188 = vector.load %arg37[%c0_520, %c0_521] : memref<1x128xf32, #tpu.memory_space<vmem>>, vector<1x128xf32>
    %1189 = vector.broadcast %1188 : vector<1x128xf32> to vector<16x128xf32>
    %1190 = arith.addf %1187, %1189 : vector<16x128xf32>
    %c0_522 = arith.constant 0 : index
    %c0_523 = arith.constant 0 : index
    %1191 = vector.load %arg38[%c0_522, %c0_523] : memref<16x128xf32, #tpu.memory_space<vmem>>, vector<16x128xf32>
    tpu.vector_store %arg38[%c0_522, %c0_523], %1190 {strides = array<i32>} : memref<16x128xf32, #tpu.memory_space<vmem>>, vector<16x128xf32>,
    return
  }
}

</mosaic_0001>

<bundles_post_ra>
// kernel: uformer_forward.1
= control target key start
LH: loop header
LB: loop body
LE: loop exit
PB: predicated region body
PF: predicated region fallthrough
CT: control target
= control target key end

     0   :  { %s17107_s3 = smov 4   ;;  %vm175_vm0 = vcmask 261120   ;;  %v17108_v8 = vmov 0.0   ;;  %s17109_s10 = smov 5   ;;  %vm17110_vm1 = vmmov 0   ;;  %vm260_vm2 = vcmask 64512   ;;  %s19150_s0 = inlined_call_operand.smem [shape: u32[39], index: -1, kind: input, shape index: {}] }
   0x1   :  { %19191 = sst [smem:[#allocation8_spill]] %s19150_s0  ;;  %15457 = vmatprep.subr.mxu1 %v17108_v8  ;;  %15459 = vmatprep.mubr.msk.f32.mxu1 %vm17110_vm1, %v17108_v8  ;;  %s19177_s14 = smov 96   ;;  %vm1633_vm3 = vcmask 195584   ;;  %vm1630_vm4 = vcmask 130048   ;;  %vm1884_vm5 = vcmask 523264  }
   0x2   :  { %s17166_s6 = sld [smem:[%s19150_s0 + %s17107_s3]]   ;;  %s17112_s15 = smov 2  }
   0x3   :  { %s1_s9 = sld [smem:[%s19150_s0]]   ;;  %s19161_s19 = smov 64  }
   0x4   :  { %s17188_s13 = sld [smem:[%s19150_s0 + %s17109_s10]]   ;;  %s19175_s20 = smov 88  }
   0x5   :  { %s17218_s18 = sld [smem:[%s19150_s0 + %s17112_s15]]   ;;  %s19173_s21 = smov 120  }
   0x6   :  { %s19159_s22 = smov 56   ;;  %s19169_s23 = smov 112  }
   0x7   :  { %s19171_s24 = smov 80   ;;  %s19157_s25 = smov 48  }
   0x8   :  { %v164_v0 = vld [vmem:[%s17166_s6] sm:$0xff]  ;;  %v165_v1 = vld [vmem:[%s17166_s6 + $0x8] sm:$0xff]  ;;  %v166_v2 = vld [vmem:[%s17166_s6 + $0x10] sm:$0xff]  ;;  %s19167_s26 = smov 72   ;;  %s19165_s27 = smov 104  }
   0x9   :  { %v16456_v3 = vpack.c.bf16 %v165_v1, %v164_v0  ;;  %v167_v4 = vld [vmem:[%s17166_s6 + $0x18] sm:$0xff]  ;;  %v17175_v5 = vld [vmem:[%s1_s9] sm:$0xff]  ;;  %v17179_v7 = vld [vmem:[%s1_s9 + $0x8] sm:$0xff]  ;;  %s19155_s28 = smov 40   ;;  %s19163_s29 = smov 8  }
   0xa   :  { %v16460_v6 = vpack.c.bf16 %v167_v4, %v166_v2  ;;  %15454 = vmatprep.mubr.msk.f32.mxu0 %vm175_vm0, %v17175_v5  ;;  %v14562_v9 = vld [vmem:[%s17188_s13] ss:$0 sm:$0xff]  ;;  %s19153_s30 = smov 16   ;;  %s17125_s1 = smov 6  }
   0xb   :  { %16457 = vmatprep.subr.bf16.mxu0 %v16456_v3  ;;  %v17221_v17 = vld [vmem:[%s17218_s18] ss:$0 sm:$0xff]  ;;  %v17225_v22 = vld [vmem:[%s17218_s18 + $0x1] ss:$0 sm:$0xff]  ;;  %s17363_s4 = sld [smem:[%s19150_s0 + %s17125_s1]]   ;;  %s19151_s5 = smov 24  }
   0xc   :  { %16459 = vmatpush3.bf16.msra.mxu0 %v16456_v3  ;;  %s17127_s7 = smov 7   ;;  %s17397_s15 = sld [smem:[%s19150_s0 + %s19163_s29]]  }
   0xd   :  { %16461 = vmatprep.subr.bf16.mxu0 %v16460_v6  ;;  %s17384_s10 = sld [smem:[%s19150_s0 + %s17127_s7]]   ;;  %s17128_s16 = smov 10  }
   0xe   :  { %s17406_s2 = sld [smem:[%s19150_s0 + %s17128_s16]]   ;;  %s17129_s3 = smov 12  }
   0xf   :  { %s17417_s9 = sld [smem:[%s19150_s0 + %s17129_s3]]   ;;  %s17130_s11 = smov 13  }
  0x10   :  { %16463 = vmatpush3.bf16.msra.mxu0 %v16460_v6  ;;  %s17422_s17 = sld [smem:[%s19150_s0 + %s17130_s11]]   ;;  %s17131_s1 = smov 9  }
  0x11   :  { %15477 = vmatprep.subr.mxu0 %v17108_v8  ;;  %s17434_s8 = sld [smem:[%s19150_s0 + %s17131_s1]]   ;;  %s17132_s11 = smov 11  }
  0x12   :  { %s17444_s1 = sld [smem:[%s19150_s0 + %s17132_s11]]   ;;  %s17133_s3 = smov 14  }
  0x13   :  { %15455 = vmatmul.mubr.msk.f32.vlgmr.msra.gmra.mrb[0].mxu0 %vm175_vm0, %v17179_v7  ;;  %s17134_s12 = smov 15   ;;  %s17138_s7 = smov 18  }
  0x14   :  { %15479 = vmatprep.mubr.msk.f32.mxu0 %vm17110_vm1, %v17108_v8  ;;  %s17143_s16 = smov 30   ;;  %s17144_s11 = smov 31  }
  0x18   :  { %19192 = sst [smem:[#allocation2_spill]] %s17444_s1 }
  0xe6   :  { %v15456_v10 = vpop.f32.mrb[0].mxu0 }
  0xe7   :  { %v248_v11 = vpop.f32.mrb[1].mxu0  ;;  %v17199_v13 = vadd.f32 %v15456_v10, %v14562_v9 }
  0xe8   :  { %v17195_v12 = vadd.f32 %v14562_v9, %v248_v11 }
  0xea   :  { %258 = vrot.lane.b32.xlu0 %v17195_v12, %s19177_s14 }
  0xee   :  { %336 = vrot.lane.b32.xlu0 %v17199_v13, %s19177_s14 }
 0x15c   :  { %v259_v14 = vpop.permute.xlu0 %258 }
 0x15d   :  { %15458 = vmatpush3.xpose.msk.msra.mxu1 %vm260_vm2, %v259_v14 }
 0x15e   :  { %15462 = vmatprep.subr.mxu1 %v17108_v8 }
 0x160   :  { %15460 = vmatmul.mubr.msk.f32.vlgmr.msra.gmra.mrb[0].mxu1 %vm260_vm2, %v17195_v12  ;;  %v337_v15 = vpop.permute.xlu0 %336 }
 0x161   :  { %15463 = vmatpush3.xpose.msk.msra.mxu1 %vm260_vm2, %v337_v15  ;;  %15464 = vmatprep.mubr.msk.f32.mxu1 %vm17110_vm1, %v17108_v8 }
 0x162   :  { %15467 = vmatprep.subr.mxu1 %v17108_v8 }
 0x164   :  { %15465 = vmatmul.mubr.msk.f32.vlgmr.msra.gmra.mrb[2].mxu1 %vm260_vm2, %v17199_v13 }
 0x165   :  { %15469 = vmatprep.mubr.msk.f32.mxu1 %vm17110_vm1, %v17108_v8 }
 0x233   :  { %v331_v16 = vpop.f32.mrb[0].mxu1 }
 0x234   :  { %v412_v18 = vmul.f32 0.35355338, %v331_v16  ;;  %v15461_v19 = vpop.f32.mrb[1].mxu1 }
 0x236   :  { %v426_v20 = vadd.f32 %v17221_v17, %v412_v18 }
 0x237   :  { %v408_v21 = vpop.f32.mrb[2].mxu1 }
 0x238   :  { %v413_v23 = vmul.f32 0.35355338, %v408_v21  ;;  %v15466_v24 = vpop.f32.mrb[3].mxu1  ;;  %v428_v25 = vsel %vm260_vm2, %v426_v20, -inf }
 0x239   :  { %429 = vmax.xlane.f32.xlu1 %v428_v25 }
 0x23a   :  { %v427_v26 = vadd.f32 %v17225_v22, %v413_v23 }
 0x23c   :  { %v431_v27 = vsel %vm260_vm2, %v427_v26, -inf }
 0x23d   :  { %432 = vmax.xlane.f32.xlu1 %v431_v27 }
 0x24e   :  { %450 = vrot.lane.b32.xlu1 %v17195_v12, %s19161_s19 }
 0x252   :  { %526 = vrot.lane.b32.xlu1 %v17199_v13, %s19161_s19 }
 0x256   :  { %604 = vrot.lane.b32.xlu1 %v17195_v12, %s19175_s20 }
 0x25a   :  { %682 = vrot.lane.b32.xlu1 %v17199_v13, %s19175_s20 }
 0x2c6   :  { %v430_v28 = vpop.xlane.xlu1 %429 }
 0x2c7   :  { %v434_v29 = vsub.f32 %v426_v20, %v430_v28 }
 0x2c9   :  { %v436_v30 = vmul.f32 1.442695, %v434_v29 }
 0x2ca   :  { %v433_v31 = vpop.xlane.xlu1 %432 }
 0x2cb   :  { %16787 = vpow2.f32 %v436_v30  ;;  %v435_v32 = vsub.f32 %v427_v26, %v433_v31 }
 0x2cd   :  { %v438_v33 = vmul.f32 1.442695, %v435_v32 }
 0x2ce   :  { %v451_v34 = vpop.permute.xlu1 %450 }
 0x2cf   :  { %16789 = vpow2.f32 %v438_v33  ;;  %15468 = vmatpush3.msra.mxu1 %v451_v34 }
 0x2d0   :  { %15472 = vmatprep.subr.mxu1 %v17108_v8 }
 0x2d2   :  { %v527_v35 = vpop.permute.xlu1 %526 }
 0x2d5   :  { %v16788_v36 = vpop.eup %16787 }
 0x2d6   :  { %v605_v37 = vpop.permute.xlu1 %604  ;;  %v440_v38 = vsel %vm260_vm2, %v16788_v36, 0.0 }
 0x2d7   :  { %441 = vadd.xlane.f32.xlu0 %v440_v38  ;;  %15478 = vmatpush3.xpose.msk.msra.mxu0 %vm260_vm2, %v605_v37 }
 0x2d8   :  { %15487 = vmatprep.subr.mxu0 %v17108_v8 }
 0x2d9   :  { %v16790_v39 = vpop.eup %16789 }
 0x2da   :  { %v443_v40 = vsel %vm260_vm2, %v16790_v39, 0.0  ;;  %v683_v41 = vpop.permute.xlu1 %682 }
 0x2db   :  { %444 = vadd.xlane.f32.xlu1 %v443_v40 }
 0x2ec   :  { %680 = vrot.lane.b32.xlu1 %v17199_v13, %s19173_s21 }
 0x2ed   :  { %602 = vrot.lane.b32.xlu0 %v17195_v12, %s19173_s21 }
 0x364   :  { %v442_v42 = vpop.xlane.xlu0 %441 }
 0x365   :  { %16791 = vrcp.f32 %v442_v42 }
 0x368   :  { %v445_v43 = vpop.xlane.xlu1 %444  ;;  %v603_v44 = vpop.permute.xlu0 %602 }
 0x369   :  { %16793 = vrcp.f32 %v445_v43  ;;  %15480 = vmatmul.mubr.msk.f32.vlgmr.msra.gmra.mrb[2].mxu0 %vm260_vm2, %v603_v44 }
 0x36a   :  { %15489 = vmatprep.mubr.msk.f32.mxu0 %vm17110_vm1, %v17108_v8 }
 0x36c   :  { %v681_v49 = vpop.permute.xlu1 %680 }
 0x36f   :  { %v16792_v45 = vpop.eup %16791 }
 0x370   :  { %v448_v46 = vmul.f32 %v16792_v45, %v16788_v36 }
 0x372   :  { %15470 = vmatmul.mubr.msk.f32.vlgmr.msra.gmra.mrb[4].mxu1 %vm260_vm2, %v448_v46 }
 0x373   :  { %v16794_v47 = vpop.eup %16793  ;;  %15473 = vmatpush3.msra.mxu1 %v527_v35  ;;  %15474 = vmatprep.mubr.msk.f32.mxu1 %vm17110_vm1, %v17108_v8 }
 0x374   :  { %v449_v48 = vmul.f32 %v16794_v47, %v16790_v39  ;;  %15482 = vmatprep.subr.mxu1 %v17108_v8 }
 0x376   :  { %15475 = vmatmul.mubr.msk.f32.vlgmr.msra.gmra.mrb[6].mxu1 %vm260_vm2, %v449_v48 }
 0x377   :  { %15484 = vmatprep.mubr.msk.f32.mxu1 %vm17110_vm1, %v17108_v8 }
 0x37a   :  { %15483 = vmatpush3.xpose.msk.msra.mxu1 %vm260_vm2, %v683_v41 }
 0x37b   :  { %15492 = vmatprep.subr.mxu1 %v17108_v8 }
 0x37d   :  { %15485 = vmatmul.mubr.msk.f32.vlgmr.msra.gmra.mrb[8].mxu1 %vm260_vm2, %v681_v49 }
 0x37e   :  { %15494 = vmatprep.mubr.msk.f32.mxu1 %vm17110_vm1, %v17108_v8 }
 0x43c   :  { %v676_v50 = vpop.f32.mrb[2].mxu0 }
 0x43d   :  { %v758_v51 = vmul.f32 0.35355338, %v676_v50  ;;  %v15481_v52 = vpop.f32.mrb[3].mxu0 }
 0x43f   :  { %v760_v53 = vadd.f32 %v17221_v17, %v758_v51 }
 0x441   :  { %v762_v54 = vsel %vm260_vm2, %v760_v53, -inf }
 0x442   :  { %763 = vmax.xlane.f32.xlu1 %v762_v54 }
 0x445   :  { %v17264_v55 = vpop.f32.mrb[4].mxu1 }
 0x446   :  { %v15471_v56 = vpop.f32.mrb[5].mxu1 }
 0x449   :  { %v17266_v57 = vpop.f32.mrb[6].mxu1 }
 0x44a   :  { %v15476_v58 = vpop.f32.mrb[7].mxu1 }
 0x450   :  { %v754_v59 = vpop.f32.mrb[8].mxu1 }
 0x451   :  { %v759_v60 = vmul.f32 0.35355338, %v754_v59  ;;  %v15486_v61 = vpop.f32.mrb[9].mxu1 }
 0x453   :  { %v761_v62 = vadd.f32 %v17225_v22, %v759_v60 }
 0x455   :  { %v765_v63 = vsel %vm260_vm2, %v761_v62, -inf }
 0x456   :  { %766 = vmax.xlane.f32.xlu0 %v765_v63 }
 0x46c   :  { %860 = vrot.lane.b32.xlu0 %v17199_v13, %s19159_s22 }
 0x470   :  { %936 = vrot.lane.b32.xlu0 %v17195_v12, %s19169_s23 }
 0x4cf   :  { %v764_v0 = vpop.xlane.xlu1 %763 }
 0x4d0   :  { %v768_v1 = vsub.f32 %v760_v53, %v764_v0 }
 0x4d2   :  { %v770_v2 = vmul.f32 1.442695, %v768_v1 }
 0x4d4   :  { %16795 = vpow2.f32 %v770_v2 }
 0x4de   :  { %v16796_v3 = vpop.eup %16795 }
 0x4df   :  { %v774_v4 = vsel %vm260_vm2, %v16796_v3, 0.0 }
 0x4e0   :  { %775 = vadd.xlane.f32.xlu1 %v774_v4 }
 0x4e3   :  { %v767_v6 = vpop.xlane.xlu0 %766 }
 0x4e4   :  { %v769_v10 = vsub.f32 %v761_v62, %v767_v6 }
 0x4e6   :  { %v772_v11 = vmul.f32 1.442695, %v769_v10 }
 0x4e7   :  { %v861_v9 = vpop.permute.xlu0 %860 }
 0x4e8   :  { %15493 = vmatpush3.msra.mxu1 %v861_v9  ;;  %16797 = vpow2.f32 %v772_v11 }
 0x4e9   :  { %15502 = vmatprep.subr.mxu1 %v17108_v8 }
 0x4eb   :  { %v937_v23 = vpop.permute.xlu0 %936 }
 0x4f1   :  { %784 = vrot.lane.b32.xlu1 %v17195_v12, %s19159_s22 }
 0x4f2   :  { %v16798_v14 = vpop.eup %16797 }
 0x4f3   :  { %v777_v15 = vsel %vm260_vm2, %v16798_v14, 0.0 }
 0x4f5   :  { %938 = vrot.lane.b32.xlu1 %v17195_v12, %s19171_s24 }
 0x4f9   :  { %1016 = vrot.lane.b32.xlu1 %v17199_v13, %s19171_s24 }
 0x51d   :  { %778 = vadd.xlane.f32.xlu1 %v777_v15 }
 0x52e   :  { %1014 = vrot.lane.b32.xlu1 %v17199_v13, %s19169_s23 }
 0x56d   :  { %v776_v16 = vpop.xlane.xlu1 %775 }
 0x56e   :  { %16799 = vrcp.f32 %v776_v16 }
 0x571   :  { %v785_v18 = vpop.permute.xlu1 %784 }
 0x572   :  { %15488 = vmatpush3.msra.mxu0 %v785_v18 }
 0x573   :  { %15497 = vmatprep.subr.mxu0 %v17108_v8 }
 0x575   :  { %v939_v21 = vpop.permute.xlu1 %938 }
 0x578   :  { %v16800_v19 = vpop.eup %16799 }
 0x579   :  { %v782_v20 = vmul.f32 %v16800_v19, %v16796_v3  ;;  %v1017_v24 = vpop.permute.xlu1 %1016 }
 0x57b   :  { %15490 = vmatmul.mubr.msk.f32.vlgmr.msra.gmra.mrb[4].mxu0 %vm260_vm2, %v782_v20 }
 0x57c   :  { %15498 = vmatpush3.xpose.msk.msra.mxu0 %vm260_vm2, %v939_v21  ;;  %15499 = vmatprep.mubr.msk.f32.mxu0 %vm17110_vm1, %v17108_v8 }
 0x57d   :  { %15507 = vmatprep.subr.mxu0 %v17108_v8 }
 0x57f   :  { %15500 = vmatmul.mubr.msk.f32.vlgmr.msra.gmra.mrb[6].mxu0 %vm260_vm2, %v937_v23 }
 0x580   :  { %15509 = vmatprep.mubr.msk.f32.mxu0 %vm17110_vm1, %v17108_v8 }
 0x5aa   :  { %v779_v25 = vpop.xlane.xlu1 %778 }
 0x5ab   :  { %16801 = vrcp.f32 %v779_v25 }
 0x5ae   :  { %v1015_v28 = vpop.permute.xlu1 %1014 }
 0x5b5   :  { %v16802_v26 = vpop.eup %16801 }
 0x5b6   :  { %v783_v27 = vmul.f32 %v16802_v26, %v16798_v14 }
 0x5b8   :  { %15495 = vmatmul.mubr.msk.f32.vlgmr.msra.gmra.mrb[10].mxu1 %vm260_vm2, %v783_v27 }
 0x5b9   :  { %15503 = vmatpush3.xpose.msk.msra.mxu1 %vm260_vm2, %v1017_v24  ;;  %15504 = vmatprep.mubr.msk.f32.mxu1 %vm17110_vm1, %v17108_v8 }
 0x5ba   :  { %15512 = vmatprep.subr.mxu1 %v17108_v8 }
 0x5bc   :  { %15505 = vmatmul.mubr.msk.f32.vlgmr.msra.gmra.mrb[12].mxu1 %vm260_vm2, %v1015_v28 }
 0x5bd   :  { %15514 = vmatprep.mubr.msk.f32.mxu1 %vm17110_vm1, %v17108_v8 }
 0x64e   :  { %v17302_v29 = vpop.f32.mrb[4].mxu0 }
 0x64f   :  { %v15491_v30 = vpop.f32.mrb[5].mxu0 }
 0x652   :  { %v1010_v31 = vpop.f32.mrb[6].mxu0 }
 0x653   :  { %v1092_v32 = vmul.f32 0.35355338, %v1010_v31  ;;  %v15501_v33 = vpop.f32.mrb[7].mxu0 }
 0x655   :  { %v1094_v34 = vadd.f32 %v17221_v17, %v1092_v32 }
 0x657   :  { %v1096_v35 = vsel %vm260_vm2, %v1094_v34, -inf }
 0x658   :  { %1097 = vmax.xlane.f32.xlu0 %v1096_v35 }
 0x68b   :  { %v17306_v36 = vpop.f32.mrb[10].mxu1 }
 0x68c   :  { %v15496_v37 = vpop.f32.mrb[11].mxu1 }
 0x68f   :  { %v1088_v38 = vpop.f32.mrb[12].mxu1 }
 0x690   :  { %v1093_v39 = vmul.f32 0.35355338, %v1088_v38  ;;  %v15506_v40 = vpop.f32.mrb[13].mxu1 }
 0x692   :  { %v1095_v41 = vadd.f32 %v17225_v22, %v1093_v39 }
 0x694   :  { %v1099_v42 = vsel %vm260_vm2, %v1095_v41, -inf }
 0x695   :  { %1100 = vmax.xlane.f32.xlu1 %v1099_v42  ;;  %v1638_v42 = vld [vmem:[%s17363_s4 + $0x10] sm:$0xff] }
 0x6a6   :  { %1118 = vrot.lane.b32.xlu1 %v17195_v12, %s19157_s25 }
 0x6aa   :  { %1272 = vrot.lane.b32.xlu1 %v17195_v12, %s19167_s26 }
 0x6ae   :  { %1350 = vrot.lane.b32.xlu1 %v17199_v13, %s19167_s26 }
 0x6b2   :  { %1348 = vrot.lane.b32.xlu1 %v17199_v13, %s19165_s27 }
 0x6e5   :  { %v1098_v43 = vpop.xlane.xlu0 %1097 }
 0x6e6   :  { %v1102_v44 = vsub.f32 %v1094_v34, %v1098_v43 }
 0x6e8   :  { %v1104_v45 = vmul.f32 1.442695, %v1102_v44  ;;  %v1639_v44 = vld [vmem:[%s17363_s4 + $0x18] sm:$0xff] }
 0x6ea   :  { %16803 = vpow2.f32 %v1104_v45  ;;  %v16468_v45 = vpack.c.bf16 %v1639_v44, %v1638_v42  ;;  %v14594_v42 = vld [vmem:[%s17417_s9] ss:$0 sm:$0xff] }
 0x6eb   :  { %v14595_v44 = vld [vmem:[%s17422_s17] ss:$0 sm:$0xff] }
 0x6f4   :  { %v16804_v46 = vpop.eup %16803 }
 0x6f5   :  { %v1108_v47 = vsel %vm260_vm2, %v16804_v46, 0.0 }
 0x6f6   :  { %1109 = vadd.xlane.f32.xlu0 %v1108_v47 }
 0x70c   :  { %1194 = vrot.lane.b32.xlu0 %v17199_v13, %s19157_s25 }
 0x722   :  { %v1101_v48 = vpop.xlane.xlu1 %1100 }
 0x723   :  { %v1103_v49 = vsub.f32 %v1095_v41, %v1101_v48  ;;  %v1637_v41 = vld [vmem:[%s17363_s4 + $0x8] sm:$0xff] }
 0x725   :  { %v1106_v50 = vmul.f32 1.442695, %v1103_v49 }
 0x726   :  { %v1119_v51 = vpop.permute.xlu1 %1118 }
 0x727   :  { %16805 = vpow2.f32 %v1106_v50  ;;  %15508 = vmatpush3.msra.mxu0 %v1119_v51 }
 0x728   :  { %15517 = vmatprep.subr.mxu0 %v17108_v8 }
 0x72a   :  { %v1273_v60 = vpop.permute.xlu1 %1272 }
 0x72e   :  { %v1351_v0 = vpop.permute.xlu1 %1350 }
 0x731   :  { %v16806_v52 = vpop.eup %16805 }
 0x732   :  { %v1111_v53 = vsel %vm260_vm2, %v16806_v52, 0.0  ;;  %v1349_v2 = vpop.permute.xlu1 %1348 }
 0x733   :  { %1112 = vadd.xlane.f32.xlu0 %v1111_v53 }
 0x749   :  { %1270 = vrot.lane.b32.xlu0 %v17195_v12, %s19165_s27 }
 0x783   :  { %v1110_v54 = vpop.xlane.xlu0 %1109 }
 0x784   :  { %16807 = vrcp.f32 %v1110_v54 }
 0x787   :  { %v1195_v56 = vpop.permute.xlu0 %1194 }
 0x788   :  { %15513 = vmatpush3.msra.mxu1 %v1195_v56 }
 0x789   :  { %15522 = vmatprep.subr.mxu1 %v17108_v8 }
 0x78e   :  { %v16808_v58 = vpop.eup %16807 }
 0x78f   :  { %v1116_v59 = vmul.f32 %v16808_v58, %v16804_v46 }
 0x791   :  { %15510 = vmatmul.mubr.msk.f32.vlgmr.msra.gmra.mrb[8].mxu0 %vm260_vm2, %v1116_v59 }
 0x792   :  { %15518 = vmatpush3.xpose.msk.msra.mxu0 %vm260_vm2, %v1273_v60  ;;  %15519 = vmatprep.mubr.msk.f32.mxu0 %vm17110_vm1, %v17108_v8 }
 0x793   :  { %15527 = vmatprep.subr.mxu0 %v17108_v8 }
 0x7c0   :  { %v1113_v61 = vpop.xlane.xlu0 %1112 }
 0x7c1   :  { %16809 = vrcp.f32 %v1113_v61 }
 0x7c4   :  { %v1271_v62 = vpop.permute.xlu0 %1270 }
 0x7c5   :  { %15520 = vmatmul.mubr.msk.f32.vlgmr.msra.gmra.mrb[10].mxu0 %vm260_vm2, %v1271_v62 }
 0x7c6   :  { %15529 = vmatprep.mubr.msk.f32.mxu0 %vm17110_vm1, %v17108_v8 }
 0x7cb   :  { %v16810_v63 = vpop.eup %16809 }
 0x7cc   :  { %v1117_v1 = vmul.f32 %v16810_v63, %v16806_v52 }
 0x7ce   :  { %15515 = vmatmul.mubr.msk.f32.vlgmr.msra.gmra.mrb[14].mxu1 %vm260_vm2, %v1117_v1 }
 0x7cf   :  { %15523 = vmatpush3.xpose.msk.msra.mxu1 %vm260_vm2, %v1351_v0  ;;  %15524 = vmatprep.mubr.msk.f32.mxu1 %vm17110_vm1, %v17108_v8 }
 0x7d0   :  { %15532 = vmatprep.subr.mxu1 %v17108_v8 }
 0x7d2   :  { %15525 = vmatmul.mubr.msk.f32.vlgmr.msra.gmra.mrb[16].mxu1 %vm260_vm2, %v1349_v2 }
 0x7d3   :  { %15534 = vmatprep.mubr.msk.f32.mxu1 %vm17110_vm1, %v17108_v8 }
 0x864   :  { %v1190_v3 = vpop.f32.mrb[8].mxu0 }
 0x865   :  { %v15511_v4 = vpop.f32.mrb[9].mxu0 }
 0x898   :  { %v1344_v6 = vpop.f32.mrb[10].mxu0 }
 0x899   :  { %v1426_v9 = vmul.f32 0.35355338, %v1344_v6  ;;  %v15521_v10 = vpop.f32.mrb[11].mxu0 }
 0x89b   :  { %v1428_v11 = vadd.f32 %v17221_v17, %v1426_v9 }
 0x89d   :  { %v1430_v14 = vsel %vm260_vm2, %v1428_v11, -inf }
 0x89e   :  { %1431 = vmax.xlane.f32.xlu0 %v1430_v14 }
 0x8a1   :  { %v1266_v15 = vpop.f32.mrb[14].mxu1 }
 0x8a2   :  { %v15516_v16 = vpop.f32.mrb[15].mxu1 }
 0x8a5   :  { %v1422_v18 = vpop.f32.mrb[16].mxu1 }
 0x8a6   :  { %v1427_v19 = vmul.f32 0.35355338, %v1422_v18  ;;  %v15526_v20 = vpop.f32.mrb[17].mxu1 }
 0x8a8   :  { %v1429_v21 = vadd.f32 %v17225_v22, %v1427_v19 }
 0x8aa   :  { %v1433_v23 = vsel %vm260_vm2, %v1429_v21, -inf }
 0x8ab   :  { %1434 = vmax.xlane.f32.xlu1 %v1433_v23  ;;  %v1776_v23 = vld [vmem:[%s17397_s15 + $0x8] sm:$0xff] }
 0x8bc   :  { %1452 = vrot.lane.b32.xlu1 %v17195_v12, %s19155_s28 }
 0x8c0   :  { %1606 = vrot.lane.b32.xlu1 %v17302_v29, %s19163_s29 }
 0x8c4   :  { %1608 = vrot.lane.b32.xlu1 %v17306_v36, %s19163_s29 }
 0x8c8   :  { %1616 = vrot.lane.b32.xlu1 %v1266_v15, %s19153_s30 }
 0x92b   :  { %v1432_v24 = vpop.xlane.xlu0 %1431 }
 0x92c   :  { %v1436_v25 = vsub.f32 %v1428_v11, %v1432_v24  ;;  %v1777_v24 = vld [vmem:[%s17397_s15 + $0x10] sm:$0xff] }
 0x92e   :  { %v1438_v26 = vmul.f32 1.442695, %v1436_v25 }
 0x930   :  { %16811 = vpow2.f32 %v1438_v26  ;;  %v1778_v26 = vld [vmem:[%s17397_s15 + $0x18] sm:$0xff] }
 0x938   :  { %v1435_v27 = vpop.xlane.xlu1 %1434 }
 0x939   :  { %v1437_v28 = vsub.f32 %v1429_v21, %v1435_v27  ;;  %v16476_v27 = vpack.c.bf16 %v1778_v26, %v1777_v24 }
 0x93a   :  { %v16812_v30 = vpop.eup %16811 }
 0x93b   :  { %v1440_v31 = vmul.f32 1.442695, %v1437_v28  ;;  %v1442_v12 = vsel %vm260_vm2, %v16812_v30, 0.0  ;;  %v1869_v28 = vld [vmem:[%s17406_s2] sm:$0xff] }
 0x93c   :  { %v1453_v32 = vpop.permute.xlu1 %1452  ;;  %1443 = vadd.xlane.f32.xlu0 %v1442_v12 }
 0x93d   :  { %16813 = vpow2.f32 %v1440_v31  ;;  %15528 = vmatpush3.msra.mxu0 %v1453_v32  ;;  %v1871_v31 = vld [vmem:[%s17406_s2 + $0x10] sm:$0xff]  ;;  %v1872_v32 = vld [vmem:[%s17406_s2 + $0x18] sm:$0xff] }
 0x940   :  { %v1607_v50 = vpop.permute.xlu1 %1606 }
 0x941   :  { %v1628_v52 = vsel %vm260_vm2, %v17264_v55, %v1607_v50  ;;  %v14591_v55 = vld [vmem:[%s17384_s10] ss:$0 sm:$0xff] }
 0x944   :  { %v1609_v58 = vpop.permute.xlu1 %1608 }
 0x945   :  { %v1629_v60 = vsel %vm260_vm2, %v17266_v57, %v1609_v58 }
 0x947   :  { %v16814_v29 = vpop.eup %16813 }
 0x948   :  { %v1445_v33 = vsel %vm260_vm2, %v16814_v29, 0.0  ;;  %v1617_v59 = vpop.permute.xlu1 %1616 }
 0x949   :  { %1446 = vadd.xlane.f32.xlu0 %v1445_v33  ;;  %v1632_v61 = vsel %vm1630_vm4, %v1629_v60, %v1617_v59  ;;  %v1873_v33 = vld [vmem:[%s17406_s2 + $0x20] sm:$0xff] }
 0x95f   :  { %1528 = vrot.lane.b32.xlu0 %v17199_v13, %s19155_s28  ;;  %v1636_v13 = vld [vmem:[%s17363_s4] sm:$0xff] }
 0x960   :  { %v16464_v43 = vpack.c.bf16 %v1637_v41, %v1636_v13 }
 0x962   :  { %16465 = vmatprep.subr.bf16.mxu0 %v16464_v43 }
 0x963   :  { %1614 = vrot.lane.b32.xlu0 %v1190_v3, %s19153_s30  ;;  %s17464_s30 = sld [smem:[%s19150_s0 + %s17134_s12]]  }
 0x969   :  { %19194 = sst [smem:[#allocation4_spill]] %s17464_s30 }
 0x9c9   :  { %v1444_v34 = vpop.xlane.xlu0 %1443 }
 0x9ca   :  { %16815 = vrcp.f32 %v1444_v34  ;;  %v1874_v34 = vld [vmem:[%s17406_s2 + $0x28] sm:$0xff] }
 0x9d4   :  { %v16816_v35 = vpop.eup %16815 }
 0x9d5   :  { %v1450_v36 = vmul.f32 %v16816_v35, %v16812_v30  ;;  %v1870_v30 = vld [vmem:[%s17406_s2 + $0x8] sm:$0xff]  ;;  %v16488_v35 = vpack.c.bf16 %v1874_v34, %v1873_v33 }
 0x9d6   :  { %v1447_v37 = vpop.xlane.xlu0 %1446  ;;  %v16480_v12 = vpack.c.bf16 %v1870_v30, %v1869_v28 }
 0x9d7   :  { %16817 = vrcp.f32 %v1447_v37  ;;  %15530 = vmatmul.mubr.msk.f32.vlgmr.msra.gmra.mrb[12].mxu0 %vm260_vm2, %v1450_v36 }
 0x9d8   :  { %16467 = vmatpush3.bf16.msra.mxu0 %v16464_v43 }
 0x9d9   :  { %16469 = vmatprep.subr.bf16.mxu0 %v16468_v45 }
 0x9da   :  { %v1529_v38 = vpop.permute.xlu0 %1528 }
 0x9db   :  { %15533 = vmatpush3.msra.mxu1 %v1529_v38 }
 0x9dc   :  { %16471 = vmatpush3.bf16.msra.mxu0 %v16468_v45 }
 0x9dd   :  { %16481 = vmatprep.subr.bf16.mxu0 %v16480_v12 }
 0x9de   :  { %v1615_v51 = vpop.permute.xlu0 %1614 }
 0x9df   :  { %v1631_v53 = vsel %vm1630_vm4, %v1628_v52, %v1615_v51  ;;  %v1875_v51 = vld [vmem:[%s17406_s2 + $0x30] sm:$0xff]  ;;  %v1876_v52 = vld [vmem:[%s17406_s2 + $0x38] sm:$0xff] }
 0x9e1   :  { %v16818_v39 = vpop.eup %16817 }
 0x9e2   :  { %v1451_v40 = vmul.f32 %v16818_v39, %v16814_v29  ;;  %v16484_v29 = vpack.c.bf16 %v1872_v32, %v1871_v31 }
 0x9e4   :  { %15535 = vmatmul.mubr.msk.f32.vlgmr.msra.gmra.mrb[18].mxu1 %vm260_vm2, %v1451_v40 }
 0xaaa   :  { %v1524_v46 = vpop.f32.mrb[12].mxu0 }
 0xaab   :  { %1622 = vrot.lane.b32.xlu0 %v1524_v46, %s19151_s5  ;;  %v15531_v47 = vpop.f32.mrb[13].mxu0 }
 0xab7   :  { %v1600_v48 = vpop.f32.mrb[18].mxu1 }
 0xab8   :  { %1624 = vrot.lane.b32.xlu1 %v1600_v48, %s19151_s5  ;;  %v15536_v49 = vpop.f32.mrb[19].mxu1  ;;  %s19196_s5 = smov 24  }
 0xb1d   :  { %v1623_v54 = vpop.permute.xlu0 %1622 }
 0xb1e   :  { %v1634_v56 = vsel %vm1633_vm3, %v1631_v53, %v1623_v54  ;;  %v16492_v53 = vpack.c.bf16 %v1876_v52, %v1875_v51  ;;  %v14596_v54 = vld [vmem:[%s17434_s8] ss:$0 sm:$0xff] }
 0xb1f   :  { %15545 = vmatprep.mubr.msk.f32.mxu0 %vm175_vm0, %v1634_v56 }
 0xb2a   :  { %v1625_v62 = vpop.permute.xlu1 %1624 }
 0xb2b   :  { %v1635_v63 = vsel %vm1633_vm3, %v1632_v61, %v1625_v62 }
 0xb2c   :  { %15546 = vmatmul.mubr.msk.f32.vlgmr.msra.gmra.mrb[14].mxu0 %vm175_vm0, %v1635_v63  ;;  %v14599_v63 = vld [vmem:[%s17444_s1] ss:$0 sm:$0xff] }
 0xb2d   :  { %16483 = vmatpush3.bf16.msra.mxu0 %v16480_v12 }
 0xb2e   :  { %16485 = vmatprep.subr.bf16.mxu0 %v16484_v29 }
 0xb31   :  { %16487 = vmatpush3.bf16.msra.mxu0 %v16484_v29 }
 0xb32   :  { %16489 = vmatprep.subr.bf16.mxu0 %v16488_v35 }
 0xb35   :  { %16491 = vmatpush3.bf16.msra.mxu0 %v16488_v35 }
 0xb36   :  { %16493 = vmatprep.subr.bf16.mxu0 %v16492_v53 }
 0xb39   :  { %16495 = vmatpush3.bf16.msra.mxu0 %v16492_v53 }
 0xb3a   :  { %15599 = vmatprep.subr.mxu0 %v17108_v8 }
 0xbff   :  { %v15547_v0 = vpop.f32.mrb[14].mxu0 }
 0xc00   :  { %v1725_v1 = vadd.f32 %v15547_v0, %v14591_v55  ;;  %v1719_v2 = vpop.f32.mrb[15].mxu0 }
 0xc01   :  { %v1720_v3 = vadd.f32 %v14591_v55, %v1719_v2 }
 0xc02   :  { %v1729_v57 = vadd.f32 %v1725_v1, %v17179_v7 }
 0xc03   :  { %v1728_v4 = vadd.f32 %v1720_v3, %v17175_v5  ;;  %v1775_v5 = vld [vmem:[%s17397_s15] sm:$0xff] }
 0xc04   :  { %v1735_v6 = vsel %vm175_vm0, %v1729_v57, 0.0  ;;  %v16472_v25 = vpack.c.bf16 %v1776_v23, %v1775_v5  ;;  %v14605_v5 = vld [vmem:[%s17166_s6 + $0x28] sm:$0xff]  ;;  %v14606_v23 = vld [vmem:[%s17166_s6 + $0x30] sm:$0xff] }
 0xc05   :  { %1736 = vadd.xlane.f32.xlu1 %v1735_v6  ;;  %v1732_v9 = vsel %vm175_vm0, %v1728_v4, 0.0 }
 0xc06   :  { %1733 = vadd.xlane.f32.xlu0 %v1732_v9  ;;  %16473 = vmatprep.subr.bf16.mxu1 %v16472_v25 }
 0xc07   :  { %16475 = vmatpush3.bf16.msra.mxu1 %v16472_v25  ;;  %v14607_v25 = vld [vmem:[%s17166_s6 + $0x38] sm:$0xff] }
 0xc08   :  { %16477 = vmatprep.subr.bf16.mxu1 %v16476_v27  ;;  %v16500_v26 = vpack.c.bf16 %v14607_v25, %v14606_v23 }
 0xc0b   :  { %16479 = vmatpush3.bf16.msra.mxu1 %v16476_v27 }
 0xc92   :  { %v1737_v10 = vpop.xlane.xlu1 %1736 }
 0xc93   :  { %v1740_v11 = vmul.f32 0.03125, %v1737_v10  ;;  %v1734_v14 = vpop.xlane.xlu0 %1733 }
 0xc94   :  { %v1739_v15 = vmul.f32 0.03125, %v1734_v14 }
 0xc95   :  { %v1742_v16 = vsub.f32 %v1729_v57, %v1740_v11 }
 0xc96   :  { %v1741_v18 = vsub.f32 %v1728_v4, %v1739_v15 }
 0xc97   :  { %v1744_v21 = vmul.f32 %v1742_v16, %v1742_v16 }
 0xc98   :  { %v1743_v19 = vmul.f32 %v1741_v18, %v1741_v18 }
 0xc99   :  { %v1748_v7 = vsel %vm175_vm0, %v1744_v21, 0.0 }
 0xc9a   :  { %v1745_v20 = vsel %vm175_vm0, %v1743_v19, 0.0 }
 0xc9b   :  { %1746 = vadd.xlane.f32.xlu0 %v1745_v20 }
 0xc9f   :  { %1749 = vadd.xlane.f32.xlu0 %v1748_v7  ;;  %v14604_v7 = vld [vmem:[%s17166_s6 + $0x20] sm:$0xff]  ;;  %s17459_s6 = sld [smem:[%s19150_s0 + %s17133_s3]]  }
 0xca0   :  { %v16496_v24 = vpack.c.bf16 %v14605_v5, %v14604_v7 }
 0xca2   :  { %16497 = vmatprep.subr.bf16.mxu1 %v16496_v24 }
 0xca5   :  { %19193 = sst [smem:[#allocation3_spill]] %s17459_s6  ;;  %v14602_v33 = vld [vmem:[%s17459_s6] ss:$0 sm:$0xff]  ;;  %s19202_s6 = smov 88  }
 0xd28   :  { %v1747_v36 = vpop.xlane.xlu0 %1746 }
 0xd29   :  { %v1751_v37 = vmul.f32 0.03125, %v1747_v36 }
 0xd2b   :  { %v1753_v38 = vadd.f32 1e-05, %v1751_v37  ;;  %v14603_v37 = vld [vmem:[%s17464_s30] ss:$0 sm:$0xff]  ;;  %s19201_s30 = smov 64  }
 0xd2c   :  { %v1750_v39 = vpop.xlane.xlu0 %1749 }
 0xd2d   :  { %16819 = vrsqrt.f32 %v1753_v38  ;;  %v1752_v40 = vmul.f32 0.03125, %v1750_v39 }
 0xd2f   :  { %v1754_v13 = vadd.f32 1e-05, %v1752_v40 }
 0xd31   :  { %16821 = vrsqrt.f32 %v1754_v13 }
 0xd37   :  { %v16820_v41 = vpop.eup %16819 }
 0xd38   :  { %v1757_v43 = vmul.f32 %v16820_v41, %v1741_v18  ;;  %v14609_v41 = vld [vmem:[%s17188_s13 + $0x1] ss:$0 sm:$0xff]  ;;  %s19195_s13 = smov 16  }
 0xd39   :  { %s17670_s3 = sld [smem:[%s19150_s0 + %s19195_s13]]  }
 0xd3a   :  { %v1765_v45 = vmul.f32 %v14594_v42, %v1757_v43 }
 0xd3b   :  { %v16822_v46 = vpop.eup %16821 }
 0xd3c   :  { %v1758_v47 = vmul.f32 %v16822_v46, %v1742_v16  ;;  %v1773_v48 = vadd.f32 %v14595_v44, %v1765_v45 }
 0xd3e   :  { %v1766_v49 = vmul.f32 %v14594_v42, %v1758_v47  ;;  %15556 = vmatprep.mubr.msk.f32.mxu1 %vm175_vm0, %v1773_v48 }
 0xd40   :  { %v1774_v50 = vadd.f32 %v14595_v44, %v1766_v49 }
 0xd42   :  { %15557 = vmatmul.mubr.msk.f32.vlgmr.msra.gmra.mrb[20].mxu1 %vm175_vm0, %v1774_v50 }
 0xd43   :  { %16499 = vmatpush3.bf16.msra.mxu1 %v16496_v24 }
 0xd44   :  { %16501 = vmatprep.subr.bf16.mxu1 %v16500_v26 }
 0xd47   :  { %16503 = vmatpush3.bf16.msra.mxu1 %v16500_v26  ;;  %v17540_v26 = vld [vmem:[%s17218_s18] ss:$0 sm:$0xff] }
 0xd48   :  { %15589 = vmatprep.subr.mxu1 %v17108_v8 }
 0xe15   :  { %v15558_v56 = vpop.f32.mrb[20].mxu1 }
 0xe16   :  { %v1864_v58 = vadd.f32 %v15558_v56, %v14596_v54  ;;  %v1858_v59 = vpop.f32.mrb[21].mxu1 }
 0xe17   :  { %v1859_v60 = vadd.f32 %v14596_v54, %v1858_v59 }
 0xe18   :  { %v1868_v62 = vmax.f32 %v1864_v58, 0.0 }
 0xe19   :  { %v1867_v61 = vmax.f32 %v1859_v60, 0.0 }
 0xe1b   :  { %15575 = vmatprep.mubr.msk.f32.mxu0 %vm1884_vm5, %v1867_v61 }
 0xe1c   :  { %15576 = vmatmul.mubr.msk.f32.vlgmr.msra.gmra.mrb[16].mxu0 %vm1884_vm5, %v1868_v62 }
 0xe1d   :  { %15601 = vmatprep.mubr.msk.f32.mxu0 %vm17110_vm1, %v17108_v8 }
 0xeef   :  { %v15577_v55 = vpop.f32.mrb[16].mxu0 }
 0xef0   :  { %v1963_v0 = vadd.f32 %v15577_v55, %v14599_v63  ;;  %v1957_v1 = vpop.f32.mrb[17].mxu0 }
 0xef1   :  { %v1958_v2 = vadd.f32 %v14599_v63, %v1957_v1 }
 0xef2   :  { %v1967_v3 = vadd.f32 %v1963_v0, %v1774_v50 }
 0xef3   :  { %v1966_v57 = vadd.f32 %v1958_v2, %v1773_v48 }
 0xef4   :  { %v1973_v4 = vsel %vm175_vm0, %v1967_v3, 0.0 }
 0xef5   :  { %1974 = vadd.xlane.f32.xlu0 %v1973_v4  ;;  %v1970_v6 = vsel %vm175_vm0, %v1966_v57, 0.0 }
 0xef6   :  { %1971 = vadd.xlane.f32.xlu1 %v1970_v6 }
 0xf82   :  { %v1975_v9 = vpop.xlane.xlu0 %1974 }
 0xf83   :  { %v1977_v10 = vmul.f32 0.03125, %v1975_v9  ;;  %v1972_v11 = vpop.xlane.xlu1 %1971 }
 0xf84   :  { %v1976_v14 = vmul.f32 0.03125, %v1972_v11 }
 0xf85   :  { %v1979_v15 = vsub.f32 %v1967_v3, %v1977_v10 }
 0xf86   :  { %v1978_v16 = vsub.f32 %v1966_v57, %v1976_v14 }
 0xf87   :  { %v1981_v18 = vmul.f32 %v1979_v15, %v1979_v15 }
 0xf88   :  { %v1980_v19 = vmul.f32 %v1978_v16, %v1978_v16 }
 0xf89   :  { %v1985_v20 = vsel %vm175_vm0, %v1981_v18, 0.0 }
 0xf8a   :  { %1986 = vadd.xlane.f32.xlu0 %v1985_v20  ;;  %v1982_v21 = vsel %vm175_vm0, %v1980_v19, 0.0 }
 0xf8b   :  { %1983 = vadd.xlane.f32.xlu1 %v1982_v21 }
0x1017   :  { %v1987_v27 = vpop.xlane.xlu0 %1986 }
0x1018   :  { %v1989_v28 = vmul.f32 0.03125, %v1987_v27  ;;  %v1984_v30 = vpop.xlane.xlu1 %1983 }
0x1019   :  { %v1988_v31 = vmul.f32 0.03125, %v1984_v30 }
0x101a   :  { %v1991_v12 = vadd.f32 1e-05, %v1989_v28 }
0x101b   :  { %v1990_v32 = vadd.f32 1e-05, %v1988_v31 }
0x101c   :  { %16823 = vrsqrt.f32 %v1991_v12 }
0x101d   :  { %16825 = vrsqrt.f32 %v1990_v32  ;;  %v17545_v32 = vld [vmem:[%s17218_s18 + $0x1] ss:$0 sm:$0xff] }
0x1026   :  { %v16824_v29 = vpop.eup %16823 }
0x1027   :  { %v16826_v34 = vpop.eup %16825  ;;  %v1995_v35 = vmul.f32 %v16824_v29, %v1979_v15 }
0x1028   :  { %v1994_v36 = vmul.f32 %v16826_v34, %v1978_v16 }
0x1029   :  { %v2003_v38 = vmul.f32 %v14602_v33, %v1995_v35 }
0x102a   :  { %v2002_v39 = vmul.f32 %v14602_v33, %v1994_v36 }
0x102b   :  { %v17470_v13 = vadd.f32 %v14603_v37, %v2003_v38 }
0x102c   :  { %v17468_v40 = vadd.f32 %v14603_v37, %v2002_v39 }
0x102e   :  { %15586 = vmatprep.mubr.msk.f32.mxu1 %vm175_vm0, %v17468_v40 }
0x102f   :  { %15587 = vmatmul.mubr.msk.f32.vlgmr.msra.gmra.mrb[22].mxu1 %vm175_vm0, %v17470_v13 }
0x1030   :  { %15591 = vmatprep.mubr.msk.f32.mxu1 %vm17110_vm1, %v17108_v8 }
0x1102   :  { %v15588_v42 = vpop.f32.mrb[22].mxu1 }
0x1103   :  { %v17479_v43 = vadd.f32 %v15588_v42, %v14609_v41  ;;  %v2097_v44 = vpop.f32.mrb[23].mxu1 }
0x1104   :  { %v17481_v45 = vadd.f32 %v14609_v41, %v2097_v44 }
0x1105   :  { %2184 = vrot.lane.b32.xlu0 %v17479_v43, %s19177_s14 }
0x1106   :  { %2107 = vrot.lane.b32.xlu1 %v17481_v45, %s19177_s14 }
0x1177   :  { %v2185_v47 = vpop.permute.xlu0 %2184 }
0x1178   :  { %v2108_v46 = vpop.permute.xlu1 %2107 }
0x1179   :  { %15590 = vmatpush3.xpose.msk.msra.mxu1 %vm260_vm2, %v2108_v46 }
0x117a   :  { %15594 = vmatprep.subr.mxu1 %v17108_v8 }
0x117c   :  { %15592 = vmatmul.mubr.msk.f32.vlgmr.msra.gmra.mrb[24].mxu1 %vm260_vm2, %v17481_v45 }
0x117d   :  { %15595 = vmatpush3.xpose.msk.msra.mxu1 %vm260_vm2, %v2185_v47  ;;  %15596 = vmatprep.mubr.msk.f32.mxu1 %vm17110_vm1, %v17108_v8 }
0x117e   :  { %15604 = vmatprep.subr.mxu1 %v17108_v8 }
0x1180   :  { %15597 = vmatmul.mubr.msk.f32.vlgmr.msra.gmra.mrb[26].mxu1 %vm260_vm2, %v17479_v43 }
0x1181   :  { %15606 = vmatprep.mubr.msk.f32.mxu1 %vm17110_vm1, %v17108_v8 }
0x124f   :  { %v2179_v48 = vpop.f32.mrb[24].mxu1 }
0x1250   :  { %v2260_v49 = vmul.f32 0.35355338, %v2179_v48  ;;  %v15593_v50 = vpop.f32.mrb[25].mxu1 }
0x1252   :  { %v2262_v51 = vadd.f32 %v17221_v17, %v2260_v49 }
0x1253   :  { %v2256_v52 = vpop.f32.mrb[26].mxu1 }
0x1254   :  { %v2261_v53 = vmul.f32 0.35355338, %v2256_v52  ;;  %v15598_v54 = vpop.f32.mrb[27].mxu1  ;;  %v2264_v56 = vsel %vm260_vm2, %v2262_v51, -inf }
0x1255   :  { %2265 = vmax.xlane.f32.xlu1 %v2264_v56 }
0x1256   :  { %v2263_v58 = vadd.f32 %v17225_v22, %v2261_v53 }
0x1258   :  { %v2267_v59 = vsel %vm260_vm2, %v2263_v58, -inf }
0x1259   :  { %2268 = vmax.xlane.f32.xlu0 %v2267_v59 }
0x1266   :  { %2286 = vrot.lane.b32.xlu1 %v17481_v45, %s19161_s19 }
0x126a   :  { %2440 = vrot.lane.b32.xlu1 %v17481_v45, %s19175_s20 }
0x126e   :  { %2518 = vrot.lane.b32.xlu1 %v17479_v43, %s19175_s20 }
0x126f   :  { %2362 = vrot.lane.b32.xlu0 %v17479_v43, %s19161_s19 }
0x12e2   :  { %v2266_v17 = vpop.xlane.xlu1 %2265 }
0x12e3   :  { %v2270_v60 = vsub.f32 %v2262_v51, %v2266_v17 }
0x12e5   :  { %v2272_v61 = vmul.f32 1.442695, %v2270_v60 }
0x12e6   :  { %v2287_v62 = vpop.permute.xlu1 %2286  ;;  %v2269_v22 = vpop.xlane.xlu0 %2268 }
0x12e7   :  { %16827 = vpow2.f32 %v2272_v61  ;;  %v2271_v63 = vsub.f32 %v2263_v58, %v2269_v22  ;;  %15600 = vmatpush3.msra.mxu0 %v2287_v62 }
0x12e8   :  { %15609 = vmatprep.subr.mxu0 %v17108_v8 }
0x12e9   :  { %v2274_v55 = vmul.f32 1.442695, %v2271_v63 }
0x12ea   :  { %v2363_v0 = vpop.permute.xlu0 %2362  ;;  %v2441_v4 = vpop.permute.xlu1 %2440 }
0x12eb   :  { %16829 = vpow2.f32 %v2274_v55  ;;  %15605 = vmatpush3.msra.mxu1 %v2363_v0 }
0x12ec   :  { %15614 = vmatprep.subr.mxu1 %v17108_v8 }
0x12ee   :  { %v2519_v6 = vpop.permute.xlu1 %2518 }
0x12f1   :  { %v16828_v1 = vpop.eup %16827 }
0x12f2   :  { %v2276_v2 = vsel %vm260_vm2, %v16828_v1, 0.0 }
0x12f3   :  { %2277 = vadd.xlane.f32.xlu1 %v2276_v2 }
0x12f5   :  { %v16830_v3 = vpop.eup %16829 }
0x12f6   :  { %v2279_v57 = vsel %vm260_vm2, %v16830_v3, 0.0 }
0x12f7   :  { %2280 = vadd.xlane.f32.xlu0 %v2279_v57 }
0x1304   :  { %2516 = vrot.lane.b32.xlu1 %v17479_v43, %s19173_s21 }
0x130d   :  { %2438 = vrot.lane.b32.xlu0 %v17481_v45, %s19173_s21 }
0x1380   :  { %v2278_v9 = vpop.xlane.xlu1 %2277 }
0x1381   :  { %16831 = vrcp.f32 %v2278_v9 }
0x1384   :  { %v2281_v10 = vpop.xlane.xlu0 %2280  ;;  %v2517_v19 = vpop.permute.xlu1 %2516 }
0x1385   :  { %16833 = vrcp.f32 %v2281_v10 }
0x1388   :  { %v2439_v18 = vpop.permute.xlu0 %2438 }
0x138b   :  { %v16832_v11 = vpop.eup %16831 }
0x138c   :  { %v2284_v14 = vmul.f32 %v16832_v11, %v16828_v1 }
0x138e   :  { %15602 = vmatmul.mubr.msk.f32.vlgmr.msra.gmra.mrb[18].mxu0 %vm260_vm2, %v2284_v14 }
0x138f   :  { %v16834_v15 = vpop.eup %16833  ;;  %15610 = vmatpush3.xpose.msk.msra.mxu0 %vm260_vm2, %v2441_v4  ;;  %15611 = vmatprep.mubr.msk.f32.mxu0 %vm17110_vm1, %v17108_v8 }
0x1390   :  { %v2285_v16 = vmul.f32 %v16834_v15, %v16830_v3  ;;  %15619 = vmatprep.subr.mxu0 %v17108_v8 }
0x1392   :  { %15607 = vmatmul.mubr.msk.f32.vlgmr.msra.gmra.mrb[28].mxu1 %vm260_vm2, %v2285_v16  ;;  %15612 = vmatmul.mubr.msk.f32.vlgmr.msra.gmra.mrb[20].mxu0 %vm260_vm2, %v2439_v18 }
0x1393   :  { %15615 = vmatpush3.xpose.msk.msra.mxu1 %vm260_vm2, %v2519_v6  ;;  %15616 = vmatprep.mubr.msk.f32.mxu1 %vm17110_vm1, %v17108_v8 }
0x1394   :  { %15624 = vmatprep.subr.mxu1 %v17108_v8  ;;  %15621 = vmatprep.mubr.msk.f32.mxu0 %vm17110_vm1, %v17108_v8 }
0x1396   :  { %15617 = vmatmul.mubr.msk.f32.vlgmr.msra.gmra.mrb[30].mxu1 %vm260_vm2, %v2517_v19 }
0x1397   :  { %15626 = vmatprep.mubr.msk.f32.mxu1 %vm17110_vm1, %v17108_v8 }
0x1461   :  { %v17535_v20 = vpop.f32.mrb[18].mxu0 }
0x1462   :  { %v15603_v21 = vpop.f32.mrb[19].mxu0 }
0x1465   :  { %v17537_v7 = vpop.f32.mrb[28].mxu1  ;;  %v2512_v5 = vpop.f32.mrb[20].mxu0 }
0x1466   :  { %v2594_v23 = vmul.f32 0.35355338, %v2512_v5  ;;  %v15608_v24 = vpop.f32.mrb[29].mxu1  ;;  %v15613_v25 = vpop.f32.mrb[21].mxu0 }
0x1468   :  { %v2596_v27 = vadd.f32 %v17540_v26, %v2594_v23 }
0x1469   :  { %v2590_v28 = vpop.f32.mrb[30].mxu1 }
0x146a   :  { %v2595_v30 = vmul.f32 0.35355338, %v2590_v28  ;;  %v15618_v31 = vpop.f32.mrb[31].mxu1  ;;  %v2598_v12 = vsel %vm260_vm2, %v2596_v27, -inf }
0x146b   :  { %2599 = vmax.xlane.f32.xlu0 %v2598_v12 }
0x146c   :  { %v2597_v29 = vadd.f32 %v17545_v32, %v2595_v30 }
0x146e   :  { %v2601_v33 = vsel %vm260_vm2, %v2597_v29, -inf }
0x146f   :  { %2602 = vmax.xlane.f32.xlu1 %v2601_v33 }
0x1480   :  { %2620 = vrot.lane.b32.xlu1 %v17481_v45, %s19159_s22 }
0x1481   :  { %2696 = vrot.lane.b32.xlu0 %v17479_v43, %s19159_s22 }
0x1484   :  { %2774 = vrot.lane.b32.xlu1 %v17481_v45, %s19171_s24 }
0x1488   :  { %2852 = vrot.lane.b32.xlu1 %v17479_v43, %s19171_s24 }
0x148c   :  { %2850 = vrot.lane.b32.xlu1 %v17479_v43, %s19169_s23 }
0x14f8   :  { %v2600_v34 = vpop.xlane.xlu0 %2599 }
0x14f9   :  { %v2604_v35 = vsub.f32 %v2596_v27, %v2600_v34 }
0x14fb   :  { %v2606_v36 = vmul.f32 1.442695, %v2604_v35 }
0x14fc   :  { %v2697_v37 = vpop.permute.xlu0 %2696  ;;  %v2603_v38 = vpop.xlane.xlu1 %2602 }
0x14fd   :  { %16835 = vpow2.f32 %v2606_v36  ;;  %v2605_v39 = vsub.f32 %v2597_v29, %v2603_v38  ;;  %15625 = vmatpush3.msra.mxu1 %v2697_v37 }
0x14fe   :  { %15634 = vmatprep.subr.mxu1 %v17108_v8 }
0x14ff   :  { %v2608_v41 = vmul.f32 1.442695, %v2605_v39 }
0x1500   :  { %v2621_v42 = vpop.permute.xlu1 %2620 }
0x1501   :  { %16837 = vpow2.f32 %v2608_v41  ;;  %15620 = vmatpush3.msra.mxu0 %v2621_v42 }
0x1502   :  { %15629 = vmatprep.subr.mxu0 %v17108_v8 }
0x1504   :  { %v2775_v51 = vpop.permute.xlu1 %2774 }
0x1507   :  { %v16836_v44 = vpop.eup %16835 }
0x1508   :  { %v2610_v46 = vsel %vm260_vm2, %v16836_v44, 0.0  ;;  %v2853_v56 = vpop.permute.xlu1 %2852 }
0x1509   :  { %2611 = vadd.xlane.f32.xlu0 %v2610_v46 }
0x150b   :  { %v16838_v47 = vpop.eup %16837 }
0x150c   :  { %v2613_v48 = vsel %vm260_vm2, %v16838_v47, 0.0  ;;  %v2851_v17 = vpop.permute.xlu1 %2850 }
0x150d   :  { %2614 = vadd.xlane.f32.xlu0 %v2613_v48 }
0x1523   :  { %2772 = vrot.lane.b32.xlu0 %v17481_v45, %s19169_s23 }
0x1596   :  { %v2612_v49 = vpop.xlane.xlu0 %2611 }
0x1597   :  { %16839 = vrcp.f32 %v2612_v49 }
0x159a   :  { %v2615_v50 = vpop.xlane.xlu0 %2614 }
0x159b   :  { %16841 = vrcp.f32 %v2615_v50 }
0x159e   :  { %v2773_v59 = vpop.permute.xlu0 %2772 }
0x15a1   :  { %v16840_v52 = vpop.eup %16839 }
0x15a2   :  { %v2618_v53 = vmul.f32 %v16840_v52, %v16836_v44 }
0x15a4   :  { %15622 = vmatmul.mubr.msk.f32.vlgmr.msra.gmra.mrb[22].mxu0 %vm260_vm2, %v2618_v53 }
0x15a5   :  { %v16842_v54 = vpop.eup %16841  ;;  %15630 = vmatpush3.xpose.msk.msra.mxu0 %vm260_vm2, %v2775_v51  ;;  %15631 = vmatprep.mubr.msk.f32.mxu0 %vm17110_vm1, %v17108_v8 }
0x15a6   :  { %v2619_v58 = vmul.f32 %v16842_v54, %v16838_v47  ;;  %15639 = vmatprep.subr.mxu0 %v17108_v8 }
0x15a8   :  { %15627 = vmatmul.mubr.msk.f32.vlgmr.msra.gmra.mrb[32].mxu1 %vm260_vm2, %v2619_v58  ;;  %15632 = vmatmul.mubr.msk.f32.vlgmr.msra.gmra.mrb[24].mxu0 %vm260_vm2, %v2773_v59 }
0x15a9   :  { %15635 = vmatpush3.xpose.msk.msra.mxu1 %vm260_vm2, %v2853_v56  ;;  %15636 = vmatprep.mubr.msk.f32.mxu1 %vm17110_vm1, %v17108_v8 }
0x15aa   :  { %15644 = vmatprep.subr.mxu1 %v17108_v8  ;;  %15641 = vmatprep.mubr.msk.f32.mxu0 %vm17110_vm1, %v17108_v8 }
0x15ac   :  { %15637 = vmatmul.mubr.msk.f32.vlgmr.msra.gmra.mrb[34].mxu1 %vm260_vm2, %v2851_v17 }
0x15ad   :  { %15646 = vmatprep.mubr.msk.f32.mxu1 %vm17110_vm1, %v17108_v8 }
0x1677   :  { %v17581_v60 = vpop.f32.mrb[22].mxu0 }
0x1678   :  { %v15623_v61 = vpop.f32.mrb[23].mxu0 }
0x167b   :  { %v17583_v62 = vpop.f32.mrb[32].mxu1  ;;  %v2846_v22 = vpop.f32.mrb[24].mxu0 }
0x167c   :  { %v2928_v63 = vmul.f32 0.35355338, %v2846_v22  ;;  %v15628_v55 = vpop.f32.mrb[33].mxu1  ;;  %v15633_v0 = vpop.f32.mrb[25].mxu0 }
0x167e   :  { %v2930_v1 = vadd.f32 %v17540_v26, %v2928_v63 }
0x167f   :  { %v2924_v2 = vpop.f32.mrb[34].mxu1 }
0x1680   :  { %v2929_v3 = vmul.f32 0.35355338, %v2924_v2  ;;  %v15638_v57 = vpop.f32.mrb[35].mxu1  ;;  %v2932_v4 = vsel %vm260_vm2, %v2930_v1, -inf }
0x1681   :  { %2933 = vmax.xlane.f32.xlu0 %v2932_v4  ;;  %v14636_v57 = vld [vmem:[%s17363_s4 + $0x20] sm:$0xff] }
0x1682   :  { %v2931_v6 = vadd.f32 %v17545_v32, %v2929_v3 }
0x1684   :  { %v2935_v9 = vsel %vm260_vm2, %v2931_v6, -inf }
0x1685   :  { %2936 = vmax.xlane.f32.xlu1 %v2935_v9  ;;  %v14639_v9 = vld [vmem:[%s17363_s4 + $0x38] sm:$0xff] }
0x1696   :  { %2954 = vrot.lane.b32.xlu1 %v17481_v45, %s19157_s25 }
0x1697   :  { %3030 = vrot.lane.b32.xlu0 %v17479_v43, %s19157_s25 }
0x169a   :  { %3108 = vrot.lane.b32.xlu1 %v17481_v45, %s19167_s26 }
0x169e   :  { %3186 = vrot.lane.b32.xlu1 %v17479_v43, %s19167_s26 }
0x16a2   :  { %3184 = vrot.lane.b32.xlu1 %v17479_v43, %s19165_s27 }
0x170e   :  { %v2934_v10 = vpop.xlane.xlu0 %2933 }
0x170f   :  { %v2938_v11 = vsub.f32 %v2930_v1, %v2934_v10 }
0x1711   :  { %v2940_v14 = vmul.f32 1.442695, %v2938_v11 }
0x1712   :  { %v3031_v15 = vpop.permute.xlu0 %3030  ;;  %v2937_v16 = vpop.xlane.xlu1 %2936 }
0x1713   :  { %16843 = vpow2.f32 %v2940_v14  ;;  %v2939_v18 = vsub.f32 %v2931_v6, %v2937_v16  ;;  %15645 = vmatpush3.msra.mxu1 %v3031_v15  ;;  %v14638_v6 = vld [vmem:[%s17363_s4 + $0x30] sm:$0xff] }
0x1714   :  { %15654 = vmatprep.subr.mxu1 %v17108_v8  ;;  %v16508_v10 = vpack.c.bf16 %v14639_v9, %v14638_v6 }
0x1715   :  { %v2942_v19 = vmul.f32 1.442695, %v2939_v18 }
0x1716   :  { %v2955_v21 = vpop.permute.xlu1 %2954 }
0x1717   :  { %16845 = vpow2.f32 %v2942_v19  ;;  %15640 = vmatpush3.msra.mxu0 %v2955_v21 }
0x1718   :  { %15649 = vmatprep.subr.mxu0 %v17108_v8 }
0x171a   :  { %v3109_v30 = vpop.permute.xlu1 %3108 }
0x171d   :  { %v16844_v5 = vpop.eup %16843 }
0x171e   :  { %v2944_v23 = vsel %vm260_vm2, %v16844_v5, 0.0  ;;  %v3187_v33 = vpop.permute.xlu1 %3186 }
0x171f   :  { %2945 = vadd.xlane.f32.xlu0 %v2944_v23 }
0x1721   :  { %v16846_v24 = vpop.eup %16845 }
0x1722   :  { %v2947_v25 = vsel %vm260_vm2, %v16846_v24, 0.0  ;;  %v3185_v36 = vpop.permute.xlu1 %3184 }
0x1723   :  { %2948 = vadd.xlane.f32.xlu0 %v2947_v25 }
0x1739   :  { %3106 = vrot.lane.b32.xlu0 %v17481_v45, %s19165_s27 }
0x17ac   :  { %v2946_v27 = vpop.xlane.xlu0 %2945 }
0x17ad   :  { %16847 = vrcp.f32 %v2946_v27 }
0x17b0   :  { %v2949_v28 = vpop.xlane.xlu0 %2948 }
0x17b1   :  { %16849 = vrcp.f32 %v2949_v28 }
0x17b4   :  { %v3107_v35 = vpop.permute.xlu0 %3106 }
0x17b7   :  { %v16848_v31 = vpop.eup %16847 }
0x17b8   :  { %v2952_v12 = vmul.f32 %v16848_v31, %v16844_v5 }
0x17ba   :  { %15642 = vmatmul.mubr.msk.f32.vlgmr.msra.gmra.mrb[26].mxu0 %vm260_vm2, %v2952_v12 }
0x17bb   :  { %v16850_v29 = vpop.eup %16849  ;;  %15650 = vmatpush3.xpose.msk.msra.mxu0 %vm260_vm2, %v3109_v30  ;;  %15651 = vmatprep.mubr.msk.f32.mxu0 %vm17110_vm1, %v17108_v8 }
0x17bc   :  { %v2953_v34 = vmul.f32 %v16850_v29, %v16846_v24  ;;  %15659 = vmatprep.subr.mxu0 %v17108_v8  ;;  %v14641_v29 = vld [vmem:[%s17384_s10 + $0x1] ss:$0 sm:$0xff]  ;;  %s17140_s10 = smov 19  }
0x17be   :  { %15647 = vmatmul.mubr.msk.f32.vlgmr.msra.gmra.mrb[36].mxu1 %vm260_vm2, %v2953_v34  ;;  %15652 = vmatmul.mubr.msk.f32.vlgmr.msra.gmra.mrb[28].mxu0 %vm260_vm2, %v3107_v35 }
0x17bf   :  { %15655 = vmatpush3.xpose.msk.msra.mxu1 %vm260_vm2, %v3187_v33  ;;  %15656 = vmatprep.mubr.msk.f32.mxu1 %vm17110_vm1, %v17108_v8 }
0x17c0   :  { %15664 = vmatprep.subr.mxu1 %v17108_v8  ;;  %15661 = vmatprep.mubr.msk.f32.mxu0 %vm17110_vm1, %v17108_v8 }
0x17c2   :  { %15657 = vmatmul.mubr.msk.f32.vlgmr.msra.gmra.mrb[38].mxu1 %vm260_vm2, %v3185_v36 }
0x17c3   :  { %15666 = vmatprep.mubr.msk.f32.mxu1 %vm17110_vm1, %v17108_v8 }
0x188d   :  { %v3026_v37 = vpop.f32.mrb[26].mxu0 }
0x188e   :  { %v15643_v38 = vpop.f32.mrb[27].mxu0 }
0x1891   :  { %v3102_v39 = vpop.f32.mrb[36].mxu1  ;;  %v3180_v41 = vpop.f32.mrb[28].mxu0 }
0x1892   :  { %v3262_v42 = vmul.f32 0.35355338, %v3180_v41  ;;  %v15648_v44 = vpop.f32.mrb[37].mxu1  ;;  %v15653_v46 = vpop.f32.mrb[29].mxu0 }
0x1894   :  { %v3264_v47 = vadd.f32 %v17540_v26, %v3262_v42 }
0x1895   :  { %v3258_v48 = vpop.f32.mrb[38].mxu1 }
0x1896   :  { %v3263_v49 = vmul.f32 0.35355338, %v3258_v48  ;;  %v15658_v50 = vpop.f32.mrb[39].mxu1  ;;  %v3266_v51 = vsel %vm260_vm2, %v3264_v47, -inf }
0x1897   :  { %3267 = vmax.xlane.f32.xlu0 %v3266_v51 }
0x1898   :  { %v3265_v52 = vadd.f32 %v17545_v32, %v3263_v49 }
0x189a   :  { %v3269_v53 = vsel %vm260_vm2, %v3265_v52, -inf }
0x189b   :  { %3270 = vmax.xlane.f32.xlu1 %v3269_v53  ;;  %v14649_v53 = vld [vmem:[%s17397_s15 + $0x28] sm:$0xff] }
0x18ac   :  { %3288 = vrot.lane.b32.xlu1 %v17481_v45, %s19155_s28 }
0x18b0   :  { %3442 = vrot.lane.b32.xlu1 %v17581_v60, %s19163_s29 }
0x18b4   :  { %3444 = vrot.lane.b32.xlu1 %v17583_v62, %s19163_s29 }
0x18b8   :  { %3452 = vrot.lane.b32.xlu1 %v3102_v39, %s19195_s13 }
0x1924   :  { %v3268_v26 = vpop.xlane.xlu0 %3267 }
0x1925   :  { %v3272_v54 = vsub.f32 %v3264_v47, %v3268_v26  ;;  %v14650_v26 = vld [vmem:[%s17397_s15 + $0x30] sm:$0xff] }
0x1927   :  { %v3274_v56 = vmul.f32 1.442695, %v3272_v54 }
0x1928   :  { %v3271_v58 = vpop.xlane.xlu1 %3270 }
0x1929   :  { %16851 = vpow2.f32 %v3274_v56  ;;  %v3273_v32 = vsub.f32 %v3265_v52, %v3271_v58  ;;  %v14648_v52 = vld [vmem:[%s17397_s15 + $0x20] sm:$0xff]  ;;  %v14651_v56 = vld [vmem:[%s17397_s15 + $0x38] sm:$0xff]  ;;  %s17135_s15 = smov 1  }
0x192a   :  { %v16512_v54 = vpack.c.bf16 %v14649_v53, %v14648_v52  ;;  %v16516_v58 = vpack.c.bf16 %v14651_v56, %v14650_v26  ;;  %s14524_s12 = sld [smem:[%s19150_s0 + %s17135_s15]]  }
0x192b   :  { %v3276_v59 = vmul.f32 1.442695, %v3273_v32  ;;  %v3856_v32 = vld [vmem:[%s17670_s3] sm:$0xff] }
0x192c   :  { %v3289_v17 = vpop.permute.xlu1 %3288 }
0x192d   :  { %16853 = vpow2.f32 %v3276_v59  ;;  %15660 = vmatpush3.msra.mxu0 %v3289_v17  ;;  %v3857_v59 = vld [vmem:[%s17670_s3 + $0x8] sm:$0xff] }
0x192e   :  { %v16536_v17 = vpack.c.bf16 %v3857_v59, %v3856_v32 }
0x1930   :  { %v3443_v18 = vpop.permute.xlu1 %3442 }
0x1931   :  { %v3464_v5 = vsel %vm260_vm2, %v17535_v20, %v3443_v18 }
0x1933   :  { %v16852_v61 = vpop.eup %16851 }
0x1934   :  { %v3278_v45 = vsel %vm260_vm2, %v16852_v61, 0.0  ;;  %v3445_v19 = vpop.permute.xlu1 %3444 }
0x1935   :  { %3279 = vadd.xlane.f32.xlu0 %v3278_v45  ;;  %v3465_v28 = vsel %vm260_vm2, %v17537_v7, %v3445_v19  ;;  %v14657_v45 = vld [vmem:[%s17406_s2 + $0x48] sm:$0xff] }
0x1937   :  { %v16854_v60 = vpop.eup %16853 }
0x1938   :  { %v3281_v22 = vsel %vm260_vm2, %v16854_v60, 0.0  ;;  %v3453_v23 = vpop.permute.xlu1 %3452 }
0x1939   :  { %3282 = vadd.xlane.f32.xlu0 %v3281_v22  ;;  %v3467_v30 = vsel %vm1630_vm4, %v3465_v28, %v3453_v23  ;;  %v17699_v28 = vld [vmem:[%s14524_s12 + $0x8] sm:$0xff] }
0x194f   :  { %3364 = vrot.lane.b32.xlu0 %v17479_v43, %s19155_s28  ;;  %v14637_v43 = vld [vmem:[%s17363_s4 + $0x28] sm:$0xff] }
0x1950   :  { %v16504_v4 = vpack.c.bf16 %v14637_v43, %v14636_v57 }
0x1952   :  { %16505 = vmatprep.subr.bf16.mxu0 %v16504_v4 }
0x1953   :  { %3450 = vrot.lane.b32.xlu0 %v3026_v37, %s19195_s13 }
0x19c2   :  { %v3280_v62 = vpop.xlane.xlu0 %3279 }
0x19c3   :  { %16855 = vrcp.f32 %v3280_v62  ;;  %v14659_v62 = vld [vmem:[%s17406_s2 + $0x58] sm:$0xff] }
0x19c6   :  { %v3283_v63 = vpop.xlane.xlu0 %3282 }
0x19c7   :  { %16857 = vrcp.f32 %v3283_v63 }
0x19ca   :  { %v3365_v55 = vpop.permute.xlu0 %3364 }
0x19cb   :  { %15665 = vmatpush3.msra.mxu1 %v3365_v55  ;;  %v14660_v55 = vld [vmem:[%s17406_s2 + $0x60] sm:$0xff] }
0x19cc   :  { %16513 = vmatprep.subr.bf16.mxu1 %v16512_v54 }
0x19cd   :  { %v16856_v0 = vpop.eup %16855 }
0x19ce   :  { %v3286_v1 = vmul.f32 %v16856_v0, %v16852_v61  ;;  %v3451_v21 = vpop.permute.xlu0 %3450  ;;  %v14656_v61 = vld [vmem:[%s17406_s2 + $0x40] sm:$0xff]  ;;  %v14661_v0 = vld [vmem:[%s17406_s2 + $0x68] sm:$0xff] }
0x19cf   :  { %v3466_v24 = vsel %vm1630_vm4, %v3464_v5, %v3451_v21  ;;  %v16520_v22 = vpack.c.bf16 %v14657_v45, %v14656_v61  ;;  %v3858_v21 = vld [vmem:[%s17670_s3 + $0x10] sm:$0xff]  ;;  %v3859_v5 = vld [vmem:[%s17670_s3 + $0x18] sm:$0xff] }
0x19d0   :  { %15662 = vmatmul.mubr.msk.f32.vlgmr.msra.gmra.mrb[30].mxu0 %vm260_vm2, %v3286_v1  ;;  %v16528_v1 = vpack.c.bf16 %v14661_v0, %v14660_v55 }
0x19d1   :  { %v16858_v2 = vpop.eup %16857  ;;  %16507 = vmatpush3.bf16.msra.mxu0 %v16504_v4 }
0x19d2   :  { %v3287_v3 = vmul.f32 %v16858_v2, %v16854_v60  ;;  %16509 = vmatprep.subr.bf16.mxu0 %v16508_v10  ;;  %v14658_v60 = vld [vmem:[%s17406_s2 + $0x50] sm:$0xff] }
0x19d3   :  { %v16524_v63 = vpack.c.bf16 %v14659_v62, %v14658_v60 }
0x19d4   :  { %15667 = vmatmul.mubr.msk.f32.vlgmr.msra.gmra.mrb[40].mxu1 %vm260_vm2, %v3287_v3 }
0x19d5   :  { %16511 = vmatpush3.bf16.msra.mxu0 %v16508_v10  ;;  %16515 = vmatpush3.bf16.msra.mxu1 %v16512_v54  ;;  %v14646_v10 = vld [vmem:[%s17417_s9 + $0x1] ss:$0 sm:$0xff]  ;;  %s17136_s9 = smov 17  }
0x19d6   :  { %16517 = vmatprep.subr.bf16.mxu1 %v16516_v58  ;;  %16521 = vmatprep.subr.bf16.mxu0 %v16520_v22  ;;  %s17713_s4 = sld [smem:[%s19150_s0 + %s17136_s9]]  }
0x19d7   :  { %s17892_s9 = sld [smem:[%s19150_s0 + %s17138_s7]]  }
0x19d8   :  { %s17959_s7 = sld [smem:[%s19150_s0 + %s17143_s16]]  }
0x19d9   :  { %16519 = vmatpush3.bf16.msra.mxu1 %v16516_v58 }
0x19da   :  { %16537 = vmatprep.subr.bf16.mxu1 %v16536_v17 }
0x19dc   :  { %19197 = sst [smem:[#allocation5_spill]] %s17713_s4 }
0x1aa3   :  { %v3360_v11 = vpop.f32.mrb[30].mxu0 }
0x1aa4   :  { %3458 = vrot.lane.b32.xlu0 %v3360_v11, %s19196_s5  ;;  %v15663_v14 = vpop.f32.mrb[31].mxu0 }
0x1aa5   :  { %v14647_v14 = vld [vmem:[%s17422_s17 + $0x1] ss:$0 sm:$0xff]  ;;  %s17139_s17 = smov 22  }
0x1aa7   :  { %v3436_v15 = vpop.f32.mrb[40].mxu1 }
0x1aa8   :  { %3460 = vrot.lane.b32.xlu1 %v3436_v15, %s19196_s5  ;;  %v15668_v16 = vpop.f32.mrb[41].mxu1 }
0x1b16   :  { %v3459_v25 = vpop.permute.xlu0 %3458 }
0x1b17   :  { %v3468_v27 = vsel %vm1633_vm3, %v3466_v24, %v3459_v25  ;;  %v16540_v25 = vpack.c.bf16 %v3859_v5, %v3858_v21 }
0x1b18   :  { %15677 = vmatprep.mubr.msk.f32.mxu0 %vm175_vm0, %v3468_v27  ;;  %v17693_v27 = vld [vmem:[%s14524_s12] sm:$0xff]  ;;  %s17929_s12 = sld [smem:[%s19150_s0 + %s17140_s10]]   ;;  %s17142_s10 = smov 20  }
0x1b1a   :  { %v3461_v31 = vpop.permute.xlu1 %3460 }
0x1b1b   :  { %v3469_v12 = vsel %vm1633_vm3, %v3467_v30, %v3461_v31  ;;  %v14662_v30 = vld [vmem:[%s17406_s2 + $0x70] sm:$0xff]  ;;  %v14663_v31 = vld [vmem:[%s17406_s2 + $0x78] sm:$0xff]  ;;  %s17137_s2 = smov 3  }
0x1b1c   :  { %15678 = vmatmul.mubr.msk.f32.vlgmr.msra.gmra.mrb[32].mxu0 %vm175_vm0, %v3469_v12  ;;  %v16532_v12 = vpack.c.bf16 %v14663_v31, %v14662_v30  ;;  %s17747_s15 = sld [smem:[%s19150_s0 + %s17137_s2]]  }
0x1b1d   :  { %16523 = vmatpush3.bf16.msra.mxu0 %v16520_v22 }
0x1b1e   :  { %16525 = vmatprep.subr.bf16.mxu0 %v16524_v63 }
0x1b21   :  { %16527 = vmatpush3.bf16.msra.mxu0 %v16524_v63 }
0x1b22   :  { %16529 = vmatprep.subr.bf16.mxu0 %v16528_v1  ;;  %19198 = sst [smem:[#allocation6_spill]] %s17747_s15  ;;  %v17754_v54 = vld [vmem:[%s17747_s15 + $0x8] sm:$0xff] }
0x1b25   :  { %16531 = vmatpush3.bf16.msra.mxu0 %v16528_v1 }
0x1b26   :  { %16533 = vmatprep.subr.bf16.mxu0 %v16532_v12 }
0x1b29   :  { %16535 = vmatpush3.bf16.msra.mxu0 %v16532_v12 }
0x1b2a   :  { %15731 = vmatprep.subr.mxu0 %v17108_v8 }
0x1bef   :  { %v15679_v20 = vpop.f32.mrb[32].mxu0 }
0x1bf0   :  { %v3561_v33 = vadd.f32 %v15679_v20, %v14641_v29  ;;  %v3555_v34 = vpop.f32.mrb[33].mxu0 }
0x1bf1   :  { %v3556_v35 = vadd.f32 %v14641_v29, %v3555_v34  ;;  %v14653_v29 = vld [vmem:[%s17434_s8 + $0x1] ss:$0 sm:$0xff]  ;;  %s17899_s8 = sld [smem:[%s19150_s0 + %s17139_s17]]   ;;  %s17141_s17 = smov 23  }
0x1bf2   :  { %v3565_v36 = vadd.f32 %v3561_v33, %v17470_v13 }
0x1bf3   :  { %v3564_v37 = vadd.f32 %v3556_v35, %v17468_v40 }
0x1bf4   :  { %v3573_v38 = vsel %vm175_vm0, %v3565_v36, 0.0 }
0x1bf5   :  { %3574 = vadd.xlane.f32.xlu1 %v3573_v38  ;;  %v3570_v7 = vsel %vm175_vm0, %v3564_v37, 0.0  ;;  %v14672_v38 = vld [vmem:[%s17713_s4] ss:$0 sm:$0xff] }
0x1bf6   :  { %3571 = vadd.xlane.f32.xlu0 %v3570_v7 }
0x1c82   :  { %v3575_v39 = vpop.xlane.xlu1 %3574 }
0x1c83   :  { %v3577_v41 = vmul.f32 0.03125, %v3575_v39  ;;  %v3572_v42 = vpop.xlane.xlu0 %3571 }
0x1c84   :  { %v3576_v44 = vmul.f32 0.03125, %v3572_v42 }
0x1c85   :  { %v3579_v46 = vsub.f32 %v3565_v36, %v3577_v41 }
0x1c86   :  { %v3578_v47 = vsub.f32 %v3564_v37, %v3576_v44 }
0x1c87   :  { %v3581_v50 = vmul.f32 %v3579_v46, %v3579_v46 }
0x1c88   :  { %v3580_v48 = vmul.f32 %v3578_v47, %v3578_v47 }
0x1c89   :  { %v3585_v51 = vsel %vm175_vm0, %v3581_v50, 0.0 }
0x1c8a   :  { %v3582_v49 = vsel %vm175_vm0, %v3580_v48, 0.0 }
0x1c8b   :  { %3583 = vadd.xlane.f32.xlu0 %v3582_v49  ;;  %v17750_v49 = vld [vmem:[%s17747_s15] sm:$0xff] }
0x1c8f   :  { %3586 = vadd.xlane.f32.xlu0 %v3585_v51 }
0x1d18   :  { %v3584_v2 = vpop.xlane.xlu0 %3583 }
0x1d19   :  { %v3588_v3 = vmul.f32 0.03125, %v3584_v2 }
0x1d1b   :  { %v3590_v57 = vadd.f32 1e-05, %v3588_v3 }
0x1d1c   :  { %v3587_v43 = vpop.xlane.xlu0 %3586 }
0x1d1d   :  { %16859 = vrsqrt.f32 %v3590_v57  ;;  %v3589_v4 = vmul.f32 0.03125, %v3587_v43 }
0x1d1f   :  { %v3591_v6 = vadd.f32 1e-05, %v3589_v4 }
0x1d21   :  { %16861 = vrsqrt.f32 %v3591_v6 }
0x1d27   :  { %v16860_v9 = vpop.eup %16859 }
0x1d28   :  { %v3594_v11 = vmul.f32 %v16860_v9, %v3578_v47 }
0x1d2a   :  { %v3602_v15 = vmul.f32 %v14646_v10, %v3594_v11 }
0x1d2b   :  { %v16862_v16 = vpop.eup %16861 }
0x1d2c   :  { %v3595_v18 = vmul.f32 %v16862_v16, %v3579_v46  ;;  %v17685_v19 = vadd.f32 %v14647_v14, %v3602_v15 }
0x1d2e   :  { %v3603_v23 = vmul.f32 %v14646_v10, %v3595_v18  ;;  %15688 = vmatprep.mubr.msk.f32.mxu1 %vm175_vm0, %v17685_v19 }
0x1d30   :  { %v17691_v24 = vadd.f32 %v14647_v14, %v3603_v23 }
0x1d32   :  { %15689 = vmatmul.mubr.msk.f32.vlgmr.msra.gmra.mrb[42].mxu1 %vm175_vm0, %v17691_v24 }
0x1d33   :  { %16539 = vmatpush3.bf16.msra.mxu1 %v16536_v17  ;;  %15718 = vmatprep.mubr.msk.f32.mxu1 %vm175_vm0, %v17693_v27 }
0x1d34   :  { %16541 = vmatprep.subr.bf16.mxu1 %v16540_v25 }
0x1d37   :  { %16543 = vmatpush3.bf16.msra.mxu1 %v16540_v25 }
0x1d38   :  { %15721 = vmatprep.subr.mxu1 %v17108_v8 }
0x1d3a   :  { %15719 = vmatmul.mubr.msk.f32.vlgmr.msra.gmra.mrb[44].mxu1 %vm175_vm0, %v17699_v28 }
0x1d3b   :  { %15723 = vmatprep.mubr.msk.f32.mxu1 %vm17110_vm1, %v17108_v8 }
0x1e05   :  { %v15690_v20 = vpop.f32.mrb[42].mxu1 }
0x1e06   :  { %v3703_v33 = vadd.f32 %v15690_v20, %v14653_v29  ;;  %v3697_v34 = vpop.f32.mrb[43].mxu1 }
0x1e07   :  { %v3698_v35 = vadd.f32 %v14653_v29, %v3697_v34 }
0x1e08   :  { %v3707_v37 = vmax.f32 %v3703_v33, 0.0 }
0x1e09   :  { %v3706_v36 = vmax.f32 %v3698_v35, 0.0 }
0x1e0b   :  { %15707 = vmatprep.mubr.msk.f32.mxu0 %vm1884_vm5, %v3706_v36 }
0x1e0c   :  { %15708 = vmatmul.mubr.msk.f32.vlgmr.msra.gmra.mrb[34].mxu0 %vm1884_vm5, %v3707_v37 }
0x1e0d   :  { %v15720_v7 = vpop.f32.mrb[44].mxu1  ;;  %15733 = vmatprep.mubr.msk.f32.mxu0 %vm17110_vm1, %v17108_v8 }
0x1e0e   :  { %v17720_v39 = vadd.f32 %v15720_v7, %v14672_v38  ;;  %v3939_v41 = vpop.f32.mrb[45].mxu1 }
0x1e0f   :  { %v17722_v42 = vadd.f32 %v14672_v38, %v3939_v41 }
0x1e10   :  { %4026 = vrot.lane.b32.xlu0 %v17720_v39, %s19177_s14 }
0x1e11   :  { %3949 = vrot.lane.b32.xlu1 %v17722_v42, %s19177_s14 }
0x1e82   :  { %v4027_v46 = vpop.permute.xlu0 %4026 }
0x1e83   :  { %v3950_v44 = vpop.permute.xlu1 %3949 }
0x1e84   :  { %15722 = vmatpush3.xpose.msk.msra.mxu1 %vm260_vm2, %v3950_v44 }
0x1e85   :  { %15726 = vmatprep.subr.mxu1 %v17108_v8 }
0x1e87   :  { %15724 = vmatmul.mubr.msk.f32.vlgmr.msra.gmra.mrb[46].mxu1 %vm260_vm2, %v17722_v42 }
0x1e88   :  { %15727 = vmatpush3.xpose.msk.msra.mxu1 %vm260_vm2, %v4027_v46  ;;  %15728 = vmatprep.mubr.msk.f32.mxu1 %vm17110_vm1, %v17108_v8 }
0x1e89   :  { %15736 = vmatprep.subr.mxu1 %v17108_v8 }
0x1e8b   :  { %15729 = vmatmul.mubr.msk.f32.vlgmr.msra.gmra.mrb[48].mxu1 %vm260_vm2, %v17720_v39 }
0x1e8c   :  { %15738 = vmatprep.mubr.msk.f32.mxu1 %vm17110_vm1, %v17108_v8 }
0x1edf   :  { %v17740_v47 = vpop.f32.mrb[34].mxu0 }
0x1ee0   :  { %v17742_v48 = vpop.f32.mrb[35].mxu0 }
0x1f5a   :  { %v4021_v50 = vpop.f32.mrb[46].mxu1 }
0x1f5b   :  { %v4102_v51 = vmul.f32 0.35355338, %v4021_v50  ;;  %v15725_v52 = vpop.f32.mrb[47].mxu1 }
0x1f5d   :  { %v4104_v53 = vadd.f32 %v4102_v51, %v17750_v49 }
0x1f5e   :  { %v4098_v26 = vpop.f32.mrb[48].mxu1 }
0x1f5f   :  { %v4103_v56 = vmul.f32 0.35355338, %v4098_v26  ;;  %v15730_v58 = vpop.f32.mrb[49].mxu1  ;;  %v4106_v32 = vsel %vm260_vm2, %v4104_v53, -inf }
0x1f60   :  { %4107 = vmax.xlane.f32.xlu1 %v4106_v32 }
0x1f61   :  { %v4105_v59 = vadd.f32 %v4103_v56, %v17754_v54 }
0x1f63   :  { %v4109_v17 = vsel %vm260_vm2, %v4105_v59, -inf }
0x1f64   :  { %4110 = vmax.xlane.f32.xlu0 %v4109_v17 }
0x1f71   :  { %4128 = vrot.lane.b32.xlu1 %v17722_v42, %s19161_s19 }
0x1f75   :  { %4282 = vrot.lane.b32.xlu1 %v17722_v42, %s19175_s20 }
0x1f79   :  { %4360 = vrot.lane.b32.xlu1 %v17720_v39, %s19175_s20 }
0x1f7a   :  { %4204 = vrot.lane.b32.xlu0 %v17720_v39, %s19161_s19  ;;  %s17964_s19 = sld [smem:[%s19150_s0 + %s17144_s11]]  }
0x1fed   :  { %v4108_v61 = vpop.xlane.xlu1 %4107 }
0x1fee   :  { %v4112_v45 = vsub.f32 %v4104_v53, %v4108_v61 }
0x1ff0   :  { %v4114_v60 = vmul.f32 1.442695, %v4112_v45 }
0x1ff1   :  { %v4129_v22 = vpop.permute.xlu1 %4128  ;;  %v4111_v62 = vpop.xlane.xlu0 %4110 }
0x1ff2   :  { %16863 = vpow2.f32 %v4114_v60  ;;  %v4113_v63 = vsub.f32 %v4105_v59, %v4111_v62  ;;  %15732 = vmatpush3.msra.mxu0 %v4129_v22 }
0x1ff3   :  { %15741 = vmatprep.subr.mxu0 %v17108_v8 }
0x1ff4   :  { %v4116_v55 = vmul.f32 1.442695, %v4113_v63 }
0x1ff5   :  { %v4205_v0 = vpop.permute.xlu0 %4204  ;;  %v4283_v43 = vpop.permute.xlu1 %4282 }
0x1ff6   :  { %16865 = vpow2.f32 %v4116_v55  ;;  %15737 = vmatpush3.msra.mxu1 %v4205_v0 }
0x1ff7   :  { %15746 = vmatprep.subr.mxu1 %v17108_v8 }
0x1ff9   :  { %v4361_v4 = vpop.permute.xlu1 %4360 }
0x1ffc   :  { %v16864_v1 = vpop.eup %16863 }
0x1ffd   :  { %v4118_v2 = vsel %vm260_vm2, %v16864_v1, 0.0 }
0x1ffe   :  { %4119 = vadd.xlane.f32.xlu1 %v4118_v2 }
0x2000   :  { %v16866_v3 = vpop.eup %16865 }
0x2001   :  { %v4121_v57 = vsel %vm260_vm2, %v16866_v3, 0.0 }
0x2002   :  { %4122 = vadd.xlane.f32.xlu0 %v4121_v57 }
0x200f   :  { %4358 = vrot.lane.b32.xlu1 %v17720_v39, %s19173_s21 }
0x2018   :  { %4280 = vrot.lane.b32.xlu0 %v17722_v42, %s19173_s21 }
0x208b   :  { %v4120_v6 = vpop.xlane.xlu1 %4119 }
0x208c   :  { %16867 = vrcp.f32 %v4120_v6 }
0x208f   :  { %v4123_v9 = vpop.xlane.xlu0 %4122  ;;  %v4359_v18 = vpop.permute.xlu1 %4358 }
0x2090   :  { %16869 = vrcp.f32 %v4123_v9 }
0x2093   :  { %v4281_v16 = vpop.permute.xlu0 %4280 }
0x2096   :  { %v16868_v10 = vpop.eup %16867 }
0x2097   :  { %v4126_v11 = vmul.f32 %v16868_v10, %v16864_v1 }
0x2099   :  { %15734 = vmatmul.mubr.msk.f32.vlgmr.msra.gmra.mrb[36].mxu0 %vm260_vm2, %v4126_v11 }
0x209a   :  { %v16870_v14 = vpop.eup %16869  ;;  %15742 = vmatpush3.xpose.msk.msra.mxu0 %vm260_vm2, %v4283_v43  ;;  %15743 = vmatprep.mubr.msk.f32.mxu0 %vm17110_vm1, %v17108_v8 }
0x209b   :  { %v4127_v15 = vmul.f32 %v16870_v14, %v16866_v3  ;;  %15751 = vmatprep.subr.mxu0 %v17108_v8 }
0x209d   :  { %15739 = vmatmul.mubr.msk.f32.vlgmr.msra.gmra.mrb[50].mxu1 %vm260_vm2, %v4127_v15  ;;  %15744 = vmatmul.mubr.msk.f32.vlgmr.msra.gmra.mrb[38].mxu0 %vm260_vm2, %v4281_v16 }
0x209e   :  { %15747 = vmatpush3.xpose.msk.msra.mxu1 %vm260_vm2, %v4361_v4  ;;  %15748 = vmatprep.mubr.msk.f32.mxu1 %vm17110_vm1, %v17108_v8 }
0x209f   :  { %15756 = vmatprep.subr.mxu1 %v17108_v8  ;;  %15753 = vmatprep.mubr.msk.f32.mxu0 %vm17110_vm1, %v17108_v8 }
0x20a1   :  { %15749 = vmatmul.mubr.msk.f32.vlgmr.msra.gmra.mrb[52].mxu1 %vm260_vm2, %v4359_v18 }
0x20a2   :  { %15758 = vmatprep.mubr.msk.f32.mxu1 %vm17110_vm1, %v17108_v8 }
0x216c   :  { %v17791_v21 = vpop.f32.mrb[36].mxu0 }
0x216d   :  { %v15735_v5 = vpop.f32.mrb[37].mxu0 }
0x2170   :  { %v17793_v23 = vpop.f32.mrb[50].mxu1  ;;  %v4354_v25 = vpop.f32.mrb[38].mxu0 }
0x2171   :  { %v4436_v30 = vmul.f32 0.35355338, %v4354_v25  ;;  %v15740_v31 = vpop.f32.mrb[51].mxu1  ;;  %v15745_v12 = vpop.f32.mrb[39].mxu0 }
0x2173   :  { %v4438_v29 = vadd.f32 %v4436_v30, %v17750_v49 }
0x2174   :  { %v4432_v20 = vpop.f32.mrb[52].mxu1 }
0x2175   :  { %v4437_v33 = vmul.f32 0.35355338, %v4432_v20  ;;  %v15750_v34 = vpop.f32.mrb[53].mxu1  ;;  %v4440_v35 = vsel %vm260_vm2, %v4438_v29, -inf }
0x2176   :  { %4441 = vmax.xlane.f32.xlu0 %v4440_v35 }
0x2177   :  { %v4439_v36 = vadd.f32 %v4437_v33, %v17754_v54 }
0x2179   :  { %v4443_v37 = vsel %vm260_vm2, %v4439_v36, -inf }
0x217a   :  { %4444 = vmax.xlane.f32.xlu1 %v4443_v37 }
0x218b   :  { %4462 = vrot.lane.b32.xlu1 %v17722_v42, %s19159_s22 }
0x218c   :  { %4538 = vrot.lane.b32.xlu0 %v17720_v39, %s19159_s22  ;;  %s17145_s22 = smov 21  }
0x218d   :  { %s17986_s2 = sld [smem:[%s19150_s0 + %s17145_s22]]  }
0x218e   :  { %s18148_s22 = sld [smem:[%s19150_s0 + %s19196_s5]]  }
0x218f   :  { %4616 = vrot.lane.b32.xlu1 %v17722_v42, %s19171_s24 }
0x2193   :  { %4694 = vrot.lane.b32.xlu1 %v17720_v39, %s19171_s24 }
0x2197   :  { %4692 = vrot.lane.b32.xlu1 %v17720_v39, %s19169_s23 }
0x2203   :  { %v4442_v38 = vpop.xlane.xlu0 %4441 }
0x2204   :  { %v4446_v7 = vsub.f32 %v4438_v29, %v4442_v38 }
0x2206   :  { %v4448_v41 = vmul.f32 1.442695, %v4446_v7 }
0x2207   :  { %v4445_v44 = vpop.xlane.xlu1 %4444  ;;  %v4539_v46 = vpop.permute.xlu0 %4538 }
0x2208   :  { %16871 = vpow2.f32 %v4448_v41  ;;  %v4447_v50 = vsub.f32 %v4439_v36, %v4445_v44  ;;  %15757 = vmatpush3.msra.mxu1 %v4539_v46 }
0x2209   :  { %15766 = vmatprep.subr.mxu1 %v17108_v8 }
0x220a   :  { %v4450_v51 = vmul.f32 1.442695, %v4447_v50 }
0x220b   :  { %v4463_v52 = vpop.permute.xlu1 %4462 }
0x220c   :  { %16873 = vpow2.f32 %v4450_v51  ;;  %15752 = vmatpush3.msra.mxu0 %v4463_v52 }
0x220d   :  { %15761 = vmatprep.subr.mxu0 %v17108_v8 }
0x220f   :  { %v4617_v17 = vpop.permute.xlu1 %4616 }
0x2212   :  { %v16872_v53 = vpop.eup %16871 }
0x2213   :  { %v4452_v26 = vsel %vm260_vm2, %v16872_v53, 0.0  ;;  %v4695_v22 = vpop.permute.xlu1 %4694 }
0x2214   :  { %4453 = vadd.xlane.f32.xlu0 %v4452_v26 }
0x2216   :  { %v16874_v56 = vpop.eup %16873 }
0x2217   :  { %v4455_v58 = vsel %vm260_vm2, %v16874_v56, 0.0  ;;  %v4693_v55 = vpop.permute.xlu1 %4692 }
0x2218   :  { %4456 = vadd.xlane.f32.xlu0 %v4455_v58 }
0x222e   :  { %4614 = vrot.lane.b32.xlu0 %v17722_v42, %s19169_s23 }
0x22a1   :  { %v4454_v32 = vpop.xlane.xlu0 %4453 }
0x22a2   :  { %16875 = vrcp.f32 %v4454_v32 }
0x22a5   :  { %v4457_v59 = vpop.xlane.xlu0 %4456 }
0x22a6   :  { %16877 = vrcp.f32 %v4457_v59 }
0x22a9   :  { %v4615_v63 = vpop.permute.xlu0 %4614 }
0x22ac   :  { %v16876_v61 = vpop.eup %16875 }
0x22ad   :  { %v4460_v45 = vmul.f32 %v16876_v61, %v16872_v53 }
0x22af   :  { %15754 = vmatmul.mubr.msk.f32.vlgmr.msra.gmra.mrb[40].mxu0 %vm260_vm2, %v4460_v45 }
0x22b0   :  { %v16878_v60 = vpop.eup %16877  ;;  %15762 = vmatpush3.xpose.msk.msra.mxu0 %vm260_vm2, %v4617_v17  ;;  %15763 = vmatprep.mubr.msk.f32.mxu0 %vm17110_vm1, %v17108_v8 }
0x22b1   :  { %v4461_v62 = vmul.f32 %v16878_v60, %v16874_v56  ;;  %15771 = vmatprep.subr.mxu0 %v17108_v8 }
0x22b3   :  { %15759 = vmatmul.mubr.msk.f32.vlgmr.msra.gmra.mrb[54].mxu1 %vm260_vm2, %v4461_v62  ;;  %15764 = vmatmul.mubr.msk.f32.vlgmr.msra.gmra.mrb[42].mxu0 %vm260_vm2, %v4615_v63 }
0x22b4   :  { %15767 = vmatpush3.xpose.msk.msra.mxu1 %vm260_vm2, %v4695_v22  ;;  %15768 = vmatprep.mubr.msk.f32.mxu1 %vm17110_vm1, %v17108_v8 }
0x22b5   :  { %15776 = vmatprep.subr.mxu1 %v17108_v8  ;;  %15773 = vmatprep.mubr.msk.f32.mxu0 %vm17110_vm1, %v17108_v8 }
0x22b7   :  { %15769 = vmatmul.mubr.msk.f32.vlgmr.msra.gmra.mrb[56].mxu1 %vm260_vm2, %v4693_v55 }
0x22b8   :  { %15778 = vmatprep.mubr.msk.f32.mxu1 %vm17110_vm1, %v17108_v8 }
0x2382   :  { %v17831_v0 = vpop.f32.mrb[40].mxu0 }
0x2383   :  { %v15755_v1 = vpop.f32.mrb[41].mxu0 }
0x2386   :  { %v17833_v2 = vpop.f32.mrb[54].mxu1  ;;  %v4688_v3 = vpop.f32.mrb[42].mxu0 }
0x2387   :  { %v4770_v57 = vmul.f32 0.35355338, %v4688_v3  ;;  %v15760_v43 = vpop.f32.mrb[55].mxu1  ;;  %v15765_v4 = vpop.f32.mrb[43].mxu0 }
0x2389   :  { %v4772_v6 = vadd.f32 %v4770_v57, %v17750_v49 }
0x238a   :  { %v4766_v9 = vpop.f32.mrb[56].mxu1 }
0x238b   :  { %v4771_v10 = vmul.f32 0.35355338, %v4766_v9  ;;  %v15770_v11 = vpop.f32.mrb[57].mxu1  ;;  %v4774_v14 = vsel %vm260_vm2, %v4772_v6, -inf }
0x238c   :  { %4775 = vmax.xlane.f32.xlu0 %v4774_v14 }
0x238d   :  { %v4773_v15 = vadd.f32 %v4771_v10, %v17754_v54 }
0x238f   :  { %v4777_v16 = vsel %vm260_vm2, %v4773_v15, -inf }
0x2390   :  { %4778 = vmax.xlane.f32.xlu1 %v4777_v16 }
0x23a1   :  { %4796 = vrot.lane.b32.xlu1 %v17722_v42, %s19157_s25 }
0x23a2   :  { %4872 = vrot.lane.b32.xlu0 %v17720_v39, %s19157_s25  ;;  %s17146_s25 = smov 25  }
0x23a3   :  { %s18169_s11 = sld [smem:[%s19150_s0 + %s17146_s25]]   ;;  %s17147_s25 = smov 26  }
0x23a5   :  { %4950 = vrot.lane.b32.xlu1 %v17722_v42, %s19167_s26 }
0x23a9   :  { %5028 = vrot.lane.b32.xlu1 %v17720_v39, %s19167_s26 }
0x23ad   :  { %5026 = vrot.lane.b32.xlu1 %v17720_v39, %s19165_s27 }
0x2419   :  { %v4776_v18 = vpop.xlane.xlu0 %4775 }
0x241a   :  { %v4780_v5 = vsub.f32 %v4772_v6, %v4776_v18 }
0x241c   :  { %v4782_v25 = vmul.f32 1.442695, %v4780_v5 }
0x241d   :  { %v4779_v30 = vpop.xlane.xlu1 %4778  ;;  %v4873_v31 = vpop.permute.xlu0 %4872 }
0x241e   :  { %16879 = vpow2.f32 %v4782_v25  ;;  %v4781_v12 = vsub.f32 %v4773_v15, %v4779_v30  ;;  %15777 = vmatpush3.msra.mxu1 %v4873_v31  ;;  %v5313_v25 = vld [vmem:[%s17892_s9 + $0x8] sm:$0xff]  ;;  %v5314_v31 = vld [vmem:[%s17892_s9 + $0x10] sm:$0xff] }
0x241f   :  { %15786 = vmatprep.subr.mxu1 %v17108_v8 }
0x2420   :  { %v4784_v29 = vmul.f32 1.442695, %v4781_v12  ;;  %v5315_v12 = vld [vmem:[%s17892_s9 + $0x18] sm:$0xff] }
0x2421   :  { %v4797_v20 = vpop.permute.xlu1 %4796 }
0x2422   :  { %16881 = vpow2.f32 %v4784_v29  ;;  %15772 = vmatpush3.msra.mxu0 %v4797_v20  ;;  %v16548_v29 = vpack.c.bf16 %v5315_v12, %v5314_v31  ;;  %v5542_v20 = vld [vmem:[%s17899_s8] sm:$0xff] }
0x2423   :  { %15781 = vmatprep.subr.mxu0 %v17108_v8 }
0x2425   :  { %v4951_v7 = vpop.permute.xlu1 %4950 }
0x2428   :  { %v16880_v33 = vpop.eup %16879 }
0x2429   :  { %v4786_v34 = vsel %vm260_vm2, %v16880_v33, 0.0  ;;  %v5029_v50 = vpop.permute.xlu1 %5028 }
0x242a   :  { %4787 = vadd.xlane.f32.xlu0 %v4786_v34 }
0x242c   :  { %v16882_v35 = vpop.eup %16881 }
0x242d   :  { %v4789_v36 = vsel %vm260_vm2, %v16882_v35, 0.0  ;;  %v5027_v53 = vpop.permute.xlu1 %5026 }
0x242e   :  { %4790 = vadd.xlane.f32.xlu0 %v4789_v36 }
0x2444   :  { %4948 = vrot.lane.b32.xlu0 %v17722_v42, %s19165_s27 }
0x24b7   :  { %v4788_v37 = vpop.xlane.xlu0 %4787 }
0x24b8   :  { %16883 = vrcp.f32 %v4788_v37 }
0x24bb   :  { %v4791_v38 = vpop.xlane.xlu0 %4790 }
0x24bc   :  { %16885 = vrcp.f32 %v4791_v38 }
0x24bf   :  { %v4949_v52 = vpop.permute.xlu0 %4948 }
0x24c2   :  { %v16884_v41 = vpop.eup %16883 }
0x24c3   :  { %v4794_v44 = vmul.f32 %v16884_v41, %v16880_v33  ;;  %v5543_v33 = vld [vmem:[%s17899_s8 + $0x8] sm:$0xff] }
0x24c4   :  { %v16560_v34 = vpack.c.bf16 %v5543_v33, %v5542_v20  ;;  %v14702_v33 = vld [vmem:[%s17959_s7] ss:$0 sm:$0xff] }
0x24c5   :  { %15774 = vmatmul.mubr.msk.f32.vlgmr.msra.gmra.mrb[44].mxu0 %vm260_vm2, %v4794_v44 }
0x24c6   :  { %v16886_v46 = vpop.eup %16885  ;;  %15782 = vmatpush3.xpose.msk.msra.mxu0 %vm260_vm2, %v4951_v7  ;;  %15783 = vmatprep.mubr.msk.f32.mxu0 %vm17110_vm1, %v17108_v8 }
0x24c7   :  { %v4795_v51 = vmul.f32 %v16886_v46, %v16882_v35  ;;  %15791 = vmatprep.subr.mxu0 %v17108_v8 }
0x24c9   :  { %15779 = vmatmul.mubr.msk.f32.vlgmr.msra.gmra.mrb[58].mxu1 %vm260_vm2, %v4795_v51  ;;  %15784 = vmatmul.mubr.msk.f32.vlgmr.msra.gmra.mrb[46].mxu0 %vm260_vm2, %v4949_v52 }
0x24ca   :  { %15787 = vmatpush3.xpose.msk.msra.mxu1 %vm260_vm2, %v5029_v50  ;;  %15788 = vmatprep.mubr.msk.f32.mxu1 %vm17110_vm1, %v17108_v8 }
0x24cb   :  { %15796 = vmatprep.subr.mxu1 %v17108_v8  ;;  %15793 = vmatprep.mubr.msk.f32.mxu0 %vm17110_vm1, %v17108_v8 }
0x24cd   :  { %15789 = vmatmul.mubr.msk.f32.vlgmr.msra.gmra.mrb[60].mxu1 %vm260_vm2, %v5027_v53 }
0x24ce   :  { %15798 = vmatprep.mubr.msk.f32.mxu1 %vm17110_vm1, %v17108_v8 }
0x2598   :  { %v4868_v26 = vpop.f32.mrb[44].mxu0 }
0x2599   :  { %v15775_v56 = vpop.f32.mrb[45].mxu0 }
0x259a   :  { %v5545_v56 = vld [vmem:[%s17899_s8 + $0x18] sm:$0xff] }
0x259c   :  { %v4944_v58 = vpop.f32.mrb[58].mxu1  ;;  %v5022_v32 = vpop.f32.mrb[46].mxu0 }
0x259d   :  { %v5104_v59 = vmul.f32 0.35355338, %v5022_v32  ;;  %v15780_v17 = vpop.f32.mrb[59].mxu1  ;;  %v15785_v61 = vpop.f32.mrb[47].mxu0 }
0x259f   :  { %v5106_v45 = vadd.f32 %v5104_v59, %v17750_v49 }
0x25a0   :  { %v5100_v60 = vpop.f32.mrb[60].mxu1 }
0x25a1   :  { %v5105_v22 = vmul.f32 0.35355338, %v5100_v60  ;;  %v15790_v62 = vpop.f32.mrb[61].mxu1  ;;  %v5108_v63 = vsel %vm260_vm2, %v5106_v45, -inf }
0x25a2   :  { %5109 = vmax.xlane.f32.xlu0 %v5108_v63 }
0x25a3   :  { %v5107_v55 = vadd.f32 %v5105_v22, %v17754_v54 }
0x25a5   :  { %v5111_v1 = vsel %vm260_vm2, %v5107_v55, -inf }
0x25a6   :  { %5112 = vmax.xlane.f32.xlu1 %v5111_v1 }
0x25b7   :  { %5130 = vrot.lane.b32.xlu1 %v17722_v42, %s19155_s28 }
0x25bb   :  { %5284 = vrot.lane.b32.xlu1 %v17831_v0, %s19163_s29 }
0x25bf   :  { %5286 = vrot.lane.b32.xlu1 %v17833_v2, %s19163_s29 }
0x25c3   :  { %5294 = vrot.lane.b32.xlu1 %v4944_v58, %s19195_s13 }
0x262f   :  { %v5110_v49 = vpop.xlane.xlu0 %5109 }
0x2630   :  { %v5114_v3 = vsub.f32 %v5106_v45, %v5110_v49 }
0x2632   :  { %v5116_v57 = vmul.f32 1.442695, %v5114_v3 }
0x2633   :  { %v5113_v43 = vpop.xlane.xlu1 %5112 }
0x2634   :  { %16887 = vpow2.f32 %v5116_v57  ;;  %v5115_v54 = vsub.f32 %v5107_v55, %v5113_v43 }
0x2636   :  { %v5118_v4 = vmul.f32 1.442695, %v5115_v54 }
0x2637   :  { %v5131_v6 = vpop.permute.xlu1 %5130 }
0x2638   :  { %16889 = vpow2.f32 %v5118_v4  ;;  %15792 = vmatpush3.msra.mxu0 %v5131_v6 }
0x263b   :  { %v5285_v7 = vpop.permute.xlu1 %5284 }
0x263c   :  { %v5306_v46 = vsel %vm260_vm2, %v17791_v21, %v5285_v7  ;;  %v14699_v21 = vld [vmem:[%s17929_s12] ss:$0 sm:$0xff] }
0x263e   :  { %v16888_v9 = vpop.eup %16887 }
0x263f   :  { %v5120_v42 = vsel %vm260_vm2, %v16888_v9, 0.0  ;;  %v5287_v41 = vpop.permute.xlu1 %5286 }
0x2640   :  { %5121 = vadd.xlane.f32.xlu0 %v5120_v42  ;;  %v5307_v58 = vsel %vm260_vm2, %v17793_v23, %v5287_v41 }
0x2642   :  { %v16890_v0 = vpop.eup %16889 }
0x2643   :  { %v5123_v10 = vsel %vm260_vm2, %v16890_v0, 0.0  ;;  %v5295_v50 = vpop.permute.xlu1 %5294 }
0x2644   :  { %5124 = vadd.xlane.f32.xlu0 %v5123_v10  ;;  %v5309_v32 = vsel %vm1630_vm4, %v5307_v58, %v5295_v50  ;;  %v14704_v50 = vld [vmem:[%s17986_s2] ss:$0 sm:$0xff] }
0x265a   :  { %5206 = vrot.lane.b32.xlu0 %v17720_v39, %s19155_s28  ;;  %v5312_v39 = vld [vmem:[%s17892_s9] sm:$0xff]  ;;  %s17935_s28 = sld [smem:[%s19150_s0 + %s17141_s17]]  }
0x265b   :  { %v16544_v30 = vpack.c.bf16 %v5313_v25, %v5312_v39  ;;  %s17949_s17 = sld [smem:[%s19150_s0 + %s17142_s10]]   ;;  %s17150_s10 = smov 33  }
0x265d   :  { %16545 = vmatprep.subr.bf16.mxu0 %v16544_v30 }
0x265e   :  { %5292 = vrot.lane.b32.xlu0 %v4868_v26, %s19195_s13  ;;  %v5544_v26 = vld [vmem:[%s17899_s8 + $0x10] sm:$0xff] }
0x265f   :  { %v16564_v17 = vpack.c.bf16 %v5545_v56, %v5544_v26 }
0x2660   :  { %v14707_v1 = vld [vmem:[%s17935_s28] ss:$0 sm:$0xff] }
0x26cd   :  { %v5122_v2 = vpop.xlane.xlu0 %5121 }
0x26ce   :  { %16891 = vrcp.f32 %v5122_v2 }
0x26d1   :  { %v5125_v11 = vpop.xlane.xlu0 %5124 }
0x26d2   :  { %16893 = vrcp.f32 %v5125_v11  ;;  %v5450_v11 = vld [vmem:[%s17949_s17] sm:$0xff] }
0x26d5   :  { %v5207_v14 = vpop.permute.xlu0 %5206 }
0x26d6   :  { %15797 = vmatpush3.msra.mxu1 %v5207_v14  ;;  %v5451_v14 = vld [vmem:[%s17949_s17 + $0x8] sm:$0xff] }
0x26d8   :  { %v16892_v15 = vpop.eup %16891 }
0x26d9   :  { %v5128_v16 = vmul.f32 %v16892_v15, %v16888_v9  ;;  %v5293_v44 = vpop.permute.xlu0 %5292  ;;  %v5452_v15 = vld [vmem:[%s17949_s17 + $0x10] sm:$0xff] }
0x26da   :  { %v5308_v51 = vsel %vm1630_vm4, %v5306_v46, %v5293_v44 }
0x26db   :  { %15794 = vmatmul.mubr.msk.f32.vlgmr.msra.gmra.mrb[48].mxu0 %vm260_vm2, %v5128_v16  ;;  %v16552_v16 = vpack.c.bf16 %v5451_v14, %v5450_v11 }
0x26dc   :  { %v16894_v18 = vpop.eup %16893  ;;  %16547 = vmatpush3.bf16.msra.mxu0 %v16544_v30 }
0x26dd   :  { %v5129_v5 = vmul.f32 %v16894_v18, %v16890_v0  ;;  %16549 = vmatprep.subr.bf16.mxu0 %v16548_v29  ;;  %v5453_v18 = vld [vmem:[%s17949_s17 + $0x18] sm:$0xff]  ;;  %16553 = vmatprep.subr.bf16.mxu1 %v16552_v16 }
0x26df   :  { %15799 = vmatmul.mubr.msk.f32.vlgmr.msra.gmra.mrb[62].mxu1 %vm260_vm2, %v5129_v5  ;;  %v16556_v5 = vpack.c.bf16 %v5453_v18, %v5452_v15 }
0x26e0   :  { %16551 = vmatpush3.bf16.msra.mxu0 %v16548_v29  ;;  %16555 = vmatpush3.bf16.msra.mxu1 %v16552_v16 }
0x26e1   :  { %16561 = vmatprep.subr.bf16.mxu0 %v16560_v34  ;;  %16557 = vmatprep.subr.bf16.mxu1 %v16556_v5 }
0x26e4   :  { %16559 = vmatpush3.bf16.msra.mxu1 %v16556_v5 }
0x26e5   :  { %15834 = vmatprep.subr.mxu1 %v17108_v8 }
0x27ae   :  { %v5202_v35 = vpop.f32.mrb[48].mxu0 }
0x27af   :  { %5300 = vrot.lane.b32.xlu0 %v5202_v35, %s19196_s5  ;;  %v15795_v36 = vpop.f32.mrb[49].mxu0  ;;  %v14703_v35 = vld [vmem:[%s17964_s19] ss:$0 sm:$0xff] }
0x27b2   :  { %v5278_v37 = vpop.f32.mrb[62].mxu1 }
0x27b3   :  { %5302 = vrot.lane.b32.xlu1 %v5278_v37, %s19196_s5  ;;  %v15800_v38 = vpop.f32.mrb[63].mxu1 }
0x2821   :  { %v5301_v52 = vpop.permute.xlu0 %5300 }
0x2822   :  { %v5310_v53 = vsel %vm1633_vm3, %v5308_v51, %v5301_v52 }
0x2823   :  { %15809 = vmatprep.mubr.msk.f32.mxu0 %vm175_vm0, %v5310_v53 }
0x2825   :  { %v5303_v59 = vpop.permute.xlu1 %5302 }
0x2826   :  { %v5311_v61 = vsel %vm1633_vm3, %v5309_v32, %v5303_v59  ;;  %v18005_v59 = vld [vmem:[%s17218_s18] ss:$0 sm:$0xff] }
0x2827   :  { %15810 = vmatmul.mubr.msk.f32.vlgmr.msra.gmra.mrb[50].mxu0 %vm175_vm0, %v5311_v61 }
0x2828   :  { %16563 = vmatpush3.bf16.msra.mxu0 %v16560_v34  ;;  %15831 = vmatprep.mubr.msk.f32.mxu0 %vm175_vm0, %v17468_v40 }
0x2829   :  { %16565 = vmatprep.subr.bf16.mxu0 %v16564_v17 }
0x282c   :  { %16567 = vmatpush3.bf16.msra.mxu0 %v16564_v17 }
0x282d   :  { %15844 = vmatprep.subr.mxu0 %v17108_v8 }
0x282f   :  { %15832 = vmatmul.mubr.msk.f32.vlgmr.msra.gmra.mrb[52].mxu0 %vm175_vm0, %v17470_v13 }
0x2830   :  { %15846 = vmatprep.mubr.msk.f32.mxu0 %vm17110_vm1, %v17108_v8 }
0x28fa   :  { %v15811_v23 = vpop.f32.mrb[50].mxu0 }
0x28fb   :  { %v5401_v45 = vadd.f32 %v15811_v23, %v14699_v21  ;;  %v5395_v60 = vpop.f32.mrb[51].mxu0 }
0x28fc   :  { %v5396_v22 = vadd.f32 %v14699_v21, %v5395_v60  ;;  %v18010_v60 = vld [vmem:[%s17218_s18 + $0x1] ss:$0 sm:$0xff] }
0x28fd   :  { %v5405_v62 = vadd.f32 %v5401_v45, %v17699_v28 }
0x28fe   :  { %v5404_v63 = vadd.f32 %v5396_v22, %v17693_v27 }
0x28ff   :  { %v5411_v55 = vsel %vm175_vm0, %v5405_v62, 0.0 }
0x2900   :  { %5412 = vadd.xlane.f32.xlu1 %v5411_v55  ;;  %v5408_v49 = vsel %vm175_vm0, %v5404_v63, 0.0 }
0x2901   :  { %5409 = vadd.xlane.f32.xlu0 %v5408_v49 }
0x2902   :  { %v15833_v3 = vpop.f32.mrb[52].mxu0 }
0x2903   :  { %v17942_v57 = vadd.f32 %v15833_v3, %v14707_v1  ;;  %v5619_v43 = vpop.f32.mrb[53].mxu0 }
0x2904   :  { %v17974_v46 = vadd.f32 %v14707_v1, %v5619_v43 }
0x298d   :  { %v5413_v54 = vpop.xlane.xlu1 %5412 }
0x298e   :  { %v5415_v4 = vmul.f32 0.03125, %v5413_v54  ;;  %v5410_v6 = vpop.xlane.xlu0 %5409 }
0x298f   :  { %v5414_v9 = vmul.f32 0.03125, %v5410_v6 }
0x2990   :  { %v5417_v42 = vsub.f32 %v5405_v62, %v5415_v4 }
0x2991   :  { %v5416_v0 = vsub.f32 %v5404_v63, %v5414_v9 }
0x2992   :  { %v5419_v10 = vmul.f32 %v5417_v42, %v5417_v42 }
0x2993   :  { %v5418_v28 = vmul.f32 %v5416_v0, %v5416_v0 }
0x2994   :  { %v5423_v2 = vsel %vm175_vm0, %v5419_v10, 0.0 }
0x2995   :  { %v5420_v27 = vsel %vm175_vm0, %v5418_v28, 0.0 }
0x2996   :  { %5421 = vadd.xlane.f32.xlu0 %v5420_v27 }
0x299a   :  { %5424 = vadd.xlane.f32.xlu0 %v5423_v2 }
0x2a23   :  { %v5422_v39 = vpop.xlane.xlu0 %5421 }
0x2a24   :  { %v5426_v25 = vmul.f32 0.03125, %v5422_v39 }
0x2a26   :  { %v5428_v30 = vadd.f32 1e-05, %v5426_v25 }
0x2a27   :  { %v5425_v31 = vpop.xlane.xlu0 %5424 }
0x2a28   :  { %16895 = vrsqrt.f32 %v5428_v30  ;;  %v5427_v12 = vmul.f32 0.03125, %v5425_v31 }
0x2a2a   :  { %v5429_v29 = vadd.f32 1e-05, %v5427_v12 }
0x2a2c   :  { %16897 = vrsqrt.f32 %v5429_v29 }
0x2a32   :  { %v16896_v20 = vpop.eup %16895 }
0x2a33   :  { %v5432_v34 = vmul.f32 %v16896_v20, %v5416_v0 }
0x2a35   :  { %v5440_v36 = vmul.f32 %v14702_v33, %v5432_v34 }
0x2a36   :  { %v16898_v37 = vpop.eup %16897 }
0x2a37   :  { %v5433_v38 = vmul.f32 %v16898_v37, %v5417_v42  ;;  %v17968_v7 = vadd.f32 %v14703_v35, %v5440_v36 }
0x2a39   :  { %v5441_v41 = vmul.f32 %v14702_v33, %v5433_v38  ;;  %15820 = vmatprep.mubr.msk.f32.mxu1 %vm175_vm0, %v17968_v7 }
0x2a3b   :  { %v17972_v44 = vadd.f32 %v14703_v35, %v5441_v41 }
0x2a3d   :  { %15821 = vmatmul.mubr.msk.f32.vlgmr.msra.gmra.mrb[64].mxu1 %vm175_vm0, %v17972_v44 }
0x2a3e   :  { %15835 = vmatpush3.xpose.msk.msra.mxu1 %vm260_vm2, %v17974_v46  ;;  %15836 = vmatprep.mubr.msk.f32.mxu1 %vm17110_vm1, %v17108_v8 }
0x2a3f   :  { %15839 = vmatprep.subr.mxu1 %v17108_v8 }
0x2b10   :  { %v15822_v51 = vpop.f32.mrb[64].mxu1 }
0x2b11   :  { %v5533_v52 = vpop.f32.mrb[65].mxu1  ;;  %v17997_v26 = vadd.f32 %v15822_v51, %v14704_v50 }
0x2b12   :  { %v17989_v53 = vadd.f32 %v14704_v50, %v5533_v52 }
0x2b14   :  { %15837 = vmatmul.mubr.msk.f32.vlgmr.msra.gmra.mrb[66].mxu1 %vm260_vm2, %v17989_v53 }
0x2b15   :  { %15840 = vmatpush3.xpose.msk.msra.mxu1 %vm260_vm2, %v17942_v57  ;;  %15841 = vmatprep.mubr.msk.f32.mxu1 %vm17110_vm1, %v17108_v8 }
0x2b16   :  { %15849 = vmatprep.subr.mxu1 %v17108_v8 }
0x2b18   :  { %15842 = vmatmul.mubr.msk.f32.vlgmr.msra.gmra.mrb[68].mxu1 %vm260_vm2, %v17997_v26 }
0x2b19   :  { %15851 = vmatprep.mubr.msk.f32.mxu1 %vm17110_vm1, %v17108_v8 }
0x2be7   :  { %v5700_v56 = vpop.f32.mrb[66].mxu1 }
0x2be8   :  { %v5780_v58 = vmul.f32 0.35355338, %v5700_v56  ;;  %v15838_v32 = vpop.f32.mrb[67].mxu1 }
0x2bea   :  { %v5782_v17 = vadd.f32 %v18005_v59, %v5780_v58 }
0x2beb   :  { %v5776_v61 = vpop.f32.mrb[68].mxu1 }
0x2bec   :  { %v5781_v21 = vmul.f32 0.35355338, %v5776_v61  ;;  %v15843_v23 = vpop.f32.mrb[69].mxu1  ;;  %v5784_v45 = vsel %vm260_vm2, %v5782_v17, -inf }
0x2bed   :  { %5785 = vmax.xlane.f32.xlu1 %v5784_v45 }
0x2bee   :  { %v5783_v22 = vadd.f32 %v18010_v60, %v5781_v21 }
0x2bf0   :  { %v5787_v62 = vsel %vm260_vm2, %v5783_v22, -inf }
0x2bf1   :  { %5788 = vmax.xlane.f32.xlu0 %v5787_v62 }
0x2bfe   :  { %5806 = vrot.lane.b32.xlu1 %v17974_v46, %s19177_s14 }
0x2c02   :  { %5960 = vrot.lane.b32.xlu1 %v17974_v46, %s19173_s21 }
0x2c06   :  { %6038 = vrot.lane.b32.xlu1 %v17942_v57, %s19173_s21 }
0x2c07   :  { %5882 = vrot.lane.b32.xlu0 %v17942_v57, %s19177_s14  ;;  %s17154_s14 = smov 35  }
0x2c08   :  { %s18248_s1 = sld [smem:[%s19150_s0 + %s17154_s14]]   ;;  %s19200_s14 = smov 96  }
0x2c7a   :  { %v5786_v63 = vpop.xlane.xlu1 %5785 }
0x2c7b   :  { %v5790_v55 = vsub.f32 %v5782_v17, %v5786_v63 }
0x2c7d   :  { %v5792_v1 = vmul.f32 1.442695, %v5790_v55 }
0x2c7e   :  { %v5807_v49 = vpop.permute.xlu1 %5806  ;;  %v5789_v3 = vpop.xlane.xlu0 %5788 }
0x2c7f   :  { %16899 = vpow2.f32 %v5792_v1  ;;  %v5791_v43 = vsub.f32 %v5783_v22, %v5789_v3  ;;  %15845 = vmatpush3.msra.mxu0 %v5807_v49 }
0x2c80   :  { %15854 = vmatprep.subr.mxu0 %v17108_v8 }
0x2c81   :  { %v5794_v54 = vmul.f32 1.442695, %v5791_v43 }
0x2c82   :  { %v5883_v4 = vpop.permute.xlu0 %5882  ;;  %v5961_v28 = vpop.permute.xlu1 %5960 }
0x2c83   :  { %16901 = vpow2.f32 %v5794_v54  ;;  %15850 = vmatpush3.msra.mxu1 %v5883_v4 }
0x2c84   :  { %15859 = vmatprep.subr.mxu1 %v17108_v8 }
0x2c86   :  { %v6039_v27 = vpop.permute.xlu1 %6038 }
0x2c89   :  { %v16900_v6 = vpop.eup %16899 }
0x2c8a   :  { %v5796_v9 = vsel %vm260_vm2, %v16900_v6, 0.0 }
0x2c8b   :  { %5797 = vadd.xlane.f32.xlu1 %v5796_v9 }
0x2c8d   :  { %v16902_v42 = vpop.eup %16901 }
0x2c8e   :  { %v5799_v0 = vsel %vm260_vm2, %v16902_v42, 0.0 }
0x2c8f   :  { %5800 = vadd.xlane.f32.xlu0 %v5799_v0 }
0x2c9c   :  { %6036 = vrot.lane.b32.xlu1 %v17997_v26, %s19173_s21 }
0x2ca5   :  { %5958 = vrot.lane.b32.xlu0 %v17989_v53, %s19173_s21  ;;  %s17151_s21 = smov 27  }
0x2d18   :  { %v5798_v10 = vpop.xlane.xlu1 %5797 }
0x2d19   :  { %16903 = vrcp.f32 %v5798_v10 }
0x2d1c   :  { %v5801_v2 = vpop.xlane.xlu0 %5800  ;;  %v6037_v5 = vpop.permute.xlu1 %6036 }
0x2d1d   :  { %16905 = vrcp.f32 %v5801_v2 }
0x2d20   :  { %v5959_v18 = vpop.permute.xlu0 %5958 }
0x2d23   :  { %v16904_v11 = vpop.eup %16903 }
0x2d24   :  { %v5804_v14 = vmul.f32 %v16904_v11, %v16900_v6 }
0x2d26   :  { %15847 = vmatmul.mubr.msk.f32.vlgmr.msra.gmra.mrb[54].mxu0 %vm260_vm2, %v5804_v14 }
0x2d27   :  { %v16906_v15 = vpop.eup %16905  ;;  %15855 = vmatpush3.xpose.msk.msra.mxu0 %vm260_vm2, %v5961_v28  ;;  %15856 = vmatprep.mubr.msk.f32.mxu0 %vm17110_vm1, %v17108_v8 }
0x2d28   :  { %v5805_v16 = vmul.f32 %v16906_v15, %v16902_v42  ;;  %15864 = vmatprep.subr.mxu0 %v17108_v8 }
0x2d2a   :  { %15852 = vmatmul.mubr.msk.f32.vlgmr.msra.gmra.mrb[70].mxu1 %vm260_vm2, %v5805_v16  ;;  %15857 = vmatmul.mubr.msk.f32.vlgmr.msra.gmra.mrb[56].mxu0 %vm260_vm2, %v5959_v18 }
0x2d2b   :  { %15860 = vmatpush3.xpose.msk.msra.mxu1 %vm260_vm2, %v6039_v27  ;;  %15861 = vmatprep.mubr.msk.f32.mxu1 %vm17110_vm1, %v17108_v8 }
0x2d2c   :  { %15869 = vmatprep.subr.mxu1 %v17108_v8  ;;  %15866 = vmatprep.mubr.msk.f32.mxu0 %vm17110_vm1, %v17108_v8 }
0x2d2e   :  { %15862 = vmatmul.mubr.msk.f32.vlgmr.msra.gmra.mrb[72].mxu1 %vm260_vm2, %v6037_v5 }
0x2d2f   :  { %15871 = vmatprep.mubr.msk.f32.mxu1 %vm17110_vm1, %v17108_v8 }
0x2df9   :  { %v18046_v39 = vpop.f32.mrb[54].mxu0 }
0x2dfa   :  { %v15848_v25 = vpop.f32.mrb[55].mxu0 }
0x2dfd   :  { %v18048_v30 = vpop.f32.mrb[70].mxu1  ;;  %v6032_v31 = vpop.f32.mrb[56].mxu0 }
0x2dfe   :  { %v6114_v12 = vmul.f32 0.35355338, %v6032_v31  ;;  %v15853_v29 = vpop.f32.mrb[71].mxu1  ;;  %v15858_v20 = vpop.f32.mrb[57].mxu0 }
0x2e00   :  { %v6116_v33 = vadd.f32 %v18005_v59, %v6114_v12 }
0x2e01   :  { %v6110_v34 = vpop.f32.mrb[72].mxu1 }
0x2e02   :  { %v6115_v35 = vmul.f32 0.35355338, %v6110_v34  ;;  %v15863_v36 = vpop.f32.mrb[73].mxu1  ;;  %v6118_v37 = vsel %vm260_vm2, %v6116_v33, -inf }
0x2e03   :  { %6119 = vmax.xlane.f32.xlu0 %v6118_v37 }
0x2e04   :  { %v6117_v38 = vadd.f32 %v18010_v60, %v6115_v35 }
0x2e06   :  { %v6121_v41 = vsel %vm260_vm2, %v6117_v38, -inf }
0x2e07   :  { %6122 = vmax.xlane.f32.xlu1 %v6121_v41 }
0x2e18   :  { %6140 = vrot.lane.b32.xlu1 %v17974_v46, %s19175_s20 }
0x2e19   :  { %6216 = vrot.lane.b32.xlu0 %v17942_v57, %s19175_s20  ;;  %s18206_s20 = sld [smem:[%s19150_s0 + %s17150_s10]]   ;;  %s19205_s10 = smov 80  }
0x2e1c   :  { %6294 = vrot.lane.b32.xlu1 %v17974_v46, %s19169_s23 }
0x2e20   :  { %6372 = vrot.lane.b32.xlu1 %v17942_v57, %s19169_s23 }
0x2e24   :  { %6370 = vrot.lane.b32.xlu1 %v17997_v26, %s19169_s23 }
0x2e90   :  { %v6120_v50 = vpop.xlane.xlu0 %6119 }
0x2e91   :  { %v6124_v51 = vsub.f32 %v6116_v33, %v6120_v50 }
0x2e93   :  { %v6126_v52 = vmul.f32 1.442695, %v6124_v51 }
0x2e94   :  { %v6217_v56 = vpop.permute.xlu0 %6216  ;;  %v6123_v58 = vpop.xlane.xlu1 %6122 }
0x2e95   :  { %16907 = vpow2.f32 %v6126_v52  ;;  %v6125_v32 = vsub.f32 %v6117_v38, %v6123_v58  ;;  %15870 = vmatpush3.msra.mxu1 %v6217_v56 }
0x2e96   :  { %15879 = vmatprep.subr.mxu1 %v17108_v8 }
0x2e97   :  { %v6128_v17 = vmul.f32 1.442695, %v6125_v32 }
0x2e98   :  { %v6141_v61 = vpop.permute.xlu1 %6140 }
0x2e99   :  { %16909 = vpow2.f32 %v6128_v17  ;;  %15865 = vmatpush3.msra.mxu0 %v6141_v61 }
0x2e9a   :  { %15874 = vmatprep.subr.mxu0 %v17108_v8 }
0x2e9c   :  { %v6295_v55 = vpop.permute.xlu1 %6294 }
0x2e9f   :  { %v16908_v21 = vpop.eup %16907 }
0x2ea0   :  { %v6130_v23 = vsel %vm260_vm2, %v16908_v21, 0.0  ;;  %v6373_v43 = vpop.permute.xlu1 %6372 }
0x2ea1   :  { %6131 = vadd.xlane.f32.xlu0 %v6130_v23 }
0x2ea3   :  { %v16910_v45 = vpop.eup %16909 }
0x2ea4   :  { %v6133_v22 = vsel %vm260_vm2, %v16910_v45, 0.0  ;;  %v6371_v6 = vpop.permute.xlu1 %6370 }
0x2ea5   :  { %6134 = vadd.xlane.f32.xlu0 %v6133_v22 }
0x2ebb   :  { %6292 = vrot.lane.b32.xlu0 %v17989_v53, %s19169_s23  ;;  %s17149_s23 = smov 32  }
0x2ebc   :  { %s18201_s16 = sld [smem:[%s19150_s0 + %s17149_s23]]   ;;  %s17153_s23 = smov 34  }
0x2f2e   :  { %v6132_v62 = vpop.xlane.xlu0 %6131 }
0x2f2f   :  { %16911 = vrcp.f32 %v6132_v62 }
0x2f32   :  { %v6135_v63 = vpop.xlane.xlu0 %6134 }
0x2f33   :  { %16913 = vrcp.f32 %v6135_v63 }
0x2f36   :  { %v6293_v4 = vpop.permute.xlu0 %6292 }
0x2f39   :  { %v16912_v1 = vpop.eup %16911 }
0x2f3a   :  { %v6138_v49 = vmul.f32 %v16912_v1, %v16908_v21 }
0x2f3c   :  { %15867 = vmatmul.mubr.msk.f32.vlgmr.msra.gmra.mrb[58].mxu0 %vm260_vm2, %v6138_v49 }
0x2f3d   :  { %v16914_v3 = vpop.eup %16913  ;;  %15875 = vmatpush3.xpose.msk.msra.mxu0 %vm260_vm2, %v6295_v55  ;;  %15876 = vmatprep.mubr.msk.f32.mxu0 %vm17110_vm1, %v17108_v8 }
0x2f3e   :  { %v6139_v54 = vmul.f32 %v16914_v3, %v16910_v45  ;;  %15884 = vmatprep.subr.mxu0 %v17108_v8 }
0x2f40   :  { %15872 = vmatmul.mubr.msk.f32.vlgmr.msra.gmra.mrb[74].mxu1 %vm260_vm2, %v6139_v54  ;;  %15877 = vmatmul.mubr.msk.f32.vlgmr.msra.gmra.mrb[60].mxu0 %vm260_vm2, %v6293_v4 }
0x2f41   :  { %15880 = vmatpush3.xpose.msk.msra.mxu1 %vm260_vm2, %v6373_v43  ;;  %15881 = vmatprep.mubr.msk.f32.mxu1 %vm17110_vm1, %v17108_v8 }
0x2f42   :  { %15889 = vmatprep.subr.mxu1 %v17108_v8  ;;  %15886 = vmatprep.mubr.msk.f32.mxu0 %vm17110_vm1, %v17108_v8 }
0x2f44   :  { %15882 = vmatmul.mubr.msk.f32.vlgmr.msra.gmra.mrb[76].mxu1 %vm260_vm2, %v6371_v6 }
0x2f45   :  { %15891 = vmatprep.mubr.msk.f32.mxu1 %vm17110_vm1, %v17108_v8 }
0x300f   :  { %v18086_v9 = vpop.f32.mrb[58].mxu0 }
0x3010   :  { %v15868_v42 = vpop.f32.mrb[59].mxu0 }
0x3013   :  { %v18088_v0 = vpop.f32.mrb[74].mxu1  ;;  %v6366_v28 = vpop.f32.mrb[60].mxu0 }
0x3014   :  { %v6448_v27 = vmul.f32 0.35355338, %v6366_v28  ;;  %v15873_v10 = vpop.f32.mrb[75].mxu1  ;;  %v15878_v2 = vpop.f32.mrb[61].mxu0 }
0x3016   :  { %v6450_v11 = vadd.f32 %v18005_v59, %v6448_v27 }
0x3017   :  { %v6444_v14 = vpop.f32.mrb[76].mxu1 }
0x3018   :  { %v6449_v15 = vmul.f32 0.35355338, %v6444_v14  ;;  %v15883_v16 = vpop.f32.mrb[77].mxu1  ;;  %v6452_v18 = vsel %vm260_vm2, %v6450_v11, -inf }
0x3019   :  { %6453 = vmax.xlane.f32.xlu0 %v6452_v18 }
0x301a   :  { %v6451_v5 = vadd.f32 %v18010_v60, %v6449_v15 }
0x301c   :  { %v6455_v25 = vsel %vm260_vm2, %v6451_v5, -inf }
0x301d   :  { %6456 = vmax.xlane.f32.xlu1 %v6455_v25 }
0x302e   :  { %6474 = vrot.lane.b32.xlu1 %v17974_v46, %s19171_s24 }
0x302f   :  { %6550 = vrot.lane.b32.xlu0 %v17942_v57, %s19171_s24  ;;  %s18243_s24 = sld [smem:[%s19150_s0 + %s17153_s23]]   ;;  %s19203_s23 = smov 120  }
0x3032   :  { %6628 = vrot.lane.b32.xlu1 %v17974_v46, %s19165_s27 }
0x3036   :  { %6706 = vrot.lane.b32.xlu1 %v17942_v57, %s19165_s27 }
0x303a   :  { %6704 = vrot.lane.b32.xlu1 %v17997_v26, %s19165_s27 }
0x30a6   :  { %v6454_v31 = vpop.xlane.xlu0 %6453 }
0x30a7   :  { %v6458_v12 = vsub.f32 %v6450_v11, %v6454_v31 }
0x30a9   :  { %v6460_v29 = vmul.f32 1.442695, %v6458_v12 }
0x30aa   :  { %v6551_v20 = vpop.permute.xlu0 %6550  ;;  %v6457_v33 = vpop.xlane.xlu1 %6456 }
0x30ab   :  { %16915 = vpow2.f32 %v6460_v29  ;;  %v6459_v34 = vsub.f32 %v6451_v5, %v6457_v33  ;;  %15890 = vmatpush3.msra.mxu1 %v6551_v20  ;;  %v6991_v29 = vld [vmem:[%s18148_s22 + $0x8] sm:$0xff]  ;;  %v6992_v33 = vld [vmem:[%s18148_s22 + $0x10] sm:$0xff] }
0x30ac   :  { %15899 = vmatprep.subr.mxu1 %v17108_v8 }
0x30ad   :  { %v6462_v35 = vmul.f32 1.442695, %v6459_v34  ;;  %v6993_v34 = vld [vmem:[%s18148_s22 + $0x18] sm:$0xff] }
0x30ae   :  { %v6475_v36 = vpop.permute.xlu1 %6474 }
0x30af   :  { %16917 = vpow2.f32 %v6462_v35  ;;  %15885 = vmatpush3.msra.mxu0 %v6475_v36  ;;  %v16572_v35 = vpack.c.bf16 %v6993_v34, %v6992_v33 }
0x30b0   :  { %15894 = vmatprep.subr.mxu0 %v17108_v8 }
0x30b2   :  { %v6629_v52 = vpop.permute.xlu1 %6628 }
0x30b5   :  { %v16916_v37 = vpop.eup %16915 }
0x30b6   :  { %v6464_v38 = vsel %vm260_vm2, %v16916_v37, 0.0  ;;  %v6707_v17 = vpop.permute.xlu1 %6706 }
0x30b7   :  { %6465 = vadd.xlane.f32.xlu0 %v6464_v38 }
0x30b9   :  { %v16918_v26 = vpop.eup %16917 }
0x30ba   :  { %v6467_v41 = vsel %vm260_vm2, %v16918_v26, 0.0  ;;  %v6705_v21 = vpop.permute.xlu1 %6704 }
0x30bb   :  { %6468 = vadd.xlane.f32.xlu0 %v6467_v41 }
0x30d1   :  { %6626 = vrot.lane.b32.xlu0 %v17989_v53, %s19165_s27  ;;  %s17148_s27 = smov 28  }
0x3144   :  { %v6466_v50 = vpop.xlane.xlu0 %6465 }
0x3145   :  { %16919 = vrcp.f32 %v6466_v50 }
0x3148   :  { %v6469_v51 = vpop.xlane.xlu0 %6468 }
0x3149   :  { %16921 = vrcp.f32 %v6469_v51 }
0x314c   :  { %v6627_v53 = vpop.permute.xlu0 %6626 }
0x314f   :  { %v16920_v56 = vpop.eup %16919 }
0x3150   :  { %v6472_v58 = vmul.f32 %v16920_v56, %v16916_v37 }
0x3152   :  { %15887 = vmatmul.mubr.msk.f32.vlgmr.msra.gmra.mrb[62].mxu0 %vm260_vm2, %v6472_v58 }
0x3153   :  { %v16922_v32 = vpop.eup %16921  ;;  %15895 = vmatpush3.xpose.msk.msra.mxu0 %vm260_vm2, %v6629_v52  ;;  %15896 = vmatprep.mubr.msk.f32.mxu0 %vm17110_vm1, %v17108_v8 }
0x3154   :  { %v6473_v61 = vmul.f32 %v16922_v32, %v16918_v26  ;;  %15904 = vmatprep.subr.mxu0 %v17108_v8 }
0x3156   :  { %15892 = vmatmul.mubr.msk.f32.vlgmr.msra.gmra.mrb[78].mxu1 %vm260_vm2, %v6473_v61  ;;  %15897 = vmatmul.mubr.msk.f32.vlgmr.msra.gmra.mrb[64].mxu0 %vm260_vm2, %v6627_v53 }
0x3157   :  { %15900 = vmatpush3.xpose.msk.msra.mxu1 %vm260_vm2, %v6707_v17  ;;  %15901 = vmatprep.mubr.msk.f32.mxu1 %vm17110_vm1, %v17108_v8 }
0x3158   :  { %15909 = vmatprep.subr.mxu1 %v17108_v8  ;;  %15906 = vmatprep.mubr.msk.f32.mxu0 %vm17110_vm1, %v17108_v8 }
0x315a   :  { %15902 = vmatmul.mubr.msk.f32.vlgmr.msra.gmra.mrb[80].mxu1 %vm260_vm2, %v6705_v21 }
0x315b   :  { %15911 = vmatprep.mubr.msk.f32.mxu1 %vm17110_vm1, %v17108_v8 }
0x3225   :  { %v6546_v23 = vpop.f32.mrb[62].mxu0 }
0x3226   :  { %v15888_v45 = vpop.f32.mrb[63].mxu0 }
0x3229   :  { %v6622_v22 = vpop.f32.mrb[78].mxu1  ;;  %v6700_v62 = vpop.f32.mrb[64].mxu0 }
0x322a   :  { %v6782_v63 = vmul.f32 0.35355338, %v6700_v62  ;;  %v15893_v55 = vpop.f32.mrb[79].mxu1  ;;  %v15898_v1 = vpop.f32.mrb[65].mxu0 }
0x322c   :  { %v6784_v49 = vadd.f32 %v18005_v59, %v6782_v63 }
0x322d   :  { %v6778_v3 = vpop.f32.mrb[80].mxu1 }
0x322e   :  { %v6783_v43 = vmul.f32 0.35355338, %v6778_v3  ;;  %v15903_v54 = vpop.f32.mrb[81].mxu1  ;;  %v6786_v4 = vsel %vm260_vm2, %v6784_v49, -inf }
0x322f   :  { %6787 = vmax.xlane.f32.xlu0 %v6786_v4 }
0x3230   :  { %v6785_v6 = vadd.f32 %v18010_v60, %v6783_v43 }
0x3232   :  { %v6789_v42 = vsel %vm260_vm2, %v6785_v6, -inf }
0x3233   :  { %6790 = vmax.xlane.f32.xlu1 %v6789_v42 }
0x3244   :  { %6808 = vrot.lane.b32.xlu1 %v17974_v46, %s19167_s26 }
0x3248   :  { %6962 = vrot.lane.b32.xlu1 %v18086_v9, %s19163_s29 }
0x324c   :  { %6964 = vrot.lane.b32.xlu1 %v18088_v0, %s19163_s29  ;;  %s18181_s29 = sld [smem:[%s19150_s0 + %s17147_s25]]  }
0x324d   :  { %s18190_s25 = sld [smem:[%s19150_s0 + %s17148_s27]]   ;;  %s17152_s27 = smov 29  }
0x3250   :  { %6972 = vrot.lane.b32.xlu1 %v6622_v22, %s19195_s13 }
0x32bc   :  { %v6788_v59 = vpop.xlane.xlu0 %6787 }
0x32bd   :  { %v6792_v28 = vsub.f32 %v6784_v49, %v6788_v59 }
0x32bf   :  { %v6794_v27 = vmul.f32 1.442695, %v6792_v28 }
0x32c0   :  { %v6791_v10 = vpop.xlane.xlu1 %6790 }
0x32c1   :  { %16923 = vpow2.f32 %v6794_v27  ;;  %v6793_v60 = vsub.f32 %v6785_v6, %v6791_v10  ;;  %v7129_v10 = vld [vmem:[%s18181_s29 + $0x8] sm:$0xff] }
0x32c3   :  { %v6796_v2 = vmul.f32 1.442695, %v6793_v60  ;;  %v7130_v60 = vld [vmem:[%s18181_s29 + $0x10] sm:$0xff] }
0x32c4   :  { %v6809_v11 = vpop.permute.xlu1 %6808 }
0x32c5   :  { %16925 = vpow2.f32 %v6796_v2  ;;  %15905 = vmatpush3.msra.mxu0 %v6809_v11  ;;  %v7131_v11 = vld [vmem:[%s18181_s29 + $0x18] sm:$0xff] }
0x32c8   :  { %v6963_v41 = vpop.permute.xlu1 %6962 }
0x32c9   :  { %v6984_v52 = vsel %vm260_vm2, %v18046_v39, %v6963_v41  ;;  %v14734_v39 = vld [vmem:[%s18169_s11] ss:$0 sm:$0xff] }
0x32cb   :  { %v16924_v14 = vpop.eup %16923 }
0x32cc   :  { %v6798_v46 = vsel %vm260_vm2, %v16924_v14, 0.0  ;;  %v6965_v50 = vpop.permute.xlu1 %6964 }
0x32cd   :  { %6799 = vadd.xlane.f32.xlu0 %v6798_v46  ;;  %v6985_v61 = vsel %vm260_vm2, %v18048_v30, %v6965_v50  ;;  %v7222_v46 = vld [vmem:[%s18190_s25] sm:$0xff] }
0x32cf   :  { %v16926_v9 = vpop.eup %16925 }
0x32d0   :  { %v6801_v15 = vsel %vm260_vm2, %v16926_v9, 0.0  ;;  %v6973_v56 = vpop.permute.xlu1 %6972 }
0x32d1   :  { %6802 = vadd.xlane.f32.xlu0 %v6801_v15  ;;  %v6987_v53 = vsel %vm1630_vm4, %v6985_v61, %v6973_v56  ;;  %v7224_v15 = vld [vmem:[%s18190_s25 + $0x10] sm:$0xff] }
0x32e7   :  { %6884 = vrot.lane.b32.xlu0 %v17942_v57, %s19167_s26  ;;  %v6990_v57 = vld [vmem:[%s18148_s22] sm:$0xff]  ;;  %s18218_s26 = sld [smem:[%s19150_s0 + %s17151_s21]]  }
0x32e8   :  { %v16568_v20 = vpack.c.bf16 %v6991_v29, %v6990_v57  ;;  %s18228_s21 = sld [smem:[%s19150_s0 + %s17152_s27]]   ;;  %s19204_s27 = smov 56  }
0x32e9   :  { %s19206_s0 = smov 112  }
0x32ea   :  { %16569 = vmatprep.subr.bf16.mxu0 %v16568_v20 }
0x32eb   :  { %6970 = vrot.lane.b32.xlu0 %v6546_v23, %s19195_s13 }
0x32ed   :  { %v14739_v61 = vld [vmem:[%s18218_s26] ss:$0 sm:$0xff] }
0x32ee   :  { %19199 = sst [smem:[#allocation7_spill]] %s18228_s21 }
0x335a   :  { %v6800_v0 = vpop.xlane.xlu0 %6799 }
0x335b   :  { %16927 = vrcp.f32 %v6800_v0 }
0x335e   :  { %v6803_v16 = vpop.xlane.xlu0 %6802 }
0x335f   :  { %16929 = vrcp.f32 %v6803_v16  ;;  %v7225_v16 = vld [vmem:[%s18190_s25 + $0x18] sm:$0xff] }
0x3362   :  { %v6885_v18 = vpop.permute.xlu0 %6884 }
0x3363   :  { %15910 = vmatpush3.msra.mxu1 %v6885_v18  ;;  %v16588_v18 = vpack.c.bf16 %v7225_v16, %v7224_v15 }
0x3365   :  { %v16928_v5 = vpop.eup %16927 }
0x3366   :  { %v6806_v25 = vmul.f32 %v16928_v5, %v16924_v14  ;;  %v6971_v51 = vpop.permute.xlu0 %6970  ;;  %v16580_v14 = vpack.c.bf16 %v7131_v11, %v7130_v60  ;;  %v7226_v5 = vld [vmem:[%s18190_s25 + $0x20] sm:$0xff]  ;;  %v14748_v11 = vld [vmem:[%s17670_s3 + $0x28] sm:$0xff] }
0x3367   :  { %v6986_v58 = vsel %vm1630_vm4, %v6984_v52, %v6971_v51 }
0x3368   :  { %15907 = vmatmul.mubr.msk.f32.vlgmr.msra.gmra.mrb[66].mxu0 %vm260_vm2, %v6806_v25  ;;  %v7227_v25 = vld [vmem:[%s18190_s25 + $0x28] sm:$0xff] }
0x3369   :  { %v16930_v31 = vpop.eup %16929  ;;  %16571 = vmatpush3.bf16.msra.mxu0 %v16568_v20 }
0x336a   :  { %v6807_v12 = vmul.f32 %v16930_v31, %v16926_v9  ;;  %16573 = vmatprep.subr.bf16.mxu0 %v16572_v35  ;;  %v7223_v9 = vld [vmem:[%s18190_s25 + $0x8] sm:$0xff]  ;;  %v16592_v31 = vpack.c.bf16 %v7227_v25, %v7226_v5 }
0x336b   :  { %v16584_v0 = vpack.c.bf16 %v7223_v9, %v7222_v46  ;;  %v14750_v9 = vld [vmem:[%s17670_s3 + $0x38] sm:$0xff] }
0x336c   :  { %15912 = vmatmul.mubr.msk.f32.vlgmr.msra.gmra.mrb[82].mxu1 %vm260_vm2, %v6807_v12 }
0x336d   :  { %16575 = vmatpush3.bf16.msra.mxu0 %v16572_v35 }
0x336e   :  { %16585 = vmatprep.subr.bf16.mxu0 %v16584_v0 }
0x343b   :  { %v6880_v36 = vpop.f32.mrb[66].mxu0 }
0x343c   :  { %6978 = vrot.lane.b32.xlu0 %v6880_v36, %s19196_s5  ;;  %v15908_v37 = vpop.f32.mrb[67].mxu0  ;;  %v14737_v36 = vld [vmem:[%s18201_s16] ss:$0 sm:$0xff] }
0x343f   :  { %v6956_v38 = vpop.f32.mrb[82].mxu1 }
0x3440   :  { %6980 = vrot.lane.b32.xlu1 %v6956_v38, %s19196_s5  ;;  %v15913_v26 = vpop.f32.mrb[83].mxu1  ;;  %v14738_v38 = vld [vmem:[%s18206_s20] ss:$0 sm:$0xff] }
0x34ae   :  { %v6979_v32 = vpop.permute.xlu0 %6978 }
0x34af   :  { %v6988_v17 = vsel %vm1633_vm3, %v6986_v58, %v6979_v32  ;;  %v7228_v58 = vld [vmem:[%s18190_s25 + $0x30] sm:$0xff]  ;;  %v7229_v32 = vld [vmem:[%s18190_s25 + $0x38] sm:$0xff] }
0x34b0   :  { %15922 = vmatprep.mubr.msk.f32.mxu0 %vm175_vm0, %v6988_v17  ;;  %v16596_v17 = vpack.c.bf16 %v7229_v32, %v7228_v58 }
0x34b2   :  { %v6981_v21 = vpop.permute.xlu1 %6980 }
0x34b3   :  { %v6989_v23 = vsel %vm1633_vm3, %v6987_v53, %v6981_v21 }
0x34b4   :  { %15923 = vmatmul.mubr.msk.f32.vlgmr.msra.gmra.mrb[68].mxu0 %vm175_vm0, %v6989_v23 }
0x34b5   :  { %16587 = vmatpush3.bf16.msra.mxu0 %v16584_v0 }
0x34b6   :  { %16589 = vmatprep.subr.bf16.mxu0 %v16588_v18 }
0x34b9   :  { %16591 = vmatpush3.bf16.msra.mxu0 %v16588_v18 }
0x34ba   :  { %16593 = vmatprep.subr.bf16.mxu0 %v16592_v31 }
0x34bd   :  { %16595 = vmatpush3.bf16.msra.mxu0 %v16592_v31 }
0x34be   :  { %16597 = vmatprep.subr.bf16.mxu0 %v16596_v17 }
0x34c1   :  { %16599 = vmatpush3.bf16.msra.mxu0 %v16596_v17 }
0x34c2   :  { %15976 = vmatprep.subr.mxu0 %v17108_v8 }
0x3587   :  { %v15924_v45 = vpop.f32.mrb[68].mxu0 }
0x3588   :  { %v7079_v22 = vadd.f32 %v15924_v45, %v14734_v39  ;;  %v7073_v62 = vpop.f32.mrb[69].mxu0 }
0x3589   :  { %v7074_v63 = vadd.f32 %v14734_v39, %v7073_v62  ;;  %v14742_v62 = vld [vmem:[%s18228_s21] ss:$0 sm:$0xff] }
0x358a   :  { %v7083_v30 = vadd.f32 %v7079_v22, %v17972_v44 }
0x358b   :  { %v7082_v55 = vadd.f32 %v7074_v63, %v17968_v7  ;;  %v7128_v7 = vld [vmem:[%s18181_s29] sm:$0xff] }
0x358c   :  { %v7089_v1 = vsel %vm175_vm0, %v7083_v30, 0.0  ;;  %v16576_v2 = vpack.c.bf16 %v7129_v10, %v7128_v7 }
0x358d   :  { %7090 = vadd.xlane.f32.xlu1 %v7089_v1  ;;  %v7086_v49 = vsel %vm175_vm0, %v7082_v55, 0.0 }
0x358e   :  { %7087 = vadd.xlane.f32.xlu0 %v7086_v49  ;;  %16577 = vmatprep.subr.bf16.mxu1 %v16576_v2 }
0x358f   :  { %16579 = vmatpush3.bf16.msra.mxu1 %v16576_v2  ;;  %v14747_v2 = vld [vmem:[%s17670_s3 + $0x20] sm:$0xff] }
0x3590   :  { %16581 = vmatprep.subr.bf16.mxu1 %v16580_v14  ;;  %v16600_v46 = vpack.c.bf16 %v14748_v11, %v14747_v2 }
0x3593   :  { %16583 = vmatpush3.bf16.msra.mxu1 %v16580_v14  ;;  %v14749_v14 = vld [vmem:[%s17670_s3 + $0x30] sm:$0xff] }
0x3594   :  { %v16604_v15 = vpack.c.bf16 %v14750_v9, %v14749_v14  ;;  %16601 = vmatprep.subr.bf16.mxu1 %v16600_v46 }
0x361a   :  { %v7091_v3 = vpop.xlane.xlu1 %7090 }
0x361b   :  { %v7093_v43 = vmul.f32 0.03125, %v7091_v3  ;;  %v7088_v54 = vpop.xlane.xlu0 %7087 }
0x361c   :  { %v7092_v4 = vmul.f32 0.03125, %v7088_v54 }
0x361d   :  { %v7095_v6 = vsub.f32 %v7083_v30, %v7093_v43 }
0x361e   :  { %v7094_v42 = vsub.f32 %v7082_v55, %v7092_v4 }
0x361f   :  { %v7097_v27 = vmul.f32 %v7095_v6, %v7095_v6 }
0x3620   :  { %v7096_v59 = vmul.f32 %v7094_v42, %v7094_v42 }
0x3621   :  { %v7101_v44 = vsel %vm175_vm0, %v7097_v27, 0.0 }
0x3622   :  { %v7098_v28 = vsel %vm175_vm0, %v7096_v59, 0.0 }
0x3623   :  { %7099 = vadd.xlane.f32.xlu0 %v7098_v28 }
0x3627   :  { %7102 = vadd.xlane.f32.xlu0 %v7101_v44 }
0x36b0   :  { %v7100_v12 = vpop.xlane.xlu0 %7099 }
0x36b1   :  { %v7104_v57 = vmul.f32 0.03125, %v7100_v12 }
0x36b3   :  { %v7106_v29 = vadd.f32 1e-05, %v7104_v57  ;;  %v14745_v57 = vld [vmem:[%s18243_s24] ss:$0 sm:$0xff] }
0x36b4   :  { %v7103_v20 = vpop.xlane.xlu0 %7102 }
0x36b5   :  { %16931 = vrsqrt.f32 %v7106_v29  ;;  %v7105_v33 = vmul.f32 0.03125, %v7103_v20 }
0x36b7   :  { %v7107_v34 = vadd.f32 1e-05, %v7105_v33 }
0x36b9   :  { %16933 = vrsqrt.f32 %v7107_v34  ;;  %v14746_v34 = vld [vmem:[%s18248_s1] ss:$0 sm:$0xff] }
0x36bf   :  { %v16932_v35 = vpop.eup %16931 }
0x36c0   :  { %v7110_v37 = vmul.f32 %v16932_v35, %v7094_v42 }
0x36c2   :  { %v7118_v26 = vmul.f32 %v14737_v36, %v7110_v37 }
0x36c3   :  { %v16934_v41 = vpop.eup %16933 }
0x36c4   :  { %v7111_v50 = vmul.f32 %v16934_v41, %v7095_v6  ;;  %v7126_v51 = vadd.f32 %v14738_v38, %v7118_v26  ;;  %v14752_v26 = vld [vmem:[%s17713_s4 + $0x1] ss:$0 sm:$0xff]  ;;  %s19211_s4 = smov 8  }
0x36c6   :  { %v7119_v52 = vmul.f32 %v14737_v36, %v7111_v50  ;;  %15933 = vmatprep.mubr.msk.f32.mxu1 %vm175_vm0, %v7126_v51 }
0x36c8   :  { %v7127_v56 = vadd.f32 %v14738_v38, %v7119_v52 }
0x36ca   :  { %15934 = vmatmul.mubr.msk.f32.vlgmr.msra.gmra.mrb[84].mxu1 %vm175_vm0, %v7127_v56 }
0x36cb   :  { %16603 = vmatpush3.bf16.msra.mxu1 %v16600_v46 }
0x36cc   :  { %16605 = vmatprep.subr.bf16.mxu1 %v16604_v15 }
0x36cf   :  { %16607 = vmatpush3.bf16.msra.mxu1 %v16604_v15 }
0x36d0   :  { %15966 = vmatprep.subr.mxu1 %v17108_v8 }
0x379d   :  { %v15935_v53 = vpop.f32.mrb[84].mxu1 }
0x379e   :  { %v7217_v21 = vadd.f32 %v15935_v53, %v14739_v61  ;;  %v7211_v23 = vpop.f32.mrb[85].mxu1  ;;  %v18284_v53 = vld [vmem:[%s17747_s15] sm:$0xff] }
0x379f   :  { %v7212_v39 = vadd.f32 %v14739_v61, %v7211_v23 }
0x37a0   :  { %v7221_v22 = vmax.f32 %v7217_v21, 0.0 }
0x37a1   :  { %v7220_v45 = vmax.f32 %v7212_v39, 0.0 }
0x37a3   :  { %15952 = vmatprep.mubr.msk.f32.mxu0 %vm1884_vm5, %v7220_v45 }
0x37a4   :  { %15953 = vmatmul.mubr.msk.f32.vlgmr.msra.gmra.mrb[70].mxu0 %vm1884_vm5, %v7221_v22 }
0x37a5   :  { %15978 = vmatprep.mubr.msk.f32.mxu0 %vm17110_vm1, %v17108_v8 }
0x3877   :  { %v15954_v63 = vpop.f32.mrb[70].mxu0 }
0x3878   :  { %v7315_v30 = vadd.f32 %v15954_v63, %v14742_v62  ;;  %v7309_v55 = vpop.f32.mrb[71].mxu0 }
0x3879   :  { %v7310_v1 = vadd.f32 %v14742_v62, %v7309_v55  ;;  %v18289_v62 = vld [vmem:[%s17747_s15 + $0x8] sm:$0xff]  ;;  %s19209_s15 = smov 104  }
0x387a   :  { %v7319_v49 = vadd.f32 %v7315_v30, %v7127_v56 }
0x387b   :  { %v7318_v3 = vadd.f32 %v7310_v1, %v7126_v51 }
0x387c   :  { %v7325_v43 = vsel %vm175_vm0, %v7319_v49, 0.0 }
0x387d   :  { %7326 = vadd.xlane.f32.xlu0 %v7325_v43  ;;  %v7322_v54 = vsel %vm175_vm0, %v7318_v3, 0.0 }
0x387e   :  { %7323 = vadd.xlane.f32.xlu1 %v7322_v54 }
0x390a   :  { %v7327_v4 = vpop.xlane.xlu0 %7326 }
0x390b   :  { %v7329_v6 = vmul.f32 0.03125, %v7327_v4  ;;  %v7324_v42 = vpop.xlane.xlu1 %7323 }
0x390c   :  { %v7328_v59 = vmul.f32 0.03125, %v7324_v42 }
0x390d   :  { %v7331_v28 = vsub.f32 %v7319_v49, %v7329_v6 }
0x390e   :  { %v7330_v27 = vsub.f32 %v7318_v3, %v7328_v59 }
0x390f   :  { %v7333_v44 = vmul.f32 %v7331_v28, %v7331_v28 }
0x3910   :  { %v7332_v7 = vmul.f32 %v7330_v27, %v7330_v27 }
0x3911   :  { %v7337_v10 = vsel %vm175_vm0, %v7333_v44, 0.0 }
0x3912   :  { %7338 = vadd.xlane.f32.xlu0 %v7337_v10  ;;  %v7334_v60 = vsel %vm175_vm0, %v7332_v7, 0.0 }
0x3913   :  { %7335 = vadd.xlane.f32.xlu1 %v7334_v60 }
0x399f   :  { %v7339_v0 = vpop.xlane.xlu0 %7338 }
0x39a0   :  { %v7341_v16 = vmul.f32 0.03125, %v7339_v0  ;;  %v7336_v18 = vpop.xlane.xlu1 %7335 }
0x39a1   :  { %v7340_v5 = vmul.f32 0.03125, %v7336_v18 }
0x39a2   :  { %v7343_v25 = vadd.f32 1e-05, %v7341_v16 }
0x39a3   :  { %v7342_v31 = vadd.f32 1e-05, %v7340_v5 }
0x39a4   :  { %16935 = vrsqrt.f32 %v7343_v25 }
0x39a5   :  { %16937 = vrsqrt.f32 %v7342_v31 }
0x39ae   :  { %v16936_v12 = vpop.eup %16935 }
0x39af   :  { %v16938_v29 = vpop.eup %16937  ;;  %v7347_v20 = vmul.f32 %v16936_v12, %v7331_v28 }
0x39b0   :  { %v7346_v33 = vmul.f32 %v16938_v29, %v7330_v27 }
0x39b1   :  { %v7355_v35 = vmul.f32 %v14745_v57, %v7347_v20 }
0x39b2   :  { %v7354_v36 = vmul.f32 %v14745_v57, %v7346_v33 }
0x39b3   :  { %v18254_v38 = vadd.f32 %v14746_v34, %v7355_v35 }
0x39b4   :  { %v18252_v37 = vadd.f32 %v14746_v34, %v7354_v36 }
0x39b6   :  { %15963 = vmatprep.mubr.msk.f32.mxu1 %vm175_vm0, %v18252_v37 }
0x39b7   :  { %15964 = vmatmul.mubr.msk.f32.vlgmr.msra.gmra.mrb[86].mxu1 %vm175_vm0, %v18254_v38 }
0x39b8   :  { %15968 = vmatprep.mubr.msk.f32.mxu1 %vm17110_vm1, %v17108_v8 }
0x3a8a   :  { %v15965_v41 = vpop.f32.mrb[86].mxu1 }
0x3a8b   :  { %v18263_v50 = vadd.f32 %v15965_v41, %v14752_v26  ;;  %v7449_v51 = vpop.f32.mrb[87].mxu1 }
0x3a8c   :  { %v18265_v52 = vadd.f32 %v14752_v26, %v7449_v51 }
0x3a8d   :  { %7536 = vrot.lane.b32.xlu0 %v18263_v50, %s19200_s14 }
0x3a8e   :  { %7459 = vrot.lane.b32.xlu1 %v18265_v52, %s19200_s14 }
0x3aff   :  { %v7537_v58 = vpop.permute.xlu0 %7536 }
0x3b00   :  { %v7460_v56 = vpop.permute.xlu1 %7459 }
0x3b01   :  { %15967 = vmatpush3.xpose.msk.msra.mxu1 %vm260_vm2, %v7460_v56 }
0x3b02   :  { %15971 = vmatprep.subr.mxu1 %v17108_v8 }
0x3b04   :  { %15969 = vmatmul.mubr.msk.f32.vlgmr.msra.gmra.mrb[88].mxu1 %vm260_vm2, %v18265_v52 }
0x3b05   :  { %15972 = vmatpush3.xpose.msk.msra.mxu1 %vm260_vm2, %v7537_v58  ;;  %15973 = vmatprep.mubr.msk.f32.mxu1 %vm17110_vm1, %v17108_v8 }
0x3b06   :  { %15981 = vmatprep.subr.mxu1 %v17108_v8 }
0x3b08   :  { %15974 = vmatmul.mubr.msk.f32.vlgmr.msra.gmra.mrb[90].mxu1 %vm260_vm2, %v18263_v50 }
0x3b09   :  { %15983 = vmatprep.mubr.msk.f32.mxu1 %vm17110_vm1, %v17108_v8 }
0x3bd7   :  { %v7531_v32 = vpop.f32.mrb[88].mxu1 }
0x3bd8   :  { %v7612_v17 = vmul.f32 0.35355338, %v7531_v32  ;;  %v15970_v61 = vpop.f32.mrb[89].mxu1 }
0x3bda   :  { %v7614_v21 = vadd.f32 %v18284_v53, %v7612_v17 }
0x3bdb   :  { %v7608_v23 = vpop.f32.mrb[90].mxu1 }
0x3bdc   :  { %v7613_v39 = vmul.f32 0.35355338, %v7608_v23  ;;  %v15975_v45 = vpop.f32.mrb[91].mxu1  ;;  %v7616_v22 = vsel %vm260_vm2, %v7614_v21, -inf }
0x3bdd   :  { %7617 = vmax.xlane.f32.xlu1 %v7616_v22 }
0x3bde   :  { %v7615_v63 = vadd.f32 %v18289_v62, %v7613_v39 }
0x3be0   :  { %v7619_v30 = vsel %vm260_vm2, %v7615_v63, -inf }
0x3be1   :  { %7620 = vmax.xlane.f32.xlu0 %v7619_v30 }
0x3bee   :  { %7638 = vrot.lane.b32.xlu1 %v18265_v52, %s19201_s30 }
0x3bf2   :  { %7792 = vrot.lane.b32.xlu1 %v18265_v52, %s19202_s6 }
0x3bf6   :  { %7870 = vrot.lane.b32.xlu1 %v18263_v50, %s19202_s6 }
0x3bf7   :  { %7714 = vrot.lane.b32.xlu0 %v18263_v50, %s19201_s30  ;;  %s19208_s30 = smov 72  }
0x3c6a   :  { %v7618_v55 = vpop.xlane.xlu1 %7617 }
0x3c6b   :  { %v7622_v1 = vsub.f32 %v7614_v21, %v7618_v55 }
0x3c6d   :  { %v7624_v49 = vmul.f32 1.442695, %v7622_v1 }
0x3c6e   :  { %v7639_v3 = vpop.permute.xlu1 %7638  ;;  %v7621_v43 = vpop.xlane.xlu0 %7620 }
0x3c6f   :  { %16939 = vpow2.f32 %v7624_v49  ;;  %v7623_v54 = vsub.f32 %v7615_v63, %v7621_v43  ;;  %15977 = vmatpush3.msra.mxu0 %v7639_v3 }
0x3c70   :  { %15986 = vmatprep.subr.mxu0 %v17108_v8 }
0x3c71   :  { %v7626_v4 = vmul.f32 1.442695, %v7623_v54 }
0x3c72   :  { %v7715_v6 = vpop.permute.xlu0 %7714  ;;  %v7793_v44 = vpop.permute.xlu1 %7792 }
0x3c73   :  { %16941 = vpow2.f32 %v7626_v4  ;;  %15982 = vmatpush3.msra.mxu1 %v7715_v6 }
0x3c74   :  { %15991 = vmatprep.subr.mxu1 %v17108_v8 }
0x3c76   :  { %v7871_v7 = vpop.permute.xlu1 %7870 }
0x3c79   :  { %v16940_v42 = vpop.eup %16939 }
0x3c7a   :  { %v7628_v59 = vsel %vm260_vm2, %v16940_v42, 0.0 }
0x3c7b   :  { %7629 = vadd.xlane.f32.xlu1 %v7628_v59 }
0x3c7d   :  { %v16942_v28 = vpop.eup %16941 }
0x3c7e   :  { %v7631_v27 = vsel %vm260_vm2, %v16942_v28, 0.0 }
0x3c7f   :  { %7632 = vadd.xlane.f32.xlu0 %v7631_v27 }
0x3c8c   :  { %7868 = vrot.lane.b32.xlu1 %v18263_v50, %s19203_s23 }
0x3c95   :  { %7790 = vrot.lane.b32.xlu0 %v18265_v52, %s19203_s23 }
0x3d08   :  { %v7630_v10 = vpop.xlane.xlu1 %7629 }
0x3d09   :  { %16943 = vrcp.f32 %v7630_v10 }
0x3d0c   :  { %v7633_v60 = vpop.xlane.xlu0 %7632  ;;  %v7869_v15 = vpop.permute.xlu1 %7868 }
0x3d0d   :  { %16945 = vrcp.f32 %v7633_v60 }
0x3d10   :  { %v7791_v9 = vpop.permute.xlu0 %7790 }
0x3d13   :  { %v16944_v2 = vpop.eup %16943 }
0x3d14   :  { %v7636_v11 = vmul.f32 %v16944_v2, %v16940_v42 }
0x3d16   :  { %15979 = vmatmul.mubr.msk.f32.vlgmr.msra.gmra.mrb[72].mxu0 %vm260_vm2, %v7636_v11 }
0x3d17   :  { %v16946_v14 = vpop.eup %16945  ;;  %15987 = vmatpush3.xpose.msk.msra.mxu0 %vm260_vm2, %v7793_v44  ;;  %15988 = vmatprep.mubr.msk.f32.mxu0 %vm17110_vm1, %v17108_v8 }
0x3d18   :  { %v7637_v46 = vmul.f32 %v16946_v14, %v16942_v28  ;;  %15996 = vmatprep.subr.mxu0 %v17108_v8 }
0x3d1a   :  { %15984 = vmatmul.mubr.msk.f32.vlgmr.msra.gmra.mrb[92].mxu1 %vm260_vm2, %v7637_v46  ;;  %15989 = vmatmul.mubr.msk.f32.vlgmr.msra.gmra.mrb[74].mxu0 %vm260_vm2, %v7791_v9 }
0x3d1b   :  { %15992 = vmatpush3.xpose.msk.msra.mxu1 %vm260_vm2, %v7871_v7  ;;  %15993 = vmatprep.mubr.msk.f32.mxu1 %vm17110_vm1, %v17108_v8 }
0x3d1c   :  { %16001 = vmatprep.subr.mxu1 %v17108_v8  ;;  %15998 = vmatprep.mubr.msk.f32.mxu0 %vm17110_vm1, %v17108_v8 }
0x3d1e   :  { %15994 = vmatmul.mubr.msk.f32.vlgmr.msra.gmra.mrb[94].mxu1 %vm260_vm2, %v7869_v15 }
0x3d1f   :  { %16003 = vmatprep.mubr.msk.f32.mxu1 %vm17110_vm1, %v17108_v8 }
0x3de9   :  { %v18325_v0 = vpop.f32.mrb[72].mxu0 }
0x3dea   :  { %v15980_v16 = vpop.f32.mrb[73].mxu0 }
0x3ded   :  { %v18327_v18 = vpop.f32.mrb[92].mxu1  ;;  %v7864_v5 = vpop.f32.mrb[74].mxu0 }
0x3dee   :  { %v7946_v25 = vmul.f32 0.35355338, %v7864_v5  ;;  %v15985_v31 = vpop.f32.mrb[93].mxu1  ;;  %v15990_v12 = vpop.f32.mrb[75].mxu0 }
0x3df0   :  { %v7948_v57 = vadd.f32 %v18284_v53, %v7946_v25 }
0x3df1   :  { %v7942_v29 = vpop.f32.mrb[94].mxu1 }
0x3df2   :  { %v7947_v20 = vmul.f32 0.35355338, %v7942_v29  ;;  %v15995_v33 = vpop.f32.mrb[95].mxu1  ;;  %v7950_v34 = vsel %vm260_vm2, %v7948_v57, -inf }
0x3df3   :  { %7951 = vmax.xlane.f32.xlu0 %v7950_v34 }
0x3df4   :  { %v7949_v35 = vadd.f32 %v18289_v62, %v7947_v20 }
0x3df6   :  { %v7953_v36 = vsel %vm260_vm2, %v7949_v35, -inf }
0x3df7   :  { %7954 = vmax.xlane.f32.xlu1 %v7953_v36 }
0x3e08   :  { %7972 = vrot.lane.b32.xlu1 %v18265_v52, %s19204_s27 }
0x3e09   :  { %8048 = vrot.lane.b32.xlu0 %v18263_v50, %s19204_s27  ;;  %s19207_s27 = smov 48  }
0x3e0c   :  { %8126 = vrot.lane.b32.xlu1 %v18265_v52, %s19205_s10 }
0x3e10   :  { %8204 = vrot.lane.b32.xlu1 %v18263_v50, %s19205_s10 }
0x3e14   :  { %8202 = vrot.lane.b32.xlu1 %v18263_v50, %s19206_s0 }
0x3e80   :  { %v7952_v26 = vpop.xlane.xlu0 %7951 }
0x3e81   :  { %v7956_v41 = vsub.f32 %v7948_v57, %v7952_v26 }
0x3e83   :  { %v7958_v51 = vmul.f32 1.442695, %v7956_v41 }
0x3e84   :  { %v8049_v56 = vpop.permute.xlu0 %8048  ;;  %v7955_v58 = vpop.xlane.xlu1 %7954 }
0x3e85   :  { %16947 = vpow2.f32 %v7958_v51  ;;  %v7957_v32 = vsub.f32 %v7949_v35, %v7955_v58  ;;  %16002 = vmatpush3.msra.mxu1 %v8049_v56 }
0x3e86   :  { %16011 = vmatprep.subr.mxu1 %v17108_v8 }
0x3e87   :  { %v7960_v17 = vmul.f32 1.442695, %v7957_v32 }
0x3e88   :  { %v7973_v61 = vpop.permute.xlu1 %7972 }
0x3e89   :  { %16949 = vpow2.f32 %v7960_v17  ;;  %15997 = vmatpush3.msra.mxu0 %v7973_v61 }
0x3e8a   :  { %16006 = vmatprep.subr.mxu0 %v17108_v8 }
0x3e8c   :  { %v8127_v30 = vpop.permute.xlu1 %8126 }
0x3e8f   :  { %v16948_v21 = vpop.eup %16947 }
0x3e90   :  { %v7962_v23 = vsel %vm260_vm2, %v16948_v21, 0.0  ;;  %v8205_v3 = vpop.permute.xlu1 %8204 }
0x3e91   :  { %7963 = vadd.xlane.f32.xlu0 %v7962_v23 }
0x3e93   :  { %v16950_v39 = vpop.eup %16949 }
0x3e94   :  { %v7965_v45 = vsel %vm260_vm2, %v16950_v39, 0.0  ;;  %v8203_v4 = vpop.permute.xlu1 %8202 }
0x3e95   :  { %7966 = vadd.xlane.f32.xlu0 %v7965_v45 }
0x3eab   :  { %8124 = vrot.lane.b32.xlu0 %v18265_v52, %s19206_s0 }
0x3f1e   :  { %v7964_v22 = vpop.xlane.xlu0 %7963 }
0x3f1f   :  { %16951 = vrcp.f32 %v7964_v22 }
0x3f22   :  { %v7967_v63 = vpop.xlane.xlu0 %7966 }
0x3f23   :  { %16953 = vrcp.f32 %v7967_v63 }
0x3f26   :  { %v8125_v54 = vpop.permute.xlu0 %8124 }
0x3f29   :  { %v16952_v55 = vpop.eup %16951 }
0x3f2a   :  { %v7970_v1 = vmul.f32 %v16952_v55, %v16948_v21 }
0x3f2c   :  { %15999 = vmatmul.mubr.msk.f32.vlgmr.msra.gmra.mrb[76].mxu0 %vm260_vm2, %v7970_v1 }
0x3f2d   :  { %v16954_v49 = vpop.eup %16953  ;;  %16007 = vmatpush3.xpose.msk.msra.mxu0 %vm260_vm2, %v8127_v30  ;;  %16008 = vmatprep.mubr.msk.f32.mxu0 %vm17110_vm1, %v17108_v8 }
0x3f2e   :  { %v7971_v43 = vmul.f32 %v16954_v49, %v16950_v39  ;;  %16016 = vmatprep.subr.mxu0 %v17108_v8 }
0x3f30   :  { %16004 = vmatmul.mubr.msk.f32.vlgmr.msra.gmra.mrb[96].mxu1 %vm260_vm2, %v7971_v43  ;;  %16009 = vmatmul.mubr.msk.f32.vlgmr.msra.gmra.mrb[78].mxu0 %vm260_vm2, %v8125_v54 }
0x3f31   :  { %16012 = vmatpush3.xpose.msk.msra.mxu1 %vm260_vm2, %v8205_v3  ;;  %16013 = vmatprep.mubr.msk.f32.mxu1 %vm17110_vm1, %v17108_v8 }
0x3f32   :  { %16021 = vmatprep.subr.mxu1 %v17108_v8  ;;  %16018 = vmatprep.mubr.msk.f32.mxu0 %vm17110_vm1, %v17108_v8 }
0x3f34   :  { %16014 = vmatmul.mubr.msk.f32.vlgmr.msra.gmra.mrb[98].mxu1 %vm260_vm2, %v8203_v4 }
0x3f35   :  { %16023 = vmatprep.mubr.msk.f32.mxu1 %vm17110_vm1, %v17108_v8 }
0x3fff   :  { %v18365_v6 = vpop.f32.mrb[76].mxu0 }
0x4000   :  { %v16000_v42 = vpop.f32.mrb[77].mxu0 }
0x4003   :  { %v18367_v59 = vpop.f32.mrb[96].mxu1  ;;  %v8198_v28 = vpop.f32.mrb[78].mxu0 }
0x4004   :  { %v8280_v27 = vmul.f32 0.35355338, %v8198_v28  ;;  %v16005_v44 = vpop.f32.mrb[97].mxu1  ;;  %v16010_v7 = vpop.f32.mrb[79].mxu0 }
0x4006   :  { %v8282_v10 = vadd.f32 %v18284_v53, %v8280_v27 }
0x4007   :  { %v8276_v60 = vpop.f32.mrb[98].mxu1 }
0x4008   :  { %v8281_v2 = vmul.f32 0.35355338, %v8276_v60  ;;  %v16015_v11 = vpop.f32.mrb[99].mxu1  ;;  %v8284_v14 = vsel %vm260_vm2, %v8282_v10, -inf }
0x4009   :  { %8285 = vmax.xlane.f32.xlu0 %v8284_v14 }
0x400a   :  { %v8283_v46 = vadd.f32 %v18289_v62, %v8281_v2 }
0x400c   :  { %v8287_v9 = vsel %vm260_vm2, %v8283_v46, -inf }
0x400d   :  { %8288 = vmax.xlane.f32.xlu1 %v8287_v9 }
0x401e   :  { %8306 = vrot.lane.b32.xlu1 %v18265_v52, %s19207_s27 }
0x401f   :  { %8382 = vrot.lane.b32.xlu0 %v18263_v50, %s19207_s27  ;;  %s19210_s27 = smov 40  }
0x4022   :  { %8460 = vrot.lane.b32.xlu1 %v18265_v52, %s19208_s30 }
0x4026   :  { %8538 = vrot.lane.b32.xlu1 %v18263_v50, %s19208_s30 }
0x402a   :  { %8536 = vrot.lane.b32.xlu1 %v18263_v50, %s19209_s15 }
0x4096   :  { %v8286_v15 = vpop.xlane.xlu0 %8285 }
0x4097   :  { %v8290_v16 = vsub.f32 %v8282_v10, %v8286_v15 }
0x4099   :  { %v8292_v5 = vmul.f32 1.442695, %v8290_v16 }
0x409a   :  { %v8383_v25 = vpop.permute.xlu0 %8382  ;;  %v8289_v31 = vpop.xlane.xlu1 %8288 }
0x409b   :  { %16955 = vpow2.f32 %v8292_v5  ;;  %v8291_v12 = vsub.f32 %v8283_v46, %v8289_v31  ;;  %16022 = vmatpush3.msra.mxu1 %v8383_v25  ;;  %v14780_v5 = vld [vmem:[%s17892_s9 + $0x28] sm:$0xff]  ;;  %v14781_v31 = vld [vmem:[%s17892_s9 + $0x30] sm:$0xff] }
0x409c   :  { %16031 = vmatprep.subr.mxu1 %v17108_v8 }
0x409d   :  { %v8294_v57 = vmul.f32 1.442695, %v8291_v12  ;;  %v14782_v12 = vld [vmem:[%s17892_s9 + $0x38] sm:$0xff] }
0x409e   :  { %v8307_v29 = vpop.permute.xlu1 %8306 }
0x409f   :  { %16957 = vpow2.f32 %v8294_v57  ;;  %16017 = vmatpush3.msra.mxu0 %v8307_v29  ;;  %v16612_v57 = vpack.c.bf16 %v14782_v12, %v14781_v31  ;;  %v14799_v29 = vld [vmem:[%s17899_s8 + $0x20] sm:$0xff] }
0x40a0   :  { %16026 = vmatprep.subr.mxu0 %v17108_v8 }
0x40a2   :  { %v8461_v41 = vpop.permute.xlu1 %8460 }
0x40a5   :  { %v16956_v20 = vpop.eup %16955 }
0x40a6   :  { %v8296_v33 = vsel %vm260_vm2, %v16956_v20, 0.0  ;;  %v8539_v32 = vpop.permute.xlu1 %8538 }
0x40a7   :  { %8297 = vadd.xlane.f32.xlu0 %v8296_v33 }
0x40a9   :  { %v16958_v34 = vpop.eup %16957 }
0x40aa   :  { %v8299_v35 = vsel %vm260_vm2, %v16958_v34, 0.0  ;;  %v8537_v21 = vpop.permute.xlu1 %8536 }
0x40ab   :  { %8300 = vadd.xlane.f32.xlu0 %v8299_v35 }
0x40c1   :  { %8458 = vrot.lane.b32.xlu0 %v18265_v52, %s19209_s15 }
0x4134   :  { %v8298_v36 = vpop.xlane.xlu0 %8297 }
0x4135   :  { %16959 = vrcp.f32 %v8298_v36 }
0x4138   :  { %v8301_v26 = vpop.xlane.xlu0 %8300 }
0x4139   :  { %16961 = vrcp.f32 %v8301_v26 }
0x413c   :  { %v8459_v61 = vpop.permute.xlu0 %8458 }
0x413f   :  { %v16960_v51 = vpop.eup %16959 }
0x4140   :  { %v8304_v56 = vmul.f32 %v16960_v51, %v16956_v20  ;;  %v14800_v20 = vld [vmem:[%s17899_s8 + $0x28] sm:$0xff] }
0x4141   :  { %v16624_v33 = vpack.c.bf16 %v14800_v20, %v14799_v29  ;;  %v14790_v20 = vld [vmem:[%s17964_s19 + $0x1] ss:$0 sm:$0xff] }
0x4142   :  { %16019 = vmatmul.mubr.msk.f32.vlgmr.msra.gmra.mrb[80].mxu0 %vm260_vm2, %v8304_v56 }
0x4143   :  { %v16962_v58 = vpop.eup %16961  ;;  %16027 = vmatpush3.xpose.msk.msra.mxu0 %vm260_vm2, %v8461_v41  ;;  %16028 = vmatprep.mubr.msk.f32.mxu0 %vm17110_vm1, %v17108_v8 }
0x4144   :  { %v8305_v17 = vmul.f32 %v16962_v58, %v16958_v34  ;;  %16036 = vmatprep.subr.mxu0 %v17108_v8 }
0x4146   :  { %16024 = vmatmul.mubr.msk.f32.vlgmr.msra.gmra.mrb[100].mxu1 %vm260_vm2, %v8305_v17  ;;  %16029 = vmatmul.mubr.msk.f32.vlgmr.msra.gmra.mrb[82].mxu0 %vm260_vm2, %v8459_v61 }
0x4147   :  { %16032 = vmatpush3.xpose.msk.msra.mxu1 %vm260_vm2, %v8539_v32  ;;  %16033 = vmatprep.mubr.msk.f32.mxu1 %vm17110_vm1, %v17108_v8 }
0x4148   :  { %16041 = vmatprep.subr.mxu1 %v17108_v8  ;;  %16038 = vmatprep.mubr.msk.f32.mxu0 %vm17110_vm1, %v17108_v8 }
0x414a   :  { %16034 = vmatmul.mubr.msk.f32.vlgmr.msra.gmra.mrb[102].mxu1 %vm260_vm2, %v8537_v21 }
0x414b   :  { %16043 = vmatprep.mubr.msk.f32.mxu1 %vm17110_vm1, %v17108_v8 }
0x4215   :  { %v8378_v23 = vpop.f32.mrb[80].mxu0 }
0x4216   :  { %v16020_v39 = vpop.f32.mrb[81].mxu0 }
0x4217   :  { %v14802_v39 = vld [vmem:[%s17899_s8 + $0x38] sm:$0xff] }
0x4219   :  { %v8454_v45 = vpop.f32.mrb[100].mxu1  ;;  %v8532_v22 = vpop.f32.mrb[82].mxu0 }
0x421a   :  { %v8614_v63 = vmul.f32 0.35355338, %v8532_v22  ;;  %v16025_v30 = vpop.f32.mrb[101].mxu1  ;;  %v16030_v55 = vpop.f32.mrb[83].mxu0 }
0x421c   :  { %v8616_v1 = vadd.f32 %v18284_v53, %v8614_v63 }
0x421d   :  { %v8610_v49 = vpop.f32.mrb[102].mxu1 }
0x421e   :  { %v8615_v3 = vmul.f32 0.35355338, %v8610_v49  ;;  %v16035_v43 = vpop.f32.mrb[103].mxu1  ;;  %v8618_v54 = vsel %vm260_vm2, %v8616_v1, -inf }
0x421f   :  { %8619 = vmax.xlane.f32.xlu0 %v8618_v54 }
0x4220   :  { %v8617_v4 = vadd.f32 %v18289_v62, %v8615_v3 }
0x4222   :  { %v8621_v42 = vsel %vm260_vm2, %v8617_v4, -inf }
0x4223   :  { %8622 = vmax.xlane.f32.xlu1 %v8621_v42 }
0x4234   :  { %8640 = vrot.lane.b32.xlu1 %v18265_v52, %s19210_s27 }
0x4238   :  { %8794 = vrot.lane.b32.xlu1 %v18365_v6, %s19211_s4 }
0x423c   :  { %8796 = vrot.lane.b32.xlu1 %v18367_v59, %s19211_s4 }
0x4240   :  { %8804 = vrot.lane.b32.xlu1 %v8454_v45, %s19195_s13 }
0x42ac   :  { %v8620_v53 = vpop.xlane.xlu0 %8619 }
0x42ad   :  { %v8624_v28 = vsub.f32 %v8616_v1, %v8620_v53 }
0x42af   :  { %v8626_v27 = vmul.f32 1.442695, %v8624_v28 }
0x42b0   :  { %v8623_v44 = vpop.xlane.xlu1 %8622 }
0x42b1   :  { %16963 = vpow2.f32 %v8626_v27  ;;  %v8625_v62 = vsub.f32 %v8617_v4, %v8623_v44  ;;  %v14804_v4 = vld [vmem:[%s17935_s28 + $0x1] ss:$0 sm:$0xff] }
0x42b3   :  { %v8628_v7 = vmul.f32 1.442695, %v8625_v62 }
0x42b4   :  { %v8641_v10 = vpop.permute.xlu1 %8640 }
0x42b5   :  { %16965 = vpow2.f32 %v8628_v7  ;;  %16037 = vmatpush3.msra.mxu0 %v8641_v10 }
0x42b8   :  { %v8795_v41 = vpop.permute.xlu1 %8794 }
0x42b9   :  { %v8816_v58 = vsel %vm260_vm2, %v18325_v0, %v8795_v41 }
0x42bb   :  { %v16964_v60 = vpop.eup %16963 }
0x42bc   :  { %v8630_v52 = vsel %vm260_vm2, %v16964_v60, 0.0  ;;  %v8797_v51 = vpop.permute.xlu1 %8796 }
0x42bd   :  { %8631 = vadd.xlane.f32.xlu0 %v8630_v52  ;;  %v8817_v45 = vsel %vm260_vm2, %v18327_v18, %v8797_v51  ;;  %v14784_v18 = vld [vmem:[%s17929_s12 + $0x1] ss:$0 sm:$0xff] }
0x42bf   :  { %v16966_v6 = vpop.eup %16965 }
0x42c0   :  { %v8633_v2 = vsel %vm260_vm2, %v16966_v6, 0.0  ;;  %v8805_v32 = vpop.permute.xlu1 %8804 }
0x42c1   :  { %8634 = vadd.xlane.f32.xlu0 %v8633_v2  ;;  %v8819_v22 = vsel %vm1630_vm4, %v8817_v45, %v8805_v32  ;;  %v14791_v2 = vld [vmem:[%s17949_s17 + $0x20] sm:$0xff] }
0x42c2   :  { %v18499_v45 = vld [vmem:[%s17218_s18] ss:$0 sm:$0xff] }
0x42d7   :  { %8716 = vrot.lane.b32.xlu0 %v18263_v50, %s19210_s27  ;;  %v14779_v50 = vld [vmem:[%s17892_s9 + $0x20] sm:$0xff] }
0x42d8   :  { %v16608_v25 = vpack.c.bf16 %v14780_v5, %v14779_v50 }
0x42da   :  { %16609 = vmatprep.subr.bf16.mxu0 %v16608_v25 }
0x42db   :  { %8802 = vrot.lane.b32.xlu0 %v8378_v23, %s19195_s13  ;;  %v14801_v23 = vld [vmem:[%s17899_s8 + $0x30] sm:$0xff] }
0x42dc   :  { %v16628_v30 = vpack.c.bf16 %v14802_v39, %v14801_v23 }
0x434a   :  { %v8632_v59 = vpop.xlane.xlu0 %8631 }
0x434b   :  { %16967 = vrcp.f32 %v8632_v59  ;;  %v14792_v59 = vld [vmem:[%s17949_s17 + $0x28] sm:$0xff] }
0x434e   :  { %v8635_v11 = vpop.xlane.xlu0 %8634 }
0x434f   :  { %16969 = vrcp.f32 %v8635_v11  ;;  %v14793_v11 = vld [vmem:[%s17949_s17 + $0x30] sm:$0xff] }
0x4352   :  { %v8717_v14 = vpop.permute.xlu0 %8716 }
0x4353   :  { %16042 = vmatpush3.msra.mxu1 %v8717_v14  ;;  %v16616_v14 = vpack.c.bf16 %v14792_v59, %v14791_v2 }
0x4355   :  { %v16968_v46 = vpop.eup %16967  ;;  %16617 = vmatprep.subr.bf16.mxu1 %v16616_v14 }
0x4356   :  { %v8638_v9 = vmul.f32 %v16968_v46, %v16964_v60  ;;  %v8803_v56 = vpop.permute.xlu0 %8802  ;;  %v14794_v46 = vld [vmem:[%s17949_s17 + $0x38] sm:$0xff] }
0x4357   :  { %v8818_v17 = vsel %vm1630_vm4, %v8816_v58, %v8803_v56  ;;  %v14796_v56 = vld [vmem:[%s17986_s2 + $0x1] ss:$0 sm:$0xff] }
0x4358   :  { %16039 = vmatmul.mubr.msk.f32.vlgmr.msra.gmra.mrb[84].mxu0 %vm260_vm2, %v8638_v9  ;;  %v16620_v9 = vpack.c.bf16 %v14794_v46, %v14793_v11 }
0x4359   :  { %v16970_v15 = vpop.eup %16969  ;;  %16611 = vmatpush3.bf16.msra.mxu0 %v16608_v25 }
0x435a   :  { %v8639_v16 = vmul.f32 %v16970_v15, %v16966_v6  ;;  %16613 = vmatprep.subr.bf16.mxu0 %v16612_v57 }
0x435c   :  { %16044 = vmatmul.mubr.msk.f32.vlgmr.msra.gmra.mrb[104].mxu1 %vm260_vm2, %v8639_v16 }
0x435d   :  { %16615 = vmatpush3.bf16.msra.mxu0 %v16612_v57  ;;  %16619 = vmatpush3.bf16.msra.mxu1 %v16616_v14  ;;  %v14789_v57 = vld [vmem:[%s17959_s7 + $0x1] ss:$0 sm:$0xff] }
0x435e   :  { %16625 = vmatprep.subr.bf16.mxu0 %v16624_v33  ;;  %16621 = vmatprep.subr.bf16.mxu1 %v16620_v9 }
0x4361   :  { %16623 = vmatpush3.bf16.msra.mxu1 %v16620_v9 }
0x4362   :  { %16079 = vmatprep.subr.mxu1 %v17108_v8 }
0x442b   :  { %v8712_v34 = vpop.f32.mrb[84].mxu0 }
0x442c   :  { %8810 = vrot.lane.b32.xlu0 %v8712_v34, %s19196_s5  ;;  %v16040_v35 = vpop.f32.mrb[85].mxu0 }
0x442f   :  { %v8788_v36 = vpop.f32.mrb[104].mxu1 }
0x4430   :  { %8812 = vrot.lane.b32.xlu1 %v8788_v36, %s19196_s5  ;;  %v16045_v26 = vpop.f32.mrb[105].mxu1 }
0x449e   :  { %v8811_v61 = vpop.permute.xlu0 %8810 }
0x449f   :  { %v8820_v21 = vsel %vm1633_vm3, %v8818_v17, %v8811_v61 }
0x44a0   :  { %16054 = vmatprep.mubr.msk.f32.mxu0 %vm175_vm0, %v8820_v21 }
0x44a2   :  { %v8813_v63 = vpop.permute.xlu1 %8812 }
0x44a3   :  { %v8821_v0 = vsel %vm1633_vm3, %v8819_v22, %v8813_v63 }
0x44a4   :  { %16055 = vmatmul.mubr.msk.f32.vlgmr.msra.gmra.mrb[86].mxu0 %vm175_vm0, %v8821_v0 }
0x44a5   :  { %16627 = vmatpush3.bf16.msra.mxu0 %v16624_v33  ;;  %16076 = vmatprep.mubr.msk.f32.mxu0 %vm175_vm0, %v17468_v40 }
0x44a6   :  { %16629 = vmatprep.subr.bf16.mxu0 %v16628_v30 }
0x44a9   :  { %16631 = vmatpush3.bf16.msra.mxu0 %v16628_v30 }
0x44aa   :  { %16089 = vmatprep.subr.mxu0 %v17108_v8 }
0x44ac   :  { %16077 = vmatmul.mubr.msk.f32.vlgmr.msra.gmra.mrb[88].mxu0 %vm175_vm0, %v17470_v13 }
0x44ad   :  { %16091 = vmatprep.mubr.msk.f32.mxu0 %vm17110_vm1, %v17108_v8 }
0x4577   :  { %v16056_v55 = vpop.f32.mrb[86].mxu0 }
0x4578   :  { %v8913_v1 = vadd.f32 %v16056_v55, %v14784_v18  ;;  %v8907_v49 = vpop.f32.mrb[87].mxu0  ;;  %v18504_v55 = vld [vmem:[%s17218_s18 + $0x1] ss:$0 sm:$0xff] }
0x4579   :  { %v8908_v3 = vadd.f32 %v14784_v18, %v8907_v49 }
0x457a   :  { %v8917_v43 = vadd.f32 %v8913_v1, %v18254_v38 }
0x457b   :  { %v8916_v54 = vadd.f32 %v8908_v3, %v18252_v37 }
0x457c   :  { %v8925_v40 = vsel %vm175_vm0, %v8917_v43, 0.0 }
0x457d   :  { %8926 = vadd.xlane.f32.xlu1 %v8925_v40  ;;  %v8922_v42 = vsel %vm175_vm0, %v8916_v54, 0.0 }
0x457e   :  { %8923 = vadd.xlane.f32.xlu0 %v8922_v42 }
0x457f   :  { %v16078_v13 = vpop.f32.mrb[88].mxu0 }
0x4580   :  { %v18456_v53 = vadd.f32 %v16078_v13, %v14804_v4  ;;  %v9137_v28 = vpop.f32.mrb[89].mxu0 }
0x4581   :  { %v18473_v51 = vadd.f32 %v14804_v4, %v9137_v28 }
0x460a   :  { %v8927_v27 = vpop.xlane.xlu1 %8926 }
0x460b   :  { %v8929_v44 = vmul.f32 0.03125, %v8927_v27  ;;  %v8924_v38 = vpop.xlane.xlu0 %8923 }
0x460c   :  { %v8928_v62 = vmul.f32 0.03125, %v8924_v38 }
0x460d   :  { %v8931_v37 = vsub.f32 %v8917_v43, %v8929_v44 }
0x460e   :  { %v8930_v7 = vsub.f32 %v8916_v54, %v8928_v62 }
0x460f   :  { %v8933_v52 = vmul.f32 %v8931_v37, %v8931_v37 }
0x4610   :  { %v8932_v10 = vmul.f32 %v8930_v7, %v8930_v7 }
0x4611   :  { %v8937_v6 = vsel %vm175_vm0, %v8933_v52, 0.0 }
0x4612   :  { %v8934_v60 = vsel %vm175_vm0, %v8932_v10, 0.0 }
0x4613   :  { %8935 = vadd.xlane.f32.xlu0 %v8934_v60 }
0x4617   :  { %8938 = vadd.xlane.f32.xlu0 %v8937_v6 }
0x46a0   :  { %v8936_v15 = vpop.xlane.xlu0 %8935 }
0x46a1   :  { %v8940_v16 = vmul.f32 0.03125, %v8936_v15 }
0x46a3   :  { %v8942_v50 = vadd.f32 1e-05, %v8940_v16 }
0x46a4   :  { %v8939_v5 = vpop.xlane.xlu0 %8938 }
0x46a5   :  { %16971 = vrsqrt.f32 %v8942_v50  ;;  %v8941_v25 = vmul.f32 0.03125, %v8939_v5 }
0x46a7   :  { %v8943_v31 = vadd.f32 1e-05, %v8941_v25 }
0x46a9   :  { %16973 = vrsqrt.f32 %v8943_v31 }
0x46af   :  { %v16972_v12 = vpop.eup %16971 }
0x46b0   :  { %v8946_v29 = vmul.f32 %v16972_v12, %v8930_v7 }
0x46b2   :  { %v8954_v33 = vmul.f32 %v14789_v57, %v8946_v29 }
0x46b3   :  { %v16974_v34 = vpop.eup %16973 }
0x46b4   :  { %v8947_v35 = vmul.f32 %v16974_v34, %v8931_v37  ;;  %v18467_v36 = vadd.f32 %v14790_v20, %v8954_v33 }
0x46b6   :  { %v8955_v26 = vmul.f32 %v14789_v57, %v8947_v35  ;;  %16065 = vmatprep.mubr.msk.f32.mxu1 %vm175_vm0, %v18467_v36 }
0x46b8   :  { %v18471_v41 = vadd.f32 %v14790_v20, %v8955_v26 }
0x46ba   :  { %16066 = vmatmul.mubr.msk.f32.vlgmr.msra.gmra.mrb[106].mxu1 %vm175_vm0, %v18471_v41 }
0x46bb   :  { %16080 = vmatpush3.xpose.msk.msra.mxu1 %vm260_vm2, %v18473_v51  ;;  %16081 = vmatprep.mubr.msk.f32.mxu1 %vm17110_vm1, %v17108_v8 }
0x46bc   :  { %16084 = vmatprep.subr.mxu1 %v17108_v8 }
0x478d   :  { %v16067_v58 = vpop.f32.mrb[106].mxu1 }
0x478e   :  { %v9049_v32 = vpop.f32.mrb[107].mxu1  ;;  %v18491_v61 = vadd.f32 %v16067_v58, %v14796_v56 }
0x478f   :  { %v18483_v17 = vadd.f32 %v14796_v56, %v9049_v32 }
0x4791   :  { %16082 = vmatmul.mubr.msk.f32.vlgmr.msra.gmra.mrb[108].mxu1 %vm260_vm2, %v18483_v17 }
0x4792   :  { %16085 = vmatpush3.xpose.msk.msra.mxu1 %vm260_vm2, %v18456_v53  ;;  %16086 = vmatprep.mubr.msk.f32.mxu1 %vm17110_vm1, %v17108_v8 }
0x4793   :  { %16094 = vmatprep.subr.mxu1 %v17108_v8 }
0x4795   :  { %16087 = vmatmul.mubr.msk.f32.vlgmr.msra.gmra.mrb[110].mxu1 %vm260_vm2, %v18491_v61 }
0x4796   :  { %16096 = vmatprep.mubr.msk.f32.mxu1 %vm17110_vm1, %v17108_v8 }
0x4864   :  { %v9218_v21 = vpop.f32.mrb[108].mxu1 }
0x4865   :  { %v9298_v23 = vmul.f32 0.35355338, %v9218_v21  ;;  %v16083_v39 = vpop.f32.mrb[109].mxu1 }
0x4867   :  { %v9300_v22 = vadd.f32 %v18499_v45, %v9298_v23 }
0x4868   :  { %v9294_v63 = vpop.f32.mrb[110].mxu1 }
0x4869   :  { %v9299_v30 = vmul.f32 0.35355338, %v9294_v63  ;;  %v16088_v0 = vpop.f32.mrb[111].mxu1  ;;  %v9302_v18 = vsel %vm260_vm2, %v9300_v22, -inf }
0x486a   :  { %9303 = vmax.xlane.f32.xlu1 %v9302_v18 }
0x486b   :  { %v9301_v1 = vadd.f32 %v18504_v55, %v9299_v30 }
0x486d   :  { %v9305_v49 = vsel %vm260_vm2, %v9301_v1, -inf }
0x486e   :  { %9306 = vmax.xlane.f32.xlu0 %v9305_v49 }
0x487b   :  { %9324 = vrot.lane.b32.xlu1 %v18473_v51, %s19200_s14 }
0x487f   :  { %9478 = vrot.lane.b32.xlu1 %v18473_v51, %s19203_s23 }
0x4883   :  { %9556 = vrot.lane.b32.xlu1 %v18456_v53, %s19203_s23 }
0x4884   :  { %9400 = vrot.lane.b32.xlu0 %v18456_v53, %s19200_s14 }
0x48f7   :  { %v9304_v3 = vpop.xlane.xlu1 %9303 }
0x48f8   :  { %v9308_v43 = vsub.f32 %v9300_v22, %v9304_v3 }
0x48fa   :  { %v9310_v54 = vmul.f32 1.442695, %v9308_v43 }
0x48fb   :  { %v9325_v40 = vpop.permute.xlu1 %9324  ;;  %v9307_v4 = vpop.xlane.xlu0 %9306 }
0x48fc   :  { %16975 = vpow2.f32 %v9310_v54  ;;  %v9309_v42 = vsub.f32 %v9301_v1, %v9307_v4  ;;  %16090 = vmatpush3.msra.mxu0 %v9325_v40 }
0x48fd   :  { %16099 = vmatprep.subr.mxu0 %v17108_v8 }
0x48fe   :  { %v9312_v13 = vmul.f32 1.442695, %v9309_v42 }
0x48ff   :  { %v9401_v28 = vpop.permute.xlu0 %9400  ;;  %v9479_v37 = vpop.permute.xlu1 %9478 }
0x4900   :  { %16977 = vpow2.f32 %v9312_v13  ;;  %16095 = vmatpush3.msra.mxu1 %v9401_v28 }
0x4901   :  { %16104 = vmatprep.subr.mxu1 %v17108_v8 }
0x4903   :  { %v9557_v7 = vpop.permute.xlu1 %9556 }
0x4906   :  { %v16976_v27 = vpop.eup %16975 }
0x4907   :  { %v9314_v44 = vsel %vm260_vm2, %v16976_v27, 0.0 }
0x4908   :  { %9315 = vadd.xlane.f32.xlu1 %v9314_v44 }
0x490a   :  { %v16978_v38 = vpop.eup %16977 }
0x490b   :  { %v9317_v62 = vsel %vm260_vm2, %v16978_v38, 0.0 }
0x490c   :  { %9318 = vadd.xlane.f32.xlu0 %v9317_v62 }
0x4919   :  { %9554 = vrot.lane.b32.xlu1 %v18491_v61, %s19203_s23 }
0x4922   :  { %9476 = vrot.lane.b32.xlu0 %v18483_v17, %s19203_s23 }
0x4995   :  { %v9316_v10 = vpop.xlane.xlu1 %9315 }
0x4996   :  { %16979 = vrcp.f32 %v9316_v10 }
0x4999   :  { %v9319_v60 = vpop.xlane.xlu0 %9318  ;;  %v9555_v14 = vpop.permute.xlu1 %9554 }
0x499a   :  { %16981 = vrcp.f32 %v9319_v60 }
0x499d   :  { %v9477_v11 = vpop.permute.xlu0 %9476 }
0x49a0   :  { %v16980_v52 = vpop.eup %16979 }
0x49a1   :  { %v9322_v6 = vmul.f32 %v16980_v52, %v16976_v27 }
0x49a3   :  { %16092 = vmatmul.mubr.msk.f32.vlgmr.msra.gmra.mrb[90].mxu0 %vm260_vm2, %v9322_v6 }
0x49a4   :  { %v16982_v2 = vpop.eup %16981  ;;  %16100 = vmatpush3.xpose.msk.msra.mxu0 %vm260_vm2, %v9479_v37  ;;  %16101 = vmatprep.mubr.msk.f32.mxu0 %vm17110_vm1, %v17108_v8 }
0x49a5   :  { %v9323_v59 = vmul.f32 %v16982_v2, %v16978_v38  ;;  %16109 = vmatprep.subr.mxu0 %v17108_v8 }
0x49a7   :  { %16097 = vmatmul.mubr.msk.f32.vlgmr.msra.gmra.mrb[112].mxu1 %vm260_vm2, %v9323_v59  ;;  %16102 = vmatmul.mubr.msk.f32.vlgmr.msra.gmra.mrb[92].mxu0 %vm260_vm2, %v9477_v11 }
0x49a8   :  { %16105 = vmatpush3.xpose.msk.msra.mxu1 %vm260_vm2, %v9557_v7  ;;  %16106 = vmatprep.mubr.msk.f32.mxu1 %vm17110_vm1, %v17108_v8 }
0x49a9   :  { %16114 = vmatprep.subr.mxu1 %v17108_v8  ;;  %16111 = vmatprep.mubr.msk.f32.mxu0 %vm17110_vm1, %v17108_v8 }
0x49ab   :  { %16107 = vmatmul.mubr.msk.f32.vlgmr.msra.gmra.mrb[114].mxu1 %vm260_vm2, %v9555_v14 }
0x49ac   :  { %16116 = vmatprep.mubr.msk.f32.mxu1 %vm17110_vm1, %v17108_v8 }
0x4a76   :  { %v18540_v46 = vpop.f32.mrb[90].mxu0 }
0x4a77   :  { %v16093_v9 = vpop.f32.mrb[91].mxu0 }
0x4a7a   :  { %v18542_v15 = vpop.f32.mrb[112].mxu1  ;;  %v9550_v16 = vpop.f32.mrb[92].mxu0 }
0x4a7b   :  { %v9632_v50 = vmul.f32 0.35355338, %v9550_v16  ;;  %v16098_v5 = vpop.f32.mrb[113].mxu1  ;;  %v16103_v25 = vpop.f32.mrb[93].mxu0 }
0x4a7d   :  { %v9634_v31 = vadd.f32 %v18499_v45, %v9632_v50 }
0x4a7e   :  { %v9628_v12 = vpop.f32.mrb[114].mxu1 }
0x4a7f   :  { %v9633_v57 = vmul.f32 0.35355338, %v9628_v12  ;;  %v16108_v29 = vpop.f32.mrb[115].mxu1  ;;  %v9636_v20 = vsel %vm260_vm2, %v9634_v31, -inf }
0x4a80   :  { %9637 = vmax.xlane.f32.xlu0 %v9636_v20 }
0x4a81   :  { %v9635_v33 = vadd.f32 %v18504_v55, %v9633_v57 }
0x4a83   :  { %v9639_v34 = vsel %vm260_vm2, %v9635_v33, -inf }
0x4a84   :  { %9640 = vmax.xlane.f32.xlu1 %v9639_v34 }
0x4a95   :  { %9658 = vrot.lane.b32.xlu1 %v18473_v51, %s19202_s6 }
0x4a96   :  { %9734 = vrot.lane.b32.xlu0 %v18456_v53, %s19202_s6 }
0x4a99   :  { %9812 = vrot.lane.b32.xlu1 %v18473_v51, %s19206_s0 }
0x4a9d   :  { %9890 = vrot.lane.b32.xlu1 %v18456_v53, %s19206_s0 }
0x4aa1   :  { %9888 = vrot.lane.b32.xlu1 %v18491_v61, %s19206_s0 }
0x4b0d   :  { %v9638_v35 = vpop.xlane.xlu0 %9637 }
0x4b0e   :  { %v9642_v26 = vsub.f32 %v9634_v31, %v9638_v35 }
0x4b10   :  { %v9644_v56 = vmul.f32 1.442695, %v9642_v26 }
0x4b11   :  { %v9735_v58 = vpop.permute.xlu0 %9734  ;;  %v9641_v32 = vpop.xlane.xlu1 %9640 }
0x4b12   :  { %16983 = vpow2.f32 %v9644_v56  ;;  %v9643_v21 = vsub.f32 %v9635_v33, %v9641_v32  ;;  %16115 = vmatpush3.msra.mxu1 %v9735_v58 }
0x4b13   :  { %16124 = vmatprep.subr.mxu1 %v17108_v8 }
0x4b14   :  { %v9646_v23 = vmul.f32 1.442695, %v9643_v21 }
0x4b15   :  { %v9659_v39 = vpop.permute.xlu1 %9658 }
0x4b16   :  { %16985 = vpow2.f32 %v9646_v23  ;;  %16110 = vmatpush3.msra.mxu0 %v9659_v39 }
0x4b17   :  { %16119 = vmatprep.subr.mxu0 %v17108_v8 }
0x4b19   :  { %v9813_v49 = vpop.permute.xlu1 %9812 }
0x4b1c   :  { %v16984_v22 = vpop.eup %16983 }
0x4b1d   :  { %v9648_v63 = vsel %vm260_vm2, %v16984_v22, 0.0  ;;  %v9891_v40 = vpop.permute.xlu1 %9890 }
0x4b1e   :  { %9649 = vadd.xlane.f32.xlu0 %v9648_v63 }
0x4b20   :  { %v16986_v30 = vpop.eup %16985 }
0x4b21   :  { %v9651_v0 = vsel %vm260_vm2, %v16986_v30, 0.0  ;;  %v9889_v13 = vpop.permute.xlu1 %9888 }
0x4b22   :  { %9652 = vadd.xlane.f32.xlu0 %v9651_v0 }
0x4b38   :  { %9810 = vrot.lane.b32.xlu0 %v18483_v17, %s19206_s0 }
0x4bab   :  { %v9650_v18 = vpop.xlane.xlu0 %9649 }
0x4bac   :  { %16987 = vrcp.f32 %v9650_v18 }
0x4baf   :  { %v9653_v1 = vpop.xlane.xlu0 %9652 }
0x4bb0   :  { %16989 = vrcp.f32 %v9653_v1 }
0x4bb3   :  { %v9811_v42 = vpop.permute.xlu0 %9810 }
0x4bb6   :  { %v16988_v3 = vpop.eup %16987 }
0x4bb7   :  { %v9656_v43 = vmul.f32 %v16988_v3, %v16984_v22 }
0x4bb9   :  { %16112 = vmatmul.mubr.msk.f32.vlgmr.msra.gmra.mrb[94].mxu0 %vm260_vm2, %v9656_v43 }
0x4bba   :  { %v16990_v54 = vpop.eup %16989  ;;  %16120 = vmatpush3.xpose.msk.msra.mxu0 %vm260_vm2, %v9813_v49  ;;  %16121 = vmatprep.mubr.msk.f32.mxu0 %vm17110_vm1, %v17108_v8 }
0x4bbb   :  { %v9657_v4 = vmul.f32 %v16990_v54, %v16986_v30  ;;  %16129 = vmatprep.subr.mxu0 %v17108_v8 }
0x4bbd   :  { %16117 = vmatmul.mubr.msk.f32.vlgmr.msra.gmra.mrb[116].mxu1 %vm260_vm2, %v9657_v4  ;;  %16122 = vmatmul.mubr.msk.f32.vlgmr.msra.gmra.mrb[96].mxu0 %vm260_vm2, %v9811_v42 }
0x4bbe   :  { %16125 = vmatpush3.xpose.msk.msra.mxu1 %vm260_vm2, %v9891_v40  ;;  %16126 = vmatprep.mubr.msk.f32.mxu1 %vm17110_vm1, %v17108_v8 }
0x4bbf   :  { %16134 = vmatprep.subr.mxu1 %v17108_v8  ;;  %16131 = vmatprep.mubr.msk.f32.mxu0 %vm17110_vm1, %v17108_v8 }
0x4bc1   :  { %16127 = vmatmul.mubr.msk.f32.vlgmr.msra.gmra.mrb[118].mxu1 %vm260_vm2, %v9889_v13 }
0x4bc2   :  { %16136 = vmatprep.mubr.msk.f32.mxu1 %vm17110_vm1, %v17108_v8 }
0x4c8c   :  { %v18580_v28 = vpop.f32.mrb[94].mxu0 }
0x4c8d   :  { %v16113_v27 = vpop.f32.mrb[95].mxu0 }
0x4c90   :  { %v18582_v44 = vpop.f32.mrb[116].mxu1  ;;  %v9884_v38 = vpop.f32.mrb[96].mxu0 }
0x4c91   :  { %v9966_v62 = vmul.f32 0.35355338, %v9884_v38  ;;  %v16118_v37 = vpop.f32.mrb[117].mxu1  ;;  %v16123_v7 = vpop.f32.mrb[97].mxu0 }
0x4c93   :  { %v9968_v10 = vadd.f32 %v18499_v45, %v9966_v62 }
0x4c94   :  { %v9962_v60 = vpop.f32.mrb[118].mxu1 }
0x4c95   :  { %v9967_v52 = vmul.f32 0.35355338, %v9962_v60  ;;  %v16128_v6 = vpop.f32.mrb[119].mxu1  ;;  %v9970_v2 = vsel %vm260_vm2, %v9968_v10, -inf }
0x4c96   :  { %9971 = vmax.xlane.f32.xlu0 %v9970_v2 }
0x4c97   :  { %v9969_v59 = vadd.f32 %v18504_v55, %v9967_v52 }
0x4c99   :  { %v9973_v11 = vsel %vm260_vm2, %v9969_v59, -inf }
0x4c9a   :  { %9974 = vmax.xlane.f32.xlu1 %v9973_v11 }
0x4cab   :  { %9992 = vrot.lane.b32.xlu1 %v18473_v51, %s19205_s10 }
0x4cac   :  { %10068 = vrot.lane.b32.xlu0 %v18456_v53, %s19205_s10 }
0x4caf   :  { %10146 = vrot.lane.b32.xlu1 %v18473_v51, %s19209_s15 }
0x4cb3   :  { %10224 = vrot.lane.b32.xlu1 %v18456_v53, %s19209_s15 }
0x4cb7   :  { %10222 = vrot.lane.b32.xlu1 %v18491_v61, %s19209_s15 }
0x4d23   :  { %v9972_v14 = vpop.xlane.xlu0 %9971 }
0x4d24   :  { %v9976_v9 = vsub.f32 %v9968_v10, %v9972_v14  ;;  %v14831_v14 = vld [vmem:[%s18148_s22 + $0x20] sm:$0xff] }
0x4d26   :  { %v9978_v16 = vmul.f32 1.442695, %v9976_v9 }
0x4d27   :  { %v10069_v50 = vpop.permute.xlu0 %10068  ;;  %v9975_v5 = vpop.xlane.xlu1 %9974 }
0x4d28   :  { %16991 = vpow2.f32 %v9978_v16  ;;  %v9977_v25 = vsub.f32 %v9969_v59, %v9975_v5  ;;  %16135 = vmatpush3.msra.mxu1 %v10069_v50  ;;  %v14833_v16 = vld [vmem:[%s18148_s22 + $0x30] sm:$0xff]  ;;  %v14834_v50 = vld [vmem:[%s18148_s22 + $0x38] sm:$0xff] }
0x4d29   :  { %16144 = vmatprep.subr.mxu1 %v17108_v8  ;;  %v16636_v5 = vpack.c.bf16 %v14834_v50, %v14833_v16  ;;  %v14841_v50 = vld [vmem:[%s18201_s16 + $0x1] ss:$0 sm:$0xff] }
0x4d2a   :  { %v9980_v31 = vmul.f32 1.442695, %v9977_v25 }
0x4d2b   :  { %v9993_v12 = vpop.permute.xlu1 %9992 }
0x4d2c   :  { %16993 = vpow2.f32 %v9980_v31  ;;  %16130 = vmatpush3.msra.mxu0 %v9993_v12 }
0x4d2d   :  { %16139 = vmatprep.subr.mxu0 %v17108_v8 }
0x4d2f   :  { %v10147_v35 = vpop.permute.xlu1 %10146 }
0x4d32   :  { %v16992_v57 = vpop.eup %16991 }
0x4d33   :  { %v9982_v29 = vsel %vm260_vm2, %v16992_v57, 0.0  ;;  %v10225_v32 = vpop.permute.xlu1 %10224 }
0x4d34   :  { %9983 = vadd.xlane.f32.xlu0 %v9982_v29 }
0x4d36   :  { %v16994_v61 = vpop.eup %16993 }
0x4d37   :  { %v9985_v20 = vsel %vm260_vm2, %v16994_v61, 0.0  ;;  %v10223_v23 = vpop.permute.xlu1 %10222 }
0x4d38   :  { %9986 = vadd.xlane.f32.xlu0 %v9985_v20 }
0x4d4e   :  { %10144 = vrot.lane.b32.xlu0 %v18483_v17, %s19209_s15 }
0x4dc1   :  { %v9984_v33 = vpop.xlane.xlu0 %9983 }
0x4dc2   :  { %16995 = vrcp.f32 %v9984_v33 }
0x4dc5   :  { %v9987_v34 = vpop.xlane.xlu0 %9986 }
0x4dc6   :  { %16997 = vrcp.f32 %v9987_v34 }
0x4dc9   :  { %v10145_v17 = vpop.permute.xlu0 %10144 }
0x4dcc   :  { %v16996_v26 = vpop.eup %16995 }
0x4dcd   :  { %v9990_v56 = vmul.f32 %v16996_v26, %v16992_v57 }
0x4dcf   :  { %16132 = vmatmul.mubr.msk.f32.vlgmr.msra.gmra.mrb[98].mxu0 %vm260_vm2, %v9990_v56 }
0x4dd0   :  { %v16998_v58 = vpop.eup %16997  ;;  %16140 = vmatpush3.xpose.msk.msra.mxu0 %vm260_vm2, %v10147_v35  ;;  %16141 = vmatprep.mubr.msk.f32.mxu0 %vm17110_vm1, %v17108_v8 }
0x4dd1   :  { %v9991_v21 = vmul.f32 %v16998_v58, %v16994_v61  ;;  %16149 = vmatprep.subr.mxu0 %v17108_v8 }
0x4dd3   :  { %16137 = vmatmul.mubr.msk.f32.vlgmr.msra.gmra.mrb[120].mxu1 %vm260_vm2, %v9991_v21  ;;  %16142 = vmatmul.mubr.msk.f32.vlgmr.msra.gmra.mrb[100].mxu0 %vm260_vm2, %v10145_v17 }
0x4dd4   :  { %16145 = vmatpush3.xpose.msk.msra.mxu1 %vm260_vm2, %v10225_v32  ;;  %16146 = vmatprep.mubr.msk.f32.mxu1 %vm17110_vm1, %v17108_v8 }
0x4dd5   :  { %16154 = vmatprep.subr.mxu1 %v17108_v8  ;;  %16151 = vmatprep.mubr.msk.f32.mxu0 %vm17110_vm1, %v17108_v8 }
0x4dd7   :  { %16147 = vmatmul.mubr.msk.f32.vlgmr.msra.gmra.mrb[122].mxu1 %vm260_vm2, %v10223_v23  ;;  %v14836_v23 = vld [vmem:[%s18169_s11 + $0x1] ss:$0 sm:$0xff] }
0x4dd8   :  { %16156 = vmatprep.mubr.msk.f32.mxu1 %vm17110_vm1, %v17108_v8 }
0x4ea2   :  { %v10064_v39 = vpop.f32.mrb[98].mxu0 }
0x4ea3   :  { %v16133_v22 = vpop.f32.mrb[99].mxu0 }
0x4ea6   :  { %v10140_v63 = vpop.f32.mrb[120].mxu1  ;;  %v10218_v30 = vpop.f32.mrb[100].mxu0 }
0x4ea7   :  { %v10300_v0 = vmul.f32 0.35355338, %v10218_v30  ;;  %v16138_v18 = vpop.f32.mrb[121].mxu1  ;;  %v16143_v1 = vpop.f32.mrb[101].mxu0 }
0x4ea9   :  { %v10302_v49 = vadd.f32 %v18499_v45, %v10300_v0 }
0x4eaa   :  { %v10296_v3 = vpop.f32.mrb[122].mxu1 }
0x4eab   :  { %v10301_v43 = vmul.f32 0.35355338, %v10296_v3  ;;  %v16148_v54 = vpop.f32.mrb[123].mxu1  ;;  %v10304_v40 = vsel %vm260_vm2, %v10302_v49, -inf }
0x4eac   :  { %10305 = vmax.xlane.f32.xlu0 %v10304_v40 }
0x4ead   :  { %v10303_v4 = vadd.f32 %v18504_v55, %v10301_v43 }
0x4eaf   :  { %v10307_v42 = vsel %vm260_vm2, %v10303_v4, -inf }
0x4eb0   :  { %10308 = vmax.xlane.f32.xlu1 %v10307_v42 }
0x4ec1   :  { %10326 = vrot.lane.b32.xlu1 %v18473_v51, %s19208_s30 }
0x4ec5   :  { %10480 = vrot.lane.b32.xlu1 %v18580_v28, %s19211_s4 }
0x4ec9   :  { %10482 = vrot.lane.b32.xlu1 %v18582_v44, %s19211_s4 }
0x4ecd   :  { %10490 = vrot.lane.b32.xlu1 %v10140_v63, %s19195_s13 }
0x4f39   :  { %v10306_v45 = vpop.xlane.xlu0 %10305 }
0x4f3a   :  { %v10310_v13 = vsub.f32 %v10302_v49, %v10306_v45  ;;  %v14843_v45 = vld [vmem:[%s18181_s29 + $0x20] sm:$0xff] }
0x4f3c   :  { %v10312_v27 = vmul.f32 1.442695, %v10310_v13  ;;  %v14844_v13 = vld [vmem:[%s18181_s29 + $0x28] sm:$0xff] }
0x4f3d   :  { %v10309_v38 = vpop.xlane.xlu1 %10308 }
0x4f3e   :  { %16999 = vpow2.f32 %v10312_v27  ;;  %v10311_v55 = vsub.f32 %v10303_v4, %v10309_v38  ;;  %v14845_v27 = vld [vmem:[%s18181_s29 + $0x30] sm:$0xff]  ;;  %v16640_v38 = vpack.c.bf16 %v14844_v13, %v14843_v45  ;;  %v14867_v13 = vld [vmem:[%s17670_s3 + $0x40] sm:$0xff] }
0x4f40   :  { %v10314_v62 = vmul.f32 1.442695, %v10311_v55  ;;  %v14846_v55 = vld [vmem:[%s18181_s29 + $0x38] sm:$0xff] }
0x4f41   :  { %v10327_v37 = vpop.permute.xlu1 %10326 }
0x4f42   :  { %17001 = vpow2.f32 %v10314_v62  ;;  %16150 = vmatpush3.msra.mxu0 %v10327_v37  ;;  %v16644_v62 = vpack.c.bf16 %v14846_v55, %v14845_v27  ;;  %v14851_v37 = vld [vmem:[%s18190_s25 + $0x40] sm:$0xff]  ;;  %v14868_v27 = vld [vmem:[%s17670_s3 + $0x48] sm:$0xff] }
0x4f43   :  { %v16664_v55 = vpack.c.bf16 %v14868_v27, %v14867_v13 }
0x4f45   :  { %v10481_v29 = vpop.permute.xlu1 %10480 }
0x4f46   :  { %v10502_v33 = vsel %vm260_vm2, %v18540_v46, %v10481_v29 }
0x4f48   :  { %v17000_v7 = vpop.eup %16999 }
0x4f49   :  { %v10316_v51 = vsel %vm260_vm2, %v17000_v7, 0.0  ;;  %v10483_v61 = vpop.permute.xlu1 %10482 }
0x4f4a   :  { %10317 = vadd.xlane.f32.xlu0 %v10316_v51  ;;  %v10503_v58 = vsel %vm260_vm2, %v18542_v15, %v10483_v61  ;;  %v14853_v51 = vld [vmem:[%s18190_s25 + $0x50] sm:$0xff] }
0x4f4c   :  { %v17002_v28 = vpop.eup %17001 }
0x4f4d   :  { %v10319_v10 = vsel %vm260_vm2, %v17002_v28, 0.0  ;;  %v10491_v34 = vpop.permute.xlu1 %10490 }
0x4f4e   :  { %10320 = vadd.xlane.f32.xlu0 %v10319_v10  ;;  %v10505_v32 = vsel %vm1630_vm4, %v10503_v58, %v10491_v34  ;;  %v14854_v10 = vld [vmem:[%s18190_s25 + $0x58] sm:$0xff] }
0x4f4f   :  { %v14858_v34 = vld [vmem:[%s18190_s25 + $0x78] sm:$0xff] }
0x4f64   :  { %10402 = vrot.lane.b32.xlu0 %v18456_v53, %s19208_s30  ;;  %v14832_v53 = vld [vmem:[%s18148_s22 + $0x28] sm:$0xff] }
0x4f65   :  { %v16632_v9 = vpack.c.bf16 %v14832_v53, %v14831_v14 }
0x4f67   :  { %16633 = vmatprep.subr.bf16.mxu0 %v16632_v9 }
0x4f68   :  { %10488 = vrot.lane.b32.xlu0 %v10064_v39, %s19195_s13 }
0x4fd7   :  { %v10318_v44 = vpop.xlane.xlu0 %10317 }
0x4fd8   :  { %17003 = vrcp.f32 %v10318_v44  ;;  %v16652_v44 = vpack.c.bf16 %v14854_v10, %v14853_v51 }
0x4fdb   :  { %v10321_v60 = vpop.xlane.xlu0 %10320 }
0x4fdc   :  { %17005 = vrcp.f32 %v10321_v60  ;;  %v14855_v60 = vld [vmem:[%s18190_s25 + $0x60] sm:$0xff] }
0x4fdf   :  { %v10403_v52 = vpop.permute.xlu0 %10402 }
0x4fe0   :  { %16155 = vmatpush3.msra.mxu1 %v10403_v52  ;;  %v14856_v52 = vld [vmem:[%s18190_s25 + $0x68] sm:$0xff] }
0x4fe1   :  { %16641 = vmatprep.subr.bf16.mxu1 %v16640_v38 }
0x4fe2   :  { %v17004_v6 = vpop.eup %17003 }
0x4fe3   :  { %v10324_v2 = vmul.f32 %v17004_v6, %v17000_v7  ;;  %v10489_v20 = vpop.permute.xlu0 %10488  ;;  %v14852_v7 = vld [vmem:[%s18190_s25 + $0x48] sm:$0xff]  ;;  %v16656_v6 = vpack.c.bf16 %v14856_v52, %v14855_v60 }
0x4fe4   :  { %v10504_v35 = vsel %vm1630_vm4, %v10502_v33, %v10489_v20  ;;  %v14857_v33 = vld [vmem:[%s18190_s25 + $0x70] sm:$0xff] }
0x4fe5   :  { %16152 = vmatmul.mubr.msk.f32.vlgmr.msra.gmra.mrb[102].mxu0 %vm260_vm2, %v10324_v2 }
0x4fe6   :  { %v17006_v59 = vpop.eup %17005  ;;  %16635 = vmatpush3.bf16.msra.mxu0 %v16632_v9 }
0x4fe7   :  { %v10325_v11 = vmul.f32 %v17006_v59, %v17002_v28  ;;  %16637 = vmatprep.subr.bf16.mxu0 %v16636_v5  ;;  %v16648_v28 = vpack.c.bf16 %v14852_v7, %v14851_v37 }
0x4fe9   :  { %16157 = vmatmul.mubr.msk.f32.vlgmr.msra.gmra.mrb[124].mxu1 %vm260_vm2, %v10325_v11 }
0x4fea   :  { %16639 = vmatpush3.bf16.msra.mxu0 %v16636_v5  ;;  %16643 = vmatpush3.bf16.msra.mxu1 %v16640_v38  ;;  %v14869_v38 = vld [vmem:[%s17670_s3 + $0x50] sm:$0xff] }
0x4feb   :  { %16645 = vmatprep.subr.bf16.mxu1 %v16644_v62  ;;  %16649 = vmatprep.subr.bf16.mxu0 %v16648_v28 }
0x4fee   :  { %16647 = vmatpush3.bf16.msra.mxu1 %v16644_v62  ;;  %v14870_v62 = vld [vmem:[%s17670_s3 + $0x58] sm:$0xff]  ;;  %s19213_s3 = sld [smem:[#allocation6_spill]] }
0x4fef   :  { %v16668_v37 = vpack.c.bf16 %v14870_v62, %v14869_v38  ;;  %16665 = vmatprep.subr.bf16.mxu1 %v16664_v55 }
0x50b8   :  { %v10398_v25 = vpop.f32.mrb[102].mxu0 }
0x50b9   :  { %10496 = vrot.lane.b32.xlu0 %v10398_v25, %s19196_s5  ;;  %v16153_v31 = vpop.f32.mrb[103].mxu0  ;;  %v14842_v25 = vld [vmem:[%s18206_s20 + $0x1] ss:$0 sm:$0xff] }
0x50bc   :  { %v10474_v12 = vpop.f32.mrb[124].mxu1 }
0x50bd   :  { %10498 = vrot.lane.b32.xlu1 %v10474_v12, %s19196_s5  ;;  %v16158_v57 = vpop.f32.mrb[125].mxu1 }
0x512b   :  { %v10497_v26 = vpop.permute.xlu0 %10496 }
0x512c   :  { %v10506_v56 = vsel %vm1633_vm3, %v10504_v35, %v10497_v26  ;;  %v16660_v35 = vpack.c.bf16 %v14858_v34, %v14857_v33  ;;  %v14848_v26 = vld [vmem:[%s18218_s26 + $0x1] ss:$0 sm:$0xff] }
0x512d   :  { %16167 = vmatprep.mubr.msk.f32.mxu0 %vm175_vm0, %v10506_v56 }
0x512f   :  { %v10499_v21 = vpop.permute.xlu1 %10498 }
0x5130   :  { %v10507_v17 = vsel %vm1633_vm3, %v10505_v32, %v10499_v21 }
0x5131   :  { %16168 = vmatmul.mubr.msk.f32.vlgmr.msra.gmra.mrb[104].mxu0 %vm175_vm0, %v10507_v17 }
0x5132   :  { %16651 = vmatpush3.bf16.msra.mxu0 %v16648_v28 }
0x5133   :  { %16653 = vmatprep.subr.bf16.mxu0 %v16652_v44 }
0x5136   :  { %16655 = vmatpush3.bf16.msra.mxu0 %v16652_v44 }
0x5137   :  { %16657 = vmatprep.subr.bf16.mxu0 %v16656_v6 }
0x513a   :  { %16659 = vmatpush3.bf16.msra.mxu0 %v16656_v6  ;;  %v14865_v6 = vld [vmem:[%s18243_s24 + $0x1] ss:$0 sm:$0xff] }
0x513b   :  { %16661 = vmatprep.subr.bf16.mxu0 %v16660_v35 }
0x513e   :  { %16663 = vmatpush3.bf16.msra.mxu0 %v16660_v35  ;;  %v18727_v35 = vld [vmem:[%s19213_s3] sm:$0xff] }
0x513f   :  { %16221 = vmatprep.subr.mxu0 %v17108_v8 }
0x5204   :  { %v16169_v46 = vpop.f32.mrb[104].mxu0 }
0x5205   :  { %v10599_v39 = vadd.f32 %v16169_v46, %v14836_v23  ;;  %v10593_v22 = vpop.f32.mrb[105].mxu0  ;;  %v14860_v46 = vld [vmem:[%s18228_s21 + $0x1] ss:$0 sm:$0xff]  ;;  %s19212_s21 = sld [smem:[#allocation5_spill]] }
0x5206   :  { %v10594_v63 = vadd.f32 %v14836_v23, %v10593_v22 }
0x5207   :  { %v10603_v30 = vadd.f32 %v10599_v39, %v18471_v41 }
0x5208   :  { %v10602_v0 = vadd.f32 %v10594_v63, %v18467_v36 }
0x5209   :  { %v10611_v18 = vsel %vm175_vm0, %v10603_v30, 0.0 }
0x520a   :  { %10612 = vadd.xlane.f32.xlu1 %v10611_v18  ;;  %v10608_v15 = vsel %vm175_vm0, %v10602_v0, 0.0 }
0x520b   :  { %10609 = vadd.xlane.f32.xlu0 %v10608_v15 }
0x5297   :  { %v10613_v1 = vpop.xlane.xlu1 %10612 }
0x5298   :  { %v10615_v49 = vmul.f32 0.03125, %v10613_v1  ;;  %v10610_v3 = vpop.xlane.xlu0 %10609 }
0x5299   :  { %v10614_v43 = vmul.f32 0.03125, %v10610_v3 }
0x529a   :  { %v10617_v54 = vsub.f32 %v10603_v30, %v10615_v49 }
0x529b   :  { %v10616_v40 = vsub.f32 %v10602_v0, %v10614_v43 }
0x529c   :  { %v10619_v41 = vmul.f32 %v10617_v54, %v10617_v54 }
0x529d   :  { %v10618_v4 = vmul.f32 %v10616_v40, %v10616_v40 }
0x529e   :  { %v10623_v42 = vsel %vm175_vm0, %v10619_v41, 0.0 }
0x529f   :  { %v10620_v36 = vsel %vm175_vm0, %v10618_v4, 0.0 }
0x52a0   :  { %10621 = vadd.xlane.f32.xlu0 %v10620_v36 }
0x52a4   :  { %10624 = vadd.xlane.f32.xlu0 %v10623_v42 }
0x532d   :  { %v10622_v2 = vpop.xlane.xlu0 %10621 }
0x532e   :  { %v10626_v59 = vmul.f32 0.03125, %v10622_v2 }
0x5330   :  { %v10628_v11 = vadd.f32 1e-05, %v10626_v59 }
0x5331   :  { %v10625_v14 = vpop.xlane.xlu0 %10624 }
0x5332   :  { %17007 = vrsqrt.f32 %v10628_v11  ;;  %v10627_v53 = vmul.f32 0.03125, %v10625_v14  ;;  %v14866_v14 = vld [vmem:[%s18248_s1 + $0x1] ss:$0 sm:$0xff] }
0x5334   :  { %v10629_v9 = vadd.f32 1e-05, %v10627_v53 }
0x5336   :  { %17009 = vrsqrt.f32 %v10629_v9 }
0x533c   :  { %v17008_v16 = vpop.eup %17007 }
0x533d   :  { %v10632_v5 = vmul.f32 %v17008_v16, %v10616_v40 }
0x533f   :  { %v10640_v31 = vmul.f32 %v14841_v50, %v10632_v5  ;;  %v14872_v5 = vld [vmem:[%s19212_s21 + $0x2] ss:$0 sm:$0xff]  ;;  %s19214_s21 = smov 64  }
0x5340   :  { %v17010_v12 = vpop.eup %17009 }
0x5341   :  { %v10633_v57 = vmul.f32 %v17010_v12, %v10617_v54  ;;  %v10648_v29 = vadd.f32 %v14842_v25, %v10640_v31 }
0x5343   :  { %v10641_v61 = vmul.f32 %v14841_v50, %v10633_v57  ;;  %16178 = vmatprep.mubr.msk.f32.mxu1 %vm175_vm0, %v10648_v29 }
0x5345   :  { %v10649_v20 = vadd.f32 %v14842_v25, %v10641_v61 }
0x5347   :  { %16179 = vmatmul.mubr.msk.f32.vlgmr.msra.gmra.mrb[126].mxu1 %vm175_vm0, %v10649_v20 }
0x5348   :  { %16667 = vmatpush3.bf16.msra.mxu1 %v16664_v55 }
0x5349   :  { %16669 = vmatprep.subr.bf16.mxu1 %v16668_v37 }
0x534c   :  { %16671 = vmatpush3.bf16.msra.mxu1 %v16668_v37 }
0x534d   :  { %16211 = vmatprep.subr.mxu1 %v17108_v8 }
0x541a   :  { %v16180_v56 = vpop.f32.mrb[126].mxu1 }
0x541b   :  { %v10741_v58 = vadd.f32 %v16180_v56, %v14848_v26  ;;  %v10735_v32 = vpop.f32.mrb[127].mxu1 }
0x541c   :  { %v10736_v21 = vadd.f32 %v14848_v26, %v10735_v32 }
0x541d   :  { %v10745_v23 = vmax.f32 %v10741_v58, 0.0 }
0x541e   :  { %v10744_v17 = vmax.f32 %v10736_v21, 0.0 }
0x5420   :  { %16197 = vmatprep.mubr.msk.f32.mxu0 %vm1884_vm5, %v10744_v17  ;;  %v18732_v17 = vld [vmem:[%s19213_s3 + $0x8] sm:$0xff]  ;;  %s19215_s3 = smov 56  }
0x5421   :  { %16198 = vmatmul.mubr.msk.f32.vlgmr.msra.gmra.mrb[106].mxu0 %vm1884_vm5, %v10745_v23 }
0x5422   :  { %16223 = vmatprep.mubr.msk.f32.mxu0 %vm17110_vm1, %v17108_v8 }
0x54f4   :  { %v16199_v39 = vpop.f32.mrb[106].mxu0 }
0x54f5   :  { %v10841_v22 = vadd.f32 %v16199_v39, %v14860_v46  ;;  %v10835_v63 = vpop.f32.mrb[107].mxu0 }
0x54f6   :  { %v10836_v30 = vadd.f32 %v14860_v46, %v10835_v63 }
0x54f7   :  { %v10845_v0 = vadd.f32 %v10841_v22, %v10649_v20 }
0x54f8   :  { %v10844_v18 = vadd.f32 %v10836_v30, %v10648_v29 }
0x54f9   :  { %v10853_v15 = vsel %vm175_vm0, %v10845_v0, 0.0 }
0x54fa   :  { %10854 = vadd.xlane.f32.xlu0 %v10853_v15  ;;  %v10850_v1 = vsel %vm175_vm0, %v10844_v18, 0.0 }
0x54fb   :  { %10851 = vadd.xlane.f32.xlu1 %v10850_v1 }
0x5587   :  { %v10855_v49 = vpop.xlane.xlu0 %10854 }
0x5588   :  { %v10857_v3 = vmul.f32 0.03125, %v10855_v49  ;;  %v10852_v43 = vpop.xlane.xlu1 %10851 }
0x5589   :  { %v10856_v54 = vmul.f32 0.03125, %v10852_v43 }
0x558a   :  { %v10859_v40 = vsub.f32 %v10845_v0, %v10857_v3 }
0x558b   :  { %v10858_v4 = vsub.f32 %v10844_v18, %v10856_v54 }
0x558c   :  { %v10861_v36 = vmul.f32 %v10859_v40, %v10859_v40 }
0x558d   :  { %v10860_v41 = vmul.f32 %v10858_v4, %v10858_v4 }
0x558e   :  { %v10865_v42 = vsel %vm175_vm0, %v10861_v36, 0.0 }
0x558f   :  { %10866 = vadd.xlane.f32.xlu0 %v10865_v42  ;;  %v10862_v45 = vsel %vm175_vm0, %v10860_v41, 0.0 }
0x5590   :  { %10863 = vadd.xlane.f32.xlu1 %v10862_v45 }
0x561c   :  { %v10867_v7 = vpop.xlane.xlu0 %10866 }
0x561d   :  { %v10869_v51 = vmul.f32 0.03125, %v10867_v7  ;;  %v10864_v28 = vpop.xlane.xlu1 %10863 }
0x561e   :  { %v10868_v10 = vmul.f32 0.03125, %v10864_v28 }
0x561f   :  { %v10871_v44 = vadd.f32 1e-05, %v10869_v51 }
0x5620   :  { %v10870_v60 = vadd.f32 1e-05, %v10868_v10 }
0x5621   :  { %17011 = vrsqrt.f32 %v10871_v44 }
0x5622   :  { %17013 = vrsqrt.f32 %v10870_v60 }
0x562b   :  { %v17012_v52 = vpop.eup %17011 }
0x562c   :  { %v17014_v2 = vpop.eup %17013  ;;  %v10875_v59 = vmul.f32 %v17012_v52, %v10859_v40 }
0x562d   :  { %v10874_v11 = vmul.f32 %v17014_v2, %v10858_v4 }
0x562e   :  { %v10883_v53 = vmul.f32 %v14865_v6, %v10875_v59 }
0x562f   :  { %v10882_v9 = vmul.f32 %v14865_v6, %v10874_v11 }
0x5630   :  { %v18697_v50 = vadd.f32 %v14866_v14, %v10883_v53 }
0x5631   :  { %v18695_v16 = vadd.f32 %v14866_v14, %v10882_v9 }
0x5633   :  { %16208 = vmatprep.mubr.msk.f32.mxu1 %vm175_vm0, %v18695_v16 }
0x5634   :  { %16209 = vmatmul.mubr.msk.f32.vlgmr.msra.gmra.mrb[128].mxu1 %vm175_vm0, %v18697_v50 }
0x5635   :  { %16213 = vmatprep.mubr.msk.f32.mxu1 %vm17110_vm1, %v17108_v8 }
0x5707   :  { %v16210_v25 = vpop.f32.mrb[128].mxu1 }
0x5708   :  { %v18706_v31 = vadd.f32 %v16210_v25, %v14872_v5  ;;  %v10977_v12 = vpop.f32.mrb[129].mxu1 }
0x5709   :  { %v18708_v57 = vadd.f32 %v14872_v5, %v10977_v12 }
0x570a   :  { %11064 = vrot.lane.b32.xlu0 %v18706_v31, %s19200_s14 }
0x570b   :  { %10987 = vrot.lane.b32.xlu1 %v18708_v57, %s19200_s14 }
0x577c   :  { %v11065_v61 = vpop.permute.xlu0 %11064 }
0x577d   :  { %v10988_v29 = vpop.permute.xlu1 %10987 }
0x577e   :  { %16212 = vmatpush3.xpose.msk.msra.mxu1 %vm260_vm2, %v10988_v29 }
0x577f   :  { %16216 = vmatprep.subr.mxu1 %v17108_v8 }
0x5781   :  { %16214 = vmatmul.mubr.msk.f32.vlgmr.msra.gmra.mrb[130].mxu1 %vm260_vm2, %v18708_v57 }
0x5782   :  { %16217 = vmatpush3.xpose.msk.msra.mxu1 %vm260_vm2, %v11065_v61  ;;  %16218 = vmatprep.mubr.msk.f32.mxu1 %vm17110_vm1, %v17108_v8 }
0x5783   :  { %16226 = vmatprep.subr.mxu1 %v17108_v8 }
0x5785   :  { %16219 = vmatmul.mubr.msk.f32.vlgmr.msra.gmra.mrb[132].mxu1 %vm260_vm2, %v18706_v31 }
0x5786   :  { %16228 = vmatprep.mubr.msk.f32.mxu1 %vm17110_vm1, %v17108_v8 }
0x5854   :  { %v11059_v20 = vpop.f32.mrb[130].mxu1 }
0x5855   :  { %v11140_v33 = vmul.f32 0.35355338, %v11059_v20  ;;  %v16215_v34 = vpop.f32.mrb[131].mxu1 }
0x5857   :  { %v11142_v26 = vadd.f32 %v18727_v35, %v11140_v33 }
0x5858   :  { %v11136_v56 = vpop.f32.mrb[132].mxu1 }
0x5859   :  { %v11141_v58 = vmul.f32 0.35355338, %v11136_v56  ;;  %v16220_v32 = vpop.f32.mrb[133].mxu1  ;;  %v11144_v21 = vsel %vm260_vm2, %v11142_v26, -inf }
0x585a   :  { %11145 = vmax.xlane.f32.xlu1 %v11144_v21 }
0x585b   :  { %v11143_v23 = vadd.f32 %v18732_v17, %v11141_v58 }
0x585d   :  { %v11147_v46 = vsel %vm260_vm2, %v11143_v23, -inf }
0x585e   :  { %11148 = vmax.xlane.f32.xlu0 %v11147_v46 }
0x586b   :  { %11166 = vrot.lane.b32.xlu1 %v18708_v57, %s19214_s21 }
0x586f   :  { %11320 = vrot.lane.b32.xlu1 %v18708_v57, %s19202_s6 }
0x5873   :  { %11398 = vrot.lane.b32.xlu1 %v18706_v31, %s19202_s6 }
0x5874   :  { %11242 = vrot.lane.b32.xlu0 %v18706_v31, %s19214_s21  ;;  %s19216_s21 = smov 48  }
0x58e7   :  { %v11146_v39 = vpop.xlane.xlu1 %11145 }
0x58e8   :  { %v11150_v22 = vsub.f32 %v11142_v26, %v11146_v39 }
0x58ea   :  { %v11152_v63 = vmul.f32 1.442695, %v11150_v22 }
0x58eb   :  { %v11167_v30 = vpop.permute.xlu1 %11166  ;;  %v11149_v0 = vpop.xlane.xlu0 %11148 }
0x58ec   :  { %17015 = vpow2.f32 %v11152_v63  ;;  %v11151_v18 = vsub.f32 %v11143_v23, %v11149_v0  ;;  %16222 = vmatpush3.msra.mxu0 %v11167_v30 }
0x58ed   :  { %16231 = vmatprep.subr.mxu0 %v17108_v8 }
0x58ee   :  { %v11154_v15 = vmul.f32 1.442695, %v11151_v18 }
0x58ef   :  { %v11243_v1 = vpop.permute.xlu0 %11242  ;;  %v11321_v40 = vpop.permute.xlu1 %11320 }
0x58f0   :  { %17017 = vpow2.f32 %v11154_v15  ;;  %16227 = vmatpush3.msra.mxu1 %v11243_v1 }
0x58f1   :  { %16236 = vmatprep.subr.mxu1 %v17108_v8 }
0x58f3   :  { %v11399_v4 = vpop.permute.xlu1 %11398 }
0x58f6   :  { %v17016_v49 = vpop.eup %17015 }
0x58f7   :  { %v11156_v3 = vsel %vm260_vm2, %v17016_v49, 0.0 }
0x58f8   :  { %11157 = vadd.xlane.f32.xlu1 %v11156_v3 }
0x58fa   :  { %v17018_v43 = vpop.eup %17017 }
0x58fb   :  { %v11159_v54 = vsel %vm260_vm2, %v17018_v43, 0.0 }
0x58fc   :  { %11160 = vadd.xlane.f32.xlu0 %v11159_v54 }
0x5909   :  { %11396 = vrot.lane.b32.xlu1 %v18706_v31, %s19203_s23 }
0x5912   :  { %11318 = vrot.lane.b32.xlu0 %v18708_v57, %s19203_s23 }
0x5985   :  { %v11158_v36 = vpop.xlane.xlu1 %11157 }
0x5986   :  { %17019 = vrcp.f32 %v11158_v36 }
0x5989   :  { %v11161_v41 = vpop.xlane.xlu0 %11160  ;;  %v11397_v55 = vpop.permute.xlu1 %11396 }
0x598a   :  { %17021 = vrcp.f32 %v11161_v41 }
0x598d   :  { %v11319_v38 = vpop.permute.xlu0 %11318 }
0x5990   :  { %v17020_v42 = vpop.eup %17019 }
0x5991   :  { %v11164_v45 = vmul.f32 %v17020_v42, %v17016_v49 }
0x5993   :  { %16224 = vmatmul.mubr.msk.f32.vlgmr.msra.gmra.mrb[108].mxu0 %vm260_vm2, %v11164_v45 }
0x5994   :  { %v17022_v13 = vpop.eup %17021  ;;  %16232 = vmatpush3.xpose.msk.msra.mxu0 %vm260_vm2, %v11321_v40  ;;  %16233 = vmatprep.mubr.msk.f32.mxu0 %vm17110_vm1, %v17108_v8 }
0x5995   :  { %v11165_v27 = vmul.f32 %v17022_v13, %v17018_v43  ;;  %16241 = vmatprep.subr.mxu0 %v17108_v8 }
0x5997   :  { %16229 = vmatmul.mubr.msk.f32.vlgmr.msra.gmra.mrb[134].mxu1 %vm260_vm2, %v11165_v27  ;;  %16234 = vmatmul.mubr.msk.f32.vlgmr.msra.gmra.mrb[110].mxu0 %vm260_vm2, %v11319_v38 }
0x5998   :  { %16237 = vmatpush3.xpose.msk.msra.mxu1 %vm260_vm2, %v11399_v4  ;;  %16238 = vmatprep.mubr.msk.f32.mxu1 %vm17110_vm1, %v17108_v8 }
0x5999   :  { %16246 = vmatprep.subr.mxu1 %v17108_v8  ;;  %16243 = vmatprep.mubr.msk.f32.mxu0 %vm17110_vm1, %v17108_v8 }
0x599b   :  { %16239 = vmatmul.mubr.msk.f32.vlgmr.msra.gmra.mrb[136].mxu1 %vm260_vm2, %v11397_v55 }
0x599c   :  { %16248 = vmatprep.mubr.msk.f32.mxu1 %vm17110_vm1, %v17108_v8 }
0x5a66   :  { %v18768_v62 = vpop.f32.mrb[108].mxu0 }
0x5a67   :  { %v16225_v37 = vpop.f32.mrb[109].mxu0 }
0x5a6a   :  { %v18770_v7 = vpop.f32.mrb[134].mxu1  ;;  %v11392_v51 = vpop.f32.mrb[110].mxu0 }
0x5a6b   :  { %v11474_v28 = vmul.f32 0.35355338, %v11392_v51  ;;  %v16230_v10 = vpop.f32.mrb[135].mxu1  ;;  %v16235_v44 = vpop.f32.mrb[111].mxu0 }
0x5a6d   :  { %v11476_v60 = vadd.f32 %v18727_v35, %v11474_v28 }
0x5a6e   :  { %v11470_v52 = vpop.f32.mrb[136].mxu1 }
0x5a6f   :  { %v11475_v6 = vmul.f32 0.35355338, %v11470_v52  ;;  %v16240_v2 = vpop.f32.mrb[137].mxu1  ;;  %v11478_v59 = vsel %vm260_vm2, %v11476_v60, -inf }
0x5a70   :  { %11479 = vmax.xlane.f32.xlu0 %v11478_v59 }
0x5a71   :  { %v11477_v11 = vadd.f32 %v18732_v17, %v11475_v6 }
0x5a73   :  { %v11481_v14 = vsel %vm260_vm2, %v11477_v11, -inf }
0x5a74   :  { %11482 = vmax.xlane.f32.xlu1 %v11481_v14 }
0x5a85   :  { %11500 = vrot.lane.b32.xlu1 %v18708_v57, %s19215_s3 }
0x5a86   :  { %11576 = vrot.lane.b32.xlu0 %v18706_v31, %s19215_s3  ;;  %s19219_s3 = sld [smem:[#allocation4_spill]] }
0x5a89   :  { %11654 = vrot.lane.b32.xlu1 %v18708_v57, %s19205_s10 }
0x5a8d   :  { %11732 = vrot.lane.b32.xlu1 %v18706_v31, %s19205_s10 }
0x5a91   :  { %11730 = vrot.lane.b32.xlu1 %v18706_v31, %s19206_s0 }
0x5afd   :  { %v11480_v53 = vpop.xlane.xlu0 %11479 }
0x5afe   :  { %v11484_v9 = vsub.f32 %v11476_v60, %v11480_v53 }
0x5b00   :  { %v11486_v5 = vmul.f32 1.442695, %v11484_v9 }
0x5b01   :  { %v11577_v25 = vpop.permute.xlu0 %11576  ;;  %v11483_v12 = vpop.xlane.xlu1 %11482 }
0x5b02   :  { %17023 = vpow2.f32 %v11486_v5  ;;  %v11485_v29 = vsub.f32 %v11477_v11, %v11483_v12  ;;  %16247 = vmatpush3.msra.mxu1 %v11577_v25 }
0x5b03   :  { %16256 = vmatprep.subr.mxu1 %v17108_v8 }
0x5b04   :  { %v11488_v61 = vmul.f32 1.442695, %v11485_v29 }
0x5b05   :  { %v11501_v20 = vpop.permute.xlu1 %11500 }
0x5b06   :  { %17025 = vpow2.f32 %v11488_v61  ;;  %16242 = vmatpush3.msra.mxu0 %v11501_v20 }
0x5b07   :  { %16251 = vmatprep.subr.mxu0 %v17108_v8 }
0x5b09   :  { %v11655_v21 = vpop.permute.xlu1 %11654 }
0x5b0c   :  { %v17024_v33 = vpop.eup %17023 }
0x5b0d   :  { %v11490_v34 = vsel %vm260_vm2, %v17024_v33, 0.0  ;;  %v11733_v22 = vpop.permute.xlu1 %11732 }
0x5b0e   :  { %11491 = vadd.xlane.f32.xlu0 %v11490_v34 }
0x5b10   :  { %v17026_v26 = vpop.eup %17025 }
0x5b11   :  { %v11493_v56 = vsel %vm260_vm2, %v17026_v26, 0.0  ;;  %v11731_v0 = vpop.permute.xlu1 %11730 }
0x5b12   :  { %11494 = vadd.xlane.f32.xlu0 %v11493_v56 }
0x5b28   :  { %11652 = vrot.lane.b32.xlu0 %v18708_v57, %s19206_s0 }
0x5b9b   :  { %v11492_v58 = vpop.xlane.xlu0 %11491 }
0x5b9c   :  { %17027 = vrcp.f32 %v11492_v58 }
0x5b9f   :  { %v11495_v32 = vpop.xlane.xlu0 %11494 }
0x5ba0   :  { %17029 = vrcp.f32 %v11495_v32 }
0x5ba3   :  { %v11653_v30 = vpop.permute.xlu0 %11652 }
0x5ba6   :  { %v17028_v23 = vpop.eup %17027 }
0x5ba7   :  { %v11498_v46 = vmul.f32 %v17028_v23, %v17024_v33 }
0x5ba9   :  { %16244 = vmatmul.mubr.msk.f32.vlgmr.msra.gmra.mrb[112].mxu0 %vm260_vm2, %v11498_v46 }
0x5baa   :  { %v17030_v39 = vpop.eup %17029  ;;  %16252 = vmatpush3.xpose.msk.msra.mxu0 %vm260_vm2, %v11655_v21  ;;  %16253 = vmatprep.mubr.msk.f32.mxu0 %vm17110_vm1, %v17108_v8 }
0x5bab   :  { %v11499_v63 = vmul.f32 %v17030_v39, %v17026_v26  ;;  %16261 = vmatprep.subr.mxu0 %v17108_v8 }
0x5bad   :  { %16249 = vmatmul.mubr.msk.f32.vlgmr.msra.gmra.mrb[138].mxu1 %vm260_vm2, %v11499_v63  ;;  %16254 = vmatmul.mubr.msk.f32.vlgmr.msra.gmra.mrb[114].mxu0 %vm260_vm2, %v11653_v30 }
0x5bae   :  { %16257 = vmatpush3.xpose.msk.msra.mxu1 %vm260_vm2, %v11733_v22  ;;  %16258 = vmatprep.mubr.msk.f32.mxu1 %vm17110_vm1, %v17108_v8 }
0x5baf   :  { %16266 = vmatprep.subr.mxu1 %v17108_v8  ;;  %16263 = vmatprep.mubr.msk.f32.mxu0 %vm17110_vm1, %v17108_v8 }
0x5bb1   :  { %16259 = vmatmul.mubr.msk.f32.vlgmr.msra.gmra.mrb[140].mxu1 %vm260_vm2, %v11731_v0 }
0x5bb2   :  { %16268 = vmatprep.mubr.msk.f32.mxu1 %vm17110_vm1, %v17108_v8 }
0x5c7c   :  { %v18808_v18 = vpop.f32.mrb[112].mxu0 }
0x5c7d   :  { %v16245_v15 = vpop.f32.mrb[113].mxu0 }
0x5c80   :  { %v18810_v1 = vpop.f32.mrb[138].mxu1  ;;  %v11726_v49 = vpop.f32.mrb[114].mxu0 }
0x5c81   :  { %v11808_v3 = vmul.f32 0.35355338, %v11726_v49  ;;  %v16250_v43 = vpop.f32.mrb[139].mxu1  ;;  %v16255_v54 = vpop.f32.mrb[115].mxu0 }
0x5c83   :  { %v11810_v40 = vadd.f32 %v18727_v35, %v11808_v3 }
0x5c84   :  { %v11804_v4 = vpop.f32.mrb[140].mxu1 }
0x5c85   :  { %v11809_v36 = vmul.f32 0.35355338, %v11804_v4  ;;  %v16260_v41 = vpop.f32.mrb[141].mxu1  ;;  %v11812_v42 = vsel %vm260_vm2, %v11810_v40, -inf }
0x5c86   :  { %11813 = vmax.xlane.f32.xlu0 %v11812_v42 }
0x5c87   :  { %v11811_v45 = vadd.f32 %v18732_v17, %v11809_v36 }
0x5c89   :  { %v11815_v13 = vsel %vm260_vm2, %v11811_v45, -inf }
0x5c8a   :  { %11816 = vmax.xlane.f32.xlu1 %v11815_v13 }
0x5c9b   :  { %11834 = vrot.lane.b32.xlu1 %v18708_v57, %s19216_s21 }
0x5c9c   :  { %11910 = vrot.lane.b32.xlu0 %v18706_v31, %s19216_s21 }
0x5c9f   :  { %11988 = vrot.lane.b32.xlu1 %v18708_v57, %s19208_s30 }
0x5ca3   :  { %12066 = vrot.lane.b32.xlu1 %v18706_v31, %s19208_s30 }
0x5ca7   :  { %12064 = vrot.lane.b32.xlu1 %v18706_v31, %s19209_s15 }
0x5d13   :  { %v11814_v27 = vpop.xlane.xlu0 %11813 }
0x5d14   :  { %v11818_v38 = vsub.f32 %v11810_v40, %v11814_v27  ;;  %v14899_v27 = vld [vmem:[%s17892_s9 + $0x40] sm:$0xff] }
0x5d16   :  { %v11820_v55 = vmul.f32 1.442695, %v11818_v38 }
0x5d17   :  { %v11911_v37 = vpop.permute.xlu0 %11910  ;;  %v11817_v51 = vpop.xlane.xlu1 %11816 }
0x5d18   :  { %17031 = vpow2.f32 %v11820_v55  ;;  %v11819_v28 = vsub.f32 %v11811_v45, %v11817_v51  ;;  %16267 = vmatpush3.msra.mxu1 %v11911_v37  ;;  %v14901_v55 = vld [vmem:[%s17892_s9 + $0x50] sm:$0xff]  ;;  %v14902_v37 = vld [vmem:[%s17892_s9 + $0x58] sm:$0xff] }
0x5d19   :  { %16276 = vmatprep.subr.mxu1 %v17108_v8  ;;  %v16676_v51 = vpack.c.bf16 %v14902_v37, %v14901_v55 }
0x5d1a   :  { %v11822_v10 = vmul.f32 1.442695, %v11819_v28 }
0x5d1b   :  { %v11835_v44 = vpop.permute.xlu1 %11834 }
0x5d1c   :  { %17033 = vpow2.f32 %v11822_v10  ;;  %16262 = vmatpush3.msra.mxu0 %v11835_v44 }
0x5d1d   :  { %16271 = vmatprep.subr.mxu0 %v17108_v8 }
0x5d1f   :  { %v11989_v14 = vpop.permute.xlu1 %11988 }
0x5d22   :  { %v17032_v60 = vpop.eup %17031 }
0x5d23   :  { %v11824_v52 = vsel %vm260_vm2, %v17032_v60, 0.0  ;;  %v12067_v25 = vpop.permute.xlu1 %12066 }
0x5d24   :  { %11825 = vadd.xlane.f32.xlu0 %v11824_v52 }
0x5d26   :  { %v17034_v6 = vpop.eup %17033 }
0x5d27   :  { %v11827_v2 = vsel %vm260_vm2, %v17034_v6, 0.0  ;;  %v12065_v61 = vpop.permute.xlu1 %12064 }
0x5d28   :  { %11828 = vadd.xlane.f32.xlu0 %v11827_v2 }
0x5d3e   :  { %11986 = vrot.lane.b32.xlu0 %v18708_v57, %s19209_s15 }
0x5db1   :  { %v11826_v59 = vpop.xlane.xlu0 %11825 }
0x5db2   :  { %17035 = vrcp.f32 %v11826_v59 }
0x5db5   :  { %v11829_v11 = vpop.xlane.xlu0 %11828 }
0x5db6   :  { %17037 = vrcp.f32 %v11829_v11 }
0x5db9   :  { %v11987_v29 = vpop.permute.xlu0 %11986 }
0x5dbc   :  { %v17036_v53 = vpop.eup %17035 }
0x5dbd   :  { %v11832_v9 = vmul.f32 %v17036_v53, %v17032_v60 }
0x5dbf   :  { %16264 = vmatmul.mubr.msk.f32.vlgmr.msra.gmra.mrb[116].mxu0 %vm260_vm2, %v11832_v9 }
0x5dc0   :  { %v17038_v5 = vpop.eup %17037  ;;  %16272 = vmatpush3.xpose.msk.msra.mxu0 %vm260_vm2, %v11989_v14  ;;  %16273 = vmatprep.mubr.msk.f32.mxu0 %vm17110_vm1, %v17108_v8 }
0x5dc1   :  { %v11833_v12 = vmul.f32 %v17038_v5, %v17034_v6  ;;  %16281 = vmatprep.subr.mxu0 %v17108_v8 }
0x5dc3   :  { %16269 = vmatmul.mubr.msk.f32.vlgmr.msra.gmra.mrb[142].mxu1 %vm260_vm2, %v11833_v12  ;;  %16274 = vmatmul.mubr.msk.f32.vlgmr.msra.gmra.mrb[118].mxu0 %vm260_vm2, %v11987_v29 }
0x5dc4   :  { %16277 = vmatpush3.xpose.msk.msra.mxu1 %vm260_vm2, %v12067_v25  ;;  %16278 = vmatprep.mubr.msk.f32.mxu1 %vm17110_vm1, %v17108_v8 }
0x5dc5   :  { %16286 = vmatprep.subr.mxu1 %v17108_v8  ;;  %16283 = vmatprep.mubr.msk.f32.mxu0 %vm17110_vm1, %v17108_v8 }
0x5dc7   :  { %16279 = vmatmul.mubr.msk.f32.vlgmr.msra.gmra.mrb[144].mxu1 %vm260_vm2, %v12065_v61 }
0x5dc8   :  { %16288 = vmatprep.mubr.msk.f32.mxu1 %vm17110_vm1, %v17108_v8 }
0x5e92   :  { %v11906_v20 = vpop.f32.mrb[116].mxu0 }
0x5e93   :  { %v16265_v33 = vpop.f32.mrb[117].mxu0 }
0x5e96   :  { %v11982_v34 = vpop.f32.mrb[142].mxu1  ;;  %v12060_v26 = vpop.f32.mrb[118].mxu0 }
0x5e97   :  { %v12142_v56 = vmul.f32 0.35355338, %v12060_v26  ;;  %v16270_v58 = vpop.f32.mrb[143].mxu1  ;;  %v16275_v32 = vpop.f32.mrb[119].mxu0 }
0x5e99   :  { %v12144_v21 = vadd.f32 %v18727_v35, %v12142_v56 }
0x5e9a   :  { %v12138_v23 = vpop.f32.mrb[144].mxu1 }
0x5e9b   :  { %v12143_v46 = vmul.f32 0.35355338, %v12138_v23  ;;  %v16280_v39 = vpop.f32.mrb[145].mxu1  ;;  %v12146_v22 = vsel %vm260_vm2, %v12144_v21, -inf }
0x5e9c   :  { %12147 = vmax.xlane.f32.xlu0 %v12146_v22 }
0x5e9d   :  { %v12145_v63 = vadd.f32 %v18732_v17, %v12143_v46  ;;  %v14904_v46 = vld [vmem:[%s17929_s12 + $0x2] ss:$0 sm:$0xff] }
0x5e9f   :  { %v12149_v30 = vsel %vm260_vm2, %v12145_v63, -inf }
0x5ea0   :  { %12150 = vmax.xlane.f32.xlu1 %v12149_v30 }
0x5eb1   :  { %12168 = vrot.lane.b32.xlu1 %v18708_v57, %s19210_s27 }
0x5eb5   :  { %12322 = vrot.lane.b32.xlu1 %v18808_v18, %s19211_s4 }
0x5eb9   :  { %12324 = vrot.lane.b32.xlu1 %v18810_v1, %s19211_s4 }
0x5ebd   :  { %12332 = vrot.lane.b32.xlu1 %v11982_v34, %s19195_s13 }
0x5f29   :  { %v12148_v35 = vpop.xlane.xlu0 %12147 }
0x5f2a   :  { %v12152_v0 = vsub.f32 %v12144_v21, %v12148_v35 }
0x5f2c   :  { %v12154_v15 = vmul.f32 1.442695, %v12152_v0 }
0x5f2d   :  { %v12151_v49 = vpop.xlane.xlu1 %12150 }
0x5f2e   :  { %17039 = vpow2.f32 %v12154_v15  ;;  %v12153_v17 = vsub.f32 %v12145_v63, %v12151_v49 }
0x5f30   :  { %v12156_v3 = vmul.f32 1.442695, %v12153_v17 }
0x5f31   :  { %v12169_v43 = vpop.permute.xlu1 %12168 }
0x5f32   :  { %17041 = vpow2.f32 %v12156_v3  ;;  %16282 = vmatpush3.msra.mxu0 %v12169_v43 }
0x5f35   :  { %v12323_v9 = vpop.permute.xlu1 %12322 }
0x5f36   :  { %v12344_v12 = vsel %vm260_vm2, %v18768_v62, %v12323_v9  ;;  %v14911_v9 = vld [vmem:[%s17949_s17 + $0x40] sm:$0xff] }
0x5f38   :  { %v17040_v54 = vpop.eup %17039 }
0x5f39   :  { %v12158_v57 = vsel %vm260_vm2, %v17040_v54, 0.0  ;;  %v12325_v5 = vpop.permute.xlu1 %12324 }
0x5f3a   :  { %12159 = vadd.xlane.f32.xlu0 %v12158_v57  ;;  %v14671_v57 = vld [vmem:[%s19219_s3 + $0x1] ss:$0 sm:$0xff] }
0x5f3c   :  { %v17042_v18 = vpop.eup %17041 }
0x5f3d   :  { %v12161_v40 = vsel %vm260_vm2, %v17042_v18, 0.0  ;;  %v12333_v29 = vpop.permute.xlu1 %12332 }
0x5f3e   :  { %12162 = vadd.xlane.f32.xlu0 %v12161_v40 }
0x5f54   :  { %12244 = vrot.lane.b32.xlu0 %v18706_v31, %s19210_s27  ;;  %s19217_s27 = sld [smem:[#allocation2_spill]]  ;;  %v14900_v31 = vld [vmem:[%s17892_s9 + $0x48] sm:$0xff]  ;;  %s19218_s9 = sld [smem:[#allocation3_spill]] }
0x5f55   :  { %v16672_v38 = vpack.c.bf16 %v14900_v31, %v14899_v27 }
0x5f57   :  { %16673 = vmatprep.subr.bf16.mxu0 %v16672_v38 }
0x5f58   :  { %12330 = vrot.lane.b32.xlu0 %v11906_v20, %s19195_s13 }
0x5f5a   :  { %v14665_v52 = vld [vmem:[%s19217_s27 + $0x1] ss:$0 sm:$0xff] }
0x5f5b   :  { %v3798_v6 = vadd.f32 %v14665_v52, %v17742_v48  ;;  %v3803_v11 = vadd.f32 %v17740_v47, %v14665_v52  ;;  %v14670_v49 = vld [vmem:[%s19218_s9 + $0x1] ss:$0 sm:$0xff] }
0x5f5d   :  { %v3806_v2 = vadd.f32 %v3798_v6, %v17685_v19  ;;  %v3807_v14 = vadd.f32 %v3803_v11, %v17691_v24  ;;  %v12345_v24 = vsel %vm260_vm2, %v18770_v7, %v12325_v5  ;;  %v14912_v5 = vld [vmem:[%s17949_s17 + $0x48] sm:$0xff] }
0x5f5e   :  { %v12347_v47 = vsel %vm1630_vm4, %v12345_v24, %v12333_v29  ;;  %v14914_v29 = vld [vmem:[%s17949_s17 + $0x58] sm:$0xff] }
0x5f5f   :  { %v3812_v59 = vsel %vm175_vm0, %v3806_v2, 0.0  ;;  %v3815_v53 = vsel %vm175_vm0, %v3807_v14, 0.0 }
0x5fc7   :  { %v12160_v1 = vpop.xlane.xlu0 %12159 }
0x5fc8   :  { %17043 = vrcp.f32 %v12160_v1 }
0x5fcb   :  { %v12163_v4 = vpop.xlane.xlu0 %12162 }
0x5fcc   :  { %17045 = vrcp.f32 %v12163_v4 }
0x5fcf   :  { %v12245_v36 = vpop.permute.xlu0 %12244 }
0x5fd0   :  { %16287 = vmatpush3.msra.mxu1 %v12245_v36  ;;  %v14919_v36 = vld [vmem:[%s17899_s8 + $0x40] sm:$0xff] }
0x5fd2   :  { %v17044_v41 = vpop.eup %17043 }
0x5fd3   :  { %v12166_v42 = vmul.f32 %v17044_v41, %v17040_v54  ;;  %v12331_v25 = vpop.permute.xlu0 %12330 }
0x5fd4   :  { %v12346_v48 = vsel %vm1630_vm4, %v12344_v12, %v12331_v25  ;;  %v16680_v25 = vpack.c.bf16 %v14912_v5, %v14911_v9  ;;  %v14913_v12 = vld [vmem:[%s17949_s17 + $0x50] sm:$0xff] }
0x5fd5   :  { %16284 = vmatmul.mubr.msk.f32.vlgmr.msra.gmra.mrb[120].mxu0 %vm260_vm2, %v12166_v42  ;;  %v14921_v42 = vld [vmem:[%s17899_s8 + $0x50] sm:$0xff] }
0x5fd6   :  { %v17046_v45 = vpop.eup %17045  ;;  %16675 = vmatpush3.bf16.msra.mxu0 %v16672_v38  ;;  %16681 = vmatprep.subr.bf16.mxu1 %v16680_v25 }
0x5fd7   :  { %v12167_v13 = vmul.f32 %v17046_v45, %v17042_v18  ;;  %16677 = vmatprep.subr.bf16.mxu0 %v16676_v51  ;;  %v14922_v45 = vld [vmem:[%s17899_s8 + $0x58] sm:$0xff] }
0x5fd9   :  { %16289 = vmatmul.mubr.msk.f32.vlgmr.msra.gmra.mrb[146].mxu1 %vm260_vm2, %v12167_v13  ;;  %v16692_v13 = vpack.c.bf16 %v14922_v45, %v14921_v42 }
0x5fda   :  { %16679 = vmatpush3.bf16.msra.mxu0 %v16676_v51  ;;  %16683 = vmatpush3.bf16.msra.mxu1 %v16680_v25 }
0x60a8   :  { %v12240_v28 = vpop.f32.mrb[120].mxu0 }
0x60a9   :  { %12338 = vrot.lane.b32.xlu0 %v12240_v28, %s19196_s5  ;;  %v16285_v10 = vpop.f32.mrb[121].mxu0 }
0x60ac   :  { %v12316_v44 = vpop.f32.mrb[146].mxu1 }
0x60ad   :  { %12340 = vrot.lane.b32.xlu1 %v12316_v44, %s19196_s5  ;;  %v16290_v60 = vpop.f32.mrb[147].mxu1 }
0x60c8   :  { %3813 = vadd.xlane.f32.xlu0 %v3812_v59 }
0x60d1   :  { %3816 = vadd.xlane.f32.xlu1 %v3815_v53 }
0x611b   :  { %v12339_v19 = vpop.permute.xlu0 %12338 }
0x611c   :  { %v12348_v61 = vsel %vm1633_vm3, %v12346_v48, %v12339_v19  ;;  %v16684_v48 = vpack.c.bf16 %v14914_v29, %v14913_v12 }
0x611d   :  { %16299 = vmatprep.mubr.msk.f32.mxu0 %vm175_vm0, %v12348_v61 }
0x611e   :  { %16685 = vmatprep.subr.bf16.mxu1 %v16684_v48 }
0x611f   :  { %v12341_v20 = vpop.permute.xlu1 %12340  ;;  %16687 = vmatpush3.bf16.msra.mxu1 %v16684_v48 }
0x6120   :  { %v12349_v33 = vsel %vm1633_vm3, %v12347_v47, %v12341_v20  ;;  %16324 = vmatprep.subr.mxu1 %v17108_v8 }
0x6121   :  { %16300 = vmatmul.mubr.msk.f32.vlgmr.msra.gmra.mrb[122].mxu0 %vm175_vm0, %v12349_v33 }
0x6155   :  { %v3814_v62 = vpop.xlane.xlu0 %3813 }
0x6156   :  { %v3818_v34 = vmul.f32 0.03125, %v3814_v62 }
0x6158   :  { %v3820_v26 = vsub.f32 %v3806_v2, %v3818_v34  ;;  %v14909_v34 = vld [vmem:[%s17959_s7 + $0x2] ss:$0 sm:$0xff] }
0x615a   :  { %v3822_v56 = vmul.f32 %v3820_v26, %v3820_v26 }
0x615c   :  { %v3824_v58 = vsel %vm175_vm0, %v3822_v56, 0.0  ;;  %v14910_v56 = vld [vmem:[%s17964_s19 + $0x2] ss:$0 sm:$0xff] }
0x615d   :  { %3825 = vadd.xlane.f32.xlu1 %v3824_v58 }
0x615e   :  { %v3817_v32 = vpop.xlane.xlu1 %3816 }
0x615f   :  { %v3819_v63 = vmul.f32 0.03125, %v3817_v32 }
0x6161   :  { %v3821_v17 = vsub.f32 %v3807_v14, %v3819_v63 }
0x6163   :  { %v3823_v4 = vmul.f32 %v3821_v17, %v3821_v17 }
0x61ea   :  { %v3826_v21 = vpop.xlane.xlu1 %3825 }
0x61eb   :  { %v3830_v23 = vmul.f32 0.03125, %v3826_v21 }
0x61ed   :  { %v3832_v7 = vadd.f32 1e-05, %v3830_v23 }
0x61ef   :  { %17047 = vrsqrt.f32 %v3832_v7 }
0x61f4   :  { %v16301_v39 = vpop.f32.mrb[122].mxu0 }
0x61f5   :  { %v12435_v22 = vpop.f32.mrb[123].mxu0  ;;  %v12441_v30 = vadd.f32 %v16301_v39, %v14904_v46  ;;  %v14924_v39 = vld [vmem:[%s17935_s28 + $0x2] ss:$0 sm:$0xff]  ;;  %s19221_s28 = sld [smem:[#allocation8_spill]] }
0x61f6   :  { %v12436_v35 = vadd.f32 %v14904_v46, %v12435_v22 }
0x61f7   :  { %v12445_v3 = vadd.f32 %v12441_v30, %v18697_v50  ;;  %v14920_v50 = vld [vmem:[%s17899_s8 + $0x48] sm:$0xff]  ;;  %s17157_s8 = smov 38  }
0x61f8   :  { %v12444_v0 = vadd.f32 %v12436_v35, %v18695_v16  ;;  %v3827_v16 = vsel %vm175_vm0, %v3823_v4, 0.0  ;;  %v16688_v41 = vpack.c.bf16 %v14920_v50, %v14919_v36  ;;  %v18956_v50 = vld [vmem:[%s17218_s18 + $0x1] ss:$0 sm:$0xff] }
0x61f9   :  { %v17048_v15 = vpop.eup %17047  ;;  %v12453_v40 = vsel %vm175_vm0, %v12445_v3, 0.0 }
0x61fa   :  { %v12450_v43 = vsel %vm175_vm0, %v12444_v0, 0.0  ;;  %v3836_v54 = vmul.f32 %v17048_v15, %v3820_v26  ;;  %16689 = vmatprep.subr.bf16.mxu0 %v16688_v41 }
0x61fb   :  { %12451 = vadd.xlane.f32.xlu0 %v12450_v43  ;;  %16691 = vmatpush3.bf16.msra.mxu0 %v16688_v41  ;;  %s14561_s7 = sld [smem:[%s19221_s28 + %s17157_s8]]  }
0x61fc   :  { %v3844_v18 = vmul.f32 %v14670_v49, %v3836_v54  ;;  %16693 = vmatprep.subr.bf16.mxu0 %v16692_v13 }
0x61fe   :  { %v3852_v1 = vadd.f32 %v14671_v57, %v3844_v18  ;;  %v18951_v18 = vld [vmem:[%s17218_s18] ss:$0 sm:$0xff]  ;;  %s17155_s18 = smov 36  }
0x61ff   :  { %12454 = vadd.xlane.f32.xlu0 %v12453_v40  ;;  %16695 = vmatpush3.bf16.msra.mxu0 %v16692_v13 }
0x6200   :  { %16321 = vmatprep.mubr.msk.f32.mxu0 %vm175_vm0, %v3852_v1  ;;  %16334 = vmatprep.subr.mxu0 %v17108_v8 }
0x6203   :  { %3828 = vadd.xlane.f32.xlu0 %v3827_v16 }
0x6288   :  { %v12452_v27 = vpop.xlane.xlu0 %12451 }
0x6289   :  { %v12456_v31 = vmul.f32 0.03125, %v12452_v27 }
0x628b   :  { %v12458_v38 = vsub.f32 %v12444_v0, %v12456_v31  ;;  %v14916_v0 = vld [vmem:[%s17986_s2 + $0x2] ss:$0 sm:$0xff] }
0x628c   :  { %v12455_v55 = vpop.xlane.xlu0 %12454 }
0x628d   :  { %v12457_v37 = vmul.f32 0.03125, %v12455_v55  ;;  %v12460_v51 = vmul.f32 %v12458_v38, %v12458_v38 }
0x628f   :  { %v12459_v28 = vsub.f32 %v12445_v3, %v12457_v37  ;;  %v12462_v10 = vsel %vm175_vm0, %v12460_v51, 0.0 }
0x6290   :  { %12463 = vadd.xlane.f32.xlu1 %v12462_v10  ;;  %v3829_v44 = vpop.xlane.xlu0 %3828 }
0x6291   :  { %v3831_v60 = vmul.f32 0.03125, %v3829_v44  ;;  %v12461_v52 = vmul.f32 %v12459_v28, %v12459_v28 }
0x6293   :  { %v3833_v6 = vadd.f32 1e-05, %v3831_v60  ;;  %v12465_v2 = vsel %vm175_vm0, %v12461_v52, 0.0 }
0x6294   :  { %12466 = vadd.xlane.f32.xlu0 %v12465_v2 }
0x6295   :  { %17049 = vrsqrt.f32 %v3833_v6 }
0x629f   :  { %v17050_v59 = vpop.eup %17049 }
0x62a0   :  { %v3837_v11 = vmul.f32 %v17050_v59, %v3821_v17 }
0x62a2   :  { %v3845_v14 = vmul.f32 %v14670_v49, %v3837_v11 }
0x62a4   :  { %v3853_v53 = vadd.f32 %v14671_v57, %v3845_v14 }
0x62a6   :  { %16322 = vmatmul.mubr.msk.f32.vlgmr.msra.gmra.mrb[124].mxu0 %vm175_vm0, %v3853_v53 }
0x62a7   :  { %16336 = vmatprep.mubr.msk.f32.mxu0 %vm17110_vm1, %v17108_v8 }
0x631d   :  { %v12464_v19 = vpop.xlane.xlu1 %12463 }
0x631e   :  { %v12468_v61 = vmul.f32 0.03125, %v12464_v19 }
0x6320   :  { %v12470_v24 = vadd.f32 1e-05, %v12468_v61 }
0x6321   :  { %v12467_v47 = vpop.xlane.xlu0 %12466 }
0x6322   :  { %17051 = vrsqrt.f32 %v12470_v24  ;;  %v12469_v20 = vmul.f32 0.03125, %v12467_v47 }
0x6324   :  { %v12471_v33 = vadd.f32 1e-05, %v12469_v20 }
0x6326   :  { %17053 = vrsqrt.f32 %v12471_v33 }
0x632c   :  { %v17052_v62 = vpop.eup %17051 }
0x632d   :  { %v12474_v26 = vmul.f32 %v17052_v62, %v12458_v38 }
0x632f   :  { %v12482_v58 = vmul.f32 %v14909_v34, %v12474_v26 }
0x6330   :  { %v17054_v32 = vpop.eup %17053 }
0x6331   :  { %v12475_v21 = vmul.f32 %v17054_v32, %v12459_v28  ;;  %v18916_v23 = vadd.f32 %v14910_v56, %v12482_v58 }
0x6333   :  { %v12483_v7 = vmul.f32 %v14909_v34, %v12475_v21  ;;  %16310 = vmatprep.mubr.msk.f32.mxu1 %vm175_vm0, %v18916_v23 }
0x6335   :  { %v18920_v46 = vadd.f32 %v14910_v56, %v12483_v7 }
0x6337   :  { %16311 = vmatmul.mubr.msk.f32.vlgmr.msra.gmra.mrb[148].mxu1 %vm175_vm0, %v18920_v46 }
0x6338   :  { %16326 = vmatprep.mubr.msk.f32.mxu1 %vm17110_vm1, %v17108_v8 }
0x6379   :  { %v16323_v22 = vpop.f32.mrb[124].mxu0 }
0x637a   :  { %v18927_v63 = vadd.f32 %v16323_v22, %v14924_v39  ;;  %v12671_v30 = vpop.f32.mrb[125].mxu0 }
0x637b   :  { %v18929_v35 = vadd.f32 %v14924_v39, %v12671_v30 }
0x637d   :  { %16325 = vmatpush3.xpose.msk.msra.mxu1 %vm260_vm2, %v18929_v35 }
0x637e   :  { %16329 = vmatprep.subr.mxu1 %v17108_v8 }
0x640a   :  { %v16312_v15 = vpop.f32.mrb[148].mxu1 }
0x640b   :  { %v12577_v49 = vpop.f32.mrb[149].mxu1  ;;  %v18943_v3 = vadd.f32 %v16312_v15, %v14916_v0 }
0x640c   :  { %v18935_v17 = vadd.f32 %v14916_v0, %v12577_v49 }
0x640e   :  { %16327 = vmatmul.mubr.msk.f32.vlgmr.msra.gmra.mrb[150].mxu1 %vm260_vm2, %v18935_v17 }
0x640f   :  { %16330 = vmatpush3.xpose.msk.msra.mxu1 %vm260_vm2, %v18927_v63  ;;  %16331 = vmatprep.mubr.msk.f32.mxu1 %vm17110_vm1, %v17108_v8 }
0x6410   :  { %16339 = vmatprep.subr.mxu1 %v17108_v8 }
0x6412   :  { %16332 = vmatmul.mubr.msk.f32.vlgmr.msra.gmra.mrb[152].mxu1 %vm260_vm2, %v18943_v3 }
0x6413   :  { %16341 = vmatprep.mubr.msk.f32.mxu1 %vm17110_vm1, %v17108_v8 }
0x64e1   :  { %v12752_v43 = vpop.f32.mrb[150].mxu1 }
0x64e2   :  { %v12832_v54 = vmul.f32 0.35355338, %v12752_v43  ;;  %v16328_v57 = vpop.f32.mrb[151].mxu1 }
0x64e4   :  { %v12834_v40 = vadd.f32 %v18951_v18, %v12832_v54 }
0x64e5   :  { %v12828_v1 = vpop.f32.mrb[152].mxu1 }
0x64e6   :  { %v12833_v4 = vmul.f32 0.35355338, %v12828_v1  ;;  %v16333_v16 = vpop.f32.mrb[153].mxu1  ;;  %v12836_v36 = vsel %vm260_vm2, %v12834_v40, -inf }
0x64e7   :  { %12837 = vmax.xlane.f32.xlu1 %v12836_v36 }
0x64e8   :  { %v12835_v41 = vadd.f32 %v18956_v50, %v12833_v4 }
0x64ea   :  { %v12839_v42 = vsel %vm260_vm2, %v12835_v41, -inf }
0x64eb   :  { %12840 = vmax.xlane.f32.xlu0 %v12839_v42 }
0x64f8   :  { %12858 = vrot.lane.b32.xlu1 %v18929_v35, %s19200_s14 }
0x64fc   :  { %13012 = vrot.lane.b32.xlu1 %v18929_v35, %s19203_s23 }
0x6500   :  { %13090 = vrot.lane.b32.xlu1 %v18927_v63, %s19203_s23 }
0x6501   :  { %12934 = vrot.lane.b32.xlu0 %v18927_v63, %s19200_s14 }
0x6574   :  { %v12838_v45 = vpop.xlane.xlu1 %12837 }
0x6575   :  { %v12842_v13 = vsub.f32 %v12834_v40, %v12838_v45 }
0x6577   :  { %v12844_v27 = vmul.f32 1.442695, %v12842_v13 }
0x6578   :  { %v12859_v31 = vpop.permute.xlu1 %12858  ;;  %v12841_v38 = vpop.xlane.xlu0 %12840 }
0x6579   :  { %17055 = vpow2.f32 %v12844_v27  ;;  %v12843_v55 = vsub.f32 %v12835_v41, %v12841_v38  ;;  %16335 = vmatpush3.msra.mxu0 %v12859_v31 }
0x657a   :  { %16344 = vmatprep.subr.mxu0 %v17108_v8 }
0x657b   :  { %v12846_v37 = vmul.f32 1.442695, %v12843_v55 }
0x657c   :  { %v12935_v51 = vpop.permute.xlu0 %12934  ;;  %v13013_v52 = vpop.permute.xlu1 %13012 }
0x657d   :  { %17057 = vpow2.f32 %v12846_v37  ;;  %16340 = vmatpush3.msra.mxu1 %v12935_v51 }
0x657e   :  { %16349 = vmatprep.subr.mxu1 %v17108_v8 }
0x6580   :  { %v13091_v6 = vpop.permute.xlu1 %13090 }
0x6583   :  { %v17056_v28 = vpop.eup %17055 }
0x6584   :  { %v12848_v10 = vsel %vm260_vm2, %v17056_v28, 0.0 }
0x6585   :  { %12849 = vadd.xlane.f32.xlu1 %v12848_v10 }
0x6587   :  { %v17058_v44 = vpop.eup %17057 }
0x6588   :  { %v12851_v60 = vsel %vm260_vm2, %v17058_v44, 0.0 }
0x6589   :  { %12852 = vadd.xlane.f32.xlu0 %v12851_v60 }
0x6596   :  { %13088 = vrot.lane.b32.xlu1 %v18943_v3, %s19203_s23 }
0x659f   :  { %13010 = vrot.lane.b32.xlu0 %v18935_v17, %s19203_s23 }
0x6612   :  { %v12850_v2 = vpop.xlane.xlu1 %12849 }
0x6613   :  { %17059 = vrcp.f32 %v12850_v2 }
0x6616   :  { %v12853_v59 = vpop.xlane.xlu0 %12852  ;;  %v13089_v25 = vpop.permute.xlu1 %13088 }
0x6617   :  { %17061 = vrcp.f32 %v12853_v59 }
0x661a   :  { %v13011_v5 = vpop.permute.xlu0 %13010 }
0x661d   :  { %v17060_v11 = vpop.eup %17059 }
0x661e   :  { %v12856_v14 = vmul.f32 %v17060_v11, %v17056_v28 }
0x6620   :  { %16337 = vmatmul.mubr.msk.f32.vlgmr.msra.gmra.mrb[126].mxu0 %vm260_vm2, %v12856_v14 }
0x6621   :  { %v17062_v53 = vpop.eup %17061  ;;  %16345 = vmatpush3.xpose.msk.msra.mxu0 %vm260_vm2, %v13013_v52  ;;  %16346 = vmatprep.mubr.msk.f32.mxu0 %vm17110_vm1, %v17108_v8 }
0x6622   :  { %v12857_v9 = vmul.f32 %v17062_v53, %v17058_v44  ;;  %16354 = vmatprep.subr.mxu0 %v17108_v8 }
0x6624   :  { %16342 = vmatmul.mubr.msk.f32.vlgmr.msra.gmra.mrb[154].mxu1 %vm260_vm2, %v12857_v9  ;;  %16347 = vmatmul.mubr.msk.f32.vlgmr.msra.gmra.mrb[128].mxu0 %vm260_vm2, %v13011_v5 }
0x6625   :  { %16350 = vmatpush3.xpose.msk.msra.mxu1 %vm260_vm2, %v13091_v6  ;;  %16351 = vmatprep.mubr.msk.f32.mxu1 %vm17110_vm1, %v17108_v8 }
0x6626   :  { %16359 = vmatprep.subr.mxu1 %v17108_v8  ;;  %16356 = vmatprep.mubr.msk.f32.mxu0 %vm17110_vm1, %v17108_v8 }
0x6628   :  { %16352 = vmatmul.mubr.msk.f32.vlgmr.msra.gmra.mrb[156].mxu1 %vm260_vm2, %v13089_v25 }
0x6629   :  { %16361 = vmatprep.mubr.msk.f32.mxu1 %vm17110_vm1, %v17108_v8 }
0x66f3   :  { %v18992_v12 = vpop.f32.mrb[126].mxu0 }
0x66f4   :  { %v16338_v29 = vpop.f32.mrb[127].mxu0 }
0x66f7   :  { %v18994_v48 = vpop.f32.mrb[154].mxu1  ;;  %v13084_v19 = vpop.f32.mrb[128].mxu0 }
0x66f8   :  { %v13166_v61 = vmul.f32 0.35355338, %v13084_v19  ;;  %v16343_v24 = vpop.f32.mrb[155].mxu1  ;;  %v16348_v47 = vpop.f32.mrb[129].mxu0 }
0x66fa   :  { %v13168_v20 = vadd.f32 %v18951_v18, %v13166_v61 }
0x66fb   :  { %v13162_v33 = vpop.f32.mrb[156].mxu1 }
0x66fc   :  { %v13167_v62 = vmul.f32 0.35355338, %v13162_v33  ;;  %v16353_v34 = vpop.f32.mrb[157].mxu1  ;;  %v13170_v26 = vsel %vm260_vm2, %v13168_v20, -inf }
0x66fd   :  { %13171 = vmax.xlane.f32.xlu0 %v13170_v26 }
0x66fe   :  { %v13169_v56 = vadd.f32 %v18956_v50, %v13167_v62 }
0x6700   :  { %v13173_v58 = vsel %vm260_vm2, %v13169_v56, -inf }
0x6701   :  { %13174 = vmax.xlane.f32.xlu1 %v13173_v58 }
0x6712   :  { %13192 = vrot.lane.b32.xlu1 %v18929_v35, %s19202_s6 }
0x6713   :  { %13268 = vrot.lane.b32.xlu0 %v18927_v63, %s19202_s6 }
0x6716   :  { %13346 = vrot.lane.b32.xlu1 %v18929_v35, %s19206_s0 }
0x671a   :  { %13424 = vrot.lane.b32.xlu1 %v18927_v63, %s19206_s0 }
0x671e   :  { %13422 = vrot.lane.b32.xlu1 %v18943_v3, %s19206_s0 }
0x678a   :  { %v13172_v32 = vpop.xlane.xlu0 %13171 }
0x678b   :  { %v13176_v21 = vsub.f32 %v13168_v20, %v13172_v32 }
0x678d   :  { %v13178_v7 = vmul.f32 1.442695, %v13176_v21 }
0x678e   :  { %v13269_v39 = vpop.permute.xlu0 %13268  ;;  %v13175_v22 = vpop.xlane.xlu1 %13174 }
0x678f   :  { %17063 = vpow2.f32 %v13178_v7  ;;  %v13177_v30 = vsub.f32 %v13169_v56, %v13175_v22  ;;  %16360 = vmatpush3.msra.mxu1 %v13269_v39 }
0x6790   :  { %16369 = vmatprep.subr.mxu1 %v17108_v8 }
0x6791   :  { %v13180_v0 = vmul.f32 1.442695, %v13177_v30 }
0x6792   :  { %v13193_v15 = vpop.permute.xlu1 %13192 }
0x6793   :  { %17065 = vpow2.f32 %v13180_v0  ;;  %16355 = vmatpush3.msra.mxu0 %v13193_v15 }
0x6794   :  { %16364 = vmatprep.subr.mxu0 %v17108_v8 }
0x6796   :  { %v13347_v4 = vpop.permute.xlu1 %13346 }
0x6799   :  { %v17064_v49 = vpop.eup %17063 }
0x679a   :  { %v13182_v43 = vsel %vm260_vm2, %v17064_v49, 0.0  ;;  %v13425_v42 = vpop.permute.xlu1 %13424 }
0x679b   :  { %13183 = vadd.xlane.f32.xlu0 %v13182_v43 }
0x679d   :  { %v17066_v54 = vpop.eup %17065 }
0x679e   :  { %v13185_v57 = vsel %vm260_vm2, %v17066_v54, 0.0  ;;  %v13423_v27 = vpop.permute.xlu1 %13422 }
0x679f   :  { %13186 = vadd.xlane.f32.xlu0 %v13185_v57 }
0x67b5   :  { %13344 = vrot.lane.b32.xlu0 %v18935_v17, %s19206_s0  ;;  %s19220_s0 = sld [smem:[#allocation7_spill]] }
0x6828   :  { %v13184_v40 = vpop.xlane.xlu0 %13183 }
0x6829   :  { %17067 = vrcp.f32 %v13184_v40 }
0x682c   :  { %v13187_v1 = vpop.xlane.xlu0 %13186 }
0x682d   :  { %17069 = vrcp.f32 %v13187_v1 }
0x6830   :  { %v13345_v13 = vpop.permute.xlu0 %13344 }
0x6833   :  { %v17068_v16 = vpop.eup %17067 }
0x6834   :  { %v13190_v36 = vmul.f32 %v17068_v16, %v17064_v49 }
0x6836   :  { %16357 = vmatmul.mubr.msk.f32.vlgmr.msra.gmra.mrb[130].mxu0 %vm260_vm2, %v13190_v36 }
0x6837   :  { %v17070_v41 = vpop.eup %17069  ;;  %16365 = vmatpush3.xpose.msk.msra.mxu0 %vm260_vm2, %v13347_v4  ;;  %16366 = vmatprep.mubr.msk.f32.mxu0 %vm17110_vm1, %v17108_v8 }
0x6838   :  { %v13191_v45 = vmul.f32 %v17070_v41, %v17066_v54  ;;  %16374 = vmatprep.subr.mxu0 %v17108_v8 }
0x683a   :  { %16362 = vmatmul.mubr.msk.f32.vlgmr.msra.gmra.mrb[158].mxu1 %vm260_vm2, %v13191_v45  ;;  %16367 = vmatmul.mubr.msk.f32.vlgmr.msra.gmra.mrb[132].mxu0 %vm260_vm2, %v13345_v13 }
0x683b   :  { %16370 = vmatpush3.xpose.msk.msra.mxu1 %vm260_vm2, %v13425_v42  ;;  %16371 = vmatprep.mubr.msk.f32.mxu1 %vm17110_vm1, %v17108_v8 }
0x683c   :  { %16379 = vmatprep.subr.mxu1 %v17108_v8  ;;  %16376 = vmatprep.mubr.msk.f32.mxu0 %vm17110_vm1, %v17108_v8 }
0x683e   :  { %16372 = vmatmul.mubr.msk.f32.vlgmr.msra.gmra.mrb[160].mxu1 %vm260_vm2, %v13423_v27 }
0x683f   :  { %16381 = vmatprep.mubr.msk.f32.mxu1 %vm17110_vm1, %v17108_v8 }
0x6909   :  { %v19032_v31 = vpop.f32.mrb[130].mxu0 }
0x690a   :  { %v16358_v38 = vpop.f32.mrb[131].mxu0 }
0x690d   :  { %v19034_v55 = vpop.f32.mrb[158].mxu1  ;;  %v13418_v37 = vpop.f32.mrb[132].mxu0 }
0x690e   :  { %v13500_v51 = vmul.f32 0.35355338, %v13418_v37  ;;  %v16363_v28 = vpop.f32.mrb[159].mxu1  ;;  %v16368_v10 = vpop.f32.mrb[133].mxu0 }
0x6910   :  { %v13502_v44 = vadd.f32 %v18951_v18, %v13500_v51 }
0x6911   :  { %v13496_v60 = vpop.f32.mrb[160].mxu1 }
0x6912   :  { %v13501_v52 = vmul.f32 0.35355338, %v13496_v60  ;;  %v16373_v6 = vpop.f32.mrb[161].mxu1  ;;  %v13504_v2 = vsel %vm260_vm2, %v13502_v44, -inf }
0x6913   :  { %13505 = vmax.xlane.f32.xlu0 %v13504_v2  ;;  %v14953_v2 = vld [vmem:[%s18148_s22 + $0x50] sm:$0xff] }
0x6914   :  { %v13503_v59 = vadd.f32 %v18956_v50, %v13501_v52  ;;  %v14951_v52 = vld [vmem:[%s18148_s22 + $0x40] sm:$0xff] }
0x6916   :  { %v13507_v11 = vsel %vm260_vm2, %v13503_v59, -inf }
0x6917   :  { %13508 = vmax.xlane.f32.xlu1 %v13507_v11 }
0x6928   :  { %13526 = vrot.lane.b32.xlu1 %v18929_v35, %s19205_s10 }
0x6929   :  { %13602 = vrot.lane.b32.xlu0 %v18927_v63, %s19205_s10 }
0x692c   :  { %13680 = vrot.lane.b32.xlu1 %v18929_v35, %s19209_s15 }
0x6930   :  { %13758 = vrot.lane.b32.xlu1 %v18927_v63, %s19209_s15 }
0x6934   :  { %13756 = vrot.lane.b32.xlu1 %v18943_v3, %s19209_s15 }
0x69a0   :  { %v13506_v14 = vpop.xlane.xlu0 %13505 }
0x69a1   :  { %v13510_v53 = vsub.f32 %v13502_v44, %v13506_v14 }
0x69a3   :  { %v13512_v9 = vmul.f32 1.442695, %v13510_v53 }
0x69a4   :  { %v13603_v5 = vpop.permute.xlu0 %13602  ;;  %v13509_v25 = vpop.xlane.xlu1 %13508 }
0x69a5   :  { %17071 = vpow2.f32 %v13512_v9  ;;  %v13511_v29 = vsub.f32 %v13503_v59, %v13509_v25  ;;  %16380 = vmatpush3.msra.mxu1 %v13603_v5  ;;  %v14954_v59 = vld [vmem:[%s18148_s22 + $0x58] sm:$0xff] }
0x69a6   :  { %16389 = vmatprep.subr.mxu1 %v17108_v8  ;;  %v16700_v11 = vpack.c.bf16 %v14954_v59, %v14953_v2 }
0x69a7   :  { %v13514_v19 = vmul.f32 1.442695, %v13511_v29 }
0x69a8   :  { %v13527_v61 = vpop.permute.xlu1 %13526 }
0x69a9   :  { %17073 = vpow2.f32 %v13514_v19  ;;  %16375 = vmatpush3.msra.mxu0 %v13527_v61 }
0x69aa   :  { %16384 = vmatprep.subr.mxu0 %v17108_v8 }
0x69ac   :  { %v13681_v34 = vpop.permute.xlu1 %13680 }
0x69af   :  { %v17072_v24 = vpop.eup %17071 }
0x69b0   :  { %v13516_v47 = vsel %vm260_vm2, %v17072_v24, 0.0  ;;  %v13759_v32 = vpop.permute.xlu1 %13758 }
0x69b1   :  { %13517 = vadd.xlane.f32.xlu0 %v13516_v47 }
0x69b3   :  { %v17074_v3 = vpop.eup %17073 }
0x69b4   :  { %v13519_v20 = vsel %vm260_vm2, %v17074_v3, 0.0  ;;  %v13757_v7 = vpop.permute.xlu1 %13756 }
0x69b5   :  { %13520 = vadd.xlane.f32.xlu0 %v13519_v20 }
0x69cb   :  { %13678 = vrot.lane.b32.xlu0 %v18935_v17, %s19209_s15 }
0x6a3e   :  { %v13518_v33 = vpop.xlane.xlu0 %13517 }
0x6a3f   :  { %17075 = vrcp.f32 %v13518_v33 }
0x6a42   :  { %v13521_v62 = vpop.xlane.xlu0 %13520 }
0x6a43   :  { %17077 = vrcp.f32 %v13521_v62 }
0x6a46   :  { %v13679_v17 = vpop.permute.xlu0 %13678 }
0x6a49   :  { %v17076_v26 = vpop.eup %17075 }
0x6a4a   :  { %v13524_v56 = vmul.f32 %v17076_v26, %v17072_v24 }
0x6a4c   :  { %16377 = vmatmul.mubr.msk.f32.vlgmr.msra.gmra.mrb[134].mxu0 %vm260_vm2, %v13524_v56  ;;  %v14956_v56 = vld [vmem:[%s18169_s11 + $0x2] ss:$0 sm:$0xff] }
0x6a4d   :  { %v17078_v58 = vpop.eup %17077  ;;  %16385 = vmatpush3.xpose.msk.msra.mxu0 %vm260_vm2, %v13681_v34  ;;  %16386 = vmatprep.mubr.msk.f32.mxu0 %vm17110_vm1, %v17108_v8 }
0x6a4e   :  { %v13525_v21 = vmul.f32 %v17078_v58, %v17074_v3  ;;  %16394 = vmatprep.subr.mxu0 %v17108_v8 }
0x6a50   :  { %16382 = vmatmul.mubr.msk.f32.vlgmr.msra.gmra.mrb[162].mxu1 %vm260_vm2, %v13525_v21  ;;  %16387 = vmatmul.mubr.msk.f32.vlgmr.msra.gmra.mrb[136].mxu0 %vm260_vm2, %v13679_v17 }
0x6a51   :  { %16390 = vmatpush3.xpose.msk.msra.mxu1 %vm260_vm2, %v13759_v32  ;;  %16391 = vmatprep.mubr.msk.f32.mxu1 %vm17110_vm1, %v17108_v8 }
0x6a52   :  { %16399 = vmatprep.subr.mxu1 %v17108_v8  ;;  %16396 = vmatprep.mubr.msk.f32.mxu0 %vm17110_vm1, %v17108_v8 }
0x6a54   :  { %16392 = vmatmul.mubr.msk.f32.vlgmr.msra.gmra.mrb[164].mxu1 %vm260_vm2, %v13757_v7 }
0x6a55   :  { %16401 = vmatprep.mubr.msk.f32.mxu1 %vm17110_vm1, %v17108_v8 }
0x6b1f   :  { %v13598_v39 = vpop.f32.mrb[134].mxu0 }
0x6b20   :  { %v16378_v22 = vpop.f32.mrb[135].mxu0 }
0x6b23   :  { %v13674_v30 = vpop.f32.mrb[162].mxu1  ;;  %v13752_v0 = vpop.f32.mrb[136].mxu0 }
0x6b24   :  { %v13834_v15 = vmul.f32 0.35355338, %v13752_v0  ;;  %v16383_v49 = vpop.f32.mrb[163].mxu1  ;;  %v16388_v43 = vpop.f32.mrb[137].mxu0 }
0x6b26   :  { %v13836_v54 = vadd.f32 %v18951_v18, %v13834_v15 }
0x6b27   :  { %v13830_v57 = vpop.f32.mrb[164].mxu1 }
0x6b28   :  { %v13835_v40 = vmul.f32 0.35355338, %v13830_v57  ;;  %v16393_v1 = vpop.f32.mrb[165].mxu1  ;;  %v13838_v4 = vsel %vm260_vm2, %v13836_v54, -inf }
0x6b29   :  { %13839 = vmax.xlane.f32.xlu0 %v13838_v4  ;;  %v14964_v1 = vld [vmem:[%s18181_s29 + $0x48] sm:$0xff] }
0x6b2a   :  { %v13837_v16 = vadd.f32 %v18956_v50, %v13835_v40  ;;  %v14963_v40 = vld [vmem:[%s18181_s29 + $0x40] sm:$0xff] }
0x6b2b   :  { %v16704_v4 = vpack.c.bf16 %v14964_v1, %v14963_v40 }
0x6b2c   :  { %v13841_v36 = vsel %vm260_vm2, %v13837_v16, -inf }
0x6b2d   :  { %13842 = vmax.xlane.f32.xlu1 %v13841_v36  ;;  %v14966_v36 = vld [vmem:[%s18181_s29 + $0x58] sm:$0xff] }
0x6b3e   :  { %13860 = vrot.lane.b32.xlu1 %v18929_v35, %s19208_s30 }
0x6b42   :  { %14014 = vrot.lane.b32.xlu1 %v19032_v31, %s19211_s4 }
0x6b46   :  { %14016 = vrot.lane.b32.xlu1 %v19034_v55, %s19211_s4 }
0x6b4a   :  { %14024 = vrot.lane.b32.xlu1 %v13674_v30, %s19195_s13 }
0x6bb6   :  { %v13840_v8 = vpop.xlane.xlu0 %13839 }
0x6bb7   :  { %v13844_v18 = vsub.f32 %v13836_v54, %v13840_v8 }
0x6bb9   :  { %v13846_v41 = vmul.f32 1.442695, %v13844_v18  ;;  %v14971_v18 = vld [vmem:[%s18190_s25 + $0x80] sm:$0xff] }
0x6bba   :  { %v13843_v42 = vpop.xlane.xlu1 %13842 }
0x6bbb   :  { %17079 = vpow2.f32 %v13846_v41  ;;  %v13845_v50 = vsub.f32 %v13837_v16, %v13843_v42  ;;  %v14965_v16 = vld [vmem:[%s18181_s29 + $0x50] sm:$0xff]  ;;  %v14972_v41 = vld [vmem:[%s18190_s25 + $0x88] sm:$0xff]  ;;  %s14559_s29 = sld [smem:[%s19221_s28 + %s17155_s18]]  }
0x6bbc   :  { %v16708_v8 = vpack.c.bf16 %v14966_v36, %v14965_v16  ;;  %v14973_v42 = vld [vmem:[%s18190_s25 + $0x90] sm:$0xff] }
0x6bbd   :  { %v13848_v45 = vmul.f32 1.442695, %v13845_v50  ;;  %v16712_v50 = vpack.c.bf16 %v14972_v41, %v14971_v18 }
0x6bbe   :  { %v13861_v13 = vpop.permute.xlu1 %13860 }
0x6bbf   :  { %17081 = vpow2.f32 %v13848_v45  ;;  %16395 = vmatpush3.msra.mxu0 %v13861_v13  ;;  %v14974_v45 = vld [vmem:[%s18190_s25 + $0x98] sm:$0xff] }
0x6bc0   :  { %v16716_v13 = vpack.c.bf16 %v14974_v45, %v14973_v42 }
0x6bc1   :  { %v14429_v40 = vld [vmem:[%s14559_s29 + $0x18] sm:$0xff] }
0x6bc2   :  { %v14015_v25 = vpop.permute.xlu1 %14014 }
0x6bc3   :  { %v14036_v61 = vsel %vm260_vm2, %v18992_v12, %v14015_v25 }
0x6bc5   :  { %v17080_v27 = vpop.eup %17079 }
0x6bc6   :  { %v13850_v35 = vsel %vm260_vm2, %v17080_v27, 0.0  ;;  %v14017_v29 = vpop.permute.xlu1 %14016 }
0x6bc7   :  { %13851 = vadd.xlane.f32.xlu0 %v13850_v35  ;;  %v14037_v33 = vsel %vm260_vm2, %v18994_v48, %v14017_v29  ;;  %v14976_v35 = vld [vmem:[%s18190_s25 + $0xa8] sm:$0xff]  ;;  %v14968_v29 = vld [vmem:[%s18218_s26 + $0x2] ss:$0 sm:$0xff] }
0x6bc9   :  { %v17082_v31 = vpop.eup %17081 }
0x6bca   :  { %v13853_v38 = vsel %vm260_vm2, %v17082_v31, 0.0  ;;  %v14025_v24 = vpop.permute.xlu1 %14024 }
0x6bcb   :  { %13854 = vadd.xlane.f32.xlu0 %v13853_v38  ;;  %v14039_v62 = vsel %vm1630_vm4, %v14037_v33, %v14025_v24  ;;  %v14980_v33 = vld [vmem:[%s19220_s0 + $0x2] ss:$0 sm:$0xff] }
0x6be1   :  { %13936 = vrot.lane.b32.xlu0 %v18927_v63, %s19208_s30  ;;  %v14952_v63 = vld [vmem:[%s18148_s22 + $0x48] sm:$0xff] }
0x6be2   :  { %v16696_v6 = vpack.c.bf16 %v14952_v63, %v14951_v52  ;;  %v14962_v63 = vld [vmem:[%s18206_s20 + $0x2] ss:$0 sm:$0xff] }
0x6be4   :  { %16697 = vmatprep.subr.bf16.mxu0 %v16696_v6 }
0x6be5   :  { %14022 = vrot.lane.b32.xlu0 %v13598_v39, %s19195_s13  ;;  %s17156_s13 = smov 37  }
0x6be6   :  { %s14560_s15 = sld [smem:[%s19221_s28 + %s17156_s13]]  }
0x6c54   :  { %v13852_v55 = vpop.xlane.xlu0 %13851 }
0x6c55   :  { %17083 = vrcp.f32 %v13852_v55 }
0x6c58   :  { %v13855_v37 = vpop.xlane.xlu0 %13854 }
0x6c59   :  { %17085 = vrcp.f32 %v13855_v37 }
0x6c5c   :  { %v13937_v51 = vpop.permute.xlu0 %13936 }
0x6c5d   :  { %16400 = vmatpush3.msra.mxu1 %v13937_v51 }
0x6c5e   :  { %16705 = vmatprep.subr.bf16.mxu1 %v16704_v4 }
0x6c5f   :  { %v17084_v28 = vpop.eup %17083 }
0x6c60   :  { %v13858_v10 = vmul.f32 %v17084_v28, %v17080_v27  ;;  %v14023_v19 = vpop.permute.xlu0 %14022  ;;  %v14975_v27 = vld [vmem:[%s18190_s25 + $0xa0] sm:$0xff] }
0x6c61   :  { %v14038_v47 = vsel %vm1630_vm4, %v14036_v61, %v14023_v19 }
0x6c62   :  { %16397 = vmatmul.mubr.msk.f32.vlgmr.msra.gmra.mrb[138].mxu0 %vm260_vm2, %v13858_v10 }
0x6c63   :  { %v17086_v44 = vpop.eup %17085  ;;  %16699 = vmatpush3.bf16.msra.mxu0 %v16696_v6 }
0x6c64   :  { %v13859_v60 = vmul.f32 %v17086_v44, %v17082_v31  ;;  %16701 = vmatprep.subr.bf16.mxu0 %v16700_v11  ;;  %v16720_v31 = vpack.c.bf16 %v14976_v35, %v14975_v27  ;;  %v14986_v35 = vld [vmem:[%s18248_s1 + $0x2] ss:$0 sm:$0xff] }
0x6c66   :  { %16402 = vmatmul.mubr.msk.f32.vlgmr.msra.gmra.mrb[166].mxu1 %vm260_vm2, %v13859_v60  ;;  %v14961_v60 = vld [vmem:[%s18201_s16 + $0x2] ss:$0 sm:$0xff] }
0x6c67   :  { %16703 = vmatpush3.bf16.msra.mxu0 %v16700_v11  ;;  %16707 = vmatpush3.bf16.msra.mxu1 %v16704_v4 }
0x6c68   :  { %16709 = vmatprep.subr.bf16.mxu1 %v16708_v8  ;;  %16713 = vmatprep.subr.bf16.mxu0 %v16712_v50 }
0x6c6b   :  { %16711 = vmatpush3.bf16.msra.mxu1 %v16708_v8 }
0x6d35   :  { %v13932_v14 = vpop.f32.mrb[138].mxu0 }
0x6d36   :  { %14030 = vrot.lane.b32.xlu0 %v13932_v14, %s19196_s5  ;;  %v16398_v53 = vpop.f32.mrb[139].mxu0 }
0x6d39   :  { %v14008_v9 = vpop.f32.mrb[166].mxu1 }
0x6d3a   :  { %14032 = vrot.lane.b32.xlu1 %v14008_v9, %s19196_s5  ;;  %v16403_v5 = vpop.f32.mrb[167].mxu1  ;;  %v14977_v9 = vld [vmem:[%s18190_s25 + $0xb0] sm:$0xff] }
0x6d3b   :  { %v14978_v5 = vld [vmem:[%s18190_s25 + $0xb8] sm:$0xff] }
0x6d3c   :  { %v16724_v25 = vpack.c.bf16 %v14978_v5, %v14977_v9 }
0x6da8   :  { %v14031_v3 = vpop.permute.xlu0 %14030 }
0x6da9   :  { %v14040_v20 = vsel %vm1633_vm3, %v14038_v47, %v14031_v3 }
0x6daa   :  { %16412 = vmatprep.mubr.msk.f32.mxu0 %vm175_vm0, %v14040_v20 }
0x6dac   :  { %v14033_v34 = vpop.permute.xlu1 %14032 }
0x6dad   :  { %v14041_v26 = vsel %vm1633_vm3, %v14039_v62, %v14033_v34 }
0x6dae   :  { %16413 = vmatmul.mubr.msk.f32.vlgmr.msra.gmra.mrb[140].mxu0 %vm175_vm0, %v14041_v26 }
0x6daf   :  { %16715 = vmatpush3.bf16.msra.mxu0 %v16712_v50  ;;  %v14985_v50 = vld [vmem:[%s18243_s24 + $0x2] ss:$0 sm:$0xff] }
0x6db0   :  { %16717 = vmatprep.subr.bf16.mxu0 %v16716_v13 }
0x6db3   :  { %16719 = vmatpush3.bf16.msra.mxu0 %v16716_v13 }
0x6db4   :  { %16721 = vmatprep.subr.bf16.mxu0 %v16720_v31 }
0x6db7   :  { %16723 = vmatpush3.bf16.msra.mxu0 %v16720_v31 }
0x6db8   :  { %16725 = vmatprep.subr.bf16.mxu0 %v16724_v25 }
0x6dbb   :  { %16727 = vmatpush3.bf16.msra.mxu0 %v16724_v25 }
0x6e81   :  { %v16414_v12 = vpop.f32.mrb[140].mxu0 }
0x6e82   :  { %v14133_v58 = vadd.f32 %v16414_v12, %v14956_v56  ;;  %v14127_v32 = vpop.f32.mrb[141].mxu0 }
0x6e83   :  { %v14128_v21 = vadd.f32 %v14956_v56, %v14127_v32 }
0x6e84   :  { %v14137_v17 = vadd.f32 %v14133_v58, %v18920_v46 }
0x6e85   :  { %v14136_v7 = vadd.f32 %v14128_v21, %v18916_v23 }
0x6e86   :  { %v14145_v39 = vsel %vm175_vm0, %v14137_v17, 0.0 }
0x6e87   :  { %14146 = vadd.xlane.f32.xlu1 %v14145_v39  ;;  %v14142_v48 = vsel %vm175_vm0, %v14136_v7, 0.0 }
0x6e88   :  { %14143 = vadd.xlane.f32.xlu0 %v14142_v48 }
0x6f14   :  { %v14147_v22 = vpop.xlane.xlu1 %14146 }
0x6f15   :  { %v14149_v30 = vmul.f32 0.03125, %v14147_v22  ;;  %v14144_v0 = vpop.xlane.xlu0 %14143 }
0x6f16   :  { %v14148_v15 = vmul.f32 0.03125, %v14144_v0 }
0x6f17   :  { %v14151_v49 = vsub.f32 %v14137_v17, %v14149_v30 }
0x6f18   :  { %v14150_v43 = vsub.f32 %v14136_v7, %v14148_v15 }
0x6f19   :  { %v14153_v46 = vmul.f32 %v14151_v49, %v14151_v49 }
0x6f1a   :  { %v14152_v54 = vmul.f32 %v14150_v43, %v14150_v43 }
0x6f1b   :  { %v14157_v57 = vsel %vm175_vm0, %v14153_v46, 0.0 }
0x6f1c   :  { %v14154_v23 = vsel %vm175_vm0, %v14152_v54, 0.0  ;;  %v14426_v54 = vld [vmem:[%s14559_s29] sm:$0xff] }
0x6f1d   :  { %14155 = vadd.xlane.f32.xlu0 %v14154_v23  ;;  %v14427_v23 = vld [vmem:[%s14559_s29 + $0x8] sm:$0xff] }
0x6f1e   :  { %v16728_v46 = vpack.c.bf16 %v14427_v23, %v14426_v54 }
0x6f20   :  { %16729 = vmatprep.subr.bf16.mxu1 %v16728_v46 }
0x6f21   :  { %14158 = vadd.xlane.f32.xlu0 %v14157_v57  ;;  %v14428_v57 = vld [vmem:[%s14559_s29 + $0x10] sm:$0xff] }
0x6f22   :  { %v16732_v1 = vpack.c.bf16 %v14429_v40, %v14428_v57 }
0x6faa   :  { %v14156_v38 = vpop.xlane.xlu0 %14155 }
0x6fab   :  { %v14160_v55 = vmul.f32 0.03125, %v14156_v38 }
0x6fad   :  { %v14162_v37 = vadd.f32 1e-05, %v14160_v55 }
0x6fae   :  { %v14159_v51 = vpop.xlane.xlu0 %14158 }
0x6faf   :  { %17087 = vrsqrt.f32 %v14162_v37  ;;  %v14161_v28 = vmul.f32 0.03125, %v14159_v51  ;;  %v14987_v51 = vld [vmem:[%s14560_s15] ss:$0 sm:$0xff] }
0x6fb1   :  { %v14163_v10 = vadd.f32 1e-05, %v14161_v28 }
0x6fb3   :  { %17089 = vrsqrt.f32 %v14163_v10 }
0x6fb9   :  { %v17088_v44 = vpop.eup %17087 }
0x6fba   :  { %v14166_v52 = vmul.f32 %v17088_v44, %v14150_v43 }
0x6fbc   :  { %v14174_v6 = vmul.f32 %v14961_v60, %v14166_v52 }
0x6fbd   :  { %v17090_v2 = vpop.eup %17089 }
0x6fbe   :  { %v14167_v59 = vmul.f32 %v17090_v2, %v14151_v49  ;;  %v14182_v11 = vadd.f32 %v14962_v63, %v14174_v6 }
0x6fc0   :  { %v14175_v14 = vmul.f32 %v14961_v60, %v14167_v59  ;;  %16423 = vmatprep.mubr.msk.f32.mxu1 %vm175_vm0, %v14182_v11 }
0x6fc2   :  { %v14183_v53 = vadd.f32 %v14962_v63, %v14175_v14 }
0x6fc4   :  { %16424 = vmatmul.mubr.msk.f32.vlgmr.msra.gmra.mrb[168].mxu1 %vm175_vm0, %v14183_v53 }
0x6fc5   :  { %16731 = vmatpush3.bf16.msra.mxu1 %v16728_v46 }
0x6fc6   :  { %16733 = vmatprep.subr.bf16.mxu1 %v16732_v1 }
0x6fc9   :  { %16735 = vmatpush3.bf16.msra.mxu1 %v16732_v1 }
0x7097   :  { %v16425_v19 = vpop.f32.mrb[168].mxu1 }
0x7098   :  { %v14275_v61 = vadd.f32 %v16425_v19, %v14968_v29  ;;  %v14269_v24 = vpop.f32.mrb[169].mxu1 }
0x7099   :  { %v14270_v47 = vadd.f32 %v14968_v29, %v14269_v24 }
0x709a   :  { %v14279_v20 = vmax.f32 %v14275_v61, 0.0 }
0x709b   :  { %v14278_v3 = vmax.f32 %v14270_v47, 0.0 }
0x709d   :  { %16442 = vmatprep.mubr.msk.f32.mxu0 %vm1884_vm5, %v14278_v3 }
0x709e   :  { %16443 = vmatmul.mubr.msk.f32.vlgmr.msra.gmra.mrb[142].mxu0 %vm1884_vm5, %v14279_v20 }
0x7171   :  { %v16444_v62 = vpop.f32.mrb[142].mxu0 }
0x7172   :  { %v14375_v34 = vadd.f32 %v16444_v62, %v14980_v33  ;;  %v14369_v26 = vpop.f32.mrb[143].mxu0 }
0x7173   :  { %v14370_v56 = vadd.f32 %v14980_v33, %v14369_v26 }
0x7174   :  { %v14379_v12 = vadd.f32 %v14375_v34, %v14183_v53 }
0x7175   :  { %v14378_v58 = vadd.f32 %v14370_v56, %v14182_v11 }
0x7176   :  { %v14387_v32 = vsel %vm175_vm0, %v14379_v12, 0.0 }
0x7177   :  { %14388 = vadd.xlane.f32.xlu0 %v14387_v32  ;;  %v14384_v21 = vsel %vm175_vm0, %v14378_v58, 0.0 }
0x7178   :  { %14385 = vadd.xlane.f32.xlu1 %v14384_v21 }
0x7204   :  { %v14389_v17 = vpop.xlane.xlu0 %14388 }
0x7205   :  { %v14391_v7 = vmul.f32 0.03125, %v14389_v17  ;;  %v14386_v39 = vpop.xlane.xlu1 %14385 }
0x7206   :  { %v14390_v48 = vmul.f32 0.03125, %v14386_v39 }
0x7207   :  { %v14393_v22 = vsub.f32 %v14379_v12, %v14391_v7 }
0x7208   :  { %v14392_v30 = vsub.f32 %v14378_v58, %v14390_v48 }
0x7209   :  { %v14395_v0 = vmul.f32 %v14393_v22, %v14393_v22 }
0x720a   :  { %v14394_v15 = vmul.f32 %v14392_v30, %v14392_v30 }
0x720b   :  { %v14399_v49 = vsel %vm175_vm0, %v14395_v0, 0.0 }
0x720c   :  { %14400 = vadd.xlane.f32.xlu0 %v14399_v49  ;;  %v14396_v43 = vsel %vm175_vm0, %v14394_v15, 0.0 }
0x720d   :  { %14397 = vadd.xlane.f32.xlu1 %v14396_v43 }
0x7299   :  { %v14401_v4 = vpop.xlane.xlu0 %14400 }
0x729a   :  { %v14403_v16 = vmul.f32 0.03125, %v14401_v4  ;;  %v14398_v36 = vpop.xlane.xlu1 %14397 }
0x729b   :  { %v14402_v8 = vmul.f32 0.03125, %v14398_v36 }
0x729c   :  { %v14405_v18 = vadd.f32 1e-05, %v14403_v16 }
0x729d   :  { %v14404_v41 = vadd.f32 1e-05, %v14402_v8 }
0x729e   :  { %17091 = vrsqrt.f32 %v14405_v18 }
0x729f   :  { %17093 = vrsqrt.f32 %v14404_v41 }
0x72a8   :  { %v17092_v42 = vpop.eup %17091 }
0x72a9   :  { %v17094_v45 = vpop.eup %17093  ;;  %v14409_v13 = vmul.f32 %v17092_v42, %v14393_v22 }
0x72aa   :  { %v14408_v27 = vmul.f32 %v17094_v45, %v14392_v30 }
0x72ab   :  { %v14417_v31 = vmul.f32 %v14985_v50, %v14409_v13 }
0x72ac   :  { %v14416_v38 = vmul.f32 %v14985_v50, %v14408_v27 }
0x72ad   :  { %v14425_v37 = vadd.f32 %v14986_v35, %v14417_v31 }
0x72ae   :  { %v14424_v55 = vadd.f32 %v14986_v35, %v14416_v38 }
0x72b0   :  { %16453 = vmatprep.mubr.msk.f32.mxu1 %vm175_vm0, %v14424_v55 }
0x72b1   :  { %16454 = vmatmul.mubr.msk.f32.vlgmr.msra.gmra.mrb[170].mxu1 %vm175_vm0, %v14425_v37 }
0x7384   :  { %v16455_v28 = vpop.f32.mrb[170].mxu1 }
0x7385   :  { %v14515_v10 = vadd.f32 %v16455_v28, %v14987_v51  ;;  %v14509_v44 = vpop.f32.mrb[171].mxu1 }
0x7386   :  { %v14510_v60 = vadd.f32 %v14987_v51, %v14509_v44 }
0x7387   :  { %14519 = vst [vmem:[%s14561_s7 + $0x8] sm:$0xff] %v14515_v10 }
0x7388   :  { %14518 = vst [vmem:[%s14561_s7] sm:$0xff] %v14510_v60 }

</bundles_post_ra>
